<compile_context>
chip_gen: v6e
topology: v6e:2x2x1
jax: 0.10.0
libtpu: 0.0.40
codegen_flags: <defaults>
</compile_context>

<pallas_src>
import jax
import jax.numpy as jnp
from jax.experimental import pallas as pl
from jax.experimental.pallas import tpu as pltpu

KSIZE = 9                    # Conv1DNet conv1 kernel size
PAD = (KSIZE - 1) // 2       # = 4
FRONT = 8                    # front zero-pad rows so the y store is 8-row (sublane) aligned


def _layer_norm(z, g, b, eps=1e-5):
    mu = jnp.mean(z, axis=-1, keepdims=True)
    var = jnp.mean((z - mu) ** 2, axis=-1, keepdims=True)
    return (z - mu) * jax.lax.rsqrt(var + eps) * g + b


def _make_kernel(bt, num_head, compute_dtype):
    approx_recip = compute_dtype == jnp.bfloat16

    def kernel(lens_ref,                                    # scalar-prefetch (SMEM): [B] int32
               x_ref, wqkv_ref, bqkv_ref, wfc_ref,
               wc1_ref, bc1_ref, wc2_ref, vecs_ref,
               out_ref,
               ypad_ref):                                   # VMEM scratch (compute dtype)
        bblk = pl.program_id(0)

        x = x_ref[...]                                      # [Bt, S, E] f32
        Bt, S, E = x.shape
        H3 = wqkv_ref.shape[1]
        H = H3 // 3
        hd = H // num_head
        inner = wc1_ref.shape[2]
        inv_scale = 1.0 / float(hd) ** 0.5

        # Packed small vectors: rows = [bfc, g1, beta1, bc2, g2, beta2]
        vec = vecs_ref[...]                                 # [6, E] f32
        bfc, g1, beta1 = vec[0:1], vec[1:2], vec[2:3]
        bc2, g2, beta2 = vec[3:4], vec[4:5], vec[5:6]

        x2 = x.reshape(Bt * S, E)                           # f32, residual
        # ---------------- fused QKV projection (one wide MXU matmul) ----------------
        qkv = jnp.dot(x2.astype(compute_dtype), wqkv_ref[...],
                      preferred_element_type=jnp.float32) + bqkv_ref[...]   # [Bt*S, 3H]

        kpos = jax.lax.broadcasted_iota(jnp.int32, (1, S), 1)   # key positions (row vector)
        qpos = jax.lax.broadcasted_iota(jnp.int32, (S, 1), 0)   # query positions (column)

        # ---------------- per-batch multi-head self attention ----------------
        y_rows, npm_rows = [], []
        for b in range(Bt):                                 # Bt is small & static
            length = lens_ref[bblk * Bt + b]
            # additive key-pad mask, [1, S] broadcast over the [S, S] scores
            kmask = jnp.where(kpos >= length, jnp.float32(-1e30), jnp.float32(0.0))
            npm_rows.append((qpos < length).astype(jnp.float32))   # [S, 1] non-pad mask
            rows = slice(b * S, (b + 1) * S)
            acc_b = jnp.zeros((S, E), jnp.float32)
            for h in range(num_head):                       # num_head == 2 in FastSpeech
                q = qkv[rows, h * hd:(h + 1) * hd]
                k = qkv[rows, H + h * hd:H + (h + 1) * hd]
                v = qkv[rows, 2 * H + h * hd:2 * H + (h + 1) * hd]
                s = jax.lax.dot_general(q.astype(compute_dtype), k.astype(compute_dtype),
                                        (((1,), (1,)), ((), ())),
                                        preferred_element_type=jnp.float32)
                s = s * inv_scale + kmask                   # finite mask: no NaN rows
                m = jnp.max(s, axis=-1, keepdims=True)
                ex = jnp.exp(s - m)
                denom = jnp.sum(ex, axis=-1, keepdims=True)
                if approx_recip:
                    p = ex * pl.reciprocal(denom, approx=True)   # EUP slot (otherwise idle)
                else:
                    p = ex / denom                               # exact path for f32 checks
                oh = jnp.dot(p.astype(compute_dtype), v.astype(compute_dtype),
                             preferred_element_type=jnp.float32)     # [S, hd]
                # fc(concat(heads)) == sum_h head_h @ Wfc[h]  (no lane concat)
                acc_b = acc_b + jnp.dot(oh.astype(compute_dtype), wfc_ref[h],
                                        preferred_element_type=jnp.float32)
            y_rows.append(acc_b)

        y = jnp.concatenate(y_rows, axis=0) + bfc           # [Bt*S, E], fc bias added once
        npm = jnp.concatenate(npm_rows, axis=0)             # [Bt*S, 1]

        # dropout == identity (eval mode)
        y = _layer_norm(y + x2, g1, beta1)                  # attn residual + LN (f32)
        y = y * npm                                         # non_pad_mask after attention

        # ---------------- Conv1DNet: accumulating per-tap matmuls ----------------
        zblk = jnp.zeros((Bt, FRONT, E), compute_dtype)
        ypad_ref[:, 0:FRONT, :] = zblk                      # re-zeroed every step (cheap)
        ypad_ref[:, FRONT + S:FRONT + S + FRONT, :] = zblk
        # single cast to compute dtype; 8-row-aligned store (S % 8 == 0)
        ypad_ref[:, FRONT:FRONT + S, :] = y.astype(compute_dtype).reshape(Bt, S, E)

        acc_rows = []
        for b in range(Bt):
            acc_b = jnp.zeros((S, inner), jnp.float32)
            for kk in range(KSIZE):                         # conv1: 9 accumulating matmuls
                tap = ypad_ref[b, FRONT - PAD + kk:FRONT - PAD + kk + S, :]
                acc_b = acc_b + jnp.dot(tap, wc1_ref[kk],
                                        preferred_element_type=jnp.float32)
            acc_rows.append(acc_b)
        acc = jnp.concatenate(acc_rows, axis=0) + bc1_ref[...]
        acc = jnp.maximum(acc, 0.0)                         # ReLU(conv1)
        z = jnp.dot(acc.astype(compute_dtype), wc2_ref[...],
                    preferred_element_type=jnp.float32) + bc2    # conv2 (k=1), batched M
        z = _layer_norm(z + y, g2, beta2)                   # conv residual + LN
        out_ref[...] = ((z * npm).astype(out_ref.dtype)).reshape(Bt, S, E)

    return kernel


def fft_block_pallas(x, lens, params, num_head, use_bf16=True, bt=None):
    """FFTBlock forward.  x: [B, S, E] f32, lens: [B] int32 valid lengths."""
    B, S, E = x.shape
    H = params["wq"].shape[1]
    head_dim = H // num_head
    cdtype = jnp.bfloat16 if use_bf16 else jnp.float32

    if bt is None:
        bt = 2 if B % 2 == 0 else 1                         # batch elements per grid step
    assert B % bt == 0, "B must be divisible by the batch block"
    assert S % 8 == 0, "S must be a multiple of 8 (sublane alignment)"

    p = params
    # Fused QKV weight [E, 3H]; key bias dropped (cancels exactly in the row softmax).
    wqkv = jnp.concatenate([p["wq"], p["wk"], p["wv"]], axis=1).astype(cdtype)
    bqkv = jnp.concatenate([p["bq"], jnp.zeros_like(p["bk"]), p["bv"]], axis=1)   # [1, 3H] f32
    wfc3 = p["wfc"].reshape(num_head, head_dim, E).astype(cdtype)                 # per-head fc
    wc1 = p["wc1"].astype(cdtype)                                                 # [9, E, inner]
    wc2 = p["wc2"].astype(cdtype)
    # Coalesce the 6 small E-wide vectors into one packed input.
    vecs = jnp.concatenate([p["bfc"], p["g1"], p["beta1"],
                            p["bc2"], p["g2"], p["beta2"]], axis=0)               # [6, E] f32

    weights = [wqkv, bqkv, wfc3, wc1, p["bc1"], wc2, vecs]

    def shared_spec(arr):
        nd = arr.ndim
        # TODO(synk): on v7x mark these invariant blocks pipeline_mode=pl.Buffered(1).
        return pl.BlockSpec(arr.shape, lambda i, lens_ref, _nd=nd: (0,) * _nd)

    in_specs = ([pl.BlockSpec((bt, S, E), lambda i, lens_ref: (i, 0, 0))]
                + [shared_spec(w) for w in weights])

    kernel = _make_kernel(bt, num_head, cdtype)

    return pl.pallas_call(
        kernel,
        out_shape=jax.ShapeDtypeStruct((B, S, E), jnp.float32),
        grid_spec=pltpu.PrefetchScalarGridSpec(
            num_scalar_prefetch=1,                          # lens -> SMEM; no mask tensors
            grid=(B // bt,),
            in_specs=in_specs,
            out_specs=pl.BlockSpec((bt, S, E), lambda i, lens_ref: (i, 0, 0)),
            scratch_shapes=[pltpu.VMEM((bt, S + 2 * FRONT, E), cdtype)],   # padded conv buf
        ),
        compiler_params=pltpu.CompilerParams(
            dimension_semantics=("parallel",),              # batch-block axis across TCs
            # 32 MiB is safe on every generation; raise toward 64-96 MiB on v5e/v6e (and
            # cap ~48-56 MiB on v7x) when scaling S / batching further.
            vmem_limit_bytes=32 * 1024 * 1024),
    )(lens, x, *weights)


def fft_block_ref(x, npm, am, p, num_head):
    """Pure-JAX reference mirroring the PyTorch forward (eval mode)."""
    B, S, E = x.shape
    H = p["wq"].shape[1]
    hd = H // num_head
    Q = x @ p["wq"] + p["bq"]
    K = x @ p["wk"] + p["bk"]
    V = x @ p["wv"] + p["bv"]
    split = lambda t: t.reshape(B, S, num_head, hd).transpose(0, 2, 1, 3)
    Qh, Kh, Vh = split(Q), split(K), split(V)
    s = jnp.einsum("bhqd,bhkd->bhqk", Qh, Kh) / jnp.sqrt(jnp.float32(hd))
    s = jnp.where(am[:, None, :, :] > 0.5, -jnp.inf, s)
    a = jax.nn.softmax(s, axis=-1)
    o = jnp.einsum("bhqk,bhkd->bhqd", a, Vh).transpose(0, 2, 1, 3).reshape(B, S, H)
    y = o @ p["wfc"] + p["bfc"]
    y = _layer_norm(y + x, p["g1"], p["beta1"])
    y = y * npm
    ypad = jnp.pad(y, ((0, 0), (PAD, PAD), (0, 0)))
    acc = jnp.zeros((B, S, p["wc1"].shape[2]), jnp.float32)
    for k in range(KSIZE):
        acc = acc + jnp.einsum("bsi,io->bso", ypad[:, k:k + S, :], p["wc1"][k])
    acc = jax.nn.relu(acc + p["bc1"])
    z = acc @ p["wc2"] + p["bc2"]
    z = _layer_norm(z + y, p["g2"], p["beta2"])
    return z * npm


if __name__ == "__main__":
    # Small shapes consistent with the module: E = H = 256, num_head = 2 (head_dim = 128,
    # matching ENC_EMB_DIM / ENC_NUM_HEAD); only S and the conv inner dim are scaled down.
    B, S, E = 4, 16, 256
    NUM_HEAD = 2                 # ENC_NUM_HEAD / DEC_NUM_HEAD
    H_DIM = E                    # h_dim == emb_dim in FastSpeech
    INNER = 512                  # scaled-down *_1D_FILTER_SIZE (1024 in the real model)

    key = jax.random.PRNGKey(0)
    ks = jax.random.split(key, 18)

    def rnd(k, shape, scale=0.1):
        return scale * jax.random.normal(k, shape, dtype=jnp.float32)

    params = dict(
        wq=rnd(ks[0], (E, H_DIM)), bq=rnd(ks[1], (1, H_DIM)),
        wk=rnd(ks[2], (E, H_DIM)), bk=rnd(ks[3], (1, H_DIM)),
        wv=rnd(ks[4], (E, H_DIM)), bv=rnd(ks[5], (1, H_DIM)),
        wfc=rnd(ks[6], (H_DIM, E)), bfc=rnd(ks[7], (1, E)),
        g1=1.0 + rnd(ks[8], (1, E)), beta1=rnd(ks[9], (1, E)),
        wc1=rnd(ks[10], (KSIZE, E, INNER)), bc1=rnd(ks[11], (1, INNER)),
        wc2=rnd(ks[12], (INNER, E)), bc2=rnd(ks[13], (1, E)),
        g2=1.0 + rnd(ks[14], (1, E)), beta2=rnd(ks[15], (1, E)),
    )

    x = jax.random.normal(ks[16], (B, S, E), dtype=jnp.float32)

    # Valid lengths per batch element (rest is padding).
    lens = jnp.array([S, 11, 13, 8], dtype=jnp.int32)

    # Masks for the pure-JAX reference only (the kernel rebuilds them from `lens`).
    pos = jnp.arange(S)
    non_pad_mask = (pos[None, :] < lens[:, None]).astype(jnp.float32)[:, :, None]     # [B,S,1]
    attn_mask = jnp.broadcast_to(
        (pos[None, None, :] >= lens[:, None, None]), (B, S, S)).astype(jnp.float32)   # [B,S,S]

    ref = fft_block_ref(x, non_pad_mask, attn_mask, params, NUM_HEAD)

    # f32 path: tight correctness check against the reference.
    out_f32 = jax.block_until_ready(
        fft_block_pallas(x, lens, params, NUM_HEAD, use_bf16=False))
    assert out_f32.shape == (B, S, E)
    err_f32 = float(jnp.max(jnp.abs(out_f32 - ref)))
    assert err_f32 < 1e-2, f"f32 max abs err {err_f32}"

    # bf16-operand path (default / fast): looser tolerance vs the f32 reference.
    out_bf16 = jax.block_until_ready(
        fft_block_pallas(x, lens, params, NUM_HEAD, use_bf16=True))
    err_bf16 = float(jnp.max(jnp.abs(out_bf16 - ref)))
    assert err_bf16 < 0.25, f"bf16 max abs err {err_bf16}"

    print("KERNEL_OK")
</pallas_src>

<mosaic_0001>
module attributes {stable_mosaic.version = 11 : i64} {
  func.func @kernel(%arg0: i32, %arg1: memref<4xi32, #tpu.memory_space<smem>>, %arg2: memref<2x16x256xf32, #tpu.memory_space<vmem>>, %arg3: memref<256x768xf32, #tpu.memory_space<vmem>>, %arg4: memref<1x768xf32, #tpu.memory_space<vmem>>, %arg5: memref<2x128x256xf32, #tpu.memory_space<vmem>>, %arg6: memref<9x256x512xf32, #tpu.memory_space<vmem>>, %arg7: memref<1x512xf32, #tpu.memory_space<vmem>>, %arg8: memref<512x256xf32, #tpu.memory_space<vmem>>, %arg9: memref<6x256xf32, #tpu.memory_space<vmem>>, %arg10: memref<2x16x256xf32, #tpu.memory_space<vmem>>, %arg11: memref<2x32x256xf32, #tpu.memory_space<vmem>>) attributes {dimension_semantics = [#tpu.dimension_semantics<parallel>], iteration_bounds = array<i64: 2>, scalar_prefetch = 1 : i64, scratch_operands = 1 : i64, tpu.core_type = #tpu.core_type<tc>, window_params = [{transform_indices = @transform_0, window_bounds = array<i64: 2, 16, 256>}, {pipeline_mode = #tpu.pipeline_mode<synchronous>, transform_indices = @transform_1, window_bounds = array<i64: 256, 768>}, {pipeline_mode = #tpu.pipeline_mode<synchronous>, transform_indices = @transform_2, window_bounds = array<i64: 1, 768>}, {pipeline_mode = #tpu.pipeline_mode<synchronous>, transform_indices = @transform_3, window_bounds = array<i64: 2, 128, 256>}, {pipeline_mode = #tpu.pipeline_mode<synchronous>, transform_indices = @transform_4, window_bounds = array<i64: 9, 256, 512>}, {pipeline_mode = #tpu.pipeline_mode<synchronous>, transform_indices = @transform_5, window_bounds = array<i64: 1, 512>}, {pipeline_mode = #tpu.pipeline_mode<synchronous>, transform_indices = @transform_6, window_bounds = array<i64: 512, 256>}, {pipeline_mode = #tpu.pipeline_mode<synchronous>, transform_indices = @transform_7, window_bounds = array<i64: 6, 256>}, {transform_indices = @transform_8, window_bounds = array<i64: 2, 16, 256>}]} {
    %c0 = arith.constant 0 : index
    %c0_0 = arith.constant 0 : index
    %c0_1 = arith.constant 0 : index
    %0 = vector.load %arg2[%c0, %c0_0, %c0_1] : memref<2x16x256xf32, #tpu.memory_space<vmem>>, vector<2x16x256xf32>
    %c0_2 = arith.constant 0 : index
    %c0_3 = arith.constant 0 : index
    %1 = vector.load %arg9[%c0_2, %c0_3] : memref<6x256xf32, #tpu.memory_space<vmem>>, vector<6x256xf32>
    %2 = vector.extract_strided_slice %1 {offsets = [0, 0], sizes = [1, 256], strides = [1, 1]} : vector<6x256xf32> to vector<1x256xf32>
    %3 = vector.extract_strided_slice %1 {offsets = [1, 0], sizes = [1, 256], strides = [1, 1]} : vector<6x256xf32> to vector<1x256xf32>
    %4 = vector.extract_strided_slice %1 {offsets = [2, 0], sizes = [1, 256], strides = [1, 1]} : vector<6x256xf32> to vector<1x256xf32>
    %5 = vector.extract_strided_slice %1 {offsets = [3, 0], sizes = [1, 256], strides = [1, 1]} : vector<6x256xf32> to vector<1x256xf32>
    %6 = vector.extract_strided_slice %1 {offsets = [4, 0], sizes = [1, 256], strides = [1, 1]} : vector<6x256xf32> to vector<1x256xf32>
    %7 = vector.extract_strided_slice %1 {offsets = [5, 0], sizes = [1, 256], strides = [1, 1]} : vector<6x256xf32> to vector<1x256xf32>
    %8 = vector.shape_cast %0 : vector<2x16x256xf32> to vector<32x256xf32>
    %c0_4 = arith.constant 0 : index
    %c0_5 = arith.constant 0 : index
    %9 = vector.load %arg3[%c0_4, %c0_5] : memref<256x768xf32, #tpu.memory_space<vmem>>, vector<256x768xf32>
    %cst = arith.constant dense<0.000000e+00> : vector<32x768xf32>
    %10 = tpu.matmul %8, %9, %cst {dimension_numbers = #tpu.dot_dimension_numbers<[1], [0], [0], [1], [0, 0, 1, 1], [], []>} : vector<32x256xf32>, vector<256x768xf32>, vector<32x768xf32> -> vector<32x768xf32>
    %c0_6 = arith.constant 0 : index
    %c0_7 = arith.constant 0 : index
    %11 = vector.load %arg4[%c0_6, %c0_7] : memref<1x768xf32, #tpu.memory_space<vmem>>, vector<1x768xf32>
    %12 = vector.broadcast %11 : vector<1x768xf32> to vector<32x768xf32>
    %13 = arith.addf %10, %12 : vector<32x768xf32>
    %14 = tpu.iota {dimensions = array<i32: 1>} : vector<1x16xi32>
    %15 = tpu.iota {dimensions = array<i32: 0>} : vector<16x1xi32>
    %c2_i32 = arith.constant 2 : i32
    %16 = arith.muli %arg0, %c2_i32 : i32
    %c0_i32 = arith.constant 0 : i32
    %17 = arith.addi %16, %c0_i32 : i32
    %18 = arith.index_cast %17 : i32 to index
    %19 = memref.load %arg1[%18] : memref<4xi32, #tpu.memory_space<smem>>
    %20 = vector.broadcast %19 : i32 to vector<1x16xi32>
    %21 = arith.cmpi sge, %14, %20 : vector<1x16xi32>
    %cst_8 = arith.constant -1.000000e+30 : f32
    %cst_9 = arith.constant 0.000000e+00 : f32
    %22 = vector.broadcast %cst_8 : f32 to vector<1x16xf32>
    %23 = vector.broadcast %cst_9 : f32 to vector<1x16xf32>
    %24 = arith.select %21, %22, %23 : vector<1x16xi1>, vector<1x16xf32>
    %25 = vector.broadcast %19 : i32 to vector<16x1xi32>
    %26 = arith.cmpi slt, %15, %25 : vector<16x1xi32>
    %27 = arith.extui %26 : vector<16x1xi1> to vector<16x1xi32>
    %28 = arith.sitofp %27 : vector<16x1xi32> to vector<16x1xf32>
    %cst_10 = arith.constant 0.000000e+00 : f32
    %29 = vector.broadcast %cst_10 : f32 to vector<16x256xf32>
    %30 = vector.extract_strided_slice %13 {offsets = [0, 0], sizes = [16, 128], strides = [1, 1]} : vector<32x768xf32> to vector<16x128xf32>
    %31 = vector.extract_strided_slice %13 {offsets = [0, 256], sizes = [16, 128], strides = [1, 1]} : vector<32x768xf32> to vector<16x128xf32>
    %32 = vector.extract_strided_slice %13 {offsets = [0, 512], sizes = [16, 128], strides = [1, 1]} : vector<32x768xf32> to vector<16x128xf32>
    %cst_11 = arith.constant dense<0.000000e+00> : vector<16x16xf32>
    %33 = tpu.matmul %30, %31, %cst_11 {dimension_numbers = #tpu.dot_dimension_numbers<[1], [1], [0], [0], [0, 0, 1, 0], [], []>} : vector<16x128xf32>, vector<16x128xf32>, vector<16x16xf32> -> vector<16x16xf32>
    %cst_12 = arith.constant 0.0883883461 : f32
    %34 = vector.broadcast %cst_12 : f32 to vector<16x16xf32>
    %35 = arith.mulf %33, %34 : vector<16x16xf32>
    %36 = vector.broadcast %24 : vector<1x16xf32> to vector<16x16xf32>
    %37 = arith.addf %35, %36 : vector<16x16xf32>
    %cst_13 = arith.constant dense<0xFF800000> : vector<16xf32>
    %38 = vector.multi_reduction <maximumf>, %37, %cst_13 [1] : vector<16x16xf32> to vector<16xf32>
    %39 = vector.shape_cast %38 : vector<16xf32> to vector<16x1xf32>
    %40 = vector.broadcast %39 : vector<16x1xf32> to vector<16x16xf32>
    %41 = arith.subf %37, %40 : vector<16x16xf32>
    %42 = math.exp %41 : vector<16x16xf32>
    %cst_14 = arith.constant dense<0.000000e+00> : vector<16xf32>
    %43 = vector.multi_reduction <add>, %42, %cst_14 [1] : vector<16x16xf32> to vector<16xf32>
    %44 = vector.shape_cast %43 : vector<16xf32> to vector<16x1xf32>
    %45 = vector.broadcast %44 : vector<16x1xf32> to vector<16x16xf32>
    %46 = arith.divf %42, %45 : vector<16x16xf32>
    %cst_15 = arith.constant dense<0.000000e+00> : vector<16x128xf32>
    %47 = tpu.matmul %46, %32, %cst_15 {dimension_numbers = #tpu.dot_dimension_numbers<[1], [0], [0], [1], [0, 0, 1, 1], [], []>} : vector<16x16xf32>, vector<16x128xf32>, vector<16x128xf32> -> vector<16x128xf32>
    %c0_16 = arith.constant 0 : index
    %c0_17 = arith.constant 0 : index
    %c0_18 = arith.constant 0 : index
    %48 = vector.load %arg5[%c0_16, %c0_17, %c0_18] : memref<2x128x256xf32, #tpu.memory_space<vmem>>, vector<1x128x256xf32>
    %49 = vector.shape_cast %48 : vector<1x128x256xf32> to vector<128x256xf32>
    %cst_19 = arith.constant dense<0.000000e+00> : vector<16x256xf32>
    %50 = tpu.matmul %47, %49, %cst_19 {dimension_numbers = #tpu.dot_dimension_numbers<[1], [0], [0], [1], [0, 0, 1, 1], [], []>} : vector<16x128xf32>, vector<128x256xf32>, vector<16x256xf32> -> vector<16x256xf32>
    %51 = arith.addf %29, %50 : vector<16x256xf32>
    %52 = vector.extract_strided_slice %13 {offsets = [0, 128], sizes = [16, 128], strides = [1, 1]} : vector<32x768xf32> to vector<16x128xf32>
    %53 = vector.extract_strided_slice %13 {offsets = [0, 384], sizes = [16, 128], strides = [1, 1]} : vector<32x768xf32> to vector<16x128xf32>
    %54 = vector.extract_strided_slice %13 {offsets = [0, 640], sizes = [16, 128], strides = [1, 1]} : vector<32x768xf32> to vector<16x128xf32>
    %cst_20 = arith.constant dense<0.000000e+00> : vector<16x16xf32>
    %55 = tpu.matmul %52, %53, %cst_20 {dimension_numbers = #tpu.dot_dimension_numbers<[1], [1], [0], [0], [0, 0, 1, 0], [], []>} : vector<16x128xf32>, vector<16x128xf32>, vector<16x16xf32> -> vector<16x16xf32>
    %cst_21 = arith.constant 0.0883883461 : f32
    %56 = vector.broadcast %cst_21 : f32 to vector<16x16xf32>
    %57 = arith.mulf %55, %56 : vector<16x16xf32>
    %58 = vector.broadcast %24 : vector<1x16xf32> to vector<16x16xf32>
    %59 = arith.addf %57, %58 : vector<16x16xf32>
    %cst_22 = arith.constant dense<0xFF800000> : vector<16xf32>
    %60 = vector.multi_reduction <maximumf>, %59, %cst_22 [1] : vector<16x16xf32> to vector<16xf32>
    %61 = vector.shape_cast %60 : vector<16xf32> to vector<16x1xf32>
    %62 = vector.broadcast %61 : vector<16x1xf32> to vector<16x16xf32>
    %63 = arith.subf %59, %62 : vector<16x16xf32>
    %64 = math.exp %63 : vector<16x16xf32>
    %cst_23 = arith.constant dense<0.000000e+00> : vector<16xf32>
    %65 = vector.multi_reduction <add>, %64, %cst_23 [1] : vector<16x16xf32> to vector<16xf32>
    %66 = vector.shape_cast %65 : vector<16xf32> to vector<16x1xf32>
    %67 = vector.broadcast %66 : vector<16x1xf32> to vector<16x16xf32>
    %68 = arith.divf %64, %67 : vector<16x16xf32>
    %cst_24 = arith.constant dense<0.000000e+00> : vector<16x128xf32>
    %69 = tpu.matmul %68, %54, %cst_24 {dimension_numbers = #tpu.dot_dimension_numbers<[1], [0], [0], [1], [0, 0, 1, 1], [], []>} : vector<16x16xf32>, vector<16x128xf32>, vector<16x128xf32> -> vector<16x128xf32>
    %c1 = arith.constant 1 : index
    %c0_25 = arith.constant 0 : index
    %c0_26 = arith.constant 0 : index
    %70 = vector.load %arg5[%c1, %c0_25, %c0_26] : memref<2x128x256xf32, #tpu.memory_space<vmem>>, vector<1x128x256xf32>
    %71 = vector.shape_cast %70 : vector<1x128x256xf32> to vector<128x256xf32>
    %cst_27 = arith.constant dense<0.000000e+00> : vector<16x256xf32>
    %72 = tpu.matmul %69, %71, %cst_27 {dimension_numbers = #tpu.dot_dimension_numbers<[1], [0], [0], [1], [0, 0, 1, 1], [], []>} : vector<16x128xf32>, vector<128x256xf32>, vector<16x256xf32> -> vector<16x256xf32>
    %73 = arith.addf %51, %72 : vector<16x256xf32>
    %c2_i32_28 = arith.constant 2 : i32
    %74 = arith.muli %arg0, %c2_i32_28 : i32
    %c1_i32 = arith.constant 1 : i32
    %75 = arith.addi %74, %c1_i32 : i32
    %76 = arith.index_cast %75 : i32 to index
    %77 = memref.load %arg1[%76] : memref<4xi32, #tpu.memory_space<smem>>
    %78 = vector.broadcast %77 : i32 to vector<1x16xi32>
    %79 = arith.cmpi sge, %14, %78 : vector<1x16xi32>
    %cst_29 = arith.constant -1.000000e+30 : f32
    %cst_30 = arith.constant 0.000000e+00 : f32
    %80 = vector.broadcast %cst_29 : f32 to vector<1x16xf32>
    %81 = vector.broadcast %cst_30 : f32 to vector<1x16xf32>
    %82 = arith.select %79, %80, %81 : vector<1x16xi1>, vector<1x16xf32>
    %83 = vector.broadcast %77 : i32 to vector<16x1xi32>
    %84 = arith.cmpi slt, %15, %83 : vector<16x1xi32>
    %85 = arith.extui %84 : vector<16x1xi1> to vector<16x1xi32>
    %86 = arith.sitofp %85 : vector<16x1xi32> to vector<16x1xf32>
    %cst_31 = arith.constant 0.000000e+00 : f32
    %87 = vector.broadcast %cst_31 : f32 to vector<16x256xf32>
    %88 = vector.extract_strided_slice %13 {offsets = [16, 0], sizes = [16, 128], strides = [1, 1]} : vector<32x768xf32> to vector<16x128xf32>
    %89 = vector.extract_strided_slice %13 {offsets = [16, 256], sizes = [16, 128], strides = [1, 1]} : vector<32x768xf32> to vector<16x128xf32>
    %90 = vector.extract_strided_slice %13 {offsets = [16, 512], sizes = [16, 128], strides = [1, 1]} : vector<32x768xf32> to vector<16x128xf32>
    %cst_32 = arith.constant dense<0.000000e+00> : vector<16x16xf32>
    %91 = tpu.matmul %88, %89, %cst_32 {dimension_numbers = #tpu.dot_dimension_numbers<[1], [1], [0], [0], [0, 0, 1, 0], [], []>} : vector<16x128xf32>, vector<16x128xf32>, vector<16x16xf32> -> vector<16x16xf32>
    %cst_33 = arith.constant 0.0883883461 : f32
    %92 = vector.broadcast %cst_33 : f32 to vector<16x16xf32>
    %93 = arith.mulf %91, %92 : vector<16x16xf32>
    %94 = vector.broadcast %82 : vector<1x16xf32> to vector<16x16xf32>
    %95 = arith.addf %93, %94 : vector<16x16xf32>
    %cst_34 = arith.constant dense<0xFF800000> : vector<16xf32>
    %96 = vector.multi_reduction <maximumf>, %95, %cst_34 [1] : vector<16x16xf32> to vector<16xf32>
    %97 = vector.shape_cast %96 : vector<16xf32> to vector<16x1xf32>
    %98 = vector.broadcast %97 : vector<16x1xf32> to vector<16x16xf32>
    %99 = arith.subf %95, %98 : vector<16x16xf32>
    %100 = math.exp %99 : vector<16x16xf32>
    %cst_35 = arith.constant dense<0.000000e+00> : vector<16xf32>
    %101 = vector.multi_reduction <add>, %100, %cst_35 [1] : vector<16x16xf32> to vector<16xf32>
    %102 = vector.shape_cast %101 : vector<16xf32> to vector<16x1xf32>
    %103 = vector.broadcast %102 : vector<16x1xf32> to vector<16x16xf32>
    %104 = arith.divf %100, %103 : vector<16x16xf32>
    %cst_36 = arith.constant dense<0.000000e+00> : vector<16x128xf32>
    %105 = tpu.matmul %104, %90, %cst_36 {dimension_numbers = #tpu.dot_dimension_numbers<[1], [0], [0], [1], [0, 0, 1, 1], [], []>} : vector<16x16xf32>, vector<16x128xf32>, vector<16x128xf32> -> vector<16x128xf32>
    %c0_37 = arith.constant 0 : index
    %c0_38 = arith.constant 0 : index
    %c0_39 = arith.constant 0 : index
    %106 = vector.load %arg5[%c0_37, %c0_38, %c0_39] : memref<2x128x256xf32, #tpu.memory_space<vmem>>, vector<1x128x256xf32>
    %107 = vector.shape_cast %106 : vector<1x128x256xf32> to vector<128x256xf32>
    %cst_40 = arith.constant dense<0.000000e+00> : vector<16x256xf32>
    %108 = tpu.matmul %105, %107, %cst_40 {dimension_numbers = #tpu.dot_dimension_numbers<[1], [0], [0], [1], [0, 0, 1, 1], [], []>} : vector<16x128xf32>, vector<128x256xf32>, vector<16x256xf32> -> vector<16x256xf32>
    %109 = arith.addf %87, %108 : vector<16x256xf32>
    %110 = vector.extract_strided_slice %13 {offsets = [16, 128], sizes = [16, 128], strides = [1, 1]} : vector<32x768xf32> to vector<16x128xf32>
    %111 = vector.extract_strided_slice %13 {offsets = [16, 384], sizes = [16, 128], strides = [1, 1]} : vector<32x768xf32> to vector<16x128xf32>
    %112 = vector.extract_strided_slice %13 {offsets = [16, 640], sizes = [16, 128], strides = [1, 1]} : vector<32x768xf32> to vector<16x128xf32>
    %cst_41 = arith.constant dense<0.000000e+00> : vector<16x16xf32>
    %113 = tpu.matmul %110, %111, %cst_41 {dimension_numbers = #tpu.dot_dimension_numbers<[1], [1], [0], [0], [0, 0, 1, 0], [], []>} : vector<16x128xf32>, vector<16x128xf32>, vector<16x16xf32> -> vector<16x16xf32>
    %cst_42 = arith.constant 0.0883883461 : f32
    %114 = vector.broadcast %cst_42 : f32 to vector<16x16xf32>
    %115 = arith.mulf %113, %114 : vector<16x16xf32>
    %116 = vector.broadcast %82 : vector<1x16xf32> to vector<16x16xf32>
    %117 = arith.addf %115, %116 : vector<16x16xf32>
    %cst_43 = arith.constant dense<0xFF800000> : vector<16xf32>
    %118 = vector.multi_reduction <maximumf>, %117, %cst_43 [1] : vector<16x16xf32> to vector<16xf32>
    %119 = vector.shape_cast %118 : vector<16xf32> to vector<16x1xf32>
    %120 = vector.broadcast %119 : vector<16x1xf32> to vector<16x16xf32>
    %121 = arith.subf %117, %120 : vector<16x16xf32>
    %122 = math.exp %121 : vector<16x16xf32>
    %cst_44 = arith.constant dense<0.000000e+00> : vector<16xf32>
    %123 = vector.multi_reduction <add>, %122, %cst_44 [1] : vector<16x16xf32> to vector<16xf32>
    %124 = vector.shape_cast %123 : vector<16xf32> to vector<16x1xf32>
    %125 = vector.broadcast %124 : vector<16x1xf32> to vector<16x16xf32>
    %126 = arith.divf %122, %125 : vector<16x16xf32>
    %cst_45 = arith.constant dense<0.000000e+00> : vector<16x128xf32>
    %127 = tpu.matmul %126, %112, %cst_45 {dimension_numbers = #tpu.dot_dimension_numbers<[1], [0], [0], [1], [0, 0, 1, 1], [], []>} : vector<16x16xf32>, vector<16x128xf32>, vector<16x128xf32> -> vector<16x128xf32>
    %c1_46 = arith.constant 1 : index
    %c0_47 = arith.constant 0 : index
    %c0_48 = arith.constant 0 : index
    %128 = vector.load %arg5[%c1_46, %c0_47, %c0_48] : memref<2x128x256xf32, #tpu.memory_space<vmem>>, vector<1x128x256xf32>
    %129 = vector.shape_cast %128 : vector<1x128x256xf32> to vector<128x256xf32>
    %cst_49 = arith.constant dense<0.000000e+00> : vector<16x256xf32>
    %130 = tpu.matmul %127, %129, %cst_49 {dimension_numbers = #tpu.dot_dimension_numbers<[1], [0], [0], [1], [0, 0, 1, 1], [], []>} : vector<16x128xf32>, vector<128x256xf32>, vector<16x256xf32> -> vector<16x256xf32>
    %131 = arith.addf %109, %130 : vector<16x256xf32>
    %132 = tpu.concatenate %73, %131 in 0 : vector<16x256xf32>, vector<16x256xf32> -> vector<32x256xf32>
    %133 = vector.broadcast %2 : vector<1x256xf32> to vector<32x256xf32>
    %134 = arith.addf %132, %133 : vector<32x256xf32>
    %135 = tpu.concatenate %28, %86 in 0 : vector<16x1xf32>, vector<16x1xf32> -> vector<32x1xf32>
    %136 = arith.addf %134, %8 : vector<32x256xf32>
    %cst_50 = arith.constant dense<0.000000e+00> : vector<32xf32>
    %137 = vector.multi_reduction <add>, %136, %cst_50 [1] : vector<32x256xf32> to vector<32xf32>
    %138 = vector.shape_cast %137 : vector<32xf32> to vector<32x1xf32>
    %cst_51 = arith.constant 2.560000e+02 : f32
    %139 = vector.broadcast %cst_51 : f32 to vector<32x1xf32>
    %140 = arith.divf %138, %139 : vector<32x1xf32>
    %141 = vector.broadcast %140 : vector<32x1xf32> to vector<32x256xf32>
    %142 = arith.subf %136, %141 : vector<32x256xf32>
    %143 = arith.mulf %142, %142 : vector<32x256xf32>
    %cst_52 = arith.constant dense<0.000000e+00> : vector<32xf32>
    %144 = vector.multi_reduction <add>, %143, %cst_52 [1] : vector<32x256xf32> to vector<32xf32>
    %145 = vector.shape_cast %144 : vector<32xf32> to vector<32x1xf32>
    %cst_53 = arith.constant 2.560000e+02 : f32
    %146 = vector.broadcast %cst_53 : f32 to vector<32x1xf32>
    %147 = arith.divf %145, %146 : vector<32x1xf32>
    %148 = vector.broadcast %140 : vector<32x1xf32> to vector<32x256xf32>
    %149 = arith.subf %136, %148 : vector<32x256xf32>
    %cst_54 = arith.constant 9.99999974E-6 : f32
    %150 = vector.broadcast %cst_54 : f32 to vector<32x1xf32>
    %151 = arith.addf %147, %150 : vector<32x1xf32>
    %152 = math.rsqrt %151 : vector<32x1xf32>
    %153 = vector.broadcast %152 : vector<32x1xf32> to vector<32x256xf32>
    %154 = arith.mulf %149, %153 : vector<32x256xf32>
    %155 = vector.broadcast %3 : vector<1x256xf32> to vector<32x256xf32>
    %156 = arith.mulf %154, %155 : vector<32x256xf32>
    %157 = vector.broadcast %4 : vector<1x256xf32> to vector<32x256xf32>
    %158 = arith.addf %156, %157 : vector<32x256xf32>
    %159 = vector.broadcast %135 : vector<32x1xf32> to vector<32x256xf32>
    %160 = arith.mulf %158, %159 : vector<32x256xf32>
    %cst_55 = arith.constant 0.000000e+00 : f32
    %161 = vector.broadcast %cst_55 : f32 to vector<2x8x256xf32>
    %c0_56 = arith.constant 0 : index
    %c0_57 = arith.constant 0 : index
    %c0_58 = arith.constant 0 : index
    %162 = vector.load %arg11[%c0_56, %c0_57, %c0_58] : memref<2x32x256xf32, #tpu.memory_space<vmem>>, vector<2x8x256xf32>
    tpu.vector_store %arg11[%c0_56, %c0_57, %c0_58], %161 {strides = array<i32>} : memref<2x32x256xf32, #tpu.memory_space<vmem>>, vector<2x8x256xf32>,
    %c0_59 = arith.constant 0 : index
    %c24 = arith.constant 24 : index
    %c0_60 = arith.constant 0 : index
    %163 = vector.load %arg11[%c0_59, %c24, %c0_60] : memref<2x32x256xf32, #tpu.memory_space<vmem>>, vector<2x8x256xf32>
    tpu.vector_store %arg11[%c0_59, %c24, %c0_60], %161 {strides = array<i32>} : memref<2x32x256xf32, #tpu.memory_space<vmem>>, vector<2x8x256xf32>,
    %164 = vector.shape_cast %160 : vector<32x256xf32> to vector<2x16x256xf32>
    %c0_61 = arith.constant 0 : index
    %c8 = arith.constant 8 : index
    %c0_62 = arith.constant 0 : index
    %165 = vector.load %arg11[%c0_61, %c8, %c0_62] : memref<2x32x256xf32, #tpu.memory_space<vmem>>, vector<2x16x256xf32>
    tpu.vector_store %arg11[%c0_61, %c8, %c0_62], %164 {strides = array<i32>} : memref<2x32x256xf32, #tpu.memory_space<vmem>>, vector<2x16x256xf32>,
    %cst_63 = arith.constant 0.000000e+00 : f32
    %166 = vector.broadcast %cst_63 : f32 to vector<16x512xf32>
    %c0_64 = arith.constant 0 : index
    %c4 = arith.constant 4 : index
    %c0_65 = arith.constant 0 : index
    %167 = vector.load %arg11[%c0_64, %c4, %c0_65] : memref<2x32x256xf32, #tpu.memory_space<vmem>>, vector<1x16x256xf32>
    %168 = vector.shape_cast %167 : vector<1x16x256xf32> to vector<16x256xf32>
    %c0_66 = arith.constant 0 : index
    %c0_67 = arith.constant 0 : index
    %c0_68 = arith.constant 0 : index
    %169 = vector.load %arg6[%c0_66, %c0_67, %c0_68] : memref<9x256x512xf32, #tpu.memory_space<vmem>>, vector<1x256x512xf32>
    %170 = vector.shape_cast %169 : vector<1x256x512xf32> to vector<256x512xf32>
    %cst_69 = arith.constant dense<0.000000e+00> : vector<16x512xf32>
    %171 = tpu.matmul %168, %170, %cst_69 {dimension_numbers = #tpu.dot_dimension_numbers<[1], [0], [0], [1], [0, 0, 1, 1], [], []>} : vector<16x256xf32>, vector<256x512xf32>, vector<16x512xf32> -> vector<16x512xf32>
    %172 = arith.addf %166, %171 : vector<16x512xf32>
    %c0_70 = arith.constant 0 : index
    %c5 = arith.constant 5 : index
    %c0_71 = arith.constant 0 : index
    %173 = vector.load %arg11[%c0_70, %c5, %c0_71] : memref<2x32x256xf32, #tpu.memory_space<vmem>>, vector<1x16x256xf32>
    %174 = vector.shape_cast %173 : vector<1x16x256xf32> to vector<16x256xf32>
    %c1_72 = arith.constant 1 : index
    %c0_73 = arith.constant 0 : index
    %c0_74 = arith.constant 0 : index
    %175 = vector.load %arg6[%c1_72, %c0_73, %c0_74] : memref<9x256x512xf32, #tpu.memory_space<vmem>>, vector<1x256x512xf32>
    %176 = vector.shape_cast %175 : vector<1x256x512xf32> to vector<256x512xf32>
    %cst_75 = arith.constant dense<0.000000e+00> : vector<16x512xf32>
    %177 = tpu.matmul %174, %176, %cst_75 {dimension_numbers = #tpu.dot_dimension_numbers<[1], [0], [0], [1], [0, 0, 1, 1], [], []>} : vector<16x256xf32>, vector<256x512xf32>, vector<16x512xf32> -> vector<16x512xf32>
    %178 = arith.addf %172, %177 : vector<16x512xf32>
    %c0_76 = arith.constant 0 : index
    %c6 = arith.constant 6 : index
    %c0_77 = arith.constant 0 : index
    %179 = vector.load %arg11[%c0_76, %c6, %c0_77] : memref<2x32x256xf32, #tpu.memory_space<vmem>>, vector<1x16x256xf32>
    %180 = vector.shape_cast %179 : vector<1x16x256xf32> to vector<16x256xf32>
    %c2 = arith.constant 2 : index
    %c0_78 = arith.constant 0 : index
    %c0_79 = arith.constant 0 : index
    %181 = vector.load %arg6[%c2, %c0_78, %c0_79] : memref<9x256x512xf32, #tpu.memory_space<vmem>>, vector<1x256x512xf32>
    %182 = vector.shape_cast %181 : vector<1x256x512xf32> to vector<256x512xf32>
    %cst_80 = arith.constant dense<0.000000e+00> : vector<16x512xf32>
    %183 = tpu.matmul %180, %182, %cst_80 {dimension_numbers = #tpu.dot_dimension_numbers<[1], [0], [0], [1], [0, 0, 1, 1], [], []>} : vector<16x256xf32>, vector<256x512xf32>, vector<16x512xf32> -> vector<16x512xf32>
    %184 = arith.addf %178, %183 : vector<16x512xf32>
    %c0_81 = arith.constant 0 : index
    %c7 = arith.constant 7 : index
    %c0_82 = arith.constant 0 : index
    %185 = vector.load %arg11[%c0_81, %c7, %c0_82] : memref<2x32x256xf32, #tpu.memory_space<vmem>>, vector<1x16x256xf32>
    %186 = vector.shape_cast %185 : vector<1x16x256xf32> to vector<16x256xf32>
    %c3 = arith.constant 3 : index
    %c0_83 = arith.constant 0 : index
    %c0_84 = arith.constant 0 : index
    %187 = vector.load %arg6[%c3, %c0_83, %c0_84] : memref<9x256x512xf32, #tpu.memory_space<vmem>>, vector<1x256x512xf32>
    %188 = vector.shape_cast %187 : vector<1x256x512xf32> to vector<256x512xf32>
    %cst_85 = arith.constant dense<0.000000e+00> : vector<16x512xf32>
    %189 = tpu.matmul %186, %188, %cst_85 {dimension_numbers = #tpu.dot_dimension_numbers<[1], [0], [0], [1], [0, 0, 1, 1], [], []>} : vector<16x256xf32>, vector<256x512xf32>, vector<16x512xf32> -> vector<16x512xf32>
    %190 = arith.addf %184, %189 : vector<16x512xf32>
    %c0_86 = arith.constant 0 : index
    %c8_87 = arith.constant 8 : index
    %c0_88 = arith.constant 0 : index
    %191 = vector.load %arg11[%c0_86, %c8_87, %c0_88] : memref<2x32x256xf32, #tpu.memory_space<vmem>>, vector<1x16x256xf32>
    %192 = vector.shape_cast %191 : vector<1x16x256xf32> to vector<16x256xf32>
    %c4_89 = arith.constant 4 : index
    %c0_90 = arith.constant 0 : index
    %c0_91 = arith.constant 0 : index
    %193 = vector.load %arg6[%c4_89, %c0_90, %c0_91] : memref<9x256x512xf32, #tpu.memory_space<vmem>>, vector<1x256x512xf32>
    %194 = vector.shape_cast %193 : vector<1x256x512xf32> to vector<256x512xf32>
    %cst_92 = arith.constant dense<0.000000e+00> : vector<16x512xf32>
    %195 = tpu.matmul %192, %194, %cst_92 {dimension_numbers = #tpu.dot_dimension_numbers<[1], [0], [0], [1], [0, 0, 1, 1], [], []>} : vector<16x256xf32>, vector<256x512xf32>, vector<16x512xf32> -> vector<16x512xf32>
    %196 = arith.addf %190, %195 : vector<16x512xf32>
    %c0_93 = arith.constant 0 : index
    %c9 = arith.constant 9 : index
    %c0_94 = arith.constant 0 : index
    %197 = vector.load %arg11[%c0_93, %c9, %c0_94] : memref<2x32x256xf32, #tpu.memory_space<vmem>>, vector<1x16x256xf32>
    %198 = vector.shape_cast %197 : vector<1x16x256xf32> to vector<16x256xf32>
    %c5_95 = arith.constant 5 : index
    %c0_96 = arith.constant 0 : index
    %c0_97 = arith.constant 0 : index
    %199 = vector.load %arg6[%c5_95, %c0_96, %c0_97] : memref<9x256x512xf32, #tpu.memory_space<vmem>>, vector<1x256x512xf32>
    %200 = vector.shape_cast %199 : vector<1x256x512xf32> to vector<256x512xf32>
    %cst_98 = arith.constant dense<0.000000e+00> : vector<16x512xf32>
    %201 = tpu.matmul %198, %200, %cst_98 {dimension_numbers = #tpu.dot_dimension_numbers<[1], [0], [0], [1], [0, 0, 1, 1], [], []>} : vector<16x256xf32>, vector<256x512xf32>, vector<16x512xf32> -> vector<16x512xf32>
    %202 = arith.addf %196, %201 : vector<16x512xf32>
    %c0_99 = arith.constant 0 : index
    %c10 = arith.constant 10 : index
    %c0_100 = arith.constant 0 : index
    %203 = vector.load %arg11[%c0_99, %c10, %c0_100] : memref<2x32x256xf32, #tpu.memory_space<vmem>>, vector<1x16x256xf32>
    %204 = vector.shape_cast %203 : vector<1x16x256xf32> to vector<16x256xf32>
    %c6_101 = arith.constant 6 : index
    %c0_102 = arith.constant 0 : index
    %c0_103 = arith.constant 0 : index
    %205 = vector.load %arg6[%c6_101, %c0_102, %c0_103] : memref<9x256x512xf32, #tpu.memory_space<vmem>>, vector<1x256x512xf32>
    %206 = vector.shape_cast %205 : vector<1x256x512xf32> to vector<256x512xf32>
    %cst_104 = arith.constant dense<0.000000e+00> : vector<16x512xf32>
    %207 = tpu.matmul %204, %206, %cst_104 {dimension_numbers = #tpu.dot_dimension_numbers<[1], [0], [0], [1], [0, 0, 1, 1], [], []>} : vector<16x256xf32>, vector<256x512xf32>, vector<16x512xf32> -> vector<16x512xf32>
    %208 = arith.addf %202, %207 : vector<16x512xf32>
    %c0_105 = arith.constant 0 : index
    %c11 = arith.constant 11 : index
    %c0_106 = arith.constant 0 : index
    %209 = vector.load %arg11[%c0_105, %c11, %c0_106] : memref<2x32x256xf32, #tpu.memory_space<vmem>>, vector<1x16x256xf32>
    %210 = vector.shape_cast %209 : vector<1x16x256xf32> to vector<16x256xf32>
    %c7_107 = arith.constant 7 : index
    %c0_108 = arith.constant 0 : index
    %c0_109 = arith.constant 0 : index
    %211 = vector.load %arg6[%c7_107, %c0_108, %c0_109] : memref<9x256x512xf32, #tpu.memory_space<vmem>>, vector<1x256x512xf32>
    %212 = vector.shape_cast %211 : vector<1x256x512xf32> to vector<256x512xf32>
    %cst_110 = arith.constant dense<0.000000e+00> : vector<16x512xf32>
    %213 = tpu.matmul %210, %212, %cst_110 {dimension_numbers = #tpu.dot_dimension_numbers<[1], [0], [0], [1], [0, 0, 1, 1], [], []>} : vector<16x256xf32>, vector<256x512xf32>, vector<16x512xf32> -> vector<16x512xf32>
    %214 = arith.addf %208, %213 : vector<16x512xf32>
    %c0_111 = arith.constant 0 : index
    %c12 = arith.constant 12 : index
    %c0_112 = arith.constant 0 : index
    %215 = vector.load %arg11[%c0_111, %c12, %c0_112] : memref<2x32x256xf32, #tpu.memory_space<vmem>>, vector<1x16x256xf32>
    %216 = vector.shape_cast %215 : vector<1x16x256xf32> to vector<16x256xf32>
    %c8_113 = arith.constant 8 : index
    %c0_114 = arith.constant 0 : index
    %c0_115 = arith.constant 0 : index
    %217 = vector.load %arg6[%c8_113, %c0_114, %c0_115] : memref<9x256x512xf32, #tpu.memory_space<vmem>>, vector<1x256x512xf32>
    %218 = vector.shape_cast %217 : vector<1x256x512xf32> to vector<256x512xf32>
    %cst_116 = arith.constant dense<0.000000e+00> : vector<16x512xf32>
    %219 = tpu.matmul %216, %218, %cst_116 {dimension_numbers = #tpu.dot_dimension_numbers<[1], [0], [0], [1], [0, 0, 1, 1], [], []>} : vector<16x256xf32>, vector<256x512xf32>, vector<16x512xf32> -> vector<16x512xf32>
    %220 = arith.addf %214, %219 : vector<16x512xf32>
    %cst_117 = arith.constant 0.000000e+00 : f32
    %221 = vector.broadcast %cst_117 : f32 to vector<16x512xf32>
    %c1_118 = arith.constant 1 : index
    %c4_119 = arith.constant 4 : index
    %c0_120 = arith.constant 0 : index
    %222 = vector.load %arg11[%c1_118, %c4_119, %c0_120] : memref<2x32x256xf32, #tpu.memory_space<vmem>>, vector<1x16x256xf32>
    %223 = vector.shape_cast %222 : vector<1x16x256xf32> to vector<16x256xf32>
    %c0_121 = arith.constant 0 : index
    %c0_122 = arith.constant 0 : index
    %c0_123 = arith.constant 0 : index
    %224 = vector.load %arg6[%c0_121, %c0_122, %c0_123] : memref<9x256x512xf32, #tpu.memory_space<vmem>>, vector<1x256x512xf32>
    %225 = vector.shape_cast %224 : vector<1x256x512xf32> to vector<256x512xf32>
    %cst_124 = arith.constant dense<0.000000e+00> : vector<16x512xf32>
    %226 = tpu.matmul %223, %225, %cst_124 {dimension_numbers = #tpu.dot_dimension_numbers<[1], [0], [0], [1], [0, 0, 1, 1], [], []>} : vector<16x256xf32>, vector<256x512xf32>, vector<16x512xf32> -> vector<16x512xf32>
    %227 = arith.addf %221, %226 : vector<16x512xf32>
    %c1_125 = arith.constant 1 : index
    %c5_126 = arith.constant 5 : index
    %c0_127 = arith.constant 0 : index
    %228 = vector.load %arg11[%c1_125, %c5_126, %c0_127] : memref<2x32x256xf32, #tpu.memory_space<vmem>>, vector<1x16x256xf32>
    %229 = vector.shape_cast %228 : vector<1x16x256xf32> to vector<16x256xf32>
    %c1_128 = arith.constant 1 : index
    %c0_129 = arith.constant 0 : index
    %c0_130 = arith.constant 0 : index
    %230 = vector.load %arg6[%c1_128, %c0_129, %c0_130] : memref<9x256x512xf32, #tpu.memory_space<vmem>>, vector<1x256x512xf32>
    %231 = vector.shape_cast %230 : vector<1x256x512xf32> to vector<256x512xf32>
    %cst_131 = arith.constant dense<0.000000e+00> : vector<16x512xf32>
    %232 = tpu.matmul %229, %231, %cst_131 {dimension_numbers = #tpu.dot_dimension_numbers<[1], [0], [0], [1], [0, 0, 1, 1], [], []>} : vector<16x256xf32>, vector<256x512xf32>, vector<16x512xf32> -> vector<16x512xf32>
    %233 = arith.addf %227, %232 : vector<16x512xf32>
    %c1_132 = arith.constant 1 : index
    %c6_133 = arith.constant 6 : index
    %c0_134 = arith.constant 0 : index
    %234 = vector.load %arg11[%c1_132, %c6_133, %c0_134] : memref<2x32x256xf32, #tpu.memory_space<vmem>>, vector<1x16x256xf32>
    %235 = vector.shape_cast %234 : vector<1x16x256xf32> to vector<16x256xf32>
    %c2_135 = arith.constant 2 : index
    %c0_136 = arith.constant 0 : index
    %c0_137 = arith.constant 0 : index
    %236 = vector.load %arg6[%c2_135, %c0_136, %c0_137] : memref<9x256x512xf32, #tpu.memory_space<vmem>>, vector<1x256x512xf32>
    %237 = vector.shape_cast %236 : vector<1x256x512xf32> to vector<256x512xf32>
    %cst_138 = arith.constant dense<0.000000e+00> : vector<16x512xf32>
    %238 = tpu.matmul %235, %237, %cst_138 {dimension_numbers = #tpu.dot_dimension_numbers<[1], [0], [0], [1], [0, 0, 1, 1], [], []>} : vector<16x256xf32>, vector<256x512xf32>, vector<16x512xf32> -> vector<16x512xf32>
    %239 = arith.addf %233, %238 : vector<16x512xf32>
    %c1_139 = arith.constant 1 : index
    %c7_140 = arith.constant 7 : index
    %c0_141 = arith.constant 0 : index
    %240 = vector.load %arg11[%c1_139, %c7_140, %c0_141] : memref<2x32x256xf32, #tpu.memory_space<vmem>>, vector<1x16x256xf32>
    %241 = vector.shape_cast %240 : vector<1x16x256xf32> to vector<16x256xf32>
    %c3_142 = arith.constant 3 : index
    %c0_143 = arith.constant 0 : index
    %c0_144 = arith.constant 0 : index
    %242 = vector.load %arg6[%c3_142, %c0_143, %c0_144] : memref<9x256x512xf32, #tpu.memory_space<vmem>>, vector<1x256x512xf32>
    %243 = vector.shape_cast %242 : vector<1x256x512xf32> to vector<256x512xf32>
    %cst_145 = arith.constant dense<0.000000e+00> : vector<16x512xf32>
    %244 = tpu.matmul %241, %243, %cst_145 {dimension_numbers = #tpu.dot_dimension_numbers<[1], [0], [0], [1], [0, 0, 1, 1], [], []>} : vector<16x256xf32>, vector<256x512xf32>, vector<16x512xf32> -> vector<16x512xf32>
    %245 = arith.addf %239, %244 : vector<16x512xf32>
    %c1_146 = arith.constant 1 : index
    %c8_147 = arith.constant 8 : index
    %c0_148 = arith.constant 0 : index
    %246 = vector.load %arg11[%c1_146, %c8_147, %c0_148] : memref<2x32x256xf32, #tpu.memory_space<vmem>>, vector<1x16x256xf32>
    %247 = vector.shape_cast %246 : vector<1x16x256xf32> to vector<16x256xf32>
    %c4_149 = arith.constant 4 : index
    %c0_150 = arith.constant 0 : index
    %c0_151 = arith.constant 0 : index
    %248 = vector.load %arg6[%c4_149, %c0_150, %c0_151] : memref<9x256x512xf32, #tpu.memory_space<vmem>>, vector<1x256x512xf32>
    %249 = vector.shape_cast %248 : vector<1x256x512xf32> to vector<256x512xf32>
    %cst_152 = arith.constant dense<0.000000e+00> : vector<16x512xf32>
    %250 = tpu.matmul %247, %249, %cst_152 {dimension_numbers = #tpu.dot_dimension_numbers<[1], [0], [0], [1], [0, 0, 1, 1], [], []>} : vector<16x256xf32>, vector<256x512xf32>, vector<16x512xf32> -> vector<16x512xf32>
    %251 = arith.addf %245, %250 : vector<16x512xf32>
    %c1_153 = arith.constant 1 : index
    %c9_154 = arith.constant 9 : index
    %c0_155 = arith.constant 0 : index
    %252 = vector.load %arg11[%c1_153, %c9_154, %c0_155] : memref<2x32x256xf32, #tpu.memory_space<vmem>>, vector<1x16x256xf32>
    %253 = vector.shape_cast %252 : vector<1x16x256xf32> to vector<16x256xf32>
    %c5_156 = arith.constant 5 : index
    %c0_157 = arith.constant 0 : index
    %c0_158 = arith.constant 0 : index
    %254 = vector.load %arg6[%c5_156, %c0_157, %c0_158] : memref<9x256x512xf32, #tpu.memory_space<vmem>>, vector<1x256x512xf32>
    %255 = vector.shape_cast %254 : vector<1x256x512xf32> to vector<256x512xf32>
    %cst_159 = arith.constant dense<0.000000e+00> : vector<16x512xf32>
    %256 = tpu.matmul %253, %255, %cst_159 {dimension_numbers = #tpu.dot_dimension_numbers<[1], [0], [0], [1], [0, 0, 1, 1], [], []>} : vector<16x256xf32>, vector<256x512xf32>, vector<16x512xf32> -> vector<16x512xf32>
    %257 = arith.addf %251, %256 : vector<16x512xf32>
    %c1_160 = arith.constant 1 : index
    %c10_161 = arith.constant 10 : index
    %c0_162 = arith.constant 0 : index
    %258 = vector.load %arg11[%c1_160, %c10_161, %c0_162] : memref<2x32x256xf32, #tpu.memory_space<vmem>>, vector<1x16x256xf32>
    %259 = vector.shape_cast %258 : vector<1x16x256xf32> to vector<16x256xf32>
    %c6_163 = arith.constant 6 : index
    %c0_164 = arith.constant 0 : index
    %c0_165 = arith.constant 0 : index
    %260 = vector.load %arg6[%c6_163, %c0_164, %c0_165] : memref<9x256x512xf32, #tpu.memory_space<vmem>>, vector<1x256x512xf32>
    %261 = vector.shape_cast %260 : vector<1x256x512xf32> to vector<256x512xf32>
    %cst_166 = arith.constant dense<0.000000e+00> : vector<16x512xf32>
    %262 = tpu.matmul %259, %261, %cst_166 {dimension_numbers = #tpu.dot_dimension_numbers<[1], [0], [0], [1], [0, 0, 1, 1], [], []>} : vector<16x256xf32>, vector<256x512xf32>, vector<16x512xf32> -> vector<16x512xf32>
    %263 = arith.addf %257, %262 : vector<16x512xf32>
    %c1_167 = arith.constant 1 : index
    %c11_168 = arith.constant 11 : index
    %c0_169 = arith.constant 0 : index
    %264 = vector.load %arg11[%c1_167, %c11_168, %c0_169] : memref<2x32x256xf32, #tpu.memory_space<vmem>>, vector<1x16x256xf32>
    %265 = vector.shape_cast %264 : vector<1x16x256xf32> to vector<16x256xf32>
    %c7_170 = arith.constant 7 : index
    %c0_171 = arith.constant 0 : index
    %c0_172 = arith.constant 0 : index
    %266 = vector.load %arg6[%c7_170, %c0_171, %c0_172] : memref<9x256x512xf32, #tpu.memory_space<vmem>>, vector<1x256x512xf32>
    %267 = vector.shape_cast %266 : vector<1x256x512xf32> to vector<256x512xf32>
    %cst_173 = arith.constant dense<0.000000e+00> : vector<16x512xf32>
    %268 = tpu.matmul %265, %267, %cst_173 {dimension_numbers = #tpu.dot_dimension_numbers<[1], [0], [0], [1], [0, 0, 1, 1], [], []>} : vector<16x256xf32>, vector<256x512xf32>, vector<16x512xf32> -> vector<16x512xf32>
    %269 = arith.addf %263, %268 : vector<16x512xf32>
    %c1_174 = arith.constant 1 : index
    %c12_175 = arith.constant 12 : index
    %c0_176 = arith.constant 0 : index
    %270 = vector.load %arg11[%c1_174, %c12_175, %c0_176] : memref<2x32x256xf32, #tpu.memory_space<vmem>>, vector<1x16x256xf32>
    %271 = vector.shape_cast %270 : vector<1x16x256xf32> to vector<16x256xf32>
    %c8_177 = arith.constant 8 : index
    %c0_178 = arith.constant 0 : index
    %c0_179 = arith.constant 0 : index
    %272 = vector.load %arg6[%c8_177, %c0_178, %c0_179] : memref<9x256x512xf32, #tpu.memory_space<vmem>>, vector<1x256x512xf32>
    %273 = vector.shape_cast %272 : vector<1x256x512xf32> to vector<256x512xf32>
    %cst_180 = arith.constant dense<0.000000e+00> : vector<16x512xf32>
    %274 = tpu.matmul %271, %273, %cst_180 {dimension_numbers = #tpu.dot_dimension_numbers<[1], [0], [0], [1], [0, 0, 1, 1], [], []>} : vector<16x256xf32>, vector<256x512xf32>, vector<16x512xf32> -> vector<16x512xf32>
    %275 = arith.addf %269, %274 : vector<16x512xf32>
    %276 = tpu.concatenate %220, %275 in 0 : vector<16x512xf32>, vector<16x512xf32> -> vector<32x512xf32>
    %c0_181 = arith.constant 0 : index
    %c0_182 = arith.constant 0 : index
    %277 = vector.load %arg7[%c0_181, %c0_182] : memref<1x512xf32, #tpu.memory_space<vmem>>, vector<1x512xf32>
    %278 = vector.broadcast %277 : vector<1x512xf32> to vector<32x512xf32>
    %279 = arith.addf %276, %278 : vector<32x512xf32>
    %cst_183 = arith.constant 0.000000e+00 : f32
    %280 = vector.broadcast %cst_183 : f32 to vector<32x512xf32>
    %281 = arith.maximumf %279, %280 : vector<32x512xf32>
    %c0_184 = arith.constant 0 : index
    %c0_185 = arith.constant 0 : index
    %282 = vector.load %arg8[%c0_184, %c0_185] : memref<512x256xf32, #tpu.memory_space<vmem>>, vector<512x256xf32>
    %cst_186 = arith.constant dense<0.000000e+00> : vector<32x256xf32>
    %283 = tpu.matmul %281, %282, %cst_186 {dimension_numbers = #tpu.dot_dimension_numbers<[1], [0], [0], [1], [0, 0, 1, 1], [], []>} : vector<32x512xf32>, vector<512x256xf32>, vector<32x256xf32> -> vector<32x256xf32>
    %284 = vector.broadcast %5 : vector<1x256xf32> to vector<32x256xf32>
    %285 = arith.addf %283, %284 : vector<32x256xf32>
    %286 = arith.addf %285, %160 : vector<32x256xf32>
    %cst_187 = arith.constant dense<0.000000e+00> : vector<32xf32>
    %287 = vector.multi_reduction <add>, %286, %cst_187 [1] : vector<32x256xf32> to vector<32xf32>
    %288 = vector.shape_cast %287 : vector<32xf32> to vector<32x1xf32>
    %cst_188 = arith.constant 2.560000e+02 : f32
    %289 = vector.broadcast %cst_188 : f32 to vector<32x1xf32>
    %290 = arith.divf %288, %289 : vector<32x1xf32>
    %291 = vector.broadcast %290 : vector<32x1xf32> to vector<32x256xf32>
    %292 = arith.subf %286, %291 : vector<32x256xf32>
    %293 = arith.mulf %292, %292 : vector<32x256xf32>
    %cst_189 = arith.constant dense<0.000000e+00> : vector<32xf32>
    %294 = vector.multi_reduction <add>, %293, %cst_189 [1] : vector<32x256xf32> to vector<32xf32>
    %295 = vector.shape_cast %294 : vector<32xf32> to vector<32x1xf32>
    %cst_190 = arith.constant 2.560000e+02 : f32
    %296 = vector.broadcast %cst_190 : f32 to vector<32x1xf32>
    %297 = arith.divf %295, %296 : vector<32x1xf32>
    %298 = vector.broadcast %290 : vector<32x1xf32> to vector<32x256xf32>
    %299 = arith.subf %286, %298 : vector<32x256xf32>
    %cst_191 = arith.constant 9.99999974E-6 : f32
    %300 = vector.broadcast %cst_191 : f32 to vector<32x1xf32>
    %301 = arith.addf %297, %300 : vector<32x1xf32>
    %302 = math.rsqrt %301 : vector<32x1xf32>
    %303 = vector.broadcast %302 : vector<32x1xf32> to vector<32x256xf32>
    %304 = arith.mulf %299, %303 : vector<32x256xf32>
    %305 = vector.broadcast %6 : vector<1x256xf32> to vector<32x256xf32>
    %306 = arith.mulf %304, %305 : vector<32x256xf32>
    %307 = vector.broadcast %7 : vector<1x256xf32> to vector<32x256xf32>
    %308 = arith.addf %306, %307 : vector<32x256xf32>
    %309 = vector.broadcast %135 : vector<32x1xf32> to vector<32x256xf32>
    %310 = arith.mulf %308, %309 : vector<32x256xf32>
    %311 = vector.shape_cast %310 : vector<32x256xf32> to vector<2x16x256xf32>
    %c0_192 = arith.constant 0 : index
    %c0_193 = arith.constant 0 : index
    %c0_194 = arith.constant 0 : index
    %312 = vector.load %arg10[%c0_192, %c0_193, %c0_194] : memref<2x16x256xf32, #tpu.memory_space<vmem>>, vector<2x16x256xf32>
    tpu.vector_store %arg10[%c0_192, %c0_193, %c0_194], %311 {strides = array<i32>} : memref<2x16x256xf32, #tpu.memory_space<vmem>>, vector<2x16x256xf32>,
    return
  }
  func.func @transform_0(%arg0: i32, %arg1: memref<4xi32, #tpu.memory_space<smem>>) -> (i32, i32, i32) {
    %c0_i32 = arith.constant 0 : i32
    %c0_i32_0 = arith.constant 0 : i32
    %c0_i32_1 = arith.constant 0 : i32
    return %arg0, %c0_i32, %c0_i32_0 : i32, i32, i32
  }
  func.func @transform_1(%arg0: i32, %arg1: memref<4xi32, #tpu.memory_space<smem>>) -> (i32, i32) {
    %c0_i32 = arith.constant 0 : i32
    %c0_i32_0 = arith.constant 0 : i32
    %c0_i32_1 = arith.constant 0 : i32
    return %c0_i32, %c0_i32_0 : i32, i32
  }
  func.func @transform_2(%arg0: i32, %arg1: memref<4xi32, #tpu.memory_space<smem>>) -> (i32, i32) {
    %c0_i32 = arith.constant 0 : i32
    %c0_i32_0 = arith.constant 0 : i32
    %c0_i32_1 = arith.constant 0 : i32
    return %c0_i32, %c0_i32_0 : i32, i32
  }
  func.func @transform_3(%arg0: i32, %arg1: memref<4xi32, #tpu.memory_space<smem>>) -> (i32, i32, i32) {
    %c0_i32 = arith.constant 0 : i32
    %c0_i32_0 = arith.constant 0 : i32
    %c0_i32_1 = arith.constant 0 : i32
    %c0_i32_2 = arith.constant 0 : i32
    return %c0_i32, %c0_i32_0, %c0_i32_1 : i32, i32, i32
  }
  func.func @transform_4(%arg0: i32, %arg1: memref<4xi32, #tpu.memory_space<smem>>) -> (i32, i32, i32) {
    %c0_i32 = arith.constant 0 : i32
    %c0_i32_0 = arith.constant 0 : i32
    %c0_i32_1 = arith.constant 0 : i32
    %c0_i32_2 = arith.constant 0 : i32
    return %c0_i32, %c0_i32_0, %c0_i32_1 : i32, i32, i32
  }
  func.func @transform_5(%arg0: i32, %arg1: memref<4xi32, #tpu.memory_space<smem>>) -> (i32, i32) {
    %c0_i32 = arith.constant 0 : i32
    %c0_i32_0 = arith.constant 0 : i32
    %c0_i32_1 = arith.constant 0 : i32
    return %c0_i32, %c0_i32_0 : i32, i32
  }
  func.func @transform_6(%arg0: i32, %arg1: memref<4xi32, #tpu.memory_space<smem>>) -> (i32, i32) {
    %c0_i32 = arith.constant 0 : i32
    %c0_i32_0 = arith.constant 0 : i32
    %c0_i32_1 = arith.constant 0 : i32
    return %c0_i32, %c0_i32_0 : i32, i32
  }
  func.func @transform_7(%arg0: i32, %arg1: memref<4xi32, #tpu.memory_space<smem>>) -> (i32, i32) {
    %c0_i32 = arith.constant 0 : i32
    %c0_i32_0 = arith.constant 0 : i32
    %c0_i32_1 = arith.constant 0 : i32
    return %c0_i32, %c0_i32_0 : i32, i32
  }
  func.func @transform_8(%arg0: i32, %arg1: memref<4xi32, #tpu.memory_space<smem>>) -> (i32, i32, i32) {
    %c0_i32 = arith.constant 0 : i32
    %c0_i32_0 = arith.constant 0 : i32
    %c0_i32_1 = arith.constant 0 : i32
    return %arg0, %c0_i32, %c0_i32_0 : i32, i32, i32
  }
}

</mosaic_0001>

<bundles_post_ra>
// kernel: tpu_custom_call.1
= control target key start
LH: loop header
LB: loop body
LE: loop exit
PB: predicated region body
PF: predicated region fallthrough
CT: control target
= control target key end

     0   :  { %s9089_s30 = smov [#allocation4]   ;;  %s10865_s0 = inlined_call_operand.hbm [shape: s32[4], index: 0, kind: input, shape index: {}]   ;;  %s10866_s1 = inlined_call_operand.hbm [shape: f32[4,16,256], index: 1, kind: input, shape index: {}]   ;;  %s10867_s2 = inlined_call_operand.hbm [shape: f32[256,768], index: 2, kind: input, shape index: {}]   ;;  %s10868_s3 = inlined_call_operand.hbm [shape: f32[1,768], index: 3, kind: input, shape index: {}]   ;;  %s10869_s4 = inlined_call_operand.hbm [shape: f32[2,128,256], index: 4, kind: input, shape index: {}]   ;;  %s10870_s5 = inlined_call_operand.hbm [shape: f32[9,256,512], index: 5, kind: input, shape index: {}]   ;;  %s10871_s6 = inlined_call_operand.hbm [shape: f32[1,512], index: 6, kind: input, shape index: {}]   ;;  %s10872_s7 = inlined_call_operand.hbm [shape: f32[512,256], index: 7, kind: input, shape index: {}]   ;;  %s10873_s8 = inlined_call_operand.hbm [shape: f32[6,256], index: 8, kind: input, shape index: {}]   ;;  %s10874_s9 = inlined_call_operand.hbm [shape: f32[4,16,256], index: 9, kind: output, shape index: {}]  }
   0x1   :  { %10891 = sst [smem:[#allocation31_spill]] %s10867_s2 }
   0x2   :  { %10892 = sst [smem:[#allocation32_spill]] %s10868_s3 }
   0x3   :  { %15 = dma.hbm_to_smem %s10865_s0, 16, %s9089_s30, [#allocation3] }
   0x4   :  { %9047 = dma.done.wait [#allocation3], 16 }
   0x5   :  { %9048 = vsyncadd [#allocation3], 4294967280 }
   0x6   :  { %17 = sfence }
   0x7   :  { %18 = vsyncpa [#allocation6], 0 }
   0x8   :  { %20 = vsyncpa [#allocation6 + $0x1], 0 }
   0x9   :  { %21 = vsyncpa [#allocation9], 0 }
   0xa   :  { %22 = vsyncpa [#allocation12], 0 }
   0xb   :  { %23 = vsyncpa [#allocation15], 0 }
   0xc   :  { %24 = vsyncpa [#allocation18], 0 }
   0xd   :  { %25 = vsyncpa [#allocation7], 0 }
   0xe   :  { %27 = vsyncpa [#allocation7 + $0x1], 0  ;;  %s9162_s12 = smov 0   ;;  %s9164_s13 = smov 0  }
   0xf   :  { %s9166_s14 = smov 0   ;;  %s9168_s15 = smov 0  }
  0x10 LB: > { %s9090_s0 = smov [#allocation8]   ;;  %s9183_s17 = sadd.s32 4294967295, %s9087_s15   ;;  %s9087_s15 = sphi %s9168_s15, %s10930_s15   ;;  %s9083_s14 = sphi %s9166_s14, %s10929_s14   ;;  %s9079_s13 = sphi %s9164_s13, %s10928_s13   ;;  %s9075_s12 = sphi %s9162_s12, %s10927_s12  }
  0x11   : > { %s249_s16 = sshll.u32 %s9090_s0, 4  ;;  %p7291_p0 = scmp.ge.s32.totalorder %s9087_s15, 1  ;;  %s250_s16 = int_to_ptr.vmem [resolvable:$true] %s249_s16 }
  0x12   : > { %p10875_p1 = scmp.eq.s32.totalorder %s9183_s17, 0  ;;  %p237_p2 = scmp.lt.s32.totalorder %s9087_s15, 3 }
  0x13   : > { %s9091_s19 = smov [#allocation11]   ;;  %s9092_s22 = smov [#allocation14]  }
  0x14   : > { %p9188_p3 = pnand %p7291_p0, %p237_p2  ;;  %s273_s20 = sshll.u32 %s9091_s19, 4  ;;  %s9201_s20 = int_to_ptr.vmem [resolvable:$true] %s273_s20 }
  0x15   : > { %s9203_s23 = sshll.u32 %s9092_s22, 4  ;;  %s8806_s25 = scalar_lea.vmem %s250_s16, 24576  ;;  %s301_s23 = int_to_ptr.vmem [resolvable:$true] %s9203_s23 }
  0x16   : > { %s10893_s18 = scalar_select %p9188_p3, 1, 0 }
  0x17   : > { %p7457_p5 = pneg %p9188_p3  ;;  %p8807_p8 = scmp.ne.s32.totalorder %s250_s16, %s8806_s25 }
  0x18   : > { %p8814_p11 = scmp.lt.s32.totalorder %s250_s16, %s250_s16  ;;  %p8815_p12 = scmp.lt.s32.totalorder %s8806_s25, %s8806_s25 }
  0x19   : > { %p9197_p6 = pnand %p7457_p5, %p10875_p1 }
  0x1a   : > { %p8816_p13 = por %p8815_p12, %p8814_p11 }
  0x1b   : > { %p9207_p7 = pneg %p9197_p6 }
  0x1d   : > { %p8809_p9 = pnand %p8807_p8, %p9207_p7 }
  0x1f   : > { %p8810_p10 = pneg %p8809_p9 }
  0x21   : > { %p8817_p0 = pnand %p8816_p13, %p8810_p10 }
  0x23   : > { %8820 = shalt.err (!%p8817_p0)
}
  0x24   : > { %s9093_s26 = smov 768   ;;  %s9094_s27 = smov 48  }
  0x25   : > { %s10896_s2 = sld [smem:[#allocation31_spill]]  ;;  %s8832_s30 = scalar_lea.vmem %s9201_s20, 8192 }
  0x26   : > { %p8833_p2 = scmp.ne.s32.totalorder %s9201_s20, %s8832_s30  ;;  %p8840_p9 = scmp.lt.s32.totalorder %s9201_s20, %s9201_s20 }
  0x27   : > { %p8841_p10 = scmp.lt.s32.totalorder %s8832_s30, %s8832_s30 }
  0x28   : > { %p8835_p5 = pnand %p8833_p2, %p9207_p7 }
  0x29   : > { %p8842_p11 = por %p8841_p10, %p8840_p9 }
  0x2a   : > { %p8836_p8 = pneg %p8835_p5 }
  0x2b   : > { %7460 = dma.hbm_to_vmem [thread:$0]  (!%p9197_p6), %s10896_s2, 24576, %s250_s16, [#allocation9], %s9093_s26, %s9093_s26, %s9094_s27  }
  0x2c   : > { %p8843_p12 = pnand %p8842_p11, %p8836_p8 }
  0x2e   : > { %8846 = shalt.err (!%p8843_p12)
}
  0x2f   : > { %s10877_s10 = smov 256   ;;  %s10878_s11 = smov 16  }
  0x30   : > { %7466 = dma.hbm_to_vmem [thread:$0]  (!%p9197_p6), %s10869_s4, 8192, %s9201_s20, [#allocation12], %s10877_s10, %s10877_s10, %s10878_s11  }
  0x31   : > { %s8858_s19 = scalar_lea.vmem %s301_s23, 64  ;;  %p8866_p5 = scmp.lt.s32.totalorder %s301_s23, %s301_s23 }
  0x32   : > { %p8859_p13 = scmp.ne.s32.totalorder %s301_s23, %s8858_s19  ;;  %p8867_p8 = scmp.lt.s32.totalorder %s8858_s19, %s8858_s19 }
  0x34   : > { %p8861_p0 = pnand %p8859_p13, %p9207_p7  ;;  %p8868_p9 = por %p8867_p8, %p8866_p5 }
  0x36   : > { %p8862_p2 = pneg %p8861_p0 }
  0x38   : > { %p8869_p10 = pnand %p8868_p9, %p8862_p2 }
  0x3a   : > { %8872 = shalt.err (!%p8869_p10)
}
  0x3b   : > { %7472 = dma.hbm_to_vmem [thread:$0]  (!%p9197_p6), %s10871_s6, 64, %s301_s23, [#allocation15]  }
  0x3c   : > { %s9097_s26 = smov [#allocation10]   ;;  %s9098_s27 = smov [#allocation13]  }
  0x3d   : > { %s263_s20 = sshll.u32 %s9097_s26, 4  ;;  %s286_s28 = sshll.u32 %s9098_s27, 4  ;;  %s264_s20 = int_to_ptr.vmem [resolvable:$true] %s263_s20  ;;  %s287_s28 = int_to_ptr.vmem [resolvable:$true] %s286_s28 }
  0x3e   : > { %s8884_s29 = scalar_lea.vmem %s264_s20, 96  ;;  %p8892_p0 = scmp.lt.s32.totalorder %s264_s20, %s264_s20 }
  0x3f   : > { %p8885_p11 = scmp.ne.s32.totalorder %s264_s20, %s8884_s29  ;;  %p8893_p2 = scmp.lt.s32.totalorder %s8884_s29, %s8884_s29 }
  0x41   : > { %p8887_p12 = pnand %p8885_p11, %p9207_p7  ;;  %p8894_p5 = por %p8893_p2, %p8892_p0 }
  0x43   : > { %p8888_p13 = pneg %p8887_p12 }
  0x45   : > { %p8895_p8 = pnand %p8894_p5, %p8888_p13 }
  0x47   : > { %8898 = shalt.err (!%p8895_p8)
}
  0x48   : > { %s10897_s3 = sld [smem:[#allocation32_spill]]  ;;  %s8910_s23 = scalar_lea.vmem %s287_s28, 147456 }
  0x49   : > { %p8911_p9 = scmp.ne.s32.totalorder %s287_s28, %s8910_s23  ;;  %p8918_p11 = scmp.lt.s32.totalorder %s287_s28, %s287_s28 }
  0x4a   : > { %p8919_p12 = scmp.lt.s32.totalorder %s8910_s23, %s8910_s23 }
  0x4b   : > { %p8913_p10 = pnand %p8911_p9, %p9207_p7 }
  0x4c   : > { %p8920_p1 = por %p8919_p12, %p8918_p11 }
  0x4d   : > { %p8914_p4 = pneg %p8913_p10 }
  0x4e   : > { %7463 = dma.hbm_to_vmem [thread:$0]  (!%p9197_p6), %s10897_s3, 96, %s264_s20, [#allocation9]  }
  0x4f   : > { %p8921_p3 = pnand %p8920_p1, %p8914_p4 }
  0x51   : > { %8924 = shalt.err (!%p8921_p3)
}
  0x52   : > { %s9099_s16 = smov 512   ;;  %s9100_s19 = smov 32  }
  0x53   : > { %7469 = dma.hbm_to_vmem [thread:$0]  (!%p9197_p6), %s10870_s5, 147456, %s287_s28, [#allocation12], %s9099_s16, %s9099_s16, %s9100_s19  }
  0x54   : > { %s9101_s26 = smov [#allocation16]   ;;  %s9102_s27 = smov [#allocation17]  }
  0x55   : > { %s310_s20 = sshll.u32 %s9101_s26, 4  ;;  %s324_s29 = sshll.u32 %s9102_s27, 4  ;;  %s311_s20 = int_to_ptr.vmem [resolvable:$true] %s310_s20  ;;  %s325_s29 = int_to_ptr.vmem [resolvable:$true] %s324_s29 }
  0x56   : > { %s8936_s30 = scalar_lea.vmem %s311_s20, 16384  ;;  %p8944_p3 = scmp.lt.s32.totalorder %s311_s20, %s311_s20 }
  0x57   : > { %p8937_p13 = scmp.ne.s32.totalorder %s311_s20, %s8936_s30  ;;  %p8945_p4 = scmp.lt.s32.totalorder %s8936_s30, %s8936_s30 }
  0x59   : > { %p8939_p0 = pnand %p8937_p13, %p9207_p7  ;;  %p8946_p2 = por %p8945_p4, %p8944_p3 }
  0x5b   : > { %p8940_p1 = pneg %p8939_p0 }
  0x5d   : > { %p8947_p5 = pnand %p8946_p2, %p8940_p1 }
  0x5f   : > { %8950 = shalt.err (!%p8947_p5)
}
  0x60   : > { %7475 = dma.hbm_to_vmem [thread:$0]  (!%p9197_p6), %s10872_s7, 16384, %s311_s20, [#allocation15], %s10877_s10, %s10877_s10, %s10878_s11  }
  0x61   : > { %s8962_s23 = scalar_lea.vmem %s325_s29, 256  ;;  %p8970_p11 = scmp.lt.s32.totalorder %s325_s29, %s325_s29 }
  0x62   : > { %p8963_p8 = scmp.ne.s32.totalorder %s325_s29, %s8962_s23  ;;  %p8971_p12 = scmp.lt.s32.totalorder %s8962_s23, %s8962_s23 }
  0x64   : > { %p8965_p9 = pnand %p8963_p8, %p9207_p7  ;;  %p8972_p13 = por %p8971_p12, %p8970_p11 }
  0x66   : > { %p8966_p10 = pneg %p8965_p9 }
  0x68   : > { %p8973_p0 = pnand %p8972_p13, %p8966_p10 }
  0x6a   : > { %8976 = shalt.err (!%p8973_p0)
}
  0x6b   : > { %7478 = dma.hbm_to_vmem [thread:$0]  (!%p9197_p6), %s10873_s8, 256, %s325_s29, [#allocation18]  }
  0x6c   : > { %s7290_s24 = sadd.s32 4294967294, %s9087_s15   ;;  %s9274_s21 = sadd.s32 1, %s9087_s15  }
  0x6d   : > { %s40_s22 = sadd.s32 1, %s9083_s14  ;;  %s37_s25 = ssub.s32 %s9087_s15, %s9274_s21 }
  0x6e   : > { %p47_p7 = scmp.ne.s32.totalorder %s9083_s14, %s9079_s13  ;;  %p38_p1 = scmp.eq.s32.totalorder %s37_s25, 0 }
  0x6f   : > { %p48_p3 = scmp.eq.s32.totalorder %s9087_s15, 0  ;;  %p53_p4 = scmp.ne.s32.totalorder %s9079_s13, %s9075_s12 }
  0x70   : > { %p224_p2 = scmp.eq.s32.totalorder %s9183_s17, 1  ;;  %p10898_p8 = scmp.eq.s32.totalorder %s9183_s17, 0 }
  0x71   : > { %s9286_s26 = scalar_select %p38_p1, %s9083_s14, %s40_s22  }
  0x72   : > { %p49_p5 = por %p48_p3, %p47_p7  ;;  %p9290_p9 = por %p10898_p8, %p53_p4 }
  0x73   : > { %p9294_p6 = por %p224_p2, %p47_p7  ;;  %p230_p10 = scmp.eq.s32.totalorder %s7290_s24, 1 }
  0x74   : > { %s10899_s20 = scalar_select %p9290_p9, 1, 0 }
  0x75   : > { %s10900_s27 = scalar_select %p9294_p6, 1, 0 }
  0x76   : > { %p7494_p11 = scmp.lt.s32.totalorder %s9087_s15, 2  ;;  %s335_s29 = sand.u32 1, %s9083_s14  }
  0x77   : > { %p9300_p12 = por %p230_p10, %p53_p4  ;;  %s7300_s28 = sshll.u32 %s335_s29, 6 }
  0x78   : > { %s7334_s0 = sshll.u32 %s9087_s15, 10  ;;  %s339_s22 = scalar_lea.vmem [#allocation5], %s7300_s28 }
  0x79   : > { %s10901_s30 = scalar_select %p9300_p12, 1, 0 }
  0x7a   : > { %s9308_s19 = scalar_lea.hbm %s10866_s1, %s7334_s0  ;;  %s347_s25 = sshll.u32 %s339_s22, 4  ;;  %s9314_s25 = int_to_ptr.vmem [resolvable:$true] %s347_s25 }
  0x7b   : > { %p9310_p13 = pnand %p7494_p11, %p49_p5  ;;  %s9316_s10 = scalar_lea.sflag [#allocation6], %s335_s29 }
  0x7c   : > { %s8977_s11 = scalar_lea.hbm %s9308_s19, 1024  ;;  %s8982_s28 = scalar_lea.hbm %s10866_s1, 2048 }
  0x7d   : > { %p8978_p0 = scmp.ne.s32.totalorder %s9308_s19, %s8977_s11  ;;  %p8979_p7 = pneg %p9310_p13 }
  0x7e   : > { %p8983_p4 = scmp.lt.s32.totalorder %s9308_s19, %s10866_s1  ;;  %p8984_p2 = scmp.lt.s32.totalorder %s8982_s28, %s8977_s11 }
  0x7f   : > { %p8980_p1 = pnand %p8979_p7, %p8978_p0 }
  0x80   : > { %p8985_p5 = por %p8984_p2, %p8983_p4 }
  0x81   : > { %p8981_p3 = pneg %p8980_p1 }
  0x83   : > { %p8986_p8 = pnand %p8985_p5, %p8981_p3 }
  0x85   : > { %8989 = shalt.err (!%p8986_p8)
}
  0x86   : > { %s8990_s29 = scalar_lea.vmem %s9314_s25, 1024  ;;  %s9103_s2 = smov [#allocation5]  }
  0x87   : > { %p8991_p10 = scmp.ne.s32.totalorder %s9314_s25, %s8990_s29  ;;  %s8995_s3 = sshll.u32 %s9103_s2, 4  ;;  %s8996_s3 = int_to_ptr.vmem [resolvable:$false] %s8995_s3 }
  0x88   : > { %s8997_s0 = scalar_lea.vmem %s8996_s3, 2048  ;;  %p8998_p1 = scmp.lt.s32.totalorder %s9314_s25, %s8996_s3 }
  0x89   : > { %p8993_p11 = pnand %p8991_p10, %p8979_p7  ;;  %p8999_p12 = scmp.lt.s32.totalorder %s8997_s0, %s8990_s29 }
  0x8b   : > { %p8994_p0 = pneg %p8993_p11  ;;  %p9000_p6 = por %p8999_p12, %p8998_p1 }
  0x8d   : > { %p9001_p9 = pnand %p9000_p6, %p8994_p0 }
  0x8f   : > { %9004 = shalt.err (!%p9001_p9)
}
  0x90   : > { %s10903_s11 = smov 16   ;;  %s10904_s23 = smov 256  }
  0x91   : > { %7482 = dma.hbm_to_vmem [thread:$0]  (!%p9310_p13), %s9308_s19, 1024, %s9314_s25, %s9316_s10, %s10904_s23, %s10904_s23, %s10903_s11  }
  0x92   : > { %p10905_p7 = scmp.ne.s32.totalorder %s10893_s18, 0 }
  0x94   : > { %359 = sbr.rel (%p10905_p7) target bundleno = 4861 (0x12fd), region = 52 }
  0x99   : > { %s9343_s2 = sand.u32 1, %s9079_s13   ;;  %p10906_p9 = scmp.ne.s32.totalorder %s10899_s20, 0 }
  0x9a   : > { %s7305_s3 = sshll.u32 %s9343_s2, 6  ;;  %s362_s28 = scalar_lea.sflag [#allocation6], %s9343_s2 }
  0x9b   : > { %s9349_s24 = scalar_lea.vmem [#allocation5], %s7305_s3 }
  0x9c   : > { %9050 = dma.done.wait (%p10906_p9), %s362_s28, 1024  }
  0x9d   : > { %9052 = vsyncadd (%p10906_p9), %s362_s28, 4294966272  ;;  %p10907_p6 = scmp.eq.s32.totalorder %s9183_s17, 0 }
  0x9f   : > { %9054 = dma.done.wait (%p10907_p6), [#allocation9], 24672   ;;  %p10908_p12 = pmov %p10907_p6 }
  0xa0   : > { %p10909_p13 = pmov %p10907_p6 }
  0xa1   : > { %9056 = vsyncadd (%p10908_p12), [#allocation9], 4294942624 }
  0xa2   : > { %9058 = dma.done.wait (%p10909_p13), [#allocation12], 155648   ;;  %p10910_p3 = pmov %p10907_p6 }
  0xa4   : > { %9060 = vsyncadd (%p10910_p3), [#allocation12], 4294811648  ;;  %p10911_p4 = pmov %p10910_p3 }
  0xa5   : > { %p10912_p2 = pmov %p10910_p3 }
  0xa6   : > { %9062 = dma.done.wait (%p10911_p4), [#allocation15], 16448  }
  0xa7   : > { %9064 = vsyncadd (%p10912_p2), [#allocation15], 4294950848  ;;  %p10913_p5 = pmov %p10912_p2 }
  0xa8   : > { %p10914_p8 = pmov %p10912_p2 }
  0xa9   : > { %9066 = dma.done.wait (%p10913_p5), [#allocation18], 256  }
  0xaa   : > { %9068 = vsyncadd (%p10914_p8), [#allocation18], 4294967040  ;;  %v529_v0 = vld [vmem:[#allocation8 + $0x2d8] sm:$0xff]  ;;  %v531_v1 = vld [vmem:[#allocation8 + $0x2e8] sm:$0xff]  ;;  %s7314_s18 = sshll.u32 %s9183_s17, 1  ;;  %vm1024_vm1 = vcmask 130048  }
  0xab   : > { %v528_v2 = vld [vmem:[#allocation8 + $0x2d0] sm:$0xff]  ;;  %662 = vmatprep.subr.mxu0 %v529_v0  ;;  %751 = vmatprep.subr.mxu1 %v531_v1  ;;  %v530_v3 = vld [vmem:[#allocation8 + $0x2e0] sm:$0xff]  ;;  %v523_v4 = vld [vmem:[#allocation8 + $0x2a8] sm:$0xff]  ;;  %s935_s10 = sld [smem:[#allocation4 + %s7314_s18]]  ;;  %s1529_s20 = sadd.s32 1, %s7314_s18  ;;  %vm2496_vm5 = vcmask 1042432  }
  0xac   : > { %v525_v5 = vld [vmem:[#allocation8 + $0x2b8] sm:$0xff]  ;;  %663 = vmatpush1.msra.mxu0 %v528_v2  ;;  %752 = vmatpush1.msra.mxu1 %v530_v3  ;;  %v522_v6 = vld [vmem:[#allocation8 + $0x2a0] sm:$0xff]  ;;  %v524_v7 = vld [vmem:[#allocation8 + $0x2b0] sm:$0xff]  ;;  %s1530_s19 = sld [smem:[#allocation4 + %s1529_s20]]  ;;  %vm2669_vm6 = vcmask 1043456   ;;  %vm2975_vm7 = vcmask 1041408  }
  0xad   : > { %v517_v8 = vld [vmem:[#allocation8 + $0x278] sm:$0xff]  ;;  %664 = vmatprep.subr.mxu0 %v523_v4  ;;  %753 = vmatprep.subr.mxu1 %v525_v5  ;;  %v519_v9 = vld [vmem:[#allocation8 + $0x288] sm:$0xff]  ;;  %v516_v10 = vld [vmem:[#allocation8 + $0x270] sm:$0xff]  ;;  %vm3289_vm8 = vcmask 1040384   ;;  %vm3900_vm10 = vcmask 1046528   ;;  %vm4214_vm11 = vcmask 1045504  }
  0xae   : > { %v518_v11 = vld [vmem:[#allocation8 + $0x280] sm:$0xff]  ;;  %665 = vmatpush1.msra.mxu0 %v522_v6  ;;  %754 = vmatpush1.msra.mxu1 %v524_v7  ;;  %v511_v12 = vld [vmem:[#allocation8 + $0x248] sm:$0xff]  ;;  %v513_v13 = vld [vmem:[#allocation8 + $0x258] sm:$0xff]  ;;  %vm4528_vm12 = vcmask 1044480   ;;  %s10799_s25 = scalar_lea.vmem [#allocation19], %s7305_s3  ;;  %s7336_s16 = sshll.u32 %s9183_s17, 10 }
  0xaf   : > { %666 = vmatprep.subr.mxu0 %v517_v8  ;;  %755 = vmatprep.subr.mxu1 %v519_v9  ;;  %v510_v14 = vld [vmem:[#allocation8 + $0x240] sm:$0xff]  ;;  %v512_v15 = vld [vmem:[#allocation8 + $0x250] sm:$0xff]  ;;  %v505_v16 = vld [vmem:[#allocation8 + $0x218] sm:$0xff]  ;;  %s7150_s22 = sshll.u32 %s10799_s25, 4  ;;  %s10816_s11 = scalar_lea.hbm %s10874_s9, %s7336_s16  ;;  %s10818_s22 = int_to_ptr.vmem [resolvable:$true] %s7150_s22 }
  0xb0   : > { %667 = vmatpush1.msra.mxu0 %v516_v10  ;;  %756 = vmatpush1.msra.mxu1 %v518_v11  ;;  %v507_v17 = vld [vmem:[#allocation8 + $0x228] sm:$0xff]  ;;  %v504_v18 = vld [vmem:[#allocation8 + $0x210] sm:$0xff]  ;;  %v506_v19 = vld [vmem:[#allocation8 + $0x220] sm:$0xff]  ;;  %s7136_s17 = scalar_lea.sflag [#allocation7], %s9343_s2  ;;  %s9005_s23 = scalar_lea.vmem %s10818_s22, 1024 }
  0xb1   : > { %668 = vmatprep.subr.mxu0 %v511_v12  ;;  %757 = vmatprep.subr.mxu1 %v513_v13  ;;  %v499_v20 = vld [vmem:[#allocation8 + $0x1e8] sm:$0xff]  ;;  %v501_v21 = vld [vmem:[#allocation8 + $0x1f8] sm:$0xff]  ;;  %v498_v22 = vld [vmem:[#allocation8 + $0x1e0] sm:$0xff]  ;;  %p9006_p10 = scmp.ne.s32.totalorder %s10818_s22, %s9005_s23  ;;  %p10924_p11 = scmp.ne.s32.totalorder %s10900_s27, 0 }
  0xb2   : > { %669 = vmatpush1.msra.mxu0 %v510_v14  ;;  %758 = vmatpush1.msra.mxu1 %v512_v15  ;;  %v500_v23 = vld [vmem:[#allocation8 + $0x1f0] sm:$0xff]  ;;  %v493_v24 = vld [vmem:[#allocation8 + $0x1b8] sm:$0xff]  ;;  %v495_v25 = vld [vmem:[#allocation8 + $0x1c8] sm:$0xff]  ;;  %s9106_s3 = smov [#allocation19]  }
  0xb3   : > { %670 = vmatprep.subr.mxu0 %v505_v16  ;;  %759 = vmatprep.subr.mxu1 %v507_v17  ;;  %v492_v26 = vld [vmem:[#allocation8 + $0x1b0] sm:$0xff]  ;;  %v494_v27 = vld [vmem:[#allocation8 + $0x1c0] sm:$0xff]  ;;  %v487_v28 = vld [vmem:[#allocation8 + $0x188] sm:$0xff]  ;;  %p9007_p0 = pnand %p9006_p10, %p10924_p11  ;;  %s9009_s28 = sshll.u32 %s9106_s3, 4  ;;  %s9010_s28 = int_to_ptr.vmem [resolvable:$false] %s9009_s28 }
  0xb4   : > { %671 = vmatpush1.msra.mxu0 %v504_v18  ;;  %760 = vmatpush1.msra.mxu1 %v506_v19  ;;  %v489_v29 = vld [vmem:[#allocation8 + $0x198] sm:$0xff]  ;;  %v486_v30 = vld [vmem:[#allocation8 + $0x180] sm:$0xff]  ;;  %v488_v31 = vld [vmem:[#allocation8 + $0x190] sm:$0xff]  ;;  %p9012_p7 = scmp.lt.s32.totalorder %s10818_s22, %s9010_s28 }
  0xb5   : > { %672 = vmatprep.subr.mxu0 %v499_v20  ;;  %761 = vmatprep.subr.mxu1 %v501_v21  ;;  %v481_v32 = vld [vmem:[#allocation8 + $0x158] sm:$0xff]  ;;  %v483_v33 = vld [vmem:[#allocation8 + $0x168] sm:$0xff]  ;;  %v480_v34 = vld [vmem:[#allocation8 + $0x150] sm:$0xff]  ;;  %p9008_p1 = pneg %p9007_p0 }
  0xb6   : > { %673 = vmatpush1.msra.mxu0 %v498_v22  ;;  %762 = vmatpush1.msra.mxu1 %v500_v23  ;;  %v482_v35 = vld [vmem:[#allocation8 + $0x160] sm:$0xff]  ;;  %v475_v36 = vld [vmem:[#allocation8 + $0x128] sm:$0xff]  ;;  %v477_v37 = vld [vmem:[#allocation8 + $0x138] sm:$0xff] }
  0xb7   : > { %674 = vmatprep.subr.mxu0 %v493_v24  ;;  %763 = vmatprep.subr.mxu1 %v495_v25  ;;  %v474_v38 = vld [vmem:[#allocation8 + $0x120] sm:$0xff]  ;;  %v476_v39 = vld [vmem:[#allocation8 + $0x130] sm:$0xff]  ;;  %v469_v40 = vld [vmem:[#allocation8 + $0xf8] sm:$0xff] }
  0xb8   : > { %675 = vmatpush1.msra.mxu0 %v492_v26  ;;  %764 = vmatpush1.msra.mxu1 %v494_v27  ;;  %v471_v41 = vld [vmem:[#allocation8 + $0x108] sm:$0xff]  ;;  %v468_v42 = vld [vmem:[#allocation8 + $0xf0] sm:$0xff]  ;;  %v470_v43 = vld [vmem:[#allocation8 + $0x100] sm:$0xff] }
  0xb9   : > { %676 = vmatprep.subr.mxu0 %v487_v28  ;;  %765 = vmatprep.subr.mxu1 %v489_v29  ;;  %v463_v44 = vld [vmem:[#allocation8 + $0xc8] sm:$0xff]  ;;  %v465_v45 = vld [vmem:[#allocation8 + $0xd8] sm:$0xff]  ;;  %v462_v46 = vld [vmem:[#allocation8 + $0xc0] sm:$0xff] }
  0xba   : > { %677 = vmatpush1.msra.mxu0 %v486_v30  ;;  %766 = vmatpush1.msra.mxu1 %v488_v31  ;;  %v464_v47 = vld [vmem:[#allocation8 + $0xd0] sm:$0xff]  ;;  %v457_v48 = vld [vmem:[#allocation8 + $0x98] sm:$0xff]  ;;  %v459_v49 = vld [vmem:[#allocation8 + $0xa8] sm:$0xff] }
  0xbb   : > { %678 = vmatprep.subr.mxu0 %v481_v32  ;;  %767 = vmatprep.subr.mxu1 %v483_v33  ;;  %v456_v50 = vld [vmem:[#allocation8 + $0x90] sm:$0xff]  ;;  %v458_v51 = vld [vmem:[#allocation8 + $0xa0] sm:$0xff]  ;;  %v451_v52 = vld [vmem:[#allocation8 + $0x68] sm:$0xff] }
  0xbc   : > { %679 = vmatpush1.msra.mxu0 %v480_v34  ;;  %768 = vmatpush1.msra.mxu1 %v482_v35  ;;  %v453_v53 = vld [vmem:[#allocation8 + $0x78] sm:$0xff]  ;;  %v450_v54 = vld [vmem:[#allocation8 + $0x60] sm:$0xff]  ;;  %v452_v55 = vld [vmem:[#allocation8 + $0x70] sm:$0xff] }
  0xbd   : > { %680 = vmatprep.subr.mxu0 %v475_v36  ;;  %769 = vmatprep.subr.mxu1 %v477_v37  ;;  %v445_v56 = vld [vmem:[#allocation8 + $0x38] sm:$0xff]  ;;  %v447_v57 = vld [vmem:[#allocation8 + $0x48] sm:$0xff]  ;;  %v444_v58 = vld [vmem:[#allocation8 + $0x30] sm:$0xff] }
  0xbe   : > { %681 = vmatpush1.msra.mxu0 %v474_v38  ;;  %770 = vmatpush1.msra.mxu1 %v476_v39  ;;  %v446_v59 = vld [vmem:[#allocation8 + $0x40] sm:$0xff]  ;;  %v439_v60 = vld [vmem:[#allocation8 + $0x8] sm:$0xff]  ;;  %v441_v61 = vld [vmem:[#allocation8 + $0x18] sm:$0xff] }
  0xbf   : > { %682 = vmatprep.subr.mxu0 %v469_v40  ;;  %771 = vmatprep.subr.mxu1 %v471_v41  ;;  %v438_v62 = vld [vmem:[#allocation8] sm:$0xff]  ;;  %v440_v63 = vld [vmem:[#allocation8 + $0x10] sm:$0xff]  ;;  %v625_v0 = vld [vmem:[#allocation8 + $0x5d8] sm:$0xff] }
  0xc0   : > { %683 = vmatpush1.msra.mxu0 %v468_v42  ;;  %772 = vmatpush1.msra.mxu1 %v470_v43  ;;  %v627_v1 = vld [vmem:[#allocation8 + $0x5e8] sm:$0xff]  ;;  %v624_v2 = vld [vmem:[#allocation8 + $0x5d0] sm:$0xff]  ;;  %v626_v3 = vld [vmem:[#allocation8 + $0x5e0] sm:$0xff] }
  0xc1   : > { %684 = vmatprep.subr.mxu0 %v463_v44  ;;  %773 = vmatprep.subr.mxu1 %v465_v45  ;;  %v619_v4 = vld [vmem:[#allocation8 + $0x5a8] sm:$0xff]  ;;  %v621_v5 = vld [vmem:[#allocation8 + $0x5b8] sm:$0xff]  ;;  %v618_v6 = vld [vmem:[#allocation8 + $0x5a0] sm:$0xff] }
  0xc2   : > { %685 = vmatpush1.msra.mxu0 %v462_v46  ;;  %774 = vmatpush1.msra.mxu1 %v464_v47  ;;  %v620_v7 = vld [vmem:[#allocation8 + $0x5b0] sm:$0xff]  ;;  %v613_v8 = vld [vmem:[#allocation8 + $0x578] sm:$0xff]  ;;  %v615_v9 = vld [vmem:[#allocation8 + $0x588] sm:$0xff] }
  0xc3   : > { %686 = vmatprep.subr.mxu0 %v457_v48  ;;  %775 = vmatprep.subr.mxu1 %v459_v49  ;;  %v612_v10 = vld [vmem:[#allocation8 + $0x570] sm:$0xff]  ;;  %v614_v11 = vld [vmem:[#allocation8 + $0x580] sm:$0xff]  ;;  %v607_v12 = vld [vmem:[#allocation8 + $0x548] sm:$0xff] }
  0xc4   : > { %687 = vmatpush1.msra.mxu0 %v456_v50  ;;  %776 = vmatpush1.msra.mxu1 %v458_v51  ;;  %v609_v13 = vld [vmem:[#allocation8 + $0x558] sm:$0xff]  ;;  %v606_v14 = vld [vmem:[#allocation8 + $0x540] sm:$0xff]  ;;  %v608_v15 = vld [vmem:[#allocation8 + $0x550] sm:$0xff] }
  0xc5   : > { %688 = vmatprep.subr.mxu0 %v451_v52  ;;  %777 = vmatprep.subr.mxu1 %v453_v53  ;;  %v601_v16 = vld [vmem:[#allocation8 + $0x518] sm:$0xff]  ;;  %v603_v17 = vld [vmem:[#allocation8 + $0x528] sm:$0xff]  ;;  %v600_v18 = vld [vmem:[#allocation8 + $0x510] sm:$0xff] }
  0xc6   : > { %689 = vmatpush1.msra.mxu0 %v450_v54  ;;  %778 = vmatpush1.msra.mxu1 %v452_v55  ;;  %v602_v19 = vld [vmem:[#allocation8 + $0x520] sm:$0xff]  ;;  %v595_v20 = vld [vmem:[#allocation8 + $0x4e8] sm:$0xff]  ;;  %v597_v21 = vld [vmem:[#allocation8 + $0x4f8] sm:$0xff] }
  0xc7   : > { %690 = vmatprep.subr.mxu0 %v445_v56  ;;  %779 = vmatprep.subr.mxu1 %v447_v57  ;;  %v594_v22 = vld [vmem:[#allocation8 + $0x4e0] sm:$0xff]  ;;  %v596_v23 = vld [vmem:[#allocation8 + $0x4f0] sm:$0xff]  ;;  %v589_v24 = vld [vmem:[#allocation8 + $0x4b8] sm:$0xff] }
  0xc8   : > { %691 = vmatpush1.msra.mxu0 %v444_v58  ;;  %780 = vmatpush1.msra.mxu1 %v446_v59  ;;  %v591_v25 = vld [vmem:[#allocation8 + $0x4c8] sm:$0xff]  ;;  %v588_v26 = vld [vmem:[#allocation8 + $0x4b0] sm:$0xff]  ;;  %v590_v27 = vld [vmem:[#allocation8 + $0x4c0] sm:$0xff] }
  0xc9   : > { %692 = vmatprep.subr.mxu0 %v439_v60  ;;  %781 = vmatprep.subr.mxu1 %v441_v61  ;;  %v583_v28 = vld [vmem:[#allocation8 + $0x488] sm:$0xff]  ;;  %v585_v29 = vld [vmem:[#allocation8 + $0x498] sm:$0xff]  ;;  %v582_v30 = vld [vmem:[#allocation8 + $0x480] sm:$0xff] }
  0xca   : > { %693 = vmatpush1.msra.mxu0 %v438_v62  ;;  %782 = vmatpush1.msra.mxu1 %v440_v63  ;;  %v584_v31 = vld [vmem:[#allocation8 + $0x490] sm:$0xff]  ;;  %v577_v32 = vld [vmem:[#allocation8 + $0x458] sm:$0xff]  ;;  %v579_v33 = vld [vmem:[#allocation8 + $0x468] sm:$0xff] }
  0xcb   : > { %694 = vmatprep.subr.mxu0 %v625_v0  ;;  %783 = vmatprep.subr.mxu1 %v627_v1  ;;  %v576_v34 = vld [vmem:[#allocation8 + $0x450] sm:$0xff]  ;;  %v578_v35 = vld [vmem:[#allocation8 + $0x460] sm:$0xff]  ;;  %v571_v36 = vld [vmem:[#allocation8 + $0x428] sm:$0xff] }
  0xcc   : > { %695 = vmatpush2.msra.mxu0 %v624_v2  ;;  %784 = vmatpush2.msra.mxu1 %v626_v3  ;;  %v573_v37 = vld [vmem:[#allocation8 + $0x438] sm:$0xff]  ;;  %v570_v38 = vld [vmem:[#allocation8 + $0x420] sm:$0xff]  ;;  %v572_v39 = vld [vmem:[#allocation8 + $0x430] sm:$0xff] }
  0xcd   : > { %696 = vmatprep.subr.mxu0 %v619_v4  ;;  %785 = vmatprep.subr.mxu1 %v621_v5  ;;  %v565_v40 = vld [vmem:[#allocation8 + $0x3f8] sm:$0xff]  ;;  %v567_v41 = vld [vmem:[#allocation8 + $0x408] sm:$0xff]  ;;  %v564_v42 = vld [vmem:[#allocation8 + $0x3f0] sm:$0xff] }
  0xce   : > { %697 = vmatpush2.msra.mxu0 %v618_v6  ;;  %786 = vmatpush2.msra.mxu1 %v620_v7  ;;  %v566_v43 = vld [vmem:[#allocation8 + $0x400] sm:$0xff]  ;;  %v559_v44 = vld [vmem:[#allocation8 + $0x3c8] sm:$0xff]  ;;  %v561_v45 = vld [vmem:[#allocation8 + $0x3d8] sm:$0xff] }
  0xcf   : > { %698 = vmatprep.subr.mxu0 %v613_v8  ;;  %787 = vmatprep.subr.mxu1 %v615_v9  ;;  %v558_v46 = vld [vmem:[#allocation8 + $0x3c0] sm:$0xff]  ;;  %v560_v47 = vld [vmem:[#allocation8 + $0x3d0] sm:$0xff]  ;;  %v553_v48 = vld [vmem:[#allocation8 + $0x398] sm:$0xff] }
  0xd0   : > { %699 = vmatpush2.msra.mxu0 %v612_v10  ;;  %788 = vmatpush2.msra.mxu1 %v614_v11  ;;  %v555_v49 = vld [vmem:[#allocation8 + $0x3a8] sm:$0xff]  ;;  %v552_v50 = vld [vmem:[#allocation8 + $0x390] sm:$0xff]  ;;  %v554_v51 = vld [vmem:[#allocation8 + $0x3a0] sm:$0xff] }
  0xd1   : > { %700 = vmatprep.subr.mxu0 %v607_v12  ;;  %789 = vmatprep.subr.mxu1 %v609_v13  ;;  %v547_v52 = vld [vmem:[#allocation8 + $0x368] sm:$0xff]  ;;  %v549_v53 = vld [vmem:[#allocation8 + $0x378] sm:$0xff]  ;;  %v546_v54 = vld [vmem:[#allocation8 + $0x360] sm:$0xff] }
  0xd2   : > { %701 = vmatpush2.msra.mxu0 %v606_v14  ;;  %790 = vmatpush2.msra.mxu1 %v608_v15  ;;  %v548_v55 = vld [vmem:[#allocation8 + $0x370] sm:$0xff]  ;;  %v541_v56 = vld [vmem:[#allocation8 + $0x338] sm:$0xff]  ;;  %v543_v57 = vld [vmem:[#allocation8 + $0x348] sm:$0xff] }
  0xd3   : > { %702 = vmatprep.subr.mxu0 %v601_v16  ;;  %791 = vmatprep.subr.mxu1 %v603_v17  ;;  %v540_v58 = vld [vmem:[#allocation8 + $0x330] sm:$0xff]  ;;  %v542_v59 = vld [vmem:[#allocation8 + $0x340] sm:$0xff]  ;;  %v535_v60 = vld [vmem:[#allocation8 + $0x308] sm:$0xff] }
  0xd4   : > { %703 = vmatpush2.msra.mxu0 %v600_v18  ;;  %792 = vmatpush2.msra.mxu1 %v602_v19  ;;  %v537_v61 = vld [vmem:[#allocation8 + $0x318] sm:$0xff]  ;;  %v534_v62 = vld [vmem:[#allocation8 + $0x300] sm:$0xff]  ;;  %v536_v63 = vld [vmem:[#allocation8 + $0x310] sm:$0xff] }
  0xd5   : > { %704 = vmatprep.subr.mxu0 %v595_v20  ;;  %793 = vmatprep.subr.mxu1 %v597_v21  ;;  %v429_v0 = vld [vmem:[%s9349_s24 + $0x8] sm:$0xff]  ;;  %v9373_v1 = vld [vmem:[%s9349_s24] sm:$0xff]  ;;  %v533_v2 = vld [vmem:[#allocation8 + $0x2f8] sm:$0xff] }
  0xd6   : > { %705 = vmatpush2.msra.mxu0 %v594_v22  ;;  %794 = vmatpush2.msra.mxu1 %v596_v23  ;;  %v9376_v3 = vld [vmem:[%s9349_s24 + $0x18] sm:$0xff]  ;;  %v532_v4 = vld [vmem:[#allocation8 + $0x2f0] sm:$0xff]  ;;  %v527_v5 = vld [vmem:[#allocation8 + $0x2c8] sm:$0xff] }
  0xd7   : > { %706 = vmatprep.subr.mxu0 %v589_v24  ;;  %795 = vmatprep.subr.mxu1 %v591_v25  ;;  %v526_v6 = vld [vmem:[#allocation8 + $0x2c0] sm:$0xff]  ;;  %v9382_v7 = vld [vmem:[%s9349_s24 + $0x10] sm:$0xff]  ;;  %v521_v8 = vld [vmem:[#allocation8 + $0x298] sm:$0xff] }
  0xd8   : > { %707 = vmatpush2.msra.mxu0 %v588_v26  ;;  %796 = vmatpush2.msra.mxu1 %v590_v27  ;;  %v520_v9 = vld [vmem:[#allocation8 + $0x290] sm:$0xff]  ;;  %v9386_v10 = vld [vmem:[%s9349_s24 + $0x28] sm:$0xff]  ;;  %v514_v12 = vld [vmem:[#allocation8 + $0x260] sm:$0xff] }
  0xd9   : > { %708 = vmatprep.subr.mxu0 %v583_v28  ;;  %797 = vmatprep.subr.mxu1 %v585_v29  ;;  %v515_v11 = vld [vmem:[#allocation8 + $0x268] sm:$0xff]  ;;  %v509_v13 = vld [vmem:[#allocation8 + $0x238] sm:$0xff]  ;;  %v9392_v14 = vld [vmem:[%s9349_s24 + $0x20] sm:$0xff] }
  0xda   : > { %709 = vmatpush2.msra.mxu0 %v582_v30  ;;  %798 = vmatpush2.msra.mxu1 %v584_v31  ;;  %v508_v15 = vld [vmem:[#allocation8 + $0x230] sm:$0xff]  ;;  %v9395_v16 = vld [vmem:[%s9349_s24 + $0x38] sm:$0xff]  ;;  %v503_v17 = vld [vmem:[#allocation8 + $0x208] sm:$0xff] }
  0xdb   : > { %710 = vmatprep.subr.mxu0 %v577_v32  ;;  %799 = vmatprep.subr.mxu1 %v579_v33  ;;  %v502_v18 = vld [vmem:[#allocation8 + $0x200] sm:$0xff]  ;;  %v497_v19 = vld [vmem:[#allocation8 + $0x1d8] sm:$0xff]  ;;  %v9402_v20 = vld [vmem:[%s9349_s24 + $0x30] sm:$0xff] }
  0xdc   : > { %711 = vmatpush2.msra.mxu0 %v576_v34  ;;  %800 = vmatpush2.msra.mxu1 %v578_v35  ;;  %v496_v21 = vld [vmem:[#allocation8 + $0x1d0] sm:$0xff]  ;;  %v491_v22 = vld [vmem:[#allocation8 + $0x1a8] sm:$0xff]  ;;  %v490_v23 = vld [vmem:[#allocation8 + $0x1a0] sm:$0xff] }
  0xdd   : > { %712 = vmatprep.subr.mxu0 %v571_v36  ;;  %801 = vmatprep.subr.mxu1 %v573_v37  ;;  %v485_v24 = vld [vmem:[#allocation8 + $0x178] sm:$0xff]  ;;  %v484_v25 = vld [vmem:[#allocation8 + $0x170] sm:$0xff]  ;;  %v479_v26 = vld [vmem:[#allocation8 + $0x148] sm:$0xff] }
  0xde   : > { %713 = vmatpush2.msra.mxu0 %v570_v38  ;;  %802 = vmatpush2.msra.mxu1 %v572_v39  ;;  %v478_v27 = vld [vmem:[#allocation8 + $0x140] sm:$0xff]  ;;  %v473_v28 = vld [vmem:[#allocation8 + $0x118] sm:$0xff]  ;;  %v472_v29 = vld [vmem:[#allocation8 + $0x110] sm:$0xff] }
  0xdf   : > { %714 = vmatprep.subr.mxu0 %v565_v40  ;;  %803 = vmatprep.subr.mxu1 %v567_v41  ;;  %v467_v30 = vld [vmem:[#allocation8 + $0xe8] sm:$0xff]  ;;  %v466_v31 = vld [vmem:[#allocation8 + $0xe0] sm:$0xff]  ;;  %v461_v32 = vld [vmem:[#allocation8 + $0xb8] sm:$0xff] }
  0xe0   : > { %715 = vmatpush2.msra.mxu0 %v564_v42  ;;  %804 = vmatpush2.msra.mxu1 %v566_v43  ;;  %v460_v33 = vld [vmem:[#allocation8 + $0xb0] sm:$0xff]  ;;  %v455_v34 = vld [vmem:[#allocation8 + $0x88] sm:$0xff]  ;;  %v454_v35 = vld [vmem:[#allocation8 + $0x80] sm:$0xff] }
  0xe1   : > { %716 = vmatprep.subr.mxu0 %v559_v44  ;;  %805 = vmatprep.subr.mxu1 %v561_v45  ;;  %v449_v36 = vld [vmem:[#allocation8 + $0x58] sm:$0xff]  ;;  %v448_v37 = vld [vmem:[#allocation8 + $0x50] sm:$0xff]  ;;  %v443_v38 = vld [vmem:[#allocation8 + $0x28] sm:$0xff] }
  0xe2   : > { %717 = vmatpush2.msra.mxu0 %v558_v46  ;;  %806 = vmatpush2.msra.mxu1 %v560_v47  ;;  %v442_v39 = vld [vmem:[#allocation8 + $0x20] sm:$0xff]  ;;  %v629_v40 = vld [vmem:[#allocation8 + $0x5f8] sm:$0xff]  ;;  %v628_v41 = vld [vmem:[#allocation8 + $0x5f0] sm:$0xff] }
  0xe3   : > { %718 = vmatprep.subr.mxu0 %v553_v48  ;;  %807 = vmatprep.subr.mxu1 %v555_v49  ;;  %v623_v42 = vld [vmem:[#allocation8 + $0x5c8] sm:$0xff]  ;;  %v622_v43 = vld [vmem:[#allocation8 + $0x5c0] sm:$0xff]  ;;  %v617_v44 = vld [vmem:[#allocation8 + $0x598] sm:$0xff] }
  0xe4   : > { %719 = vmatpush2.msra.mxu0 %v552_v50  ;;  %808 = vmatpush2.msra.mxu1 %v554_v51  ;;  %v616_v45 = vld [vmem:[#allocation8 + $0x590] sm:$0xff]  ;;  %v611_v46 = vld [vmem:[#allocation8 + $0x568] sm:$0xff]  ;;  %v610_v47 = vld [vmem:[#allocation8 + $0x560] sm:$0xff] }
  0xe5   : > { %720 = vmatprep.subr.mxu0 %v547_v52  ;;  %809 = vmatprep.subr.mxu1 %v549_v53  ;;  %v605_v48 = vld [vmem:[#allocation8 + $0x538] sm:$0xff]  ;;  %v604_v49 = vld [vmem:[#allocation8 + $0x530] sm:$0xff]  ;;  %v599_v50 = vld [vmem:[#allocation8 + $0x508] sm:$0xff] }
  0xe6   : > { %721 = vmatpush2.msra.mxu0 %v546_v54  ;;  %810 = vmatpush2.msra.mxu1 %v548_v55  ;;  %v598_v51 = vld [vmem:[#allocation8 + $0x500] sm:$0xff]  ;;  %v593_v52 = vld [vmem:[#allocation8 + $0x4d8] sm:$0xff]  ;;  %v592_v53 = vld [vmem:[#allocation8 + $0x4d0] sm:$0xff] }
  0xe7   : > { %722 = vmatprep.subr.mxu0 %v541_v56  ;;  %811 = vmatprep.subr.mxu1 %v543_v57  ;;  %v587_v54 = vld [vmem:[#allocation8 + $0x4a8] sm:$0xff]  ;;  %v586_v55 = vld [vmem:[#allocation8 + $0x4a0] sm:$0xff]  ;;  %v581_v56 = vld [vmem:[#allocation8 + $0x478] sm:$0xff] }
  0xe8   : > { %723 = vmatpush2.msra.mxu0 %v540_v58  ;;  %812 = vmatpush2.msra.mxu1 %v542_v59  ;;  %v580_v57 = vld [vmem:[#allocation8 + $0x470] sm:$0xff]  ;;  %v575_v58 = vld [vmem:[#allocation8 + $0x448] sm:$0xff]  ;;  %v574_v59 = vld [vmem:[#allocation8 + $0x440] sm:$0xff] }
  0xe9   : > { %724 = vmatprep.subr.mxu0 %v535_v60  ;;  %813 = vmatprep.subr.mxu1 %v537_v61  ;;  %v569_v60 = vld [vmem:[#allocation8 + $0x418] sm:$0xff]  ;;  %v568_v61 = vld [vmem:[#allocation8 + $0x410] sm:$0xff] }
  0xea   : > { %725 = vmatpush2.msra.mxu0 %v534_v62  ;;  %814 = vmatpush2.msra.mxu1 %v536_v63  ;;  %v563_v62 = vld [vmem:[#allocation8 + $0x3e8] sm:$0xff]  ;;  %v562_v63 = vld [vmem:[#allocation8 + $0x3e0] sm:$0xff] }
  0xeb   : > { %815 = vmatprep.mubr.f32.mxu1 %v429_v0  ;;  %726 = vmatprep.mubr.f32.mxu0 %v429_v0 }
  0xec   : > { %816 = vmatmul.mubr.f32.vlgmr.msra.gmra.mxu1 %v9373_v1  ;;  %840 = vmatprep.subr.mxu0 %v533_v2  ;;  %v556_v2 = vld [vmem:[#allocation8 + $0x3b0] sm:$0xff] }
  0xed   : > { %727 = vmatmul.mubr.f32.vlgmr.msra.gmra.mxu0 %v9373_v1  ;;  %821 = vmatprep.mubr.f32.mxu1 %v9376_v3 }
  0xee   : > { %841 = vmatpush1.msra.mxu0 %v532_v4  ;;  %732 = vmatprep.mubr.f32.mxu0 %v9376_v3  ;;  %v551_v4 = vld [vmem:[#allocation8 + $0x388] sm:$0xff] }
  0xef   : > { %842 = vmatprep.subr.mxu0 %v527_v5  ;;  %v550_v5 = vld [vmem:[#allocation8 + $0x380] sm:$0xff] }
  0xf0   : > { %843 = vmatpush1.msra.mxu0 %v526_v6  ;;  %822 = vmatmul.mubr.f32.gmra.mxu1 %v9382_v7  ;;  %v545_v6 = vld [vmem:[#allocation8 + $0x358] sm:$0xff] }
  0xf1   : > { %844 = vmatprep.subr.mxu0 %v521_v8  ;;  %733 = vmatmul.mubr.f32.gmra.mxu0 %v9382_v7  ;;  %v544_v8 = vld [vmem:[#allocation8 + $0x350] sm:$0xff] }
  0xf2   : > { %845 = vmatpush1.msra.mxu0 %v520_v9  ;;  %738 = vmatprep.mubr.f32.mxu0 %v9386_v10  ;;  %v539_v9 = vld [vmem:[#allocation8 + $0x328] sm:$0xff] }
  0xf3   : > { %846 = vmatprep.subr.mxu0 %v515_v11  ;;  %827 = vmatprep.mubr.f32.mxu1 %v9386_v10  ;;  %v538_v11 = vld [vmem:[#allocation8 + $0x320] sm:$0xff] }
  0xf4   : > { %847 = vmatpush1.msra.mxu0 %v514_v12  ;;  %828 = vmatmul.mubr.f32.gmra.mxu1 %v9392_v14  ;;  %v632_v12 = vlaneseq }
  0xf5   : > { %848 = vmatprep.subr.mxu0 %v509_v13  ;;  %739 = vmatmul.mubr.f32.gmra.mxu0 %v9392_v14 }
  0xf6   : > { %849 = vmatpush1.msra.mxu0 %v508_v15  ;;  %744 = vmatprep.mubr.f32.mxu0 %v9395_v16  ;;  %v9415_v13 = vshrl.u32 %v632_v12, 7 }
  0xf7   : > { %850 = vmatprep.subr.mxu0 %v503_v17  ;;  %833 = vmatprep.mubr.f32.mxu1 %v9395_v16 }
  0xf8   : > { %851 = vmatpush1.msra.mxu0 %v502_v18  ;;  %834 = vmatmul.mubr.f32.gmra.mxu1 %v9402_v20  ;;  %v9418_v15 = vsub.s32 0, %v9415_v13 }
  0xf9   : > { %852 = vmatprep.subr.mxu0 %v497_v19  ;;  %745 = vmatmul.mubr.f32.gmra.mxu0 %v9402_v20 }
  0xfa   : > { %853 = vmatpush1.msra.mxu0 %v496_v21  ;;  %904 = vmatprep.mubr.f32.mxu0 %v429_v0  ;;  %v557_v0 = vld [vmem:[#allocation8 + $0x3b8] sm:$0xff] }
  0xfb   : > { %854 = vmatprep.subr.mxu0 %v491_v22 }
  0xfc   : > { %855 = vmatpush1.msra.mxu0 %v490_v23 }
  0xfd   : > { %856 = vmatprep.subr.mxu0 %v485_v24 }
  0xfe   : > { %857 = vmatpush1.msra.mxu0 %v484_v25 }
  0xff   : > { %858 = vmatprep.subr.mxu0 %v479_v26 }
 0x100   : > { %859 = vmatpush1.msra.mxu0 %v478_v27  ;;  %v9442_v27 = vsub.s32 1, %v9415_v13 }
 0x101   : > { %860 = vmatprep.subr.mxu0 %v473_v28 }
 0x102   : > { %861 = vmatpush1.msra.mxu0 %v472_v29 }
 0x103   : > { %862 = vmatprep.subr.mxu0 %v467_v30 }
 0x104   : > { %863 = vmatpush1.msra.mxu0 %v466_v31 }
 0x105   : > { %864 = vmatprep.subr.mxu0 %v461_v32 }
 0x106   : > { %865 = vmatpush1.msra.mxu0 %v460_v33 }
 0x107   : > { %866 = vmatprep.subr.mxu0 %v455_v34 }
 0x108   : > { %867 = vmatpush1.msra.mxu0 %v454_v35 }
 0x109   : > { %868 = vmatprep.subr.mxu0 %v449_v36 }
 0x10a   : > { %869 = vmatpush1.msra.mxu0 %v448_v37 }
 0x10b   : > { %870 = vmatprep.subr.mxu0 %v443_v38 }
 0x10c   : > { %871 = vmatpush1.msra.mxu0 %v442_v39 }
 0x10d   : > { %872 = vmatprep.subr.mxu0 %v629_v40 }
 0x10e   : > { %873 = vmatpush2.msra.mxu0 %v628_v41 }
 0x10f   : > { %874 = vmatprep.subr.mxu0 %v623_v42 }
 0x110   : > { %875 = vmatpush2.msra.mxu0 %v622_v43 }
 0x111   : > { %876 = vmatprep.subr.mxu0 %v617_v44 }
 0x112   : > { %877 = vmatpush2.msra.mxu0 %v616_v45 }
 0x113   : > { %878 = vmatprep.subr.mxu0 %v611_v46  ;;  %v9468_v46 = vsub.s32 4, %v9415_v13 }
 0x114   : > { %879 = vmatpush2.msra.mxu0 %v610_v47 }
 0x115   : > { %880 = vmatprep.subr.mxu0 %v605_v48  ;;  %10916 = vst [vmem:[#allocation28_spill] sm:$0xff] %v9468_v46 }
 0x116   : > { %881 = vmatpush2.msra.mxu0 %v604_v49 }
 0x117   : > { %882 = vmatprep.subr.mxu0 %v599_v50 }
 0x118   : > { %883 = vmatpush2.msra.mxu0 %v598_v51 }
 0x119   : > { %884 = vmatprep.subr.mxu0 %v593_v52 }
 0x11a   : > { %885 = vmatpush2.msra.mxu0 %v592_v53 }
 0x11b   : > { %886 = vmatprep.subr.mxu0 %v587_v54  ;;  %v10881_v54 = vmov 0.0  }
 0x11c   : > { %887 = vmatpush2.msra.mxu0 %v586_v55  ;;  %2207 = vst [vmem:[#allocation2 + $0x70] sm:$0xff] %v10881_v54  ;;  %2208 = vst [vmem:[#allocation2] sm:$0xff] %v10881_v54  ;;  %v9495_v55 = vand.u32 127, %v632_v12 }
 0x11d   : > { %888 = vmatprep.subr.mxu0 %v581_v56  ;;  %2209 = vst [vmem:[#allocation2 + $0x28] sm:$0xff] %v10881_v54  ;;  %2210 = vst [vmem:[#allocation2 + $0x48] sm:$0xff] %v10881_v54 }
 0x11e   : > { %889 = vmatpush2.msra.mxu0 %v580_v57  ;;  %2211 = vst [vmem:[#allocation2 + $0x20] sm:$0xff] %v10881_v54  ;;  %2212 = vst [vmem:[#allocation2 + $0x58] sm:$0xff] %v10881_v54  ;;  %v9499_v57 = vstv %s935_s10 }
 0x11f   : > { %890 = vmatprep.subr.mxu0 %v575_v58  ;;  %2213 = vst [vmem:[#allocation2 + $0x8] sm:$0xff] %v10881_v54  ;;  %2214 = vst [vmem:[#allocation2 + $0x18] sm:$0xff] %v10881_v54  ;;  %vm937_vm0 = vcmp.ge.s32.totalorder %v9495_v55, %v9499_v57  ;;  %vm939_vm3 = vcmp.lt.s32.totalorder %v9415_v13, %v9499_v57 }
 0x120   : > { %891 = vmatpush2.msra.mxu0 %v574_v59 }
 0x121   : > { %892 = vmatprep.subr.mxu0 %v569_v60 }
 0x122   : > { %893 = vmatpush2.msra.mxu0 %v568_v61 }
 0x123   : > { %894 = vmatprep.subr.mxu0 %v563_v62  ;;  %v9504_v62 = vsel %vm937_vm0, -1e+30, %v10881_v54 }
 0x124   : > { %895 = vmatpush2.msra.mxu0 %v562_v63 }
 0x125   : > { %896 = vmatprep.subr.mxu0 %v557_v0 }
 0x126   : > { %897 = vmatpush2.msra.mxu0 %v556_v2 }
 0x127   : > { %898 = vmatprep.subr.mxu0 %v551_v4 }
 0x128   : > { %899 = vmatpush2.msra.mxu0 %v550_v5 }
 0x129   : > { %900 = vmatprep.subr.mxu0 %v545_v6 }
 0x12a   : > { %901 = vmatpush2.msra.mxu0 %v544_v8 }
 0x12b   : > { %902 = vmatprep.subr.mxu0 %v539_v9 }
 0x12c   : > { %903 = vmatpush2.msra.mxu0 %v538_v11 }
 0x12d   : > { %905 = vmatmul.mubr.f32.vlgmr.msra.gmra.mxu0 %v9373_v1  ;;  %v9421_v1 = vsub.s32 3, %v9415_v13 }
 0x12e   : > { %910 = vmatprep.mubr.f32.mxu0 %v9376_v3  ;;  %v9423_v3 = vld [vmem:[#allocation10] sm:$0x3f] }
 0x12f   : > { %10915 = vst [vmem:[#allocation27_spill] sm:$0xff] %v9421_v1  ;;  %v9450_v33 = vrot.slane %v9423_v3, %v9442_v27  ;;  %v9472_v48 = vrot.slane %v9423_v3, %v9468_v46 }
 0x131   : > { %911 = vmatmul.mubr.f32.gmra.mxu0 %v9382_v7  ;;  %v635_v7 = vrot.slane %v9423_v3, %v9418_v15 }
 0x132   : > { %916 = vmatprep.mubr.f32.mxu0 %v9386_v10  ;;  %v9428_v10 = vsub.s32 2, %v9415_v13 }
 0x135   : > { %917 = vmatmul.mubr.f32.gmra.mxu0 %v9392_v14  ;;  %v9432_v14 = vrot.slane %v9423_v3, %v9421_v1 }
 0x136   : > { %922 = vmatprep.mubr.f32.mxu0 %v9395_v16 }
 0x139   : > { %923 = vmatmul.mubr.f32.gmra.mxu0 %v9402_v20  ;;  %v643_v20 = vrot.slane %v9423_v3, %v9428_v10 }
 0x13a   : > { %1516 = vmatprep.mubr.f32.mxu0 %v10881_v54 }
 0x1ac   : > { %v817_v16 = vpop.f32.mrf.mxu1 }
 0x1ad   : > { %v728_v17 = vpop.f32.mrf.mxu0  ;;  %v818_v28 = vadd.f32 %v817_v16, %v643_v20 }
 0x1ae   : > { %v819_v18 = vpop.f32.mrf.mxu1  ;;  %v729_v19 = vadd.f32 %v728_v17, %v635_v7 }
 0x1af   : > { %v9437_v21 = vadd.f32 %v819_v18, %v9432_v14  ;;  %v9439_v22 = vpop.f32.mrf.mxu0 }
 0x1b0   : > { %v823_v23 = vpop.f32.mrf.mxu1  ;;  %7373 = vmatprep.mubr.f32.mxu1 %v729_v19  ;;  %v9518_v19 = vld [vmem:[#allocation11 + $0xf8] sm:$0xff]  ;;  %v731_v46 = vadd.f32 %v9439_v22, %v9450_v33 }
 0x1b1   : > { %v824_v24 = vadd.f32 %v823_v23, %v643_v20  ;;  %v734_v25 = vpop.f32.mrf.mxu0  ;;  %v9522_v23 = vld [vmem:[#allocation11 + $0xe8] sm:$0xff]  ;;  %1452 = vmatprep.subr.mxu0 %v9518_v19 }
 0x1b2   : > { %v825_v26 = vpop.f32.mrf.mxu1  ;;  %v735_v36 = vadd.f32 %v734_v25, %v635_v7  ;;  %v9528_v25 = vld [vmem:[#allocation11 + $0xd8] sm:$0xff] }
 0x1b3   : > { %7369 = vmatprep.subr.mxu1 %v824_v24  ;;  %v9444_v29 = vpop.f32.mrf.mxu0  ;;  %v9479_v53 = vadd.f32 %v825_v26, %v9432_v14  ;;  %v9531_v26 = vld [vmem:[#allocation11 + $0xd0] sm:$0xff] }
 0x1b4   : > { %7370 = vmatpush3.xpose.msra.mxu1 %v824_v24  ;;  %v829_v30 = vpop.f32.mrf.mxu1  ;;  %v9525_v24 = vld [vmem:[#allocation11 + $0xe0] sm:$0xff] }
 0x1b5   : > { %7371 = vmatprep.subr.mxu1 %v818_v28  ;;  %v740_v31 = vpop.f32.mrf.mxu0  ;;  %v9446_v32 = vadd.f32 %v829_v30, %v643_v20  ;;  %v9537_v30 = vld [vmem:[#allocation11 + $0xc0] sm:$0xff] }
 0x1b6   : > { %v9452_v34 = vadd.f32 %v740_v31, %v635_v7  ;;  %v831_v35 = vpop.f32.mrf.mxu1  ;;  %v9540_v31 = vld [vmem:[#allocation11 + $0xb8] sm:$0xff] }
 0x1b7   : > { %v742_v37 = vpop.f32.mrf.mxu0  ;;  %v9455_v38 = vadd.f32 %v831_v35, %v9432_v14  ;;  %v9543_v35 = vld [vmem:[#allocation11 + $0xb0] sm:$0xff] }
 0x1b8   : > { %7372 = vmatpush3.xpose.msra.mxu1 %v818_v28  ;;  %v9458_v39 = vadd.f32 %v742_v37, %v9450_v33  ;;  %v835_v40 = vpop.f32.mrf.mxu1  ;;  %v9534_v28 = vld [vmem:[#allocation11 + $0xc8] sm:$0xff]  ;;  %v9549_v37 = vld [vmem:[#allocation11 + $0xa0] sm:$0xff] }
 0x1b9   : > { %v746_v41 = vpop.f32.mrf.mxu0  ;;  %v9460_v42 = vadd.f32 %v835_v40, %v643_v20  ;;  %v9520_v20 = vld [vmem:[#allocation11 + $0xf0] sm:$0xff]  ;;  %v9552_v40 = vld [vmem:[#allocation11 + $0x98] sm:$0xff] }
 0x1ba   : > { %v9462_v43 = vadd.f32 %v746_v41, %v635_v7  ;;  %v9497_v56 = vpop.f32.mrf.mxu1  ;;  %1453 = vmatpush1.msra.mxu0 %v9520_v20  ;;  %v9555_v41 = vld [vmem:[#allocation11 + $0x90] sm:$0xff] }
 0x1bb   : > { %7374 = vmatmul.mubr.f32.vlgmr.msra.gmra.mxu1 %v735_v36  ;;  %v748_v44 = vpop.f32.mrf.mxu0  ;;  %1454 = vmatprep.subr.mxu0 %v9522_v23  ;;  %v9546_v36 = vld [vmem:[#allocation11 + $0xa8] sm:$0xff] }
 0x1bc   : > { %v9465_v45 = vadd.f32 %v748_v44, %v9450_v33  ;;  %1455 = vmatpush1.msra.mxu0 %v9525_v24  ;;  %v9558_v44 = vld [vmem:[#allocation11 + $0x88] sm:$0xff] }
 0x1bd   : > { %1456 = vmatprep.subr.mxu0 %v9528_v25 }
 0x1be   : > { %1457 = vmatpush1.msra.mxu0 %v9531_v26 }
 0x1bf   : > { %1458 = vmatprep.subr.mxu0 %v9534_v28 }
 0x1c0   : > { %1459 = vmatpush1.msra.mxu0 %v9537_v30 }
 0x1c1   : > { %1460 = vmatprep.subr.mxu0 %v9540_v31 }
 0x1c2   : > { %1461 = vmatpush1.msra.mxu0 %v9543_v35 }
 0x1c3   : > { %1462 = vmatprep.subr.mxu0 %v9546_v36 }
 0x1c4   : > { %1463 = vmatpush1.msra.mxu0 %v9549_v37 }
 0x1c5   : > { %1464 = vmatprep.subr.mxu0 %v9552_v40 }
 0x1c6   : > { %1465 = vmatpush1.msra.mxu0 %v9555_v41 }
 0x1c7   : > { %1466 = vmatprep.subr.mxu0 %v9558_v44 }
 0x1ed   : > { %v906_v47 = vpop.f32.mrf.mxu0 }
 0x1ee   : > { %v907_v51 = vadd.f32 %v906_v47, %v9472_v48  ;;  %v9561_v47 = vld [vmem:[#allocation11 + $0x80] sm:$0xff] }
 0x1ef   : > { %v9474_v49 = vpop.f32.mrf.mxu0  ;;  %1467 = vmatpush1.msra.mxu0 %v9561_v47 }
 0x1f1   : > { %v912_v50 = vpop.f32.mrf.mxu0 }
 0x1f2   : > { %v913_v52 = vadd.f32 %v912_v50, %v9472_v48  ;;  %v9564_v50 = vld [vmem:[#allocation11 + $0x78] sm:$0xff] }
 0x1f3   : > { %1468 = vmatprep.subr.mxu0 %v9564_v50 }
 0x1f4   : > { %7376 = vmatprep.subr.mxu1 %v913_v52 }
 0x1f5   : > { %7377 = vmatpush3.msra.mxu1 %v913_v52  ;;  %v9570_v52 = vld [vmem:[#allocation11 + $0x68] sm:$0xff] }
 0x1f6   : > { %7378 = vmatprep.subr.mxu1 %v907_v51 }
 0x1f7   : > { %7379 = vmatpush3.msra.mxu1 %v907_v51  ;;  %v9567_v51 = vld [vmem:[#allocation11 + $0x70] sm:$0xff] }
 0x1f8   : > { %7383 = vmatprep.subr.mxu1 %v9479_v53  ;;  %1469 = vmatpush1.msra.mxu0 %v9567_v51 }
 0x1f9   : > { %1470 = vmatprep.subr.mxu0 %v9570_v52 }
 0x27b   : > { %v7375_v58 = vpop.f32.mrf.mxu1 }
 0x27c   : > { %v1021_v60 = vmul.f32 0.088388346, %v7375_v58  ;;  %v9573_v58 = vld [vmem:[#allocation11 + $0x60] sm:$0xff] }
 0x27d   : > { %v1011_v59 = vpop.f32.mrf.mxu1  ;;  %1471 = vmatpush1.msra.mxu0 %v9573_v58 }
 0x27e   : > { %v1020_v61 = vmul.f32 0.088388346, %v1011_v59  ;;  %v1023_v2 = vadd.f32 %v1021_v60, %v9504_v62  ;;  %v9576_v59 = vld [vmem:[#allocation11 + $0x58] sm:$0xff]  ;;  %v9579_v60 = vld [vmem:[#allocation11 + $0x50] sm:$0xff] }
 0x27f   : > { %1472 = vmatprep.subr.mxu0 %v9576_v59 }
 0x280   : > { %v1022_v63 = vadd.f32 %v1020_v61, %v9504_v62  ;;  %v1028_v4 = vsel %vm1024_vm1, %v1023_v2, -inf  ;;  %v9582_v61 = vld [vmem:[#allocation11 + $0x48] sm:$0xff]  ;;  %1473 = vmatpush1.msra.mxu0 %v9579_v60 }
 0x281   : > { %1474 = vmatprep.subr.mxu0 %v9582_v61 }
 0x282   : > { %v1025_v0 = vsel %vm1024_vm1, %v1022_v63, -inf }
 0x283   : > { %1026 = vmax.xlane.f32.xlu0 %v1025_v0  ;;  %v9588_v0 = vld [vmem:[#allocation11 + $0x38] sm:$0xff] }
 0x287   : > { %1029 = vmax.xlane.f32.xlu0 %v1028_v4  ;;  %v9594_v4 = vld [vmem:[#allocation11 + $0x28] sm:$0xff] }
 0x30c   : > { %v1027_v5 = vpop.xlane.xlu0 %1026 }
 0x30d   : > { %v1031_v6 = vsub.f32 %v1022_v63, %v1027_v5  ;;  %v9585_v63 = vld [vmem:[#allocation11 + $0x40] sm:$0xff] }
 0x30e   : > { %1475 = vmatpush1.msra.mxu0 %v9585_v63  ;;  %v9597_v5 = vld [vmem:[#allocation11 + $0x20] sm:$0xff] }
 0x30f   : > { %v1033_v8 = vmul.f32 1.442695, %v1031_v6  ;;  %1476 = vmatprep.subr.mxu0 %v9588_v0  ;;  %v9600_v6 = vld [vmem:[#allocation11 + $0x18] sm:$0xff] }
 0x310   : > { %v1030_v9 = vpop.xlane.xlu0 %1029 }
 0x311   : > { %7555 = vpow2.f32 %v1033_v8  ;;  %v1032_v11 = vsub.f32 %v1023_v2, %v1030_v9  ;;  %v9591_v2 = vld [vmem:[#allocation11 + $0x30] sm:$0xff] }
 0x312   : > { %1477 = vmatpush1.msra.mxu0 %v9591_v2 }
 0x313   : > { %v1035_v12 = vmul.f32 1.442695, %v1032_v11  ;;  %1478 = vmatprep.subr.mxu0 %v9594_v4 }
 0x314   : > { %1479 = vmatpush1.msra.mxu0 %v9597_v5 }
 0x315   : > { %7557 = vpow2.f32 %v1035_v12  ;;  %1480 = vmatprep.subr.mxu0 %v9600_v6 }
 0x31e   : > { %v9510_v7 = vpop.eup %7555 }
 0x31f   : > { %v1037_v16 = vsel %vm1024_vm1, %v9510_v7, 0.0 }
 0x320   : > { %1038 = vadd.xlane.f32.xlu1 %v1037_v16 }
 0x322   : > { %v9514_v17 = vpop.eup %7557 }
 0x323   : > { %v1040_v18 = vsel %vm1024_vm1, %v9514_v17, 0.0 }
 0x324   : > { %1041 = vadd.xlane.f32.xlu1 %v1040_v18  ;;  %v9608_v18 = vsub.s32 5, %v9415_v13 }
 0x326   : > { %10917 = vst [vmem:[#allocation29_spill] sm:$0xff] %v9608_v18 }
 0x3a9   : > { %v1039_v8 = vpop.xlane.xlu1 %1038 }
 0x3aa   : > { %7559 = vrcp.f32 %v1039_v8  ;;  %v914_v8 = vpop.f32.mrf.mxu0 }
 0x3ad   : > { %v1042_v9 = vpop.xlane.xlu1 %1041 }
 0x3ae   : > { %7561 = vrcp.f32 %v1042_v9 }
 0x3b7   : > { %v7560_v11 = vpop.eup %7559 }
 0x3b8   : > { %v1044_v12 = vmul.f32 %v7560_v11, %v9510_v7  ;;  %v9617_v7 = vrot.slane %v9423_v3, %v9608_v18  ;;  %v1129_v3 = vld [vmem:[#allocation11 + $0x8] sm:$0xff] }
 0x3ba   : > { %7380 = vmatprep.mubr.msk.f32.mxu1 %vm1024_vm1, %v1044_v12  ;;  %v915_v9 = vadd.f32 %v914_v8, %v9617_v7  ;;  %v909_v22 = vadd.f32 %v9474_v49, %v9617_v7  ;;  %v9691_v12 = vld [vmem:[#allocation11 + $0x1b0] sm:$0xff]  ;;  %v9697_v8 = vld [vmem:[#allocation11 + $0x1a0] sm:$0xff] }
 0x3bb   : > { %v7562_v16 = vpop.eup %7561 }
 0x3bc   : > { %v1046_v54 = vmul.f32 %v7562_v16, %v9514_v17  ;;  %v737_v17 = vadd.f32 %v9444_v29, %v9450_v33  ;;  %v10918_v29 = vmov 0.0   ;;  %v9694_v16 = vld [vmem:[#allocation11 + $0x1a8] sm:$0xff] }
 0x3be   : > { %7381 = vmatmul.mubr.msk.f32.vlgmr.msra.gmra.mxu1 %vm1024_vm1, %v1046_v54 }
 0x3bf   : > { %7384 = vmatpush3.xpose.msra.mxu1 %v9479_v53  ;;  %7387 = vmatprep.mubr.f32.mxu1 %v731_v46  ;;  %v1130_v46 = vld [vmem:[#allocation11 + $0x10] sm:$0xff]  ;;  %v1128_v53 = vld [vmem:[#allocation11] sm:$0xff] }
 0x3c0   : > { %7385 = vmatprep.subr.mxu1 %v9437_v21  ;;  %1481 = vmatpush1.msra.mxu0 %v1130_v46 }
 0x3c1   : > { %1482 = vmatprep.subr.mxu0 %v1129_v3 }
 0x3c2   : > { %1483 = vmatpush1.msra.mxu0 %v1128_v53 }
 0x3c3   : > { %7386 = vmatpush3.xpose.msra.mxu1 %v9437_v21  ;;  %1981 = vmatprep.subr.mxu0 %v9518_v19 }
 0x3c4   : > { %7390 = vmatprep.subr.mxu1 %v915_v9 }
 0x3c6   : > { %7388 = vmatmul.mubr.f32.vlgmr.msra.gmra.mxu1 %v737_v17  ;;  %v9703_v17 = vld [vmem:[#allocation11 + $0x190] sm:$0xff] }
 0x3c7   : > { %7391 = vmatpush3.msra.mxu1 %v915_v9  ;;  %v9700_v9 = vld [vmem:[#allocation11 + $0x198] sm:$0xff] }
 0x3c8   : > { %7392 = vmatprep.subr.mxu1 %v909_v22 }
 0x3c9   : > { %7393 = vmatpush3.msra.mxu1 %v909_v22  ;;  %v9706_v22 = vld [vmem:[#allocation11 + $0x188] sm:$0xff] }
 0x47e   : > { %v7382_v21 = vpop.f32.mrf.mxu1 }
 0x480   : > { %v1119_v54 = vpop.f32.mrf.mxu1 }
 0x481   : > { %1517 = vmatmul.mubr.f32.vlgmr.msra.gmra.mxu0 %v1119_v54  ;;  %v9721_v54 = vld [vmem:[#allocation11 + $0x160] sm:$0xff] }
 0x482   : > { %1522 = vmatprep.mubr.f32.mxu0 %v10918_v29  ;;  %1982 = vmatpush1.msra.mxu0 %v9520_v20 }
 0x483   : > { %1983 = vmatprep.subr.mxu0 %v9522_v23 }
 0x484   : > { %1984 = vmatpush1.msra.mxu0 %v9525_v24 }
 0x485   : > { %1523 = vmatmul.mubr.f32.gmra.mxu0 %v7382_v21  ;;  %1985 = vmatprep.subr.mxu0 %v9528_v25  ;;  %v9718_v21 = vld [vmem:[#allocation11 + $0x168] sm:$0xff] }
 0x486   : > { %v7389_v33 = vpop.f32.mrf.mxu1  ;;  %1986 = vmatpush1.msra.mxu0 %v9531_v26  ;;  %2045 = vmatprep.mubr.f32.mxu0 %v10918_v29 }
 0x487   : > { %v1236_v49 = vmul.f32 0.088388346, %v7389_v33  ;;  %1987 = vmatprep.subr.mxu0 %v9534_v28  ;;  %v9724_v33 = vld [vmem:[#allocation11 + $0x158] sm:$0xff] }
 0x488   : > { %v1226_v19 = vpop.f32.mrf.mxu1  ;;  %1988 = vmatpush1.msra.mxu0 %v9537_v30 }
 0x489   : > { %v1235_v11 = vmul.f32 0.088388346, %v1226_v19  ;;  %v1238_v20 = vadd.f32 %v1236_v49, %v9504_v62  ;;  %1989 = vmatprep.subr.mxu0 %v9540_v31  ;;  %v9727_v49 = vld [vmem:[#allocation11 + $0x150] sm:$0xff]  ;;  %v9730_v19 = vld [vmem:[#allocation11 + $0x148] sm:$0xff] }
 0x48a   : > { %1990 = vmatpush1.msra.mxu0 %v9543_v35 }
 0x48b   : > { %v1242_v23 = vsel %vm1024_vm1, %v1238_v20, -inf  ;;  %v1237_v24 = vadd.f32 %v1235_v11, %v9504_v62  ;;  %1991 = vmatprep.subr.mxu0 %v9546_v36  ;;  %v9733_v11 = vld [vmem:[#allocation11 + $0x140] sm:$0xff] }
 0x48c   : > { %1243 = vmax.xlane.f32.xlu1 %v1242_v23  ;;  %1992 = vmatpush1.msra.mxu0 %v9549_v37  ;;  %v9739_v23 = vld [vmem:[#allocation11 + $0x130] sm:$0xff] }
 0x48d   : > { %v1239_v25 = vsel %vm1024_vm1, %v1237_v24, -inf  ;;  %1993 = vmatprep.subr.mxu0 %v9552_v40 }
 0x48e   : > { %1240 = vmax.xlane.f32.xlu0 %v1239_v25  ;;  %1994 = vmatpush1.msra.mxu0 %v9555_v41  ;;  %v9745_v25 = vld [vmem:[#allocation11 + $0x120] sm:$0xff] }
 0x48f   : > { %1995 = vmatprep.subr.mxu0 %v9558_v44  ;;  %v9663_v44 = vld [vmem:[#allocation11 + $0x1f8] sm:$0xff] }
 0x490   : > { %1996 = vmatpush1.msra.mxu0 %v9561_v47  ;;  %1375 = vmatprep.subr.mxu1 %v9663_v44 }
 0x491   : > { %1997 = vmatprep.subr.mxu0 %v9564_v50 }
 0x492   : > { %1998 = vmatpush1.msra.mxu0 %v9567_v51 }
 0x493   : > { %1999 = vmatprep.subr.mxu0 %v9570_v52 }
 0x494   : > { %2000 = vmatpush1.msra.mxu0 %v9573_v58 }
 0x495   : > { %2001 = vmatprep.subr.mxu0 %v9576_v59 }
 0x496   : > { %2002 = vmatpush1.msra.mxu0 %v9579_v60  ;;  %v9666_v60 = vld [vmem:[#allocation11 + $0x1f0] sm:$0xff] }
 0x497   : > { %2003 = vmatprep.subr.mxu0 %v9582_v61  ;;  %v9669_v61 = vld [vmem:[#allocation11 + $0x1e8] sm:$0xff] }
 0x498   : > { %2004 = vmatpush1.msra.mxu0 %v9585_v63  ;;  %v9672_v63 = vld [vmem:[#allocation11 + $0x1e0] sm:$0xff] }
 0x499   : > { %2005 = vmatprep.subr.mxu0 %v9588_v0  ;;  %v9675_v0 = vld [vmem:[#allocation11 + $0x1d8] sm:$0xff] }
 0x49a   : > { %2006 = vmatpush1.msra.mxu0 %v9591_v2  ;;  %v9679_v2 = vld [vmem:[#allocation11 + $0x1d0] sm:$0xff] }
 0x49b   : > { %2007 = vmatprep.subr.mxu0 %v9594_v4  ;;  %v9682_v4 = vld [vmem:[#allocation11 + $0x1c8] sm:$0xff] }
 0x49c   : > { %2008 = vmatpush1.msra.mxu0 %v9597_v5  ;;  %v9685_v5 = vld [vmem:[#allocation11 + $0x1c0] sm:$0xff] }
 0x49d   : > { %2009 = vmatprep.subr.mxu0 %v9600_v6  ;;  %v9688_v6 = vld [vmem:[#allocation11 + $0x1b8] sm:$0xff] }
 0x49e   : > { %2010 = vmatpush1.msra.mxu0 %v1130_v46  ;;  %v9709_v46 = vld [vmem:[#allocation11 + $0x180] sm:$0xff] }
 0x49f   : > { %2011 = vmatprep.subr.mxu0 %v1129_v3  ;;  %v9712_v3 = vld [vmem:[#allocation11 + $0x178] sm:$0xff] }
 0x4a0   : > { %2012 = vmatpush1.msra.mxu0 %v1128_v53  ;;  %v9715_v53 = vld [vmem:[#allocation11 + $0x170] sm:$0xff] }
 0x515   : > { %v1244_v62 = vpop.xlane.xlu1 %1243 }
 0x516   : > { %v1246_v26 = vsub.f32 %v1238_v20, %v1244_v62  ;;  %v9736_v20 = vld [vmem:[#allocation11 + $0x138] sm:$0xff] }
 0x517   : > { %v1241_v28 = vpop.xlane.xlu0 %1240  ;;  %v9748_v62 = vld [vmem:[#allocation11 + $0x118] sm:$0xff] }
 0x518   : > { %v1249_v30 = vmul.f32 1.442695, %v1246_v26  ;;  %v1245_v31 = vsub.f32 %v1237_v24, %v1241_v28  ;;  %v9742_v24 = vld [vmem:[#allocation11 + $0x128] sm:$0xff]  ;;  %v9751_v26 = vld [vmem:[#allocation11 + $0x110] sm:$0xff] }
 0x519   : > { %v9754_v28 = vld [vmem:[#allocation11 + $0x108] sm:$0xff] }
 0x51a   : > { %7563 = vpow2.f32 %v1249_v30  ;;  %v1247_v35 = vmul.f32 1.442695, %v1245_v31  ;;  %v9757_v30 = vld [vmem:[#allocation11 + $0x100] sm:$0xff]  ;;  %v918_v31 = vpop.f32.mrf.mxu0 }
 0x51c   : > { %7565 = vpow2.f32 %v1247_v35  ;;  %v9763_v35 = vpop.f32.mrf.mxu0 }
 0x527   : > { %v7564_v36 = vpop.eup %7563 }
 0x528   : > { %v1254_v37 = vsel %vm1024_vm1, %v7564_v36, 0.0 }
 0x529   : > { %v7566_v40 = vpop.eup %7565  ;;  %1255 = vadd.xlane.f32.xlu1 %v1254_v37 }
 0x52a   : > { %v1251_v41 = vsel %vm1024_vm1, %v7566_v40, 0.0 }
 0x52b   : > { %1252 = vadd.xlane.f32.xlu0 %v1251_v41 }
 0x5b2   : > { %v1256_v47 = vpop.xlane.xlu1 %1255 }
 0x5b3   : > { %7567 = vrcp.f32 %v1256_v47  ;;  %v919_v47 = vadd.f32 %v918_v31, %v9472_v48 }
 0x5b4   : > { %v1253_v50 = vpop.xlane.xlu0 %1252 }
 0x5b5   : > { %7569 = vrcp.f32 %v1253_v50 }
 0x5c0   : > { %v7568_v51 = vpop.eup %7567 }
 0x5c1   : > { %v1260_v59 = vmul.f32 %v7568_v51, %v7564_v36 }
 0x5c2   : > { %v7570_v52 = vpop.eup %7569 }
 0x5c3   : > { %v1258_v58 = vmul.f32 %v7570_v52, %v7566_v40  ;;  %v924_v40 = vpop.f32.mrf.mxu0 }
 0x5c4   : > { %v925_v41 = vadd.f32 %v924_v40, %v9472_v48 }
 0x5c5   : > { %7394 = vmatprep.mubr.msk.f32.mxu1 %vm1024_vm1, %v1258_v58 }
 0x5c6   : > { %7395 = vmatmul.mubr.msk.f32.vlgmr.msra.gmra.mxu1 %vm1024_vm1, %v1260_v59 }
 0x5c7   : > { %1376 = vmatpush1.msra.mxu1 %v9666_v60  ;;  %1439 = vmatprep.mubr.f32.mxu1 %v10918_v29 }
 0x5c8   : > { %1377 = vmatprep.subr.mxu1 %v9669_v61 }
 0x5c9   : > { %1378 = vmatpush1.msra.mxu1 %v9672_v63 }
 0x5ca   : > { %1379 = vmatprep.subr.mxu1 %v9675_v0 }
 0x5cb   : > { %1380 = vmatpush1.msra.mxu1 %v9679_v2 }
 0x5cc   : > { %1381 = vmatprep.subr.mxu1 %v9682_v4 }
 0x5cd   : > { %1382 = vmatpush1.msra.mxu1 %v9685_v5 }
 0x5ce   : > { %1383 = vmatprep.subr.mxu1 %v9688_v6 }
 0x5cf   : > { %1384 = vmatpush1.msra.mxu1 %v9691_v12 }
 0x5d0   : > { %1385 = vmatprep.subr.mxu1 %v9694_v16 }
 0x5d1   : > { %1386 = vmatpush1.msra.mxu1 %v9697_v8 }
 0x5d2   : > { %1387 = vmatprep.subr.mxu1 %v9700_v9 }
 0x5d3   : > { %1388 = vmatpush1.msra.mxu1 %v9703_v17 }
 0x5d4   : > { %1389 = vmatprep.subr.mxu1 %v9706_v22 }
 0x5d5   : > { %1390 = vmatpush1.msra.mxu1 %v9709_v46 }
 0x5d6   : > { %1391 = vmatprep.subr.mxu1 %v9712_v3 }
 0x5d7   : > { %1392 = vmatpush1.msra.mxu1 %v9715_v53 }
 0x5d8   : > { %1393 = vmatprep.subr.mxu1 %v9718_v21 }
 0x5d9   : > { %1394 = vmatpush1.msra.mxu1 %v9721_v54 }
 0x5da   : > { %1395 = vmatprep.subr.mxu1 %v9724_v33 }
 0x5db   : > { %1396 = vmatpush1.msra.mxu1 %v9727_v49 }
 0x5dc   : > { %1397 = vmatprep.subr.mxu1 %v9730_v19 }
 0x5dd   : > { %1398 = vmatpush1.msra.mxu1 %v9733_v11 }
 0x5de   : > { %1399 = vmatprep.subr.mxu1 %v9736_v20 }
 0x5df   : > { %1400 = vmatpush1.msra.mxu1 %v9739_v23 }
 0x5e0   : > { %1401 = vmatprep.subr.mxu1 %v9742_v24 }
 0x5e1   : > { %1402 = vmatpush1.msra.mxu1 %v9745_v25 }
 0x5e2   : > { %1403 = vmatprep.subr.mxu1 %v9748_v62 }
 0x5e3   : > { %1404 = vmatpush1.msra.mxu1 %v9751_v26 }
 0x5e4   : > { %1405 = vmatprep.subr.mxu1 %v9754_v28 }
 0x5e5   : > { %1406 = vmatpush1.msra.mxu1 %v9757_v30 }
 0x5e6   : > { %7397 = vmatprep.subr.mxu1 %v9460_v42 }
 0x686   : > { %v7396_v36 = vpop.f32.mrf.mxu1 }
 0x688   : > { %v1333_v37 = vpop.f32.mrf.mxu1 }
 0x689   : > { %1440 = vmatmul.mubr.f32.vlgmr.msra.gmra.mxu1 %v1333_v37 }
 0x68a   : > { %7398 = vmatpush3.xpose.msra.mxu1 %v9460_v42  ;;  %1445 = vmatprep.mubr.f32.mxu1 %v10918_v29  ;;  %v838_v42 = vadd.f32 %v9497_v56, %v9432_v14 }
 0x68b   : > { %7399 = vmatprep.subr.mxu1 %v9446_v32 }
 0x68d   : > { %1446 = vmatmul.mubr.f32.gmra.mxu1 %v7396_v36 }
 0x68e   : > { %7400 = vmatpush3.xpose.msra.mxu1 %v9446_v32  ;;  %7401 = vmatprep.mubr.f32.mxu1 %v9452_v34  ;;  %v9781_v34 = vstv %s1530_s19 }
 0x68f   : > { %7404 = vmatprep.subr.mxu1 %v925_v41  ;;  %10919 = vst [vmem:[#allocation30_spill] sm:$0xff] %v9781_v34  ;;  %vm1532_vm2 = vcmp.ge.s32.totalorder %v9495_v55, %v9781_v34 }
 0x690   : > { %v1533_v56 = vsel %vm1532_vm2, -1e+30, %v10918_v29 }
 0x691   : > { %7402 = vmatmul.mubr.f32.vlgmr.msra.gmra.mxu1 %v9462_v43 }
 0x692   : > { %7405 = vmatpush3.msra.mxu1 %v925_v41 }
 0x693   : > { %7406 = vmatprep.subr.mxu1 %v919_v47 }
 0x694   : > { %7407 = vmatpush3.msra.mxu1 %v919_v47 }
 0x695   : > { %7411 = vmatprep.subr.mxu1 %v838_v42 }
 0x749   : > { %v9777_v50 = vpop.f32.mrf.mxu1 }
 0x74b   : > { %v9779_v32 = vpop.f32.mrf.mxu1 }
 0x74d   : > { %v9783_v48 = vpop.f32.mrf.mxu1 }
 0x74f   : > { %v9787_v43 = vpop.f32.mrf.mxu1 }
 0x751   : > { %v7403_v14 = vpop.f32.mrf.mxu1 }
 0x752   : > { %v1616_v51 = vmul.f32 0.088388346, %v7403_v14 }
 0x753   : > { %v1606_v52 = vpop.f32.mrf.mxu1 }
 0x754   : > { %v1615_v58 = vmul.f32 0.088388346, %v1606_v52  ;;  %v1618_v59 = vadd.f32 %v1616_v51, %v1533_v56 }
 0x756   : > { %v1622_v31 = vsel %vm1024_vm1, %v1618_v59, -inf  ;;  %v1617_v36 = vadd.f32 %v1615_v58, %v1533_v56 }
 0x757   : > { %1623 = vmax.xlane.f32.xlu1 %v1622_v31 }
 0x758   : > { %v1619_v37 = vsel %vm1024_vm1, %v1617_v36, -inf }
 0x759   : > { %1620 = vmax.xlane.f32.xlu0 %v1619_v37 }
 0x7e0   : > { %v1624_v40 = vpop.xlane.xlu1 %1623 }
 0x7e1   : > { %v1626_v41 = vsub.f32 %v1618_v59, %v1624_v40 }
 0x7e2   : > { %v1621_v47 = vpop.xlane.xlu0 %1620 }
 0x7e3   : > { %v1629_v55 = vmul.f32 1.442695, %v1626_v41  ;;  %v1625_v18 = vsub.f32 %v1617_v36, %v1621_v47  ;;  %v921_v36 = vadd.f32 %v9763_v35, %v9617_v7 }
 0x7e5   : > { %7571 = vpow2.f32 %v1629_v55  ;;  %v1627_v1 = vmul.f32 1.442695, %v1625_v18 }
 0x7e7   : > { %7573 = vpow2.f32 %v1627_v1  ;;  %v926_v1 = vpop.f32.mrf.mxu0 }
 0x7e8   : > { %v927_v18 = vadd.f32 %v926_v1, %v9617_v7  ;;  %v9807_v1 = vld [vmem:[#allocation17 + $0x8] sm:$0x3f] }
 0x7f2   : > { %v7572_v34 = vpop.eup %7571 }
 0x7f3   : > { %v1634_v14 = vsel %vm1024_vm1, %v7572_v34, 0.0 }
 0x7f4   : > { %v7574_v52 = vpop.eup %7573  ;;  %1635 = vadd.xlane.f32.xlu1 %v1634_v14 }
 0x7f5   : > { %v1631_v51 = vsel %vm1024_vm1, %v7574_v52, 0.0 }
 0x7f6   : > { %1632 = vadd.xlane.f32.xlu0 %v1631_v51 }
 0x87d   : > { %v1636_v58 = vpop.xlane.xlu1 %1635 }
 0x87e   : > { %7575 = vrcp.f32 %v1636_v58 }
 0x87f   : > { %v1633_v31 = vpop.xlane.xlu0 %1632 }
 0x880   : > { %7577 = vrcp.f32 %v1633_v31 }
 0x88b   : > { %v7576_v37 = vpop.eup %7575 }
 0x88c   : > { %v1640_v41 = vmul.f32 %v7576_v37, %v7572_v34 }
 0x88d   : > { %v7578_v59 = vpop.eup %7577 }
 0x88e   : > { %v1638_v40 = vmul.f32 %v7578_v59, %v7574_v52  ;;  %v1518_v52 = vpop.f32.mrf.mxu0 }
 0x890   : > { %7408 = vmatprep.mubr.msk.f32.mxu1 %vm1024_vm1, %v1638_v40  ;;  %v1520_v51 = vpop.f32.mrf.mxu0 }
 0x891   : > { %7409 = vmatmul.mubr.msk.f32.vlgmr.msra.gmra.mxu1 %vm1024_vm1, %v1640_v41 }
 0x892   : > { %7412 = vmatpush3.xpose.msra.mxu1 %v838_v42  ;;  %7415 = vmatprep.mubr.f32.mxu1 %v9458_v39  ;;  %v1524_v40 = vpop.f32.mrf.mxu0 }
 0x893   : > { %7413 = vmatprep.subr.mxu1 %v9455_v38 }
 0x896   : > { %7414 = vmatpush3.xpose.msra.mxu1 %v9455_v38 }
 0x897   : > { %7418 = vmatprep.subr.mxu1 %v927_v18 }
 0x899   : > { %7416 = vmatmul.mubr.f32.vlgmr.msra.gmra.mxu1 %v9465_v45 }
 0x89a   : > { %7419 = vmatpush3.msra.mxu1 %v927_v18  ;;  %v1526_v18 = vpop.f32.mrf.mxu0 }
 0x89b   : > { %7420 = vmatprep.subr.mxu1 %v921_v36 }
 0x89c   : > { %7421 = vmatpush3.msra.mxu1 %v921_v36  ;;  %v9810_v36 = vld [vmem:[#allocation17] sm:$0x3f] }
 0x89d   : > { %1904 = vmatprep.subr.mxu1 %v9663_v44 }
 0x951   : > { %v7410_v42 = vpop.f32.mrf.mxu1 }
 0x953   : > { %v1713_v39 = vpop.f32.mrf.mxu1 }
 0x954   : > { %2046 = vmatmul.mubr.f32.vlgmr.msra.gmra.mxu0 %v1713_v39  ;;  %v9815_v39 = vrot.slane %v9807_v1, %v9418_v15 }
 0x955   : > { %2051 = vmatprep.mubr.f32.mxu0 %v10918_v29 }
 0x958   : > { %2052 = vmatmul.mubr.f32.gmra.mxu0 %v7410_v42  ;;  %v1521_v42 = vadd.f32 %v1520_v51, %v9779_v32  ;;  %v7605_v51 = vld [vmem:[%s9349_s24 + $0x8] sm:$0xff] }
 0x959   : > { %v7417_v34 = vpop.f32.mrf.mxu1 }
 0x95a   : > { %v1798_v47 = vmul.f32 0.088388346, %v7417_v34  ;;  %v1525_v34 = vadd.f32 %v1524_v40, %v9783_v48 }
 0x95b   : > { %v1788_v38 = vpop.f32.mrf.mxu1 }
 0x95c   : > { %v1797_v55 = vmul.f32 0.088388346, %v1788_v38  ;;  %v1800_v14 = vadd.f32 %v1798_v47, %v1533_v56  ;;  %v1519_v47 = vadd.f32 %v1518_v52, %v9777_v50  ;;  %v9821_v38 = vrot.slane %v9810_v36, %v9418_v15  ;;  %v7604_v52 = vld [vmem:[%s9349_s24 + $0x10] sm:$0xff] }
 0x95e   : > { %v1804_v7 = vsel %vm1024_vm1, %v1800_v14, -inf  ;;  %v1799_v35 = vadd.f32 %v1797_v55, %v1533_v56  ;;  %v1527_v56 = vadd.f32 %v1526_v18, %v9787_v43  ;;  %v2067_v55 = vadd.f32 %v9815_v39, %v1521_v42  ;;  %v2425_v42 = vld [vmem:[#allocation13 + $0x5f8] sm:$0xff] }
 0x95f   : > { %1805 = vmax.xlane.f32.xlu1 %v1804_v7  ;;  %v2068_v32 = vadd.f32 %v9821_v38, %v1525_v34  ;;  %v2066_v7 = vadd.f32 %v9821_v38, %v1519_v47  ;;  %v9105_v18 = vmov 0   ;;  %v2424_v34 = vld [vmem:[#allocation13 + $0x5f0] sm:$0xff]  ;;  %v2421_v47 = vld [vmem:[#allocation13 + $0x5d8] sm:$0xff]  ;;  %2588 = vmatprep.subr.mxu0 %v2425_v42 }
 0x960   : > { %v1801_v45 = vsel %vm1024_vm1, %v1799_v35, -inf  ;;  %v2069_v43 = vadd.f32 %v9815_v39, %v1527_v56  ;;  %7553 = vset.pattern.permute.xlu1 %v9105_v18  ;;  %v7315_v56 = vsel %vm939_vm3, 1.0, %v10918_v29  ;;  %7554 = vset.pattern.permute.xlu0 %v9105_v18  ;;  %v2405_v29 = vld [vmem:[#allocation13 + $0x558] sm:$0xff] }
 0x961   : > { %1802 = vmax.xlane.f32.xlu0 %v1801_v45  ;;  %2589 = vmatpush1.msra.mxu0 %v2424_v34  ;;  %v2393_v18 = vld [vmem:[#allocation13 + $0x4f8] sm:$0xff]  ;;  %v2388_v34 = vld [vmem:[#allocation13 + $0x4d0] sm:$0xff] }
 0x962   : > { %2590 = vmatprep.subr.mxu0 %v2421_v47  ;;  %v2389_v42 = vld [vmem:[#allocation13 + $0x4d8] sm:$0xff] }
 0x963   : > { %v2385_v47 = vld [vmem:[#allocation13 + $0x4b8] sm:$0xff] }
 0x9e8   : > { %v1806_v44 = vpop.xlane.xlu1 %1805 }
 0x9e9   : > { %v1808_v58 = vsub.f32 %v1800_v14, %v1806_v44  ;;  %v9837_v44 = vadd.f32 %v7604_v52, %v2068_v32  ;;  %v2416_v32 = vld [vmem:[#allocation13 + $0x5b0] sm:$0xff] }
 0x9ea   : > { %v1803_v31 = vpop.xlane.xlu0 %1802  ;;  %v2408_v52 = vld [vmem:[#allocation13 + $0x570] sm:$0xff] }
 0x9eb   : > { %v1811_v37 = vmul.f32 1.442695, %v1808_v58  ;;  %v1807_v59 = vsub.f32 %v1799_v35, %v1803_v31  ;;  %v7603_v35 = vld [vmem:[%s9349_s24 + $0x18] sm:$0xff]  ;;  %v9840_v58 = vadd.f32 %v7605_v51, %v2067_v55 }
 0x9ec   : > { %v9830_v45 = vadd.f32 %v7603_v35, %v2069_v43  ;;  %v2420_v43 = vld [vmem:[#allocation13 + $0x5d0] sm:$0xff]  ;;  %v2417_v55 = vld [vmem:[#allocation13 + $0x5b8] sm:$0xff] }
 0x9ed   : > { %7579 = vpow2.f32 %v1811_v37  ;;  %v1809_v41 = vmul.f32 1.442695, %v1807_v59  ;;  %v7606_v59 = vld [vmem:[%s9349_s24] sm:$0xff]  ;;  %2591 = vmatpush1.msra.mxu0 %v2420_v43  ;;  %v2412_v35 = vld [vmem:[#allocation13 + $0x590] sm:$0xff] }
 0x9ee   : > { %v2085_v37 = vadd.f32 %v9830_v45, %v9837_v44  ;;  %v9847_v40 = vadd.f32 %v7606_v59, %v2066_v7  ;;  %v2413_v7 = vld [vmem:[#allocation13 + $0x598] sm:$0xff]  ;;  %2592 = vmatprep.subr.mxu0 %v2417_v55  ;;  %v2404_v51 = vld [vmem:[#allocation13 + $0x550] sm:$0xff] }
 0x9ef   : > { %7581 = vpow2.f32 %v1809_v41  ;;  %2593 = vmatpush1.msra.mxu0 %v2416_v32  ;;  %v2397_v59 = vld [vmem:[#allocation13 + $0x518] sm:$0xff]  ;;  %v2384_v43 = vld [vmem:[#allocation13 + $0x4b0] sm:$0xff] }
 0x9f0   : > { %v2082_v41 = vadd.f32 %v9840_v58, %v9847_v40  ;;  %2594 = vmatprep.subr.mxu0 %v2413_v7  ;;  %v2381_v55 = vld [vmem:[#allocation13 + $0x498] sm:$0xff]  ;;  %v2380_v32 = vld [vmem:[#allocation13 + $0x490] sm:$0xff] }
 0x9f1   : > { %2595 = vmatpush1.msra.mxu0 %v2412_v35  ;;  %v2377_v7 = vld [vmem:[#allocation13 + $0x478] sm:$0xff]  ;;  %v2376_v35 = vld [vmem:[#allocation13 + $0x470] sm:$0xff] }
 0x9fa   : > { %v9826_v14 = vpop.eup %7579 }
 0x9fb   : > { %v1816_v50 = vsel %vm1024_vm1, %v9826_v14, 0.0 }
 0x9fc   : > { %v9834_v48 = vpop.eup %7581  ;;  %1817 = vadd.xlane.f32.xlu1 %v1816_v50  ;;  %v2409_v50 = vld [vmem:[#allocation13 + $0x578] sm:$0xff] }
 0x9fd   : > { %v1813_v31 = vsel %vm1024_vm1, %v9834_v48, 0.0  ;;  %2596 = vmatprep.subr.mxu0 %v2409_v50  ;;  %v2373_v50 = vld [vmem:[#allocation13 + $0x458] sm:$0xff] }
 0x9fe   : > { %1814 = vadd.xlane.f32.xlu0 %v1813_v31  ;;  %2597 = vmatpush1.msra.mxu0 %v2408_v52  ;;  %v2401_v31 = vld [vmem:[#allocation13 + $0x538] sm:$0xff] }
 0x9ff   : > { %2598 = vmatprep.subr.mxu0 %v2405_v29 }
 0xa00   : > { %2086 = vadd.xlane.f32.xlu1 %v2085_v37  ;;  %v2400_v37 = vld [vmem:[#allocation13 + $0x530] sm:$0xff]  ;;  %2599 = vmatpush1.msra.mxu0 %v2404_v51 }
 0xa01   : > { %2600 = vmatprep.subr.mxu0 %v2401_v31 }
 0xa02   : > { %2083 = vadd.xlane.f32.xlu0 %v2082_v41  ;;  %v2396_v41 = vld [vmem:[#allocation13 + $0x510] sm:$0xff]  ;;  %2601 = vmatpush1.msra.mxu0 %v2400_v37 }
 0xa03   : > { %2602 = vmatprep.subr.mxu0 %v2397_v59 }
 0xa04   : > { %2603 = vmatpush1.msra.mxu0 %v2396_v41 }
 0xa05   : > { %2604 = vmatprep.subr.mxu0 %v2393_v18 }
 0xa11   : > { %2181 = vperm.xlu1 %7553, %v7315_v56   ;;  %v2392_v56 = vld [vmem:[#allocation13 + $0x4f0] sm:$0xff] }
 0xa12   : > { %2605 = vmatpush1.msra.mxu0 %v2392_v56 }
 0xa13   : > { %2606 = vmatprep.subr.mxu0 %v2389_v42 }
 0xa14   : > { %2607 = vmatpush1.msra.mxu0 %v2388_v34 }
 0xa15   : > { %2608 = vmatprep.subr.mxu0 %v2385_v47 }
 0xa16   : > { %2609 = vmatpush1.msra.mxu0 %v2384_v43 }
 0xa17   : > { %2610 = vmatprep.subr.mxu0 %v2381_v55 }
 0xa18   : > { %2611 = vmatpush1.msra.mxu0 %v2380_v32  ;;  %v2372_v32 = vld [vmem:[#allocation13 + $0x450] sm:$0xff] }
 0xa19   : > { %2612 = vmatprep.subr.mxu0 %v2377_v7 }
 0xa1a   : > { %2613 = vmatpush1.msra.mxu0 %v2376_v35  ;;  %v2369_v35 = vld [vmem:[#allocation13 + $0x438] sm:$0xff] }
 0xa1b   : > { %2614 = vmatprep.subr.mxu0 %v2373_v50 }
 0xa1c   : > { %2615 = vmatpush1.msra.mxu0 %v2372_v32 }
 0xa1d   : > { %2616 = vmatprep.subr.mxu0 %v2369_v35 }
 0xa85   : > { %v1818_v52 = vpop.xlane.xlu1 %1817 }
 0xa86   : > { %7583 = vrcp.f32 %v1818_v52  ;;  %v2368_v52 = vld [vmem:[#allocation13 + $0x430] sm:$0xff] }
 0xa87   : > { %v1815_v29 = vpop.xlane.xlu0 %1814  ;;  %2617 = vmatpush1.msra.mxu0 %v2368_v52  ;;  %v9934_v52 = vrot.slane %v9807_v1, %v9428_v10 }
 0xa88   : > { %7585 = vrcp.f32 %v1815_v29  ;;  %v2365_v29 = vld [vmem:[#allocation13 + $0x418] sm:$0xff] }
 0xa89   : > { %v2087_v51 = vpop.xlane.xlu1 %2086  ;;  %2618 = vmatprep.subr.mxu0 %v2365_v29 }
 0xa8a   : > { %v2096_v31 = vmul.f32 0.00390625, %v2087_v51  ;;  %v2364_v51 = vld [vmem:[#allocation13 + $0x410] sm:$0xff] }
 0xa8b   : > { %v2084_v37 = vpop.xlane.xlu0 %2083  ;;  %2619 = vmatpush1.msra.mxu0 %v2364_v51 }
 0xa8c   : > { %v2095_v59 = vmul.f32 0.00390625, %v2084_v37  ;;  %v9855_v41 = vsub.f32 %v9837_v44, %v2096_v31  ;;  %v9858_v18 = vsub.f32 %v9830_v45, %v2096_v31  ;;  %v2489_v31 = vld [vmem:[#allocation13 + $0x7f8] sm:$0xff]  ;;  %v2484_v37 = vld [vmem:[#allocation13 + $0x7d0] sm:$0xff] }
 0xa8d   : > { %2620 = vmatprep.subr.mxu0 %v2489_v31  ;;  %v2358_v31 = vld [vmem:[#allocation2] sm:$0xe0] }
 0xa8e   : > { %v9861_v56 = vsub.f32 %v9847_v40, %v2095_v59  ;;  %v9864_v42 = vsub.f32 %v9840_v58, %v2095_v59  ;;  %v2109_v44 = vmul.f32 %v9855_v41, %v9855_v41  ;;  %v2110_v45 = vmul.f32 %v9858_v18, %v9858_v18  ;;  %v2481_v59 = vld [vmem:[#allocation13 + $0x7b8] sm:$0xff] }
 0xa90   : > { %v2107_v34 = vmul.f32 %v9861_v56, %v9861_v56  ;;  %v2108_v47 = vmul.f32 %v9864_v42, %v9864_v42  ;;  %v2118_v7 = vadd.f32 %v2110_v45, %v2109_v44  ;;  %v2437_v44 = vld [vmem:[#allocation13 + $0x658] sm:$0xff] }
 0xa92   : > { %v2115_v43 = vadd.f32 %v2108_v47, %v2107_v34  ;;  %v2480_v34 = vld [vmem:[#allocation13 + $0x7b0] sm:$0xff] }
 0xa93   : > { %v7584_v55 = vpop.eup %7583  ;;  %v2464_v47 = vld [vmem:[#allocation13 + $0x730] sm:$0xff] }
 0xa94   : > { %2116 = vadd.xlane.f32.xlu0 %v2115_v43  ;;  %v1822_v50 = vmul.f32 %v7584_v55, %v9826_v14  ;;  %v2485_v14 = vld [vmem:[#allocation13 + $0x7d8] sm:$0xff] }
 0xa95   : > { %v7586_v40 = vpop.eup %7585 }
 0xa96   : > { %v1820_v58 = vmul.f32 %v7586_v40, %v9834_v48  ;;  %v2488_v48 = vld [vmem:[#allocation13 + $0x7f0] sm:$0xff] }
 0xa97   : > { %2621 = vmatpush2.msra.mxu0 %v2488_v48  ;;  %v2357_v48 = vld [vmem:[#allocation2 + $0x70] sm:$0xe0] }
 0xa98   : > { %7422 = vmatprep.mubr.msk.f32.mxu1 %vm1024_vm1, %v1820_v58  ;;  %2119 = vadd.xlane.f32.xlu0 %v2118_v7 }
 0xa99   : > { %7423 = vmatmul.mubr.msk.f32.vlgmr.msra.gmra.mxu1 %vm1024_vm1, %v1822_v50  ;;  %2622 = vmatprep.subr.mxu0 %v2485_v14  ;;  %v9930_v50 = vrot.slane %v9810_v36, %v9428_v10 }
 0xa9a   : > { %1905 = vmatpush1.msra.mxu1 %v9666_v60  ;;  %2623 = vmatpush2.msra.mxu0 %v2484_v37  ;;  %v2477_v60 = vld [vmem:[#allocation13 + $0x798] sm:$0xff]  ;;  %v9938_v37 = vpop.permute.xlu1 %2181 }
 0xa9b   : > { %1906 = vmatprep.subr.mxu1 %v9669_v61  ;;  %2624 = vmatprep.subr.mxu0 %v2481_v59  ;;  %v2476_v61 = vld [vmem:[#allocation13 + $0x790] sm:$0xff] }
 0xa9c   : > { %1907 = vmatpush1.msra.mxu1 %v9672_v63  ;;  %2625 = vmatpush2.msra.mxu0 %v2480_v34  ;;  %v2473_v63 = vld [vmem:[#allocation13 + $0x778] sm:$0xff]  ;;  %v2500_v34 = vrot.slane %v2358_v31, 5 }
 0xa9d   : > { %1908 = vmatprep.subr.mxu1 %v9675_v0  ;;  %2626 = vmatprep.subr.mxu0 %v2477_v60  ;;  %v2472_v0 = vld [vmem:[#allocation13 + $0x770] sm:$0xff]  ;;  %v2252_v31 = vld [vmem:[#allocation13 + $0xb8] sm:$0xff] }
 0xa9e   : > { %1909 = vmatpush1.msra.mxu1 %v9679_v2  ;;  %2627 = vmatpush2.msra.mxu0 %v2476_v61  ;;  %v9889_v2 = vadd.s32 8, %v9415_v13 }
 0xa9f   : > { %1910 = vmatprep.subr.mxu1 %v9682_v4  ;;  %2628 = vmatprep.subr.mxu0 %v2473_v63  ;;  %v2469_v4 = vld [vmem:[#allocation13 + $0x758] sm:$0xff] }
 0xaa0   : > { %1911 = vmatpush1.msra.mxu1 %v9685_v5  ;;  %2629 = vmatpush2.msra.mxu0 %v2472_v0  ;;  %v2468_v5 = vld [vmem:[#allocation13 + $0x750] sm:$0xff]  ;;  %vm940_vm4 = vcmp.lt.s32.totalorder %v9889_v2, %v9499_v57 }
 0xaa1   : > { %1912 = vmatprep.subr.mxu1 %v9688_v6  ;;  %2630 = vmatprep.subr.mxu0 %v2469_v4  ;;  %v2465_v6 = vld [vmem:[#allocation13 + $0x738] sm:$0xff]  ;;  %v2452_v57 = vld [vmem:[#allocation13 + $0x6d0] sm:$0xff] }
 0xaa2   : > { %1913 = vmatpush1.msra.mxu1 %v9691_v12  ;;  %2631 = vmatpush2.msra.mxu0 %v2468_v5  ;;  %v2461_v12 = vld [vmem:[#allocation13 + $0x718] sm:$0xff] }
 0xaa3   : > { %1914 = vmatprep.subr.mxu1 %v9694_v16  ;;  %2632 = vmatprep.subr.mxu0 %v2465_v6  ;;  %v2460_v16 = vld [vmem:[#allocation13 + $0x710] sm:$0xff] }
 0xaa4   : > { %1915 = vmatpush1.msra.mxu1 %v9697_v8  ;;  %2633 = vmatpush2.msra.mxu0 %v2464_v47  ;;  %v2457_v8 = vld [vmem:[#allocation13 + $0x6f8] sm:$0xff] }
 0xaa5   : > { %1916 = vmatprep.subr.mxu1 %v9700_v9  ;;  %2634 = vmatprep.subr.mxu0 %v2461_v12  ;;  %v2456_v9 = vld [vmem:[#allocation13 + $0x6f0] sm:$0xff] }
 0xaa6   : > { %1917 = vmatpush1.msra.mxu1 %v9703_v17  ;;  %v9900_v17 = vld [vmem:[#allocation2 + $0x70] sm:$0xff]  ;;  %2635 = vmatpush2.msra.mxu0 %v2460_v16 }
 0xaa7   : > { %1918 = vmatprep.subr.mxu1 %v9706_v22  ;;  %v7316_v43 = vsel %vm940_vm4, 1.0, %v9900_v17  ;;  %v2453_v22 = vld [vmem:[#allocation13 + $0x6d8] sm:$0xff]  ;;  %2636 = vmatprep.subr.mxu0 %v2457_v8 }
 0xaa8   : > { %1919 = vmatpush1.msra.mxu1 %v9709_v46  ;;  %2637 = vmatpush2.msra.mxu0 %v2456_v9  ;;  %v2449_v46 = vld [vmem:[#allocation13 + $0x6b8] sm:$0xff]  ;;  %v2291_v9 = vld [vmem:[#allocation13 + $0x1f0] sm:$0xff] }
 0xaa9   : > { %1920 = vmatprep.subr.mxu1 %v9712_v3  ;;  %2638 = vmatprep.subr.mxu0 %v2453_v22  ;;  %v2448_v3 = vld [vmem:[#allocation13 + $0x6b0] sm:$0xff] }
 0xaaa   : > { %1921 = vmatpush1.msra.mxu1 %v9715_v53  ;;  %2639 = vmatpush2.msra.mxu0 %v2452_v57  ;;  %v2445_v53 = vld [vmem:[#allocation13 + $0x698] sm:$0xff]  ;;  %v2287_v22 = vld [vmem:[#allocation13 + $0x1d0] sm:$0xff] }
 0xaab   : > { %1922 = vmatprep.subr.mxu1 %v9718_v21  ;;  %2640 = vmatprep.subr.mxu0 %v2449_v46  ;;  %v2444_v21 = vld [vmem:[#allocation13 + $0x690] sm:$0xff]  ;;  %v2284_v57 = vld [vmem:[#allocation13 + $0x1b8] sm:$0xff] }
 0xaac   : > { %1923 = vmatpush1.msra.mxu1 %v9721_v54  ;;  %2641 = vmatpush2.msra.mxu0 %v2448_v3  ;;  %v2441_v54 = vld [vmem:[#allocation13 + $0x678] sm:$0xff]  ;;  %v2283_v46 = vld [vmem:[#allocation13 + $0x1b0] sm:$0xff] }
 0xaad   : > { %1924 = vmatprep.subr.mxu1 %v9724_v33  ;;  %2642 = vmatprep.subr.mxu0 %v2445_v53  ;;  %v2440_v33 = vld [vmem:[#allocation13 + $0x670] sm:$0xff]  ;;  %v2280_v3 = vld [vmem:[#allocation13 + $0x198] sm:$0xff] }
 0xaae   : > { %2186 = vperm.xlu0 %7554, %v7316_v43   ;;  %1925 = vmatpush1.msra.mxu1 %v9727_v49  ;;  %v2436_v49 = vld [vmem:[#allocation13 + $0x650] sm:$0xff]  ;;  %v2288_v43 = vld [vmem:[#allocation13 + $0x1d8] sm:$0xff] }
 0xaaf   : > { %1926 = vmatprep.subr.mxu1 %v9730_v19  ;;  %2643 = vmatpush2.msra.mxu0 %v2444_v21  ;;  %v2433_v19 = vld [vmem:[#allocation13 + $0x638] sm:$0xff]  ;;  %v2279_v53 = vld [vmem:[#allocation13 + $0x190] sm:$0xff] }
 0xab0   : > { %1927 = vmatpush1.msra.mxu1 %v9733_v11  ;;  %2644 = vmatprep.subr.mxu0 %v2441_v54  ;;  %v2432_v11 = vld [vmem:[#allocation13 + $0x630] sm:$0xff]  ;;  %v2224_v21 = vld [vmem:[#allocation2] sm:$0xf0] }
 0xab1   : > { %1928 = vmatprep.subr.mxu1 %v9736_v20  ;;  %2645 = vmatpush2.msra.mxu0 %v2440_v33  ;;  %v2429_v20 = vld [vmem:[#allocation13 + $0x618] sm:$0xff]  ;;  %v2275_v33 = vld [vmem:[#allocation13 + $0x170] sm:$0xff] }
 0xab2   : > { %1929 = vmatpush1.msra.mxu1 %v9739_v23  ;;  %2646 = vmatprep.subr.mxu0 %v2437_v44  ;;  %v2428_v23 = vld [vmem:[#allocation13 + $0x610] sm:$0xff]  ;;  %v2276_v54 = vld [vmem:[#allocation13 + $0x178] sm:$0xff] }
 0xab3   : > { %1930 = vmatprep.subr.mxu1 %v9742_v24  ;;  %2647 = vmatpush2.msra.mxu0 %v2436_v49  ;;  %v2292_v24 = vld [vmem:[#allocation13 + $0x1f8] sm:$0xff] }
 0xab4   : > { %1931 = vmatpush1.msra.mxu1 %v9745_v25  ;;  %2648 = vmatprep.subr.mxu0 %v2433_v19  ;;  %v2423_v25 = vld [vmem:[#allocation13 + $0x5e8] sm:$0xff]  ;;  %v2272_v19 = vld [vmem:[#allocation13 + $0x158] sm:$0xff] }
 0xab5   : > { %1932 = vmatprep.subr.mxu1 %v9748_v62  ;;  %2649 = vmatpush2.msra.mxu0 %v2432_v11 }
 0xab6   : > { %1933 = vmatpush1.msra.mxu1 %v9751_v26  ;;  %2650 = vmatprep.subr.mxu0 %v2429_v20 }
 0xab7   : > { %1934 = vmatprep.subr.mxu1 %v9754_v28  ;;  %1968 = vmatprep.mubr.f32.mxu1 %v9900_v17  ;;  %v9920_v28 = vrot.slane %v9810_v36, %v9442_v27 }
 0xab8   : > { %1935 = vmatpush1.msra.mxu1 %v9757_v30  ;;  %2651 = vmatpush2.msra.mxu0 %v2428_v23  ;;  %v9924_v30 = vrot.slane %v9807_v1, %v9442_v27  ;;  %v2497_v1 = vrot.slane %v2357_v48, 5  ;;  %v2673_v23 = vrot.slane %v2224_v21, 4  ;;  %v2251_v48 = vld [vmem:[#allocation13 + $0xb0] sm:$0xff]  ;;  %v2410_v21 = vld [vmem:[#allocation13 + $0x580] sm:$0xff] }
 0xab9   : > { %2761 = vmatprep.subr.mxu0 %v2292_v24  ;;  %2511 = vmatprep.subr.mxu1 %v2423_v25  ;;  %v2271_v25 = vld [vmem:[#allocation13 + $0x150] sm:$0xff] }
 0xb1d   : > { %v2117_v62 = vpop.xlane.xlu0 %2116 }
 0xb1e   : > { %v2127_v45 = vmul.f32 0.00390625, %v2117_v62  ;;  %v2268_v62 = vld [vmem:[#allocation13 + $0x138] sm:$0xff] }
 0xb20   : > { %v2131_v55 = vadd.f32 1e-05, %v2127_v45 }
 0xb21   : > { %v2120_v26 = vpop.xlane.xlu0 %2119 }
 0xb22   : > { %7587 = vrsqrt.f32 %v2131_v55  ;;  %v2128_v40 = vmul.f32 0.00390625, %v2120_v26  ;;  %v2267_v26 = vld [vmem:[#allocation13 + $0x130] sm:$0xff] }
 0xb24   : > { %v2132_v32 = vadd.f32 1e-05, %v2128_v40  ;;  %v2264_v40 = vld [vmem:[#allocation13 + $0x118] sm:$0xff] }
 0xb26   : > { %7589 = vrsqrt.f32 %v2132_v32 }
 0xb29   : > { %v9952_v4 = vpop.permute.xlu0 %2186 }
 0xb2f   : > { %v7588_v58 = vpop.eup %7587 }
 0xb30   : > { %v2139_v7 = vmul.f32 %v7588_v58, %v9861_v56  ;;  %v2140_v35 = vmul.f32 %v7588_v58, %v9864_v42  ;;  %v2263_v58 = vld [vmem:[#allocation13 + $0x110] sm:$0xff] }
 0xb32   : > { %v2155_v29 = vmul.f32 %v9920_v28, %v2139_v7  ;;  %v2156_v51 = vmul.f32 %v9924_v30, %v2140_v35  ;;  %v2260_v7 = vld [vmem:[#allocation13 + $0xf8] sm:$0xff]  ;;  %v2259_v35 = vld [vmem:[#allocation13 + $0xf0] sm:$0xff] }
 0xb33   : > { %v7590_v14 = vpop.eup %7589 }
 0xb34   : > { %v2171_v56 = vadd.f32 %v9930_v50, %v2155_v29  ;;  %v2172_v42 = vadd.f32 %v9934_v52, %v2156_v51  ;;  %v2141_v36 = vmul.f32 %v7590_v14, %v9855_v41  ;;  %v2142_v59 = vmul.f32 %v7590_v14, %v9858_v18  ;;  %v2256_v29 = vld [vmem:[#allocation13 + $0xd8] sm:$0xff]  ;;  %v2255_v51 = vld [vmem:[#allocation13 + $0xd0] sm:$0xff] }
 0xb35   : > { %v2248_v14 = vld [vmem:[#allocation13 + $0x98] sm:$0xff] }
 0xb36   : > { %v9945_v60 = vmul.f32 %v9938_v37, %v2171_v56  ;;  %v9948_v61 = vmul.f32 %v9938_v37, %v2172_v42  ;;  %v2157_v63 = vmul.f32 %v9920_v28, %v2141_v36  ;;  %v2158_v0 = vmul.f32 %v9924_v30, %v2142_v59  ;;  %v2247_v56 = vld [vmem:[#allocation13 + $0x90] sm:$0xff]  ;;  %v2244_v42 = vld [vmem:[#allocation13 + $0x78] sm:$0xff] }
 0xb37   : > { %v2243_v36 = vld [vmem:[#allocation13 + $0x70] sm:$0xff]  ;;  %v2240_v59 = vld [vmem:[#allocation13 + $0x58] sm:$0xff] }
 0xb38   : > { %2215 = vst [vmem:[#allocation2 + $0x10] sm:$0xff] %v9945_v60  ;;  %2216 = vst [vmem:[#allocation2 + $0x30] sm:$0xff] %v9948_v61  ;;  %v2173_v41 = vadd.f32 %v9930_v50, %v2157_v63  ;;  %v2174_v18 = vadd.f32 %v9934_v52, %v2158_v0  ;;  %v2501_v5 = vrot.slane %v9948_v61, 5  ;;  %v2498_v6 = vrot.slane %v9945_v60, 5  ;;  %v2235_v63 = vld [vmem:[#allocation13 + $0x30] sm:$0xff]  ;;  %v2232_v0 = vld [vmem:[#allocation13 + $0x18] sm:$0xff] }
 0xb39   : > { %v2674_v24 = vrot.slane %v9948_v61, 4 }
 0xb3a   : > { %v2201_v47 = vmul.f32 %v9952_v4, %v2173_v41  ;;  %v2202_v12 = vmul.f32 %v9952_v4, %v2174_v18  ;;  %v9963_v16 = vsel %vm2496_vm5, %v2500_v34, %v2501_v5  ;;  %v9966_v8 = vsel %vm2496_vm5, %v2497_v1, %v2498_v6  ;;  %v2239_v34 = vld [vmem:[#allocation13 + $0x50] sm:$0xff]  ;;  %v2236_v1 = vld [vmem:[#allocation13 + $0x38] sm:$0xff] }
 0xb3b   : > { %2652 = vmatprep.mubr.f32.mxu0 %v9963_v16  ;;  %v9982_v32 = vsel %vm2669_vm6, %v2673_v23, %v2674_v24  ;;  %v2231_v41 = vld [vmem:[#allocation13 + $0x10] sm:$0xff]  ;;  %v2340_v23 = vld [vmem:[#allocation13 + $0x378] sm:$0xff] }
 0xb3c   : > { %2217 = vst [vmem:[#allocation2 + $0x40] sm:$0xff] %v2201_v47  ;;  %2218 = vst [vmem:[#allocation2 + $0x78] sm:$0xff] %v2202_v12  ;;  %2653 = vmatmul.mubr.f32.vlgmr.msra.gmra.mxu0 %v9966_v8  ;;  %v2419_v12 = vld [vmem:[#allocation13 + $0x5c8] sm:$0xff] }
 0xb3d   : > { %2762 = vmatpush1.msra.mxu0 %v2291_v9  ;;  %v2355_v9 = vld [vmem:[#allocation13 + $0x3f0] sm:$0xff] }
 0xb3e   : > { %2763 = vmatprep.subr.mxu0 %v2288_v43  ;;  %v2418_v43 = vld [vmem:[#allocation13 + $0x5c0] sm:$0xff] }
 0xb3f   : > { %2764 = vmatpush1.msra.mxu0 %v2287_v22  ;;  %v2352_v22 = vld [vmem:[#allocation13 + $0x3d8] sm:$0xff] }
 0xb40   : > { %2765 = vmatprep.subr.mxu0 %v2284_v57  ;;  %v2415_v57 = vld [vmem:[#allocation13 + $0x5a8] sm:$0xff] }
 0xb41   : > { %2766 = vmatpush1.msra.mxu0 %v2283_v46  ;;  %v2414_v46 = vld [vmem:[#allocation13 + $0x5a0] sm:$0xff] }
 0xb42   : > { %2767 = vmatprep.subr.mxu0 %v2280_v3  ;;  %v2411_v3 = vld [vmem:[#allocation13 + $0x588] sm:$0xff] }
 0xb43   : > { %v2360_v44 = vld [vmem:[#allocation2 + $0x78] sm:$0x1f]  ;;  %v2359_v49 = vld [vmem:[#allocation2 + $0x40] sm:$0x1f]  ;;  %2768 = vmatpush1.msra.mxu0 %v2279_v53 }
 0xb44   : > { %v2505_v11 = vrot.slane %v2360_v44, 5  ;;  %v2503_v20 = vrot.slane %v2359_v49, 5  ;;  %2769 = vmatprep.subr.mxu0 %v2276_v54  ;;  %v2351_v53 = vld [vmem:[#allocation13 + $0x3d0] sm:$0xff]  ;;  %v2348_v54 = vld [vmem:[#allocation13 + $0x3b8] sm:$0xff]  ;;  %v2406_v49 = vld [vmem:[#allocation13 + $0x560] sm:$0xff] }
 0xb45   : > { %2770 = vmatpush1.msra.mxu0 %v2275_v33  ;;  %v2407_v33 = vld [vmem:[#allocation13 + $0x568] sm:$0xff]  ;;  %v2347_v44 = vld [vmem:[#allocation13 + $0x3b0] sm:$0xff] }
 0xb46   : > { %v9972_v45 = vsel %vm2496_vm5, %v2501_v5, %v2505_v11  ;;  %v9975_v55 = vsel %vm2496_vm5, %v2498_v6, %v2503_v20  ;;  %2771 = vmatprep.subr.mxu0 %v2272_v19  ;;  %v2356_v5 = vld [vmem:[#allocation13 + $0x3f8] sm:$0xff]  ;;  %v2422_v6 = vld [vmem:[#allocation13 + $0x5e0] sm:$0xff]  ;;  %v2403_v19 = vld [vmem:[#allocation13 + $0x548] sm:$0xff] }
 0xb47   : > { %2658 = vmatprep.mubr.f32.mxu0 %v9972_v45  ;;  %2772 = vmatpush1.msra.mxu0 %v2271_v25  ;;  %v2343_v11 = vld [vmem:[#allocation13 + $0x390] sm:$0xff]  ;;  %v2402_v20 = vld [vmem:[#allocation13 + $0x540] sm:$0xff]  ;;  %v2399_v25 = vld [vmem:[#allocation13 + $0x528] sm:$0xff] }
 0xb48   : > { %2659 = vmatmul.mubr.f32.gmra.mxu0 %v9975_v55  ;;  %2773 = vmatprep.subr.mxu0 %v2268_v62  ;;  %v2339_v62 = vld [vmem:[#allocation13 + $0x370] sm:$0xff] }
 0xb49   : > { %2825 = vmatprep.mubr.f32.mxu0 %v9982_v32  ;;  %2774 = vmatpush1.msra.mxu0 %v2267_v26  ;;  %v2336_v26 = vld [vmem:[#allocation13 + $0x358] sm:$0xff] }
 0xb4a   : > { %2775 = vmatprep.subr.mxu0 %v2264_v40  ;;  %v2395_v40 = vld [vmem:[#allocation13 + $0x508] sm:$0xff] }
 0xb4b   : > { %2776 = vmatpush1.msra.mxu0 %v2263_v58  ;;  %v2335_v58 = vld [vmem:[#allocation13 + $0x350] sm:$0xff] }
 0xb4c   : > { %2777 = vmatprep.subr.mxu0 %v2260_v7  ;;  %v2394_v7 = vld [vmem:[#allocation13 + $0x500] sm:$0xff] }
 0xb4d   : > { %2778 = vmatpush1.msra.mxu0 %v2259_v35  ;;  %v2332_v35 = vld [vmem:[#allocation13 + $0x338] sm:$0xff] }
 0xb4e   : > { %2779 = vmatprep.subr.mxu0 %v2256_v29  ;;  %v2391_v29 = vld [vmem:[#allocation13 + $0x4e8] sm:$0xff] }
 0xb4f   : > { %2780 = vmatpush1.msra.mxu0 %v2255_v51  ;;  %v2331_v51 = vld [vmem:[#allocation13 + $0x330] sm:$0xff] }
 0xb50   : > { %2781 = vmatprep.subr.mxu0 %v2252_v31  ;;  %v2390_v31 = vld [vmem:[#allocation13 + $0x4e0] sm:$0xff] }
 0xb51   : > { %2782 = vmatpush1.msra.mxu0 %v2251_v48  ;;  %v2328_v48 = vld [vmem:[#allocation13 + $0x318] sm:$0xff] }
 0xb52   : > { %2783 = vmatprep.subr.mxu0 %v2248_v14  ;;  %v2387_v14 = vld [vmem:[#allocation13 + $0x4c8] sm:$0xff] }
 0xb53   : > { %2784 = vmatpush1.msra.mxu0 %v2247_v56  ;;  %v2327_v56 = vld [vmem:[#allocation13 + $0x310] sm:$0xff] }
 0xb54   : > { %2785 = vmatprep.subr.mxu0 %v2244_v42  ;;  %v2386_v42 = vld [vmem:[#allocation13 + $0x4c0] sm:$0xff] }
 0xb55   : > { %2786 = vmatpush1.msra.mxu0 %v2243_v36  ;;  %v2324_v36 = vld [vmem:[#allocation13 + $0x2f8] sm:$0xff] }
 0xb56   : > { %2787 = vmatprep.subr.mxu0 %v2240_v59  ;;  %v2383_v59 = vld [vmem:[#allocation13 + $0x4a8] sm:$0xff] }
 0xb57   : > { %2788 = vmatpush1.msra.mxu0 %v2239_v34  ;;  %v2323_v34 = vld [vmem:[#allocation13 + $0x2f0] sm:$0xff] }
 0xb58   : > { %2789 = vmatprep.subr.mxu0 %v2236_v1  ;;  %v2382_v1 = vld [vmem:[#allocation13 + $0x4a0] sm:$0xff] }
 0xb59   : > { %v7424_v18 = vpop.f32.mrf.mxu1  ;;  %2790 = vmatpush1.msra.mxu0 %v2235_v63  ;;  %v2320_v63 = vld [vmem:[#allocation13 + $0x2d8] sm:$0xff] }
 0xb5a   : > { %2791 = vmatprep.subr.mxu0 %v2232_v0  ;;  %v2379_v0 = vld [vmem:[#allocation13 + $0x488] sm:$0xff] }
 0xb5b   : > { %v1895_v47 = vpop.f32.mrf.mxu1  ;;  %2792 = vmatpush1.msra.mxu0 %v2231_v41  ;;  %v2319_v41 = vld [vmem:[#allocation13 + $0x2d0] sm:$0xff] }
 0xb5c   : > { %1969 = vmatmul.mubr.f32.vlgmr.msra.gmra.mxu1 %v1895_v47  ;;  %2793 = vmatprep.subr.mxu0 %v2356_v5  ;;  %v2316_v5 = vld [vmem:[#allocation13 + $0x2b8] sm:$0xff]  ;;  %v2315_v47 = vld [vmem:[#allocation13 + $0x2b0] sm:$0xff] }
 0xb5d   : > { %2512 = vmatpush1.msra.mxu1 %v2422_v6  ;;  %1974 = vmatprep.mubr.f32.mxu1 %v9900_v17  ;;  %v2344_v17 = vld [vmem:[#allocation13 + $0x398] sm:$0xff]  ;;  %v2375_v6 = vld [vmem:[#allocation13 + $0x468] sm:$0xff] }
 0xb5e   : > { %2513 = vmatprep.subr.mxu1 %v2419_v12  ;;  %2794 = vmatpush2.msra.mxu0 %v2355_v9  ;;  %v2374_v12 = vld [vmem:[#allocation13 + $0x460] sm:$0xff]  ;;  %v2312_v9 = vld [vmem:[#allocation13 + $0x298] sm:$0xff] }
 0xb5f   : > { %2514 = vmatpush1.msra.mxu1 %v2418_v43  ;;  %2795 = vmatprep.subr.mxu0 %v2352_v22  ;;  %v2371_v43 = vld [vmem:[#allocation13 + $0x448] sm:$0xff]  ;;  %v2311_v22 = vld [vmem:[#allocation13 + $0x290] sm:$0xff] }
 0xb60   : > { %2515 = vmatprep.subr.mxu1 %v2415_v57  ;;  %1975 = vmatmul.mubr.f32.gmra.mxu1 %v7424_v18  ;;  %v2378_v18 = vld [vmem:[#allocation13 + $0x480] sm:$0xff] }
 0xb61   : > { %2516 = vmatpush1.msra.mxu1 %v2414_v46  ;;  %2575 = vmatprep.mubr.f32.mxu1 %v9963_v16  ;;  %v2398_v16 = vld [vmem:[#allocation13 + $0x520] sm:$0xff]  ;;  %v2308_v46 = vld [vmem:[#allocation13 + $0x278] sm:$0xff] }
 0xb62   : > { %2517 = vmatprep.subr.mxu1 %v2411_v3  ;;  %2796 = vmatpush2.msra.mxu0 %v2351_v53  ;;  %v2370_v57 = vld [vmem:[#allocation13 + $0x440] sm:$0xff]  ;;  %v2367_v3 = vld [vmem:[#allocation13 + $0x428] sm:$0xff]  ;;  %v2307_v53 = vld [vmem:[#allocation13 + $0x270] sm:$0xff] }
 0xb63   : > { %2518 = vmatpush1.msra.mxu1 %v2410_v21  ;;  %2797 = vmatprep.subr.mxu0 %v2348_v54  ;;  %v2366_v21 = vld [vmem:[#allocation13 + $0x420] sm:$0xff]  ;;  %v2304_v54 = vld [vmem:[#allocation13 + $0x258] sm:$0xff] }
 0xb64   : > { %2519 = vmatprep.subr.mxu1 %v2407_v33  ;;  %2798 = vmatpush2.msra.mxu0 %v2347_v44  ;;  %v2363_v33 = vld [vmem:[#allocation13 + $0x408] sm:$0xff]  ;;  %v2303_v44 = vld [vmem:[#allocation13 + $0x250] sm:$0xff] }
 0xb65   : > { %2520 = vmatpush1.msra.mxu1 %v2406_v49  ;;  %2799 = vmatprep.subr.mxu0 %v2344_v17  ;;  %v2223_v49 = vld [vmem:[#allocation2 + $0x70] sm:$0xf0]  ;;  %v2362_v17 = vld [vmem:[#allocation13 + $0x400] sm:$0xff] }
 0xb66   : > { %2521 = vmatprep.subr.mxu1 %v2403_v19  ;;  %2800 = vmatpush2.msra.mxu0 %v2343_v11  ;;  %v2300_v19 = vld [vmem:[#allocation13 + $0x238] sm:$0xff]  ;;  %v2487_v11 = vld [vmem:[#allocation13 + $0x7e8] sm:$0xff] }
 0xb67   : > { %2522 = vmatpush1.msra.mxu1 %v2402_v20  ;;  %2801 = vmatprep.subr.mxu0 %v2340_v23  ;;  %v2299_v20 = vld [vmem:[#allocation13 + $0x230] sm:$0xff] }
 0xb68   : > { %2523 = vmatprep.subr.mxu1 %v2399_v25  ;;  %2802 = vmatpush2.msra.mxu0 %v2339_v62  ;;  %v2228_v23 = vld [vmem:[#allocation2 + $0x78] sm:$0xf]  ;;  %v2486_v25 = vld [vmem:[#allocation13 + $0x7e0] sm:$0xff]  ;;  %v2296_v62 = vld [vmem:[#allocation13 + $0x218] sm:$0xff] }
 0xb69   : > { %2524 = vmatpush1.msra.mxu1 %v2398_v16  ;;  %2803 = vmatprep.subr.mxu0 %v2336_v26  ;;  %v2670_v16 = vrot.slane %v2223_v49, 4  ;;  %v2671_v26 = vrot.slane %v9945_v60, 4  ;;  %v2475_v60 = vld [vmem:[#allocation13 + $0x788] sm:$0xff]  ;;  %v2454_v49 = vld [vmem:[#allocation13 + $0x6e0] sm:$0xff] }
 0xb6a   : > { %2525 = vmatprep.subr.mxu1 %v2395_v40  ;;  %2804 = vmatpush2.msra.mxu0 %v2335_v58  ;;  %v2483_v40 = vld [vmem:[#allocation13 + $0x7c8] sm:$0xff]  ;;  %v2295_v58 = vld [vmem:[#allocation13 + $0x210] sm:$0xff] }
 0xb6b   : > { %2526 = vmatpush1.msra.mxu1 %v2394_v7  ;;  %2805 = vmatprep.subr.mxu0 %v2332_v35  ;;  %v2482_v7 = vld [vmem:[#allocation13 + $0x7c0] sm:$0xff]  ;;  %v2678_v35 = vrot.slane %v2228_v23, 4  ;;  %v2882_v23 = vld [vmem:[#allocation13 + $0x938] sm:$0xff] }
 0xb6c   : > { %2527 = vmatprep.subr.mxu1 %v2391_v29  ;;  %2806 = vmatpush2.msra.mxu0 %v2331_v51  ;;  %v2479_v29 = vld [vmem:[#allocation13 + $0x7a8] sm:$0xff]  ;;  %v2906_v51 = vld [vmem:[#allocation13 + $0x9f8] sm:$0xff] }
 0xb6d   : > { %2528 = vmatpush1.msra.mxu1 %v2390_v31  ;;  %2807 = vmatprep.subr.mxu0 %v2328_v48  ;;  %v2227_v31 = vld [vmem:[#allocation2 + $0x40] sm:$0xf]  ;;  %v2478_v48 = vld [vmem:[#allocation13 + $0x7a0] sm:$0xff] }
 0xb6e   : > { %2529 = vmatprep.subr.mxu1 %v2387_v14  ;;  %2808 = vmatpush2.msra.mxu0 %v2327_v56  ;;  %v9989_v14 = vsel %vm2669_vm6, %v2670_v16, %v2671_v26  ;;  %v2905_v56 = vld [vmem:[#allocation13 + $0x9f0] sm:$0xff]  ;;  %v2446_v16 = vld [vmem:[#allocation13 + $0x6a0] sm:$0xff] }
 0xb6f   : > { %2530 = vmatpush1.msra.mxu1 %v2386_v42  ;;  %2809 = vmatprep.subr.mxu0 %v2324_v36  ;;  %v2474_v42 = vld [vmem:[#allocation13 + $0x780] sm:$0xff]  ;;  %v9995_v36 = vsel %vm2669_vm6, %v2674_v24, %v2678_v35  ;;  %v2874_v35 = vld [vmem:[#allocation13 + $0x8f8] sm:$0xff] }
 0xb70   : > { %2531 = vmatprep.subr.mxu1 %v2383_v59  ;;  %2810 = vmatpush2.msra.mxu0 %v2323_v34  ;;  %v2902_v59 = vld [vmem:[#allocation13 + $0x9d8] sm:$0xff]  ;;  %v2676_v34 = vrot.slane %v2227_v31, 4  ;;  %v2466_v24 = vld [vmem:[#allocation13 + $0x740] sm:$0xff] }
 0xb71   : > { %2532 = vmatpush1.msra.mxu1 %v2382_v1  ;;  %2811 = vmatprep.subr.mxu0 %v2320_v63  ;;  %v2839_v1 = vld [vmem:[#allocation2] sm:$0xc0]  ;;  %v2471_v63 = vld [vmem:[#allocation13 + $0x768] sm:$0xff] }
 0xb72   : > { %2533 = vmatprep.subr.mxu1 %v2379_v0  ;;  %2812 = vmatpush2.msra.mxu0 %v2319_v41  ;;  %v2901_v0 = vld [vmem:[#allocation13 + $0x9d0] sm:$0xff]  ;;  %v2470_v41 = vld [vmem:[#allocation13 + $0x760] sm:$0xff] }
 0xb73   : > { %2534 = vmatpush1.msra.mxu1 %v2378_v18  ;;  %2813 = vmatprep.subr.mxu0 %v2316_v5  ;;  %v2467_v18 = vld [vmem:[#allocation13 + $0x748] sm:$0xff]  ;;  %v2898_v5 = vld [vmem:[#allocation13 + $0x9b8] sm:$0xff]  ;;  %v2438_v31 = vld [vmem:[#allocation13 + $0x660] sm:$0xff] }
 0xb74   : > { %2535 = vmatprep.subr.mxu1 %v2375_v6  ;;  %2814 = vmatpush2.msra.mxu0 %v2315_v47  ;;  %v2979_v6 = vrot.slane %v2839_v1, 6  ;;  %v2980_v47 = vrot.slane %v9948_v61, 6  ;;  %v2865_v1 = vld [vmem:[#allocation13 + $0x8b0] sm:$0xff]  ;;  %v2329_v61 = vld [vmem:[#allocation13 + $0x320] sm:$0xff] }
 0xb75   : > { %2536 = vmatpush1.msra.mxu1 %v2374_v12  ;;  %2815 = vmatprep.subr.mxu0 %v2312_v9  ;;  %v10000_v12 = vsel %vm2669_vm6, %v2671_v26, %v2676_v34  ;;  %v2897_v9 = vld [vmem:[#allocation13 + $0x9b0] sm:$0xff]  ;;  %v2878_v26 = vld [vmem:[#allocation13 + $0x918] sm:$0xff]  ;;  %v2431_v34 = vld [vmem:[#allocation13 + $0x628] sm:$0xff] }
 0xb76   : > { %2537 = vmatprep.subr.mxu1 %v2371_v43  ;;  %2816 = vmatpush2.msra.mxu0 %v2311_v22  ;;  %v2463_v43 = vld [vmem:[#allocation13 + $0x728] sm:$0xff]  ;;  %v2462_v22 = vld [vmem:[#allocation13 + $0x720] sm:$0xff] }
 0xb77   : > { %2538 = vmatpush1.msra.mxu1 %v2370_v57  ;;  %2817 = vmatprep.subr.mxu0 %v2308_v46  ;;  %v2894_v57 = vld [vmem:[#allocation13 + $0x998] sm:$0xff]  ;;  %v10006_v46 = vsel %vm2975_vm7, %v2979_v6, %v2980_v47 }
 0xb78   : > { %2539 = vmatprep.subr.mxu1 %v2367_v3  ;;  %2818 = vmatpush2.msra.mxu0 %v2307_v53  ;;  %v2459_v3 = vld [vmem:[#allocation13 + $0x708] sm:$0xff]  ;;  %v2893_v53 = vld [vmem:[#allocation13 + $0x990] sm:$0xff]  ;;  %v2858_v6 = vld [vmem:[#allocation13 + $0x878] sm:$0xff] }
 0xb79   : > { %2540 = vmatpush1.msra.mxu1 %v2366_v21  ;;  %2819 = vmatprep.subr.mxu0 %v2304_v54  ;;  %v2458_v21 = vld [vmem:[#allocation13 + $0x700] sm:$0xff]  ;;  %v2890_v54 = vld [vmem:[#allocation13 + $0x978] sm:$0xff] }
 0xb7a   : > { %2541 = vmatprep.subr.mxu1 %v2363_v33  ;;  %2820 = vmatpush2.msra.mxu0 %v2303_v44  ;;  %v2455_v33 = vld [vmem:[#allocation13 + $0x6e8] sm:$0xff]  ;;  %v2889_v44 = vld [vmem:[#allocation13 + $0x970] sm:$0xff] }
 0xb7b   : > { %2542 = vmatpush1.msra.mxu1 %v2362_v17  ;;  %2821 = vmatprep.subr.mxu0 %v2300_v19  ;;  %v2886_v17 = vld [vmem:[#allocation13 + $0x958] sm:$0xff]  ;;  %v2451_v19 = vld [vmem:[#allocation13 + $0x6c8] sm:$0xff] }
 0xb7c   : > { %2543 = vmatprep.subr.mxu1 %v2487_v11  ;;  %2822 = vmatpush2.msra.mxu0 %v2299_v20  ;;  %v2885_v11 = vld [vmem:[#allocation13 + $0x950] sm:$0xff]  ;;  %v2450_v20 = vld [vmem:[#allocation13 + $0x6c0] sm:$0xff] }
 0xb7d   : > { %2544 = vmatpush2.msra.mxu1 %v2486_v25  ;;  %2823 = vmatprep.subr.mxu0 %v2296_v62  ;;  %v2447_v25 = vld [vmem:[#allocation13 + $0x6a8] sm:$0xff]  ;;  %v2881_v62 = vld [vmem:[#allocation13 + $0x930] sm:$0xff] }
 0xb7e   : > { %2545 = vmatprep.subr.mxu1 %v2483_v40  ;;  %2824 = vmatpush2.msra.mxu0 %v2295_v58  ;;  %v2443_v40 = vld [vmem:[#allocation13 + $0x688] sm:$0xff]  ;;  %v2877_v58 = vld [vmem:[#allocation13 + $0x910] sm:$0xff] }
 0xb7f   : > { %2546 = vmatpush2.msra.mxu1 %v2482_v7  ;;  %2826 = vmatmul.mubr.f32.vlgmr.msra.gmra.mxu0 %v9989_v14  ;;  %v2442_v7 = vld [vmem:[#allocation13 + $0x680] sm:$0xff] }
 0xb80   : > { %2547 = vmatprep.subr.mxu1 %v2479_v29  ;;  %3067 = vmatprep.subr.mxu0 %v2906_v51  ;;  %v2439_v29 = vld [vmem:[#allocation13 + $0x668] sm:$0xff]  ;;  %v2873_v51 = vld [vmem:[#allocation13 + $0x8f0] sm:$0xff] }
 0xb81   : > { %2548 = vmatpush2.msra.mxu1 %v2478_v48  ;;  %2831 = vmatprep.mubr.f32.mxu0 %v9995_v36  ;;  %v2870_v48 = vld [vmem:[#allocation13 + $0x8d8] sm:$0xff] }
 0xb82   : > { %2549 = vmatprep.subr.mxu1 %v2475_v60  ;;  %3068 = vmatpush1.msra.mxu0 %v2905_v56  ;;  %v2435_v60 = vld [vmem:[#allocation13 + $0x648] sm:$0xff]  ;;  %v2869_v56 = vld [vmem:[#allocation13 + $0x8d0] sm:$0xff] }
 0xb83   : > { %2550 = vmatpush2.msra.mxu1 %v2474_v42  ;;  %3069 = vmatprep.subr.mxu0 %v2902_v59  ;;  %v2434_v42 = vld [vmem:[#allocation13 + $0x640] sm:$0xff]  ;;  %v2866_v59 = vld [vmem:[#allocation13 + $0x8b8] sm:$0xff] }
 0xb84   : > { %2551 = vmatprep.subr.mxu1 %v2471_v63  ;;  %3070 = vmatpush1.msra.mxu0 %v2901_v0  ;;  %v2430_v63 = vld [vmem:[#allocation13 + $0x620] sm:$0xff]  ;;  %v2862_v0 = vld [vmem:[#allocation13 + $0x898] sm:$0xff] }
 0xb85   : > { %2552 = vmatpush2.msra.mxu1 %v2470_v41  ;;  %2832 = vmatmul.mubr.f32.gmra.mxu0 %v10000_v12  ;;  %v2427_v41 = vld [vmem:[#allocation13 + $0x608] sm:$0xff] }
 0xb86   : > { %2553 = vmatprep.subr.mxu1 %v2467_v18  ;;  %3071 = vmatprep.subr.mxu0 %v2898_v5  ;;  %v2861_v18 = vld [vmem:[#allocation13 + $0x890] sm:$0xff]  ;;  %v2426_v5 = vld [vmem:[#allocation13 + $0x600] sm:$0xff] }
 0xb87   : > { %2554 = vmatpush2.msra.mxu1 %v2466_v24  ;;  %3072 = vmatpush1.msra.mxu0 %v2897_v9  ;;  %v2290_v24 = vld [vmem:[#allocation13 + $0x1e8] sm:$0xff]  ;;  %v2289_v9 = vld [vmem:[#allocation13 + $0x1e0] sm:$0xff] }
 0xb88   : > { %2555 = vmatprep.subr.mxu1 %v2463_v43  ;;  %3131 = vmatprep.mubr.f32.mxu0 %v10006_v46  ;;  %v2857_v43 = vld [vmem:[#allocation13 + $0x870] sm:$0xff] }
 0xb89   : > { %2556 = vmatpush2.msra.mxu1 %v2462_v22  ;;  %3073 = vmatprep.subr.mxu0 %v2894_v57  ;;  %v2286_v22 = vld [vmem:[#allocation13 + $0x1c8] sm:$0xff]  ;;  %v2854_v57 = vld [vmem:[#allocation13 + $0x858] sm:$0xff] }
 0xb8a   : > { %2557 = vmatprep.subr.mxu1 %v2459_v3  ;;  %3074 = vmatpush1.msra.mxu0 %v2893_v53  ;;  %v2285_v3 = vld [vmem:[#allocation13 + $0x1c0] sm:$0xff]  ;;  %v2853_v53 = vld [vmem:[#allocation13 + $0x850] sm:$0xff] }
 0xb8b   : > { %2558 = vmatpush2.msra.mxu1 %v2458_v21  ;;  %3075 = vmatprep.subr.mxu0 %v2890_v54  ;;  %v2282_v21 = vld [vmem:[#allocation13 + $0x1a8] sm:$0xff]  ;;  %v2850_v54 = vld [vmem:[#allocation13 + $0x838] sm:$0xff] }
 0xb8c   : > { %2559 = vmatprep.subr.mxu1 %v2455_v33  ;;  %3076 = vmatpush1.msra.mxu0 %v2889_v44  ;;  %v2281_v33 = vld [vmem:[#allocation13 + $0x1a0] sm:$0xff]  ;;  %v2849_v44 = vld [vmem:[#allocation13 + $0x830] sm:$0xff] }
 0xb8d   : > { %2560 = vmatpush2.msra.mxu1 %v2454_v49  ;;  %3077 = vmatprep.subr.mxu0 %v2886_v17  ;;  %v2278_v49 = vld [vmem:[#allocation13 + $0x188] sm:$0xff]  ;;  %v2277_v17 = vld [vmem:[#allocation13 + $0x180] sm:$0xff] }
 0xb8e   : > { %2561 = vmatprep.subr.mxu1 %v2451_v19  ;;  %3078 = vmatpush1.msra.mxu0 %v2885_v11  ;;  %v2274_v19 = vld [vmem:[#allocation13 + $0x168] sm:$0xff]  ;;  %v2970_v11 = vld [vmem:[#allocation13 + $0xbf8] sm:$0xff] }
 0xb8f   : > { %2562 = vmatpush2.msra.mxu1 %v2450_v20  ;;  %3079 = vmatprep.subr.mxu0 %v2882_v23  ;;  %v2273_v20 = vld [vmem:[#allocation13 + $0x160] sm:$0xff]  ;;  %v2969_v23 = vld [vmem:[#allocation13 + $0xbf0] sm:$0xff] }
 0xb90   : > { %2563 = vmatprep.subr.mxu1 %v2447_v25  ;;  %3080 = vmatpush1.msra.mxu0 %v2881_v62  ;;  %v2270_v25 = vld [vmem:[#allocation13 + $0x148] sm:$0xff]  ;;  %v2269_v62 = vld [vmem:[#allocation13 + $0x140] sm:$0xff] }
 0xb91   : > { %2564 = vmatpush2.msra.mxu1 %v2446_v16  ;;  %3081 = vmatprep.subr.mxu0 %v2878_v26  ;;  %v2965_v16 = vld [vmem:[#allocation13 + $0xbd0] sm:$0xff]  ;;  %v2266_v26 = vld [vmem:[#allocation13 + $0x128] sm:$0xff] }
 0xb92   : > { %2565 = vmatprep.subr.mxu1 %v2443_v40  ;;  %3082 = vmatpush1.msra.mxu0 %v2877_v58  ;;  %v2265_v40 = vld [vmem:[#allocation13 + $0x120] sm:$0xff]  ;;  %v2961_v58 = vld [vmem:[#allocation13 + $0xbb0] sm:$0xff] }
 0xb93   : > { %2566 = vmatpush2.msra.mxu1 %v2442_v7  ;;  %3083 = vmatprep.subr.mxu0 %v2874_v35  ;;  %v2262_v7 = vld [vmem:[#allocation13 + $0x108] sm:$0xff]  ;;  %v2958_v35 = vld [vmem:[#allocation13 + $0xb98] sm:$0xff] }
 0xb94   : > { %2567 = vmatprep.subr.mxu1 %v2439_v29  ;;  %3084 = vmatpush1.msra.mxu0 %v2873_v51  ;;  %v2261_v29 = vld [vmem:[#allocation13 + $0x100] sm:$0xff]  ;;  %v2957_v51 = vld [vmem:[#allocation13 + $0xb90] sm:$0xff] }
 0xb95   : > { %2568 = vmatpush2.msra.mxu1 %v2438_v31  ;;  %3085 = vmatprep.subr.mxu0 %v2870_v48  ;;  %v2258_v31 = vld [vmem:[#allocation13 + $0xe8] sm:$0xff]  ;;  %v2954_v48 = vld [vmem:[#allocation13 + $0xb78] sm:$0xff] }
 0xb96   : > { %2569 = vmatprep.subr.mxu1 %v2435_v60  ;;  %3086 = vmatpush1.msra.mxu0 %v2869_v56  ;;  %v2257_v60 = vld [vmem:[#allocation13 + $0xe0] sm:$0xff]  ;;  %v2953_v56 = vld [vmem:[#allocation13 + $0xb70] sm:$0xff] }
 0xb97   : > { %2570 = vmatpush2.msra.mxu1 %v2434_v42  ;;  %3087 = vmatprep.subr.mxu0 %v2866_v59  ;;  %v2254_v42 = vld [vmem:[#allocation13 + $0xc8] sm:$0xff]  ;;  %v2950_v59 = vld [vmem:[#allocation13 + $0xb58] sm:$0xff] }
 0xb98   : > { %2571 = vmatprep.subr.mxu1 %v2431_v34  ;;  %3088 = vmatpush1.msra.mxu0 %v2865_v1  ;;  %v2253_v34 = vld [vmem:[#allocation13 + $0xc0] sm:$0xff]  ;;  %v2949_v1 = vld [vmem:[#allocation13 + $0xb50] sm:$0xff] }
 0xb99   : > { %2572 = vmatpush2.msra.mxu1 %v2430_v63  ;;  %3089 = vmatprep.subr.mxu0 %v2862_v0  ;;  %v2250_v63 = vld [vmem:[#allocation13 + $0xa8] sm:$0xff]  ;;  %v2946_v0 = vld [vmem:[#allocation13 + $0xb38] sm:$0xff] }
 0xb9a   : > { %2573 = vmatprep.subr.mxu1 %v2427_v41  ;;  %3090 = vmatpush1.msra.mxu0 %v2861_v18  ;;  %v2249_v41 = vld [vmem:[#allocation13 + $0xa0] sm:$0xff]  ;;  %v2945_v18 = vld [vmem:[#allocation13 + $0xb30] sm:$0xff] }
 0xb9b   : > { %2574 = vmatpush2.msra.mxu1 %v2426_v5  ;;  %3091 = vmatprep.subr.mxu0 %v2858_v6  ;;  %v2246_v5 = vld [vmem:[#allocation13 + $0x88] sm:$0xff]  ;;  %v2942_v6 = vld [vmem:[#allocation13 + $0xb18] sm:$0xff] }
 0xb9c   : > { %2576 = vmatmul.mubr.f32.vlgmr.msra.gmra.mxu1 %v9966_v8  ;;  %2684 = vmatprep.subr.mxu1 %v2290_v24  ;;  %v2846_v8 = vld [vmem:[#allocation13 + $0x818] sm:$0xff]  ;;  %v2245_v24 = vld [vmem:[#allocation13 + $0x80] sm:$0xff] }
 0xb9d   : > { %2581 = vmatprep.mubr.f32.mxu1 %v9972_v45  ;;  %2685 = vmatpush1.msra.mxu1 %v2289_v9  ;;  %v2845_v45 = vld [vmem:[#allocation13 + $0x810] sm:$0xff] }
 0xb9e   : > { %3092 = vmatpush1.msra.mxu0 %v2857_v43  ;;  %2686 = vmatprep.subr.mxu1 %v2286_v22  ;;  %v2941_v9 = vld [vmem:[#allocation13 + $0xb10] sm:$0xff]  ;;  %v2242_v43 = vld [vmem:[#allocation13 + $0x68] sm:$0xff]  ;;  %v2938_v22 = vld [vmem:[#allocation13 + $0xaf8] sm:$0xff] }
 0xb9f   : > { %3093 = vmatprep.subr.mxu0 %v2854_v57  ;;  %2687 = vmatpush1.msra.mxu1 %v2285_v3  ;;  %v2241_v57 = vld [vmem:[#allocation13 + $0x60] sm:$0xff]  ;;  %v2937_v3 = vld [vmem:[#allocation13 + $0xaf0] sm:$0xff] }
 0xba0   : > { %3094 = vmatpush1.msra.mxu0 %v2853_v53  ;;  %2582 = vmatmul.mubr.f32.gmra.mxu1 %v9975_v55  ;;  %v2966_v55 = vld [vmem:[#allocation13 + $0xbd8] sm:$0xff]  ;;  %v2238_v53 = vld [vmem:[#allocation13 + $0x48] sm:$0xff] }
 0xba1   : > { %2688 = vmatprep.subr.mxu1 %v2282_v21  ;;  %3095 = vmatprep.subr.mxu0 %v2850_v54  ;;  %v2934_v21 = vld [vmem:[#allocation13 + $0xad8] sm:$0xff]  ;;  %v2237_v54 = vld [vmem:[#allocation13 + $0x40] sm:$0xff] }
 0xba2   : > { %2689 = vmatpush1.msra.mxu1 %v2281_v33  ;;  %2748 = vmatprep.mubr.f32.mxu1 %v9982_v32  ;;  %v2962_v32 = vld [vmem:[#allocation13 + $0xbb8] sm:$0xff]  ;;  %v2933_v33 = vld [vmem:[#allocation13 + $0xad0] sm:$0xff] }
 0xba3   : > { %3096 = vmatpush1.msra.mxu0 %v2849_v44  ;;  %2690 = vmatprep.subr.mxu1 %v2278_v49  ;;  %v2234_v44 = vld [vmem:[#allocation13 + $0x28] sm:$0xff]  ;;  %v2930_v49 = vld [vmem:[#allocation13 + $0xab8] sm:$0xff] }
 0xba4   : > { %3097 = vmatprep.subr.mxu0 %v2846_v8  ;;  %2691 = vmatpush1.msra.mxu1 %v2277_v17  ;;  %v2233_v8 = vld [vmem:[#allocation13 + $0x20] sm:$0xff]  ;;  %v2929_v17 = vld [vmem:[#allocation13 + $0xab0] sm:$0xff] }
 0xba5   : > { %3098 = vmatpush1.msra.mxu0 %v2845_v45  ;;  %2692 = vmatprep.subr.mxu1 %v2274_v19  ;;  %v2230_v45 = vld [vmem:[#allocation13 + $0x8] sm:$0xff]  ;;  %v2926_v19 = vld [vmem:[#allocation13 + $0xa98] sm:$0xff] }
 0xba6   : > { %3099 = vmatprep.subr.mxu0 %v2970_v11  ;;  %2693 = vmatpush1.msra.mxu1 %v2273_v20  ;;  %v2229_v11 = vld [vmem:[#allocation13] sm:$0xff]  ;;  %v2925_v20 = vld [vmem:[#allocation13 + $0xa90] sm:$0xff] }
 0xba7   : > { %3100 = vmatpush2.msra.mxu0 %v2969_v23  ;;  %2694 = vmatprep.subr.mxu1 %v2270_v25  ;;  %v2354_v23 = vld [vmem:[#allocation13 + $0x3e8] sm:$0xff]  ;;  %v2922_v25 = vld [vmem:[#allocation13 + $0xa78] sm:$0xff] }
 0xba8   : > { %3101 = vmatprep.subr.mxu0 %v2966_v55  ;;  %2695 = vmatpush1.msra.mxu1 %v2269_v62  ;;  %v2353_v55 = vld [vmem:[#allocation13 + $0x3e0] sm:$0xff]  ;;  %v2921_v62 = vld [vmem:[#allocation13 + $0xa70] sm:$0xff] }
 0xba9   : > { %3102 = vmatpush2.msra.mxu0 %v2965_v16  ;;  %2696 = vmatprep.subr.mxu1 %v2266_v26  ;;  %v2350_v16 = vld [vmem:[#allocation13 + $0x3c8] sm:$0xff]  ;;  %v2918_v26 = vld [vmem:[#allocation13 + $0xa58] sm:$0xff] }
 0xbaa   : > { %3103 = vmatprep.subr.mxu0 %v2962_v32  ;;  %2697 = vmatpush1.msra.mxu1 %v2265_v40  ;;  %v2349_v32 = vld [vmem:[#allocation13 + $0x3c0] sm:$0xff]  ;;  %v2917_v40 = vld [vmem:[#allocation13 + $0xa50] sm:$0xff] }
 0xbab   : > { %3104 = vmatpush2.msra.mxu0 %v2961_v58  ;;  %2698 = vmatprep.subr.mxu1 %v2262_v7  ;;  %v2346_v58 = vld [vmem:[#allocation13 + $0x3a8] sm:$0xff]  ;;  %v2838_v7 = vld [vmem:[#allocation2 + $0x70] sm:$0xc0] }
 0xbac   : > { %3105 = vmatprep.subr.mxu0 %v2958_v35  ;;  %2699 = vmatpush1.msra.mxu1 %v2261_v29  ;;  %v2914_v35 = vld [vmem:[#allocation13 + $0xa38] sm:$0xff]  ;;  %v2345_v29 = vld [vmem:[#allocation13 + $0x3a0] sm:$0xff] }
 0xbad   : > { %3106 = vmatpush2.msra.mxu0 %v2957_v51  ;;  %2700 = vmatprep.subr.mxu1 %v2258_v31  ;;  %v2841_v51 = vld [vmem:[#allocation2 + $0x78] sm:$0x3f] }
 0xbae   : > { %3107 = vmatprep.subr.mxu0 %v2954_v48  ;;  %2701 = vmatpush1.msra.mxu1 %v2257_v60  ;;  %v2913_v31 = vld [vmem:[#allocation13 + $0xa30] sm:$0xff]  ;;  %v2342_v48 = vld [vmem:[#allocation13 + $0x388] sm:$0xff]  ;;  %v2910_v60 = vld [vmem:[#allocation13 + $0xa18] sm:$0xff] }
 0xbaf   : > { %3108 = vmatpush2.msra.mxu0 %v2953_v56  ;;  %2702 = vmatprep.subr.mxu1 %v2254_v42  ;;  %v2341_v56 = vld [vmem:[#allocation13 + $0x380] sm:$0xff]  ;;  %v2976_v42 = vrot.slane %v2838_v7, 6  ;;  %v2314_v7 = vld [vmem:[#allocation13 + $0x2a8] sm:$0xff] }
 0xbb0   : > { %3109 = vmatprep.subr.mxu0 %v2950_v59  ;;  %2703 = vmatpush1.msra.mxu1 %v2253_v34  ;;  %v10013_v59 = vld [vmem:[#allocation2 + $0x10] sm:$0xff] }
 0xbb1   : > { %3110 = vmatpush2.msra.mxu0 %v2949_v1  ;;  %2704 = vmatprep.subr.mxu1 %v2250_v63  ;;  %v2977_v34 = vrot.slane %v10013_v59, 6  ;;  %v2909_v1 = vld [vmem:[#allocation13 + $0xa10] sm:$0xff]  ;;  %v2338_v63 = vld [vmem:[#allocation13 + $0x368] sm:$0xff] }
 0xbb2   : > { %3111 = vmatprep.subr.mxu0 %v2946_v0  ;;  %2705 = vmatpush1.msra.mxu1 %v2249_v41  ;;  %v2984_v0 = vrot.slane %v2841_v51, 6  ;;  %v3220_v41 = vld [vmem:[#allocation13 + $0xdf8] sm:$0xff]  ;;  %v3195_v51 = vld [vmem:[#allocation13 + $0xd30] sm:$0xff] }
 0xbb3   : > { %3112 = vmatpush2.msra.mxu0 %v2945_v18  ;;  %2706 = vmatprep.subr.mxu1 %v2246_v5  ;;  %v2840_v18 = vld [vmem:[#allocation2 + $0x40] sm:$0x3f]  ;;  %v2337_v5 = vld [vmem:[#allocation13 + $0x360] sm:$0xff] }
 0xbb4   : > { %3113 = vmatprep.subr.mxu0 %v2942_v6  ;;  %2707 = vmatpush1.msra.mxu1 %v2245_v24  ;;  %v10017_v6 = vsel %vm2975_vm7, %v2976_v42, %v2977_v34  ;;  %v3219_v24 = vld [vmem:[#allocation13 + $0xdf0] sm:$0xff]  ;;  %v2306_v42 = vld [vmem:[#allocation13 + $0x268] sm:$0xff] }
 0xbb5   : > { %3114 = vmatpush2.msra.mxu0 %v2941_v9  ;;  %2708 = vmatprep.subr.mxu1 %v2242_v43  ;;  %v2334_v9 = vld [vmem:[#allocation13 + $0x348] sm:$0xff]  ;;  %v3153_v43 = vld [vmem:[#allocation2] sm:$0x80] }
 0xbb6   : > { %3115 = vmatprep.subr.mxu0 %v2938_v22  ;;  %2709 = vmatpush1.msra.mxu1 %v2241_v57  ;;  %v10023_v22 = vsel %vm2975_vm7, %v2980_v47, %v2984_v0  ;;  %v3216_v57 = vld [vmem:[#allocation13 + $0xdd8] sm:$0xff]  ;;  %v3211_v47 = vld [vmem:[#allocation13 + $0xdb0] sm:$0xff]  ;;  %v2302_v0 = vld [vmem:[#allocation13 + $0x248] sm:$0xff] }
 0xbb7   : > { %3116 = vmatpush2.msra.mxu0 %v2937_v3  ;;  %2710 = vmatprep.subr.mxu1 %v2238_v53  ;;  %v2333_v3 = vld [vmem:[#allocation13 + $0x340] sm:$0xff]  ;;  %v2982_v53 = vrot.slane %v2840_v18, 6 }
 0xbb8   : > { %3117 = vmatprep.subr.mxu0 %v2934_v21  ;;  %2711 = vmatpush1.msra.mxu1 %v2237_v54  ;;  %v3215_v21 = vld [vmem:[#allocation13 + $0xdd0] sm:$0xff]  ;;  %v2330_v54 = vld [vmem:[#allocation13 + $0x328] sm:$0xff]  ;;  %v2301_v18 = vld [vmem:[#allocation13 + $0x240] sm:$0xff] }
 0xbb9   : > { %3118 = vmatpush2.msra.mxu0 %v2933_v33  ;;  %2712 = vmatprep.subr.mxu1 %v2234_v44  ;;  %v3212_v33 = vld [vmem:[#allocation13 + $0xdb8] sm:$0xff]  ;;  %v3293_v44 = vrot.slane %v3153_v43, 7  ;;  %v2297_v43 = vld [vmem:[#allocation13 + $0x220] sm:$0xff] }
 0xbba   : > { %3119 = vmatprep.subr.mxu0 %v2930_v49  ;;  %2713 = vmatpush1.msra.mxu1 %v2233_v8  ;;  %v10026_v49 = vld [vmem:[#allocation2 + $0x30] sm:$0xff] }
 0xbbb   : > { %3120 = vmatpush2.msra.mxu0 %v2929_v17  ;;  %2714 = vmatprep.subr.mxu1 %v2230_v45  ;;  %v3294_v8 = vrot.slane %v10026_v49, 7  ;;  %v10030_v17 = vsel %vm2975_vm7, %v2977_v34, %v2982_v53  ;;  %v2326_v45 = vld [vmem:[#allocation13 + $0x308] sm:$0xff]  ;;  %v3188_v34 = vld [vmem:[#allocation13 + $0xcf8] sm:$0xff] }
 0xbbc   : > { %3121 = vmatprep.subr.mxu0 %v2926_v19  ;;  %2715 = vmatpush1.msra.mxu1 %v2229_v11  ;;  %v3208_v19 = vld [vmem:[#allocation13 + $0xd98] sm:$0xff]  ;;  %v2325_v11 = vld [vmem:[#allocation13 + $0x300] sm:$0xff] }
 0xbbd   : > { %3122 = vmatpush2.msra.mxu0 %v2925_v20  ;;  %2716 = vmatprep.subr.mxu1 %v2354_v23  ;;  %v10036_v20 = vsel %vm3289_vm8, %v3293_v44, %v3294_v8  ;;  %v3207_v23 = vld [vmem:[#allocation13 + $0xd90] sm:$0xff]  ;;  %v3176_v53 = vld [vmem:[#allocation13 + $0xc98] sm:$0xff] }
 0xbbe   : > { %3123 = vmatprep.subr.mxu0 %v2922_v25  ;;  %2717 = vmatpush2.msra.mxu1 %v2353_v55  ;;  %v2322_v25 = vld [vmem:[#allocation13 + $0x2e8] sm:$0xff]  ;;  %v3204_v55 = vld [vmem:[#allocation13 + $0xd78] sm:$0xff] }
 0xbbf   : > { %3124 = vmatpush2.msra.mxu0 %v2921_v62  ;;  %2718 = vmatprep.subr.mxu1 %v2350_v16  ;;  %v2321_v62 = vld [vmem:[#allocation13 + $0x2e0] sm:$0xff]  ;;  %v3203_v16 = vld [vmem:[#allocation13 + $0xd70] sm:$0xff]  ;;  %v3172_v44 = vld [vmem:[#allocation13 + $0xc78] sm:$0xff] }
 0xbc0   : > { %3125 = vmatprep.subr.mxu0 %v2918_v26  ;;  %2719 = vmatpush2.msra.mxu1 %v2349_v32  ;;  %v2318_v26 = vld [vmem:[#allocation13 + $0x2c8] sm:$0xff]  ;;  %v3200_v32 = vld [vmem:[#allocation13 + $0xd58] sm:$0xff] }
 0xbc1   : > { %3126 = vmatpush2.msra.mxu0 %v2917_v40  ;;  %2720 = vmatprep.subr.mxu1 %v2346_v58  ;;  %v2317_v40 = vld [vmem:[#allocation13 + $0x2c0] sm:$0xff]  ;;  %v3199_v58 = vld [vmem:[#allocation13 + $0xd50] sm:$0xff] }
 0xbc2   : > { %3127 = vmatprep.subr.mxu0 %v2914_v35  ;;  %2721 = vmatpush2.msra.mxu1 %v2345_v29  ;;  %v3196_v35 = vld [vmem:[#allocation13 + $0xd38] sm:$0xff]  ;;  %v2313_v29 = vld [vmem:[#allocation13 + $0x2a0] sm:$0xff] }
 0xbc3   : > { %3128 = vmatpush2.msra.mxu0 %v2913_v31  ;;  %2722 = vmatprep.subr.mxu1 %v2342_v48  ;;  %v2310_v31 = vld [vmem:[#allocation13 + $0x288] sm:$0xff]  ;;  %v3192_v48 = vld [vmem:[#allocation13 + $0xd18] sm:$0xff] }
 0xbc4   : > { %3129 = vmatprep.subr.mxu0 %v2910_v60  ;;  %2723 = vmatpush2.msra.mxu1 %v2341_v56  ;;  %v2309_v60 = vld [vmem:[#allocation13 + $0x280] sm:$0xff]  ;;  %v3191_v56 = vld [vmem:[#allocation13 + $0xd10] sm:$0xff] }
 0xbc5   : > { %3130 = vmatpush2.msra.mxu0 %v2909_v1  ;;  %2724 = vmatprep.subr.mxu1 %v2338_v63  ;;  %v2305_v1 = vld [vmem:[#allocation13 + $0x260] sm:$0xff]  ;;  %v3187_v63 = vld [vmem:[#allocation13 + $0xcf0] sm:$0xff] }
 0xbc6   : > { %3132 = vmatmul.mubr.f32.vlgmr.msra.gmra.mxu0 %v10017_v6  ;;  %3381 = vmatprep.subr.mxu0 %v3220_v41  ;;  %v3184_v41 = vld [vmem:[#allocation13 + $0xcd8] sm:$0xff] }
 0xbc7   : > { %2725 = vmatpush2.msra.mxu1 %v2337_v5  ;;  %3137 = vmatprep.mubr.f32.mxu0 %v10023_v22  ;;  %v3183_v5 = vld [vmem:[#allocation13 + $0xcd0] sm:$0xff] }
 0xbc8   : > { %3382 = vmatpush1.msra.mxu0 %v3219_v24  ;;  %2726 = vmatprep.subr.mxu1 %v2334_v9  ;;  %v2298_v24 = vld [vmem:[#allocation13 + $0x228] sm:$0xff]  ;;  %v3180_v9 = vld [vmem:[#allocation13 + $0xcb8] sm:$0xff] }
 0xbc9   : > { %3383 = vmatprep.subr.mxu0 %v3216_v57  ;;  %2727 = vmatpush2.msra.mxu1 %v2333_v3  ;;  %v3179_v57 = vld [vmem:[#allocation13 + $0xcb0] sm:$0xff]  ;;  %v2294_v3 = vld [vmem:[#allocation13 + $0x208] sm:$0xff] }
 0xbca   : > { %3384 = vmatpush1.msra.mxu0 %v3215_v21  ;;  %2728 = vmatprep.subr.mxu1 %v2330_v54  ;;  %v2293_v21 = vld [vmem:[#allocation13 + $0x200] sm:$0xff]  ;;  %v3175_v54 = vld [vmem:[#allocation13 + $0xc90] sm:$0xff] }
 0xbcb   : > { %3138 = vmatmul.mubr.f32.gmra.mxu0 %v10030_v17  ;;  %3385 = vmatprep.subr.mxu0 %v3212_v33  ;;  %v2904_v33 = vld [vmem:[#allocation13 + $0x9e8] sm:$0xff] }
 0xbcc   : > { %2729 = vmatpush2.msra.mxu1 %v2329_v61  ;;  %3386 = vmatpush1.msra.mxu0 %v3211_v47  ;;  %v2903_v61 = vld [vmem:[#allocation13 + $0x9e0] sm:$0xff]  ;;  %v3171_v47 = vld [vmem:[#allocation13 + $0xc70] sm:$0xff] }
 0xbcd   : > { %3445 = vmatprep.mubr.f32.mxu0 %v10036_v20  ;;  %2730 = vmatprep.subr.mxu1 %v2326_v45  ;;  %v2900_v45 = vld [vmem:[#allocation13 + $0x9c8] sm:$0xff] }
 0xbce   : > { %3387 = vmatprep.subr.mxu0 %v3208_v19  ;;  %2731 = vmatpush2.msra.mxu1 %v2325_v11  ;;  %v3168_v19 = vld [vmem:[#allocation13 + $0xc58] sm:$0xff]  ;;  %v2899_v11 = vld [vmem:[#allocation13 + $0x9c0] sm:$0xff] }
 0xbcf   : > { %3388 = vmatpush1.msra.mxu0 %v3207_v23  ;;  %2732 = vmatprep.subr.mxu1 %v2322_v25  ;;  %v3167_v23 = vld [vmem:[#allocation13 + $0xc50] sm:$0xff]  ;;  %v2896_v25 = vld [vmem:[#allocation13 + $0x9a8] sm:$0xff] }
 0xbd0   : > { %3389 = vmatprep.subr.mxu0 %v3204_v55  ;;  %2733 = vmatpush2.msra.mxu1 %v2321_v62  ;;  %v3164_v55 = vld [vmem:[#allocation13 + $0xc38] sm:$0xff]  ;;  %v2895_v62 = vld [vmem:[#allocation13 + $0x9a0] sm:$0xff] }
 0xbd1   : > { %3390 = vmatpush1.msra.mxu0 %v3203_v16  ;;  %2734 = vmatprep.subr.mxu1 %v2318_v26  ;;  %v2892_v16 = vld [vmem:[#allocation13 + $0x988] sm:$0xff]  ;;  %v3160_v26 = vld [vmem:[#allocation13 + $0xc18] sm:$0xff] }
 0xbd2   : > { %3391 = vmatprep.subr.mxu0 %v3200_v32  ;;  %2735 = vmatpush2.msra.mxu1 %v2317_v40  ;;  %v2891_v32 = vld [vmem:[#allocation13 + $0x980] sm:$0xff]  ;;  %v2888_v40 = vld [vmem:[#allocation13 + $0x968] sm:$0xff] }
 0xbd3   : > { %3392 = vmatpush1.msra.mxu0 %v3199_v58  ;;  %2736 = vmatprep.subr.mxu1 %v2314_v7  ;;  %v3284_v58 = vld [vmem:[#allocation13 + $0xff8] sm:$0xff]  ;;  %v2887_v7 = vld [vmem:[#allocation13 + $0x960] sm:$0xff] }
 0xbd4   : > { %3393 = vmatprep.subr.mxu0 %v3196_v35  ;;  %2737 = vmatpush2.msra.mxu1 %v2313_v29  ;;  %v3283_v35 = vld [vmem:[#allocation13 + $0xff0] sm:$0xff]  ;;  %v2884_v29 = vld [vmem:[#allocation13 + $0x948] sm:$0xff] }
 0xbd5   : > { %3394 = vmatpush1.msra.mxu0 %v3195_v51  ;;  %2738 = vmatprep.subr.mxu1 %v2310_v31  ;;  %v2883_v51 = vld [vmem:[#allocation13 + $0x940] sm:$0xff]  ;;  %v3279_v31 = vld [vmem:[#allocation13 + $0xfd0] sm:$0xff] }
 0xbd6   : > { %3395 = vmatprep.subr.mxu0 %v3192_v48  ;;  %2739 = vmatpush2.msra.mxu1 %v2309_v60  ;;  %v2880_v48 = vld [vmem:[#allocation13 + $0x928] sm:$0xff]  ;;  %v2879_v60 = vld [vmem:[#allocation13 + $0x920] sm:$0xff] }
 0xbd7   : > { %3396 = vmatpush1.msra.mxu0 %v3191_v56  ;;  %2740 = vmatprep.subr.mxu1 %v2306_v42  ;;  %v3275_v56 = vld [vmem:[#allocation13 + $0xfb0] sm:$0xff]  ;;  %v2876_v42 = vld [vmem:[#allocation13 + $0x908] sm:$0xff] }
 0xbd8   : > { %3397 = vmatprep.subr.mxu0 %v3188_v34  ;;  %2741 = vmatpush2.msra.mxu1 %v2305_v1  ;;  %v3272_v34 = vld [vmem:[#allocation13 + $0xf98] sm:$0xff]  ;;  %v2875_v1 = vld [vmem:[#allocation13 + $0x900] sm:$0xff] }
 0xbd9   : > { %3398 = vmatpush1.msra.mxu0 %v3187_v63  ;;  %2742 = vmatprep.subr.mxu1 %v2302_v0  ;;  %v3271_v63 = vld [vmem:[#allocation13 + $0xf90] sm:$0xff]  ;;  %v2872_v0 = vld [vmem:[#allocation13 + $0x8e8] sm:$0xff] }
 0xbda   : > { %3399 = vmatprep.subr.mxu0 %v3184_v41  ;;  %2743 = vmatpush2.msra.mxu1 %v2301_v18  ;;  %v3268_v41 = vld [vmem:[#allocation13 + $0xf78] sm:$0xff]  ;;  %v2871_v18 = vld [vmem:[#allocation13 + $0x8e0] sm:$0xff] }
 0xbdb   : > { %3400 = vmatpush1.msra.mxu0 %v3183_v5  ;;  %2744 = vmatprep.subr.mxu1 %v2298_v24  ;;  %v3267_v5 = vld [vmem:[#allocation13 + $0xf70] sm:$0xff]  ;;  %v2868_v24 = vld [vmem:[#allocation13 + $0x8c8] sm:$0xff] }
 0xbdc   : > { %3401 = vmatprep.subr.mxu0 %v3180_v9  ;;  %2745 = vmatpush2.msra.mxu1 %v2297_v43  ;;  %v3264_v9 = vld [vmem:[#allocation13 + $0xf58] sm:$0xff]  ;;  %v2867_v43 = vld [vmem:[#allocation13 + $0x8c0] sm:$0xff] }
 0xbdd   : > { %3402 = vmatpush1.msra.mxu0 %v3179_v57  ;;  %2746 = vmatprep.subr.mxu1 %v2294_v3  ;;  %v3263_v57 = vld [vmem:[#allocation13 + $0xf50] sm:$0xff]  ;;  %v2864_v3 = vld [vmem:[#allocation13 + $0x8a8] sm:$0xff] }
 0xbde   : > { %3403 = vmatprep.subr.mxu0 %v3176_v53  ;;  %2747 = vmatpush2.msra.mxu1 %v2293_v21  ;;  %v3260_v53 = vld [vmem:[#allocation13 + $0xf38] sm:$0xff]  ;;  %v2863_v21 = vld [vmem:[#allocation13 + $0x8a0] sm:$0xff] }
 0xbdf   : > { %3404 = vmatpush1.msra.mxu0 %v3175_v54  ;;  %2749 = vmatmul.mubr.f32.vlgmr.msra.gmra.mxu1 %v9989_v14  ;;  %v3163_v14 = vld [vmem:[#allocation13 + $0xc30] sm:$0xff] }
 0xbe0   : > { %2990 = vmatprep.subr.mxu1 %v2904_v33  ;;  %3405 = vmatprep.subr.mxu0 %v3172_v44  ;;  %v3259_v54 = vld [vmem:[#allocation13 + $0xf30] sm:$0xff]  ;;  %v2860_v33 = vld [vmem:[#allocation13 + $0x888] sm:$0xff]  ;;  %v3256_v44 = vld [vmem:[#allocation13 + $0xf18] sm:$0xff] }
 0xbe1   : > { %2754 = vmatprep.mubr.f32.mxu1 %v9995_v36  ;;  %2991 = vmatpush1.msra.mxu1 %v2903_v61  ;;  %v3159_v36 = vld [vmem:[#allocation13 + $0xc10] sm:$0xff]  ;;  %v2859_v61 = vld [vmem:[#allocation13 + $0x880] sm:$0xff] }
 0xbe2   : > { %3406 = vmatpush1.msra.mxu0 %v3171_v47  ;;  %2992 = vmatprep.subr.mxu1 %v2900_v45  ;;  %v3255_v47 = vld [vmem:[#allocation13 + $0xf10] sm:$0xff]  ;;  %v2856_v45 = vld [vmem:[#allocation13 + $0x868] sm:$0xff] }
 0xbe3   : > { %3407 = vmatprep.subr.mxu0 %v3168_v19  ;;  %2993 = vmatpush1.msra.mxu1 %v2899_v11  ;;  %v3252_v19 = vld [vmem:[#allocation13 + $0xef8] sm:$0xff]  ;;  %v2855_v11 = vld [vmem:[#allocation13 + $0x860] sm:$0xff] }
 0xbe4   : > { %3408 = vmatpush1.msra.mxu0 %v3167_v23  ;;  %2755 = vmatmul.mubr.f32.gmra.mxu1 %v10000_v12  ;;  %v3280_v12 = vld [vmem:[#allocation13 + $0xfd8] sm:$0xff]  ;;  %v3251_v23 = vld [vmem:[#allocation13 + $0xef0] sm:$0xff] }
 0xbe5   : > { %2994 = vmatprep.subr.mxu1 %v2896_v25  ;;  %3409 = vmatprep.subr.mxu0 %v3164_v55  ;;  %v2852_v25 = vld [vmem:[#allocation13 + $0x848] sm:$0xff]  ;;  %v3248_v55 = vld [vmem:[#allocation13 + $0xed8] sm:$0xff] }
 0xbe6   : > { %2995 = vmatpush1.msra.mxu1 %v2895_v62  ;;  %3054 = vmatprep.mubr.f32.mxu1 %v10006_v46  ;;  %v3276_v46 = vld [vmem:[#allocation13 + $0xfb8] sm:$0xff]  ;;  %v2851_v62 = vld [vmem:[#allocation13 + $0x840] sm:$0xff] }
 0xbe7   : > { %3410 = vmatpush1.msra.mxu0 %v3163_v14  ;;  %2996 = vmatprep.subr.mxu1 %v2892_v16  ;;  %v3247_v14 = vld [vmem:[#allocation13 + $0xed0] sm:$0xff]  ;;  %v2848_v16 = vld [vmem:[#allocation13 + $0x828] sm:$0xff] }
 0xbe8   : > { %3411 = vmatprep.subr.mxu0 %v3160_v26  ;;  %2997 = vmatpush1.msra.mxu1 %v2891_v32  ;;  %v3244_v26 = vld [vmem:[#allocation13 + $0xeb8] sm:$0xff]  ;;  %v2847_v32 = vld [vmem:[#allocation13 + $0x820] sm:$0xff] }
 0xbe9   : > { %3412 = vmatpush1.msra.mxu0 %v3159_v36  ;;  %2998 = vmatprep.subr.mxu1 %v2888_v40  ;;  %v3243_v36 = vld [vmem:[#allocation13 + $0xeb0] sm:$0xff]  ;;  %v2844_v40 = vld [vmem:[#allocation13 + $0x808] sm:$0xff] }
 0xbea   : > { %3413 = vmatprep.subr.mxu0 %v3284_v58  ;;  %2999 = vmatpush1.msra.mxu1 %v2887_v7  ;;  %v3240_v58 = vld [vmem:[#allocation13 + $0xe98] sm:$0xff]  ;;  %v2843_v7 = vld [vmem:[#allocation13 + $0x800] sm:$0xff] }
 0xbeb   : > { %3414 = vmatpush2.msra.mxu0 %v3283_v35  ;;  %3000 = vmatprep.subr.mxu1 %v2884_v29  ;;  %v3239_v35 = vld [vmem:[#allocation13 + $0xe90] sm:$0xff]  ;;  %v2968_v29 = vld [vmem:[#allocation13 + $0xbe8] sm:$0xff] }
 0xbec   : > { %3415 = vmatprep.subr.mxu0 %v3280_v12  ;;  %3001 = vmatpush1.msra.mxu1 %v2883_v51  ;;  %v3236_v12 = vld [vmem:[#allocation13 + $0xe78] sm:$0xff]  ;;  %v2967_v51 = vld [vmem:[#allocation13 + $0xbe0] sm:$0xff] }
 0xbed   : > { %3416 = vmatpush2.msra.mxu0 %v3279_v31  ;;  %3002 = vmatprep.subr.mxu1 %v2880_v48  ;;  %v3235_v31 = vld [vmem:[#allocation13 + $0xe70] sm:$0xff]  ;;  %v2964_v48 = vld [vmem:[#allocation13 + $0xbc8] sm:$0xff] }
 0xbee   : > { %3417 = vmatprep.subr.mxu0 %v3276_v46  ;;  %3003 = vmatpush1.msra.mxu1 %v2879_v60  ;;  %v3232_v46 = vld [vmem:[#allocation13 + $0xe58] sm:$0xff]  ;;  %v2963_v60 = vld [vmem:[#allocation13 + $0xbc0] sm:$0xff] }
 0xbef   : > { %3418 = vmatpush2.msra.mxu0 %v3275_v56  ;;  %3004 = vmatprep.subr.mxu1 %v2876_v42  ;;  %v3231_v56 = vld [vmem:[#allocation13 + $0xe50] sm:$0xff]  ;;  %v2960_v42 = vld [vmem:[#allocation13 + $0xba8] sm:$0xff] }
 0xbf0   : > { %3419 = vmatprep.subr.mxu0 %v3272_v34  ;;  %3005 = vmatpush1.msra.mxu1 %v2875_v1  ;;  %v3152_v34 = vld [vmem:[#allocation2 + $0x70] sm:$0x80]  ;;  %v3228_v1 = vld [vmem:[#allocation13 + $0xe38] sm:$0xff] }
 0xbf1   : > { %3420 = vmatpush2.msra.mxu0 %v3271_v63  ;;  %3006 = vmatprep.subr.mxu1 %v2872_v0  ;;  %v2959_v63 = vld [vmem:[#allocation13 + $0xba0] sm:$0xff]  ;;  %v3155_v0 = vld [vmem:[#allocation2 + $0x78] sm:$0x7f] }
 0xbf2   : > { %3421 = vmatprep.subr.mxu0 %v3268_v41  ;;  %3007 = vmatpush1.msra.mxu1 %v2871_v18  ;;  %v3227_v41 = vld [vmem:[#allocation13 + $0xe30] sm:$0xff]  ;;  %v2956_v18 = vld [vmem:[#allocation13 + $0xb88] sm:$0xff] }
 0xbf3   : > { %3422 = vmatpush2.msra.mxu0 %v3267_v5  ;;  %3008 = vmatprep.subr.mxu1 %v2868_v24  ;;  %v3224_v5 = vld [vmem:[#allocation13 + $0xe18] sm:$0xff]  ;;  %v2955_v24 = vld [vmem:[#allocation13 + $0xb80] sm:$0xff] }
 0xbf4   : > { %3423 = vmatprep.subr.mxu0 %v3264_v9  ;;  %3009 = vmatpush1.msra.mxu1 %v2867_v43  ;;  %v3290_v9 = vrot.slane %v3152_v34, 7  ;;  %v3291_v43 = vrot.slane %v10013_v59, 7  ;;  %v2923_v34 = vld [vmem:[#allocation13 + $0xa80] sm:$0xff] }
 0xbf5   : > { %3424 = vmatpush2.msra.mxu0 %v3263_v57  ;;  %3010 = vmatprep.subr.mxu1 %v2864_v3  ;;  %v3223_v57 = vld [vmem:[#allocation13 + $0xe10] sm:$0xff]  ;;  %v2952_v3 = vld [vmem:[#allocation13 + $0xb68] sm:$0xff] }
 0xbf6   : > { %3425 = vmatprep.subr.mxu0 %v3260_v53  ;;  %3011 = vmatpush1.msra.mxu1 %v2863_v21  ;;  %v3298_v53 = vrot.slane %v3155_v0, 7  ;;  %v3532_v21 = vld [vmem:[#allocation13 + $0x11f8] sm:$0xff]  ;;  %v2047_v0 = vpop.f32.mrf.mxu0 }
 0xbf7   : > { %3426 = vmatpush2.msra.mxu0 %v3259_v54  ;;  %3012 = vmatprep.subr.mxu1 %v2860_v33  ;;  %v3154_v54 = vld [vmem:[#allocation2 + $0x40] sm:$0x7f] }
 0xbf8   : > { %3427 = vmatprep.subr.mxu0 %v3256_v44  ;;  %3013 = vmatpush1.msra.mxu1 %v2859_v61  ;;  %v2951_v33 = vld [vmem:[#allocation13 + $0xb60] sm:$0xff]  ;;  %v10045_v44 = vsel %vm3289_vm8, %v3290_v9, %v3291_v43  ;;  %v3531_v61 = vld [vmem:[#allocation13 + $0x11f0] sm:$0xff]  ;;  %v10051_v59 = vsel %vm3289_vm8, %v3294_v8, %v3298_v53  ;;  %v3496_v9 = vld [vmem:[#allocation13 + $0x10d8] sm:$0xff] }
 0xbf9   : > { %3428 = vmatpush2.msra.mxu0 %v3255_v47  ;;  %3014 = vmatprep.subr.mxu1 %v2856_v45  ;;  %v2948_v47 = vld [vmem:[#allocation13 + $0xb48] sm:$0xff]  ;;  %v3528_v45 = vld [vmem:[#allocation13 + $0x11d8] sm:$0xff] }
 0xbfa   : > { %3429 = vmatprep.subr.mxu0 %v3252_v19  ;;  %3015 = vmatpush1.msra.mxu1 %v2855_v11  ;;  %v2947_v19 = vld [vmem:[#allocation13 + $0xb40] sm:$0xff]  ;;  %v3296_v11 = vrot.slane %v3154_v54, 7  ;;  %v3492_v54 = vld [vmem:[#allocation13 + $0x10b8] sm:$0xff] }
 0xbfb   : > { %3430 = vmatpush2.msra.mxu0 %v3251_v23  ;;  %3016 = vmatprep.subr.mxu1 %v2852_v25  ;;  %v3527_v23 = vld [vmem:[#allocation13 + $0x11d0] sm:$0xff]  ;;  %v2944_v25 = vld [vmem:[#allocation13 + $0xb28] sm:$0xff] }
 0xbfc   : > { %3431 = vmatprep.subr.mxu0 %v3248_v55  ;;  %3017 = vmatpush1.msra.mxu1 %v2851_v62  ;;  %v3524_v55 = vld [vmem:[#allocation13 + $0x11b8] sm:$0xff]  ;;  %v2943_v62 = vld [vmem:[#allocation13 + $0xb20] sm:$0xff]  ;;  %v10055_v8 = vsel %vm3289_vm8, %v3291_v43, %v3296_v11 }
 0xbfd   : > { %3432 = vmatpush2.msra.mxu0 %v3247_v14  ;;  %3018 = vmatprep.subr.mxu1 %v2848_v16  ;;  %v3523_v14 = vld [vmem:[#allocation13 + $0x11b0] sm:$0xff]  ;;  %v2940_v16 = vld [vmem:[#allocation13 + $0xb08] sm:$0xff]  ;;  %v2915_v43 = vld [vmem:[#allocation13 + $0xa40] sm:$0xff] }
 0xbfe   : > { %3433 = vmatprep.subr.mxu0 %v3244_v26  ;;  %3019 = vmatpush1.msra.mxu1 %v2847_v32  ;;  %v3520_v26 = vld [vmem:[#allocation13 + $0x1198] sm:$0xff]  ;;  %v2939_v32 = vld [vmem:[#allocation13 + $0xb00] sm:$0xff] }
 0xbff   : > { %3434 = vmatpush2.msra.mxu0 %v3243_v36  ;;  %3020 = vmatprep.subr.mxu1 %v2844_v40  ;;  %v3519_v36 = vld [vmem:[#allocation13 + $0x1190] sm:$0xff]  ;;  %v2936_v40 = vld [vmem:[#allocation13 + $0xae8] sm:$0xff]  ;;  %v2907_v11 = vld [vmem:[#allocation13 + $0xa00] sm:$0xff] }
 0xc00   : > { %3435 = vmatprep.subr.mxu0 %v3240_v58  ;;  %3021 = vmatpush1.msra.mxu1 %v2843_v7  ;;  %v3516_v58 = vld [vmem:[#allocation13 + $0x1178] sm:$0xff]  ;;  %v2935_v7 = vld [vmem:[#allocation13 + $0xae0] sm:$0xff] }
 0xc01   : > { %3436 = vmatpush2.msra.mxu0 %v3239_v35  ;;  %3022 = vmatprep.subr.mxu1 %v2968_v29  ;;  %v3515_v35 = vld [vmem:[#allocation13 + $0x1170] sm:$0xff]  ;;  %v2932_v29 = vld [vmem:[#allocation13 + $0xac8] sm:$0xff] }
 0xc02   : > { %3437 = vmatprep.subr.mxu0 %v3236_v12  ;;  %3023 = vmatpush2.msra.mxu1 %v2967_v51  ;;  %v3512_v12 = vld [vmem:[#allocation13 + $0x1158] sm:$0xff]  ;;  %v2931_v51 = vld [vmem:[#allocation13 + $0xac0] sm:$0xff] }
 0xc03   : > { %3438 = vmatpush2.msra.mxu0 %v3235_v31  ;;  %3024 = vmatprep.subr.mxu1 %v2964_v48  ;;  %v3511_v31 = vld [vmem:[#allocation13 + $0x1150] sm:$0xff]  ;;  %v2928_v48 = vld [vmem:[#allocation13 + $0xaa8] sm:$0xff] }
 0xc04   : > { %3439 = vmatprep.subr.mxu0 %v3232_v46  ;;  %3025 = vmatpush2.msra.mxu1 %v2963_v60  ;;  %v3508_v46 = vld [vmem:[#allocation13 + $0x1138] sm:$0xff]  ;;  %v2927_v60 = vld [vmem:[#allocation13 + $0xaa0] sm:$0xff] }
 0xc05   : > { %3440 = vmatpush2.msra.mxu0 %v3231_v56  ;;  %3026 = vmatprep.subr.mxu1 %v2960_v42  ;;  %v2924_v56 = vld [vmem:[#allocation13 + $0xa88] sm:$0xff]  ;;  %v3504_v42 = vld [vmem:[#allocation13 + $0x1118] sm:$0xff] }
 0xc06   : > { %3441 = vmatprep.subr.mxu0 %v3228_v1  ;;  %3027 = vmatpush2.msra.mxu1 %v2959_v63  ;;  %v3503_v1 = vld [vmem:[#allocation13 + $0x1110] sm:$0xff]  ;;  %v2920_v63 = vld [vmem:[#allocation13 + $0xa68] sm:$0xff] }
 0xc07   : > { %3442 = vmatpush2.msra.mxu0 %v3227_v41  ;;  %3028 = vmatprep.subr.mxu1 %v2956_v18  ;;  %v3500_v41 = vld [vmem:[#allocation13 + $0x10f8] sm:$0xff]  ;;  %v2919_v18 = vld [vmem:[#allocation13 + $0xa60] sm:$0xff] }
 0xc08   : > { %3443 = vmatprep.subr.mxu0 %v3224_v5  ;;  %3029 = vmatpush2.msra.mxu1 %v2955_v24  ;;  %v3499_v5 = vld [vmem:[#allocation13 + $0x10f0] sm:$0xff]  ;;  %v2916_v24 = vld [vmem:[#allocation13 + $0xa48] sm:$0xff] }
 0xc09   : > { %3444 = vmatpush2.msra.mxu0 %v3223_v57  ;;  %3030 = vmatprep.subr.mxu1 %v2952_v3  ;;  %v3495_v57 = vld [vmem:[#allocation13 + $0x10d0] sm:$0xff]  ;;  %v2912_v3 = vld [vmem:[#allocation13 + $0xa28] sm:$0xff] }
 0xc0a   : > { %3446 = vmatmul.mubr.f32.vlgmr.msra.gmra.mxu0 %v10045_v44  ;;  %3674 = vmatprep.subr.mxu0 %v3532_v21  ;;  %v2049_v21 = vpop.f32.mrf.mxu0 }
 0xc0b   : > { %3031 = vmatpush2.msra.mxu1 %v2951_v33  ;;  %3451 = vmatprep.mubr.f32.mxu0 %v10051_v59  ;;  %v2911_v33 = vld [vmem:[#allocation13 + $0xa20] sm:$0xff] }
 0xc0c   : > { %3675 = vmatpush1.msra.mxu0 %v3531_v61  ;;  %3032 = vmatprep.subr.mxu1 %v2948_v47  ;;  %v3491_v61 = vld [vmem:[#allocation13 + $0x10b0] sm:$0xff]  ;;  %v2908_v47 = vld [vmem:[#allocation13 + $0xa08] sm:$0xff] }
 0xc0d   : > { %3676 = vmatprep.subr.mxu0 %v3528_v45  ;;  %3033 = vmatpush2.msra.mxu1 %v2947_v19  ;;  %v3488_v19 = vld [vmem:[#allocation13 + $0x1098] sm:$0xff] }
 0xc0e   : > { %3677 = vmatpush1.msra.mxu0 %v3527_v23  ;;  %3034 = vmatprep.subr.mxu1 %v2944_v25  ;;  %v3487_v23 = vld [vmem:[#allocation13 + $0x1090] sm:$0xff] }
 0xc0f   : > { %3452 = vmatmul.mubr.f32.gmra.mxu0 %v10055_v8  ;;  %3678 = vmatprep.subr.mxu0 %v3524_v55  ;;  %v2053_v55 = vpop.f32.mrf.mxu0 }
 0xc10   : > { %3035 = vmatpush2.msra.mxu1 %v2943_v62  ;;  %3679 = vmatpush1.msra.mxu0 %v3523_v14  ;;  %v3218_v62 = vld [vmem:[#allocation13 + $0xde8] sm:$0xff]  ;;  %v3484_v14 = vld [vmem:[#allocation13 + $0x1078] sm:$0xff] }
 0xc11   : > { %3738 = vmatprep.mubr.f32.mxu0 %v10026_v49  ;;  %3036 = vmatprep.subr.mxu1 %v2940_v16  ;;  %v3507_v49 = vld [vmem:[#allocation13 + $0x1130] sm:$0xff] }
 0xc12   : > { %3680 = vmatprep.subr.mxu0 %v3520_v26  ;;  %3037 = vmatpush2.msra.mxu1 %v2939_v32  ;;  %v3217_v26 = vld [vmem:[#allocation13 + $0xde0] sm:$0xff] }
 0xc13   : > { %3681 = vmatpush1.msra.mxu0 %v3519_v36  ;;  %3038 = vmatprep.subr.mxu1 %v2936_v40  ;;  %v3483_v36 = vld [vmem:[#allocation13 + $0x1070] sm:$0xff]  ;;  %v3214_v40 = vld [vmem:[#allocation13 + $0xdc8] sm:$0xff] }
 0xc14   : > { %3682 = vmatprep.subr.mxu0 %v3516_v58  ;;  %3039 = vmatpush2.msra.mxu1 %v2935_v7  ;;  %v3480_v7 = vld [vmem:[#allocation13 + $0x1058] sm:$0xff] }
 0xc15   : > { %3683 = vmatpush1.msra.mxu0 %v3515_v35  ;;  %3040 = vmatprep.subr.mxu1 %v2932_v29  ;;  %v3213_v35 = vld [vmem:[#allocation13 + $0xdc0] sm:$0xff]  ;;  %v2055_v29 = vpop.f32.mrf.mxu0 }
 0xc16   : > { %3684 = vmatprep.subr.mxu0 %v3512_v12  ;;  %3041 = vmatpush2.msra.mxu1 %v2931_v51  ;;  %v3479_v51 = vld [vmem:[#allocation13 + $0x1050] sm:$0xff] }
 0xc17   : > { %3685 = vmatpush1.msra.mxu0 %v3511_v31  ;;  %3042 = vmatprep.subr.mxu1 %v2928_v48  ;;  %v3210_v31 = vld [vmem:[#allocation13 + $0xda8] sm:$0xff] }
 0xc18   : > { %3686 = vmatprep.subr.mxu0 %v3508_v46  ;;  %3043 = vmatpush2.msra.mxu1 %v2927_v60  ;;  %v3209_v60 = vld [vmem:[#allocation13 + $0xda0] sm:$0xff] }
 0xc19   : > { %3687 = vmatpush1.msra.mxu0 %v3507_v49  ;;  %3044 = vmatprep.subr.mxu1 %v2924_v56  ;;  %v3206_v56 = vld [vmem:[#allocation13 + $0xd88] sm:$0xff] }
 0xc1a   : > { %3688 = vmatprep.subr.mxu0 %v3504_v42  ;;  %3045 = vmatpush2.msra.mxu1 %v2923_v34  ;;  %v3472_v42 = vld [vmem:[#allocation13 + $0x1018] sm:$0xff]  ;;  %v3205_v34 = vld [vmem:[#allocation13 + $0xd80] sm:$0xff] }
 0xc1b   : > { %3689 = vmatpush1.msra.mxu0 %v3503_v1  ;;  %3046 = vmatprep.subr.mxu1 %v2920_v63  ;;  %v7610_v1 = vld [vmem:[%s9349_s24 + $0x28] sm:$0xff] }
 0xc1c   : > { %3690 = vmatprep.subr.mxu0 %v3500_v41  ;;  %3047 = vmatpush2.msra.mxu1 %v2919_v18  ;;  %v1970_v53 = vpop.f32.mrf.mxu1  ;;  %v3471_v41 = vld [vmem:[#allocation13 + $0x1010] sm:$0xff]  ;;  %v3202_v18 = vld [vmem:[#allocation13 + $0xd68] sm:$0xff] }
 0xc1d   : > { %3691 = vmatpush1.msra.mxu0 %v3499_v5  ;;  %3048 = vmatprep.subr.mxu1 %v2916_v24  ;;  %v2048_v32 = vadd.f32 %v2047_v0, %v1970_v53  ;;  %v3201_v5 = vld [vmem:[#allocation13 + $0xd60] sm:$0xff] }
 0xc1e   : > { %3692 = vmatprep.subr.mxu0 %v3496_v9  ;;  %3049 = vmatpush2.msra.mxu1 %v2915_v43  ;;  %v1972_v45 = vpop.f32.mrf.mxu1  ;;  %v7611_v24 = vld [vmem:[%s9349_s24 + $0x20] sm:$0xff] }
 0xc1f   : > { %3693 = vmatpush1.msra.mxu0 %v3495_v57  ;;  %3050 = vmatprep.subr.mxu1 %v2912_v3  ;;  %v2050_v16 = vadd.f32 %v2049_v21, %v1972_v45  ;;  %v2070_v46 = vadd.f32 %v9821_v38, %v2048_v32  ;;  %v3595_v57 = vld [vmem:[#allocation13 + $0x13f0] sm:$0xff]  ;;  %v3198_v3 = vld [vmem:[#allocation13 + $0xd48] sm:$0xff]  ;;  %v3580_v32 = vld [vmem:[#allocation13 + $0x1378] sm:$0xff] }
 0xc20   : > { %3694 = vmatprep.subr.mxu0 %v3492_v54  ;;  %3051 = vmatpush2.msra.mxu1 %v2911_v33  ;;  %v1976_v25 = vpop.f32.mrf.mxu1  ;;  %v3591_v21 = vld [vmem:[#allocation13 + $0x13d0] sm:$0xff] }
 0xc21   : > { %3695 = vmatpush1.msra.mxu0 %v3491_v61  ;;  %3052 = vmatprep.subr.mxu1 %v2908_v47  ;;  %v2071_v12 = vadd.f32 %v9815_v39, %v2050_v16  ;;  %v2054_v49 = vadd.f32 %v2053_v55, %v1976_v25  ;;  %v10070_v9 = vadd.f32 %v7611_v24, %v2070_v46  ;;  %v7612_v54 = vld [vmem:[%s9349_s24 + $0x38] sm:$0xff]  ;;  %v3193_v47 = vld [vmem:[#allocation13 + $0xd20] sm:$0xff]  ;;  %v10083_v16 = vpop.f32.mrf.mxu0 }
 0xc22   : > { %3696 = vmatprep.subr.mxu0 %v3488_v19  ;;  %3053 = vmatpush2.msra.mxu1 %v2907_v11  ;;  %v1978_v58 = vpop.f32.mrf.mxu1  ;;  %v3588_v61 = vld [vmem:[#allocation13 + $0x13b8] sm:$0xff]  ;;  %v3587_v45 = vld [vmem:[#allocation13 + $0x13b0] sm:$0xff]  ;;  %v3189_v55 = vld [vmem:[#allocation13 + $0xd00] sm:$0xff] }
 0xc23   : > { %3697 = vmatpush1.msra.mxu0 %v3487_v23  ;;  %3055 = vmatmul.mubr.f32.vlgmr.msra.gmra.mxu1 %v10017_v6  ;;  %v3476_v6 = vld [vmem:[#allocation13 + $0x1038] sm:$0xff]  ;;  %v2056_v48 = vadd.f32 %v2055_v29, %v1978_v58  ;;  %v10065_v63 = vadd.f32 %v7610_v1, %v2071_v12  ;;  %v2072_v43 = vadd.f32 %v9821_v38, %v2054_v49  ;;  %v3194_v38 = vld [vmem:[#allocation13 + $0xd28] sm:$0xff]  ;;  %v10085_v29 = vpop.f32.mrf.mxu0  ;;  %v3575_v12 = vld [vmem:[#allocation13 + $0x1350] sm:$0xff] }
 0xc24   : > { %3304 = vmatprep.subr.mxu1 %v3218_v62  ;;  %3698 = vmatprep.subr.mxu0 %v3484_v14  ;;  %v7613_v19 = vld [vmem:[%s9349_s24 + $0x30] sm:$0xff]  ;;  %v3584_v25 = vld [vmem:[#allocation13 + $0x1398] sm:$0xff]  ;;  %v3169_v1 = vld [vmem:[#allocation13 + $0xc60] sm:$0xff]  ;;  %s9011_s24 = scalar_lea.vmem %s9010_s28, 2048 }
 0xc25   : > { %3060 = vmatprep.mubr.f32.mxu1 %v10023_v22  ;;  %3305 = vmatpush1.msra.mxu1 %v3217_v26  ;;  %v3475_v22 = vld [vmem:[#allocation13 + $0x1030] sm:$0xff]  ;;  %v2073_v0 = vadd.f32 %v9815_v39, %v2056_v48  ;;  %v3197_v39 = vld [vmem:[#allocation13 + $0xd40] sm:$0xff]  ;;  %v2088_v53 = vadd.f32 %v10065_v63, %v10070_v9  ;;  %v10079_v11 = vadd.f32 %v7613_v19, %v2072_v43  ;;  %v3190_v23 = vld [vmem:[#allocation13 + $0xd08] sm:$0xff]  ;;  %v2660_v48 = vpop.f32.mrf.mxu0  ;;  %p9013_p9 = scmp.lt.s32.totalorder %s9011_s24, %s9005_s23 }
 0xc26   : > { %3699 = vmatpush1.msra.mxu0 %v3483_v36  ;;  %3306 = vmatprep.subr.mxu1 %v3214_v40  ;;  %v3583_v62 = vld [vmem:[#allocation13 + $0x1390] sm:$0xff]  ;;  %v3186_v26 = vld [vmem:[#allocation13 + $0xce8] sm:$0xff]  ;;  %v3185_v36 = vld [vmem:[#allocation13 + $0xce0] sm:$0xff] }
 0xc27   : > { %3700 = vmatprep.subr.mxu0 %v3480_v7  ;;  %3307 = vmatpush1.msra.mxu1 %v3213_v35  ;;  %v10076_v33 = vadd.f32 %v7612_v54, %v2073_v0  ;;  %v3579_v40 = vld [vmem:[#allocation13 + $0x1370] sm:$0xff]  ;;  %v3182_v58 = vld [vmem:[#allocation13 + $0xcc8] sm:$0xff]  ;;  %v3576_v7 = vld [vmem:[#allocation13 + $0x1358] sm:$0xff]  ;;  %v2662_v0 = vpop.f32.mrf.mxu0  ;;  %p9014_p6 = por %p9013_p9, %p9012_p7 }
 0xc28   : > { %3701 = vmatpush1.msra.mxu0 %v3479_v51  ;;  %3061 = vmatmul.mubr.f32.gmra.mxu1 %v10030_v17  ;;  %v3596_v17 = vld [vmem:[#allocation13 + $0x13f8] sm:$0xff]  ;;  %v3181_v35 = vld [vmem:[#allocation13 + $0xcc0] sm:$0xff]  ;;  %v3178_v51 = vld [vmem:[#allocation13 + $0xca8] sm:$0xff] }
 0xc29   : > { %3308 = vmatprep.subr.mxu1 %v3210_v31  ;;  %3702 = vmatprep.subr.mxu0 %v3476_v6  ;;  %v2091_v14 = vadd.f32 %v10076_v33, %v10079_v11  ;;  %v3572_v31 = vld [vmem:[#allocation13 + $0x1338] sm:$0xff]  ;;  %v3177_v6 = vld [vmem:[#allocation13 + $0xca0] sm:$0xff]  ;;  %v3571_v46 = vld [vmem:[#allocation13 + $0x1330] sm:$0xff]  ;;  %p9015_p12 = pnand %p9014_p6, %p9008_p1 }
 0xc2a   : > { %3309 = vmatpush1.msra.mxu1 %v3209_v60  ;;  %3368 = vmatprep.mubr.f32.mxu1 %v10036_v20  ;;  %v3592_v20 = vld [vmem:[#allocation13 + $0x13d8] sm:$0xff]  ;;  %v3174_v60 = vld [vmem:[#allocation13 + $0xc88] sm:$0xff]  ;;  %v3559_v24 = vld [vmem:[#allocation13 + $0x12d0] sm:$0xff] }
 0xc2b   : > { %3703 = vmatpush1.msra.mxu0 %v3475_v22  ;;  %3310 = vmatprep.subr.mxu1 %v3206_v56  ;;  %v3568_v49 = vld [vmem:[#allocation13 + $0x1318] sm:$0xff]  ;;  %v3173_v22 = vld [vmem:[#allocation13 + $0xc80] sm:$0xff]  ;;  %v3567_v56 = vld [vmem:[#allocation13 + $0x1310] sm:$0xff] }
 0xc2c   : > { %3704 = vmatprep.subr.mxu0 %v3472_v42  ;;  %3311 = vmatpush1.msra.mxu1 %v3205_v34  ;;  %v3170_v42 = vld [vmem:[#allocation13 + $0xc68] sm:$0xff]  ;;  %v3564_v34 = vld [vmem:[#allocation13 + $0x12f8] sm:$0xff]  ;;  %v3281_v19 = vld [vmem:[#allocation13 + $0xfe0] sm:$0xff] }
 0xc2d   : > { %3705 = vmatpush1.msra.mxu0 %v3471_v41  ;;  %3312 = vmatprep.subr.mxu1 %v3202_v18  ;;  %v3563_v41 = vld [vmem:[#allocation13 + $0x12f0] sm:$0xff]  ;;  %v3166_v18 = vld [vmem:[#allocation13 + $0xc48] sm:$0xff]  ;;  %v3552_v54 = vld [vmem:[#allocation13 + $0x1298] sm:$0xff] }
 0xc2e   : > { %3706 = vmatprep.subr.mxu0 %v3596_v17  ;;  %3313 = vmatpush1.msra.mxu1 %v3201_v5  ;;  %v3560_v17 = vld [vmem:[#allocation13 + $0x12d8] sm:$0xff]  ;;  %v3165_v5 = vld [vmem:[#allocation13 + $0xc40] sm:$0xff]  ;;  %v3162_v43 = vld [vmem:[#allocation13 + $0xc28] sm:$0xff] }
 0xc2f   : > { %3707 = vmatpush2.msra.mxu0 %v3595_v57  ;;  %3314 = vmatprep.subr.mxu1 %v3198_v3  ;;  %v3556_v3 = vld [vmem:[#allocation13 + $0x12b8] sm:$0xff] }
 0xc30   : > { %3708 = vmatprep.subr.mxu0 %v3592_v20  ;;  %3315 = vmatpush1.msra.mxu1 %v3197_v39  ;;  %v3161_v20 = vld [vmem:[#allocation13 + $0xc20] sm:$0xff]  ;;  %v3555_v39 = vld [vmem:[#allocation13 + $0x12b0] sm:$0xff] }
 0xc31   : > { %3709 = vmatpush2.msra.mxu0 %v3591_v21  ;;  %2089 = vadd.xlane.f32.xlu1 %v2088_v53  ;;  %v3158_v53 = vld [vmem:[#allocation13 + $0xc08] sm:$0xff] }
 0xc32   : > { %3316 = vmatprep.subr.mxu1 %v3194_v38  ;;  %3710 = vmatprep.subr.mxu0 %v3588_v61  ;;  %v3157_v38 = vld [vmem:[#allocation13 + $0xc00] sm:$0xff]  ;;  %v3551_v61 = vld [vmem:[#allocation13 + $0x1290] sm:$0xff] }
 0xc33   : > { %3317 = vmatpush1.msra.mxu1 %v3193_v47  ;;  %3711 = vmatpush2.msra.mxu0 %v3587_v45  ;;  %v3282_v47 = vld [vmem:[#allocation13 + $0xfe8] sm:$0xff]  ;;  %v3548_v45 = vld [vmem:[#allocation13 + $0x1278] sm:$0xff] }
 0xc34   : > { %3318 = vmatprep.subr.mxu1 %v3190_v23  ;;  %3712 = vmatprep.subr.mxu0 %v3584_v25  ;;  %v3547_v23 = vld [vmem:[#allocation13 + $0x1270] sm:$0xff]  ;;  %v3278_v25 = vld [vmem:[#allocation13 + $0xfc8] sm:$0xff] }
 0xc35   : > { %3319 = vmatpush1.msra.mxu1 %v3189_v55  ;;  %3713 = vmatpush2.msra.mxu0 %v3583_v62  ;;  %v3544_v62 = vld [vmem:[#allocation13 + $0x1258] sm:$0xff] }
 0xc36   : > { %2092 = vadd.xlane.f32.xlu0 %v2091_v14  ;;  %3320 = vmatprep.subr.mxu1 %v3186_v26  ;;  %v3277_v14 = vld [vmem:[#allocation13 + $0xfc0] sm:$0xff]  ;;  %v10920_v26 = vld [vmem:[#allocation30_spill] sm:$0xff] }
 0xc37   : > { %3714 = vmatprep.subr.mxu0 %v3580_v32  ;;  %3321 = vmatpush1.msra.mxu1 %v3185_v36  ;;  %vm1535_vm9 = vcmp.lt.s32.totalorder %v9889_v2, %v10920_v26  ;;  %v3543_v36 = vld [vmem:[#allocation13 + $0x1250] sm:$0xff]  ;;  %vm1534_vm13 = vcmp.lt.s32.totalorder %v9415_v13, %v10920_v26 }
 0xc38   : > { %3715 = vmatpush2.msra.mxu0 %v3579_v40  ;;  %3322 = vmatprep.subr.mxu1 %v3182_v58  ;;  %v3274_v40 = vld [vmem:[#allocation13 + $0xfa8] sm:$0xff]  ;;  %v3828_v2 = vld [vmem:[#allocation13 + $0x15f0] sm:$0xff] }
 0xc39   : > { %3716 = vmatprep.subr.mxu0 %v3576_v7  ;;  %3323 = vmatpush1.msra.mxu1 %v3181_v35  ;;  %v3540_v7 = vld [vmem:[#allocation13 + $0x1238] sm:$0xff]  ;;  %v3273_v35 = vld [vmem:[#allocation13 + $0xfa0] sm:$0xff]  ;;  %v4446_v13 = vld [vmem:[#allocation13 + $0x1d90] sm:$0xff] }
 0xc3a   : > { %3717 = vmatpush2.msra.mxu0 %v3575_v12  ;;  %3324 = vmatprep.subr.mxu1 %v3178_v51  ;;  %v3539_v51 = vld [vmem:[#allocation13 + $0x1230] sm:$0xff] }
 0xc3b   : > { %3718 = vmatprep.subr.mxu0 %v3572_v31  ;;  %3325 = vmatpush1.msra.mxu1 %v3177_v6  ;;  %v7614_v31 = vld [vmem:[#allocation2 + $0x70] sm:$0xff] }
 0xc3c   : > { %3719 = vmatpush2.msra.mxu0 %v3571_v46  ;;  %3326 = vmatprep.subr.mxu1 %v3174_v60  ;;  %v7322_v6 = vsel %vm1535_vm9, 1.0, %v7614_v31  ;;  %v3536_v46 = vld [vmem:[#allocation13 + $0x1218] sm:$0xff]  ;;  %v3269_v60 = vld [vmem:[#allocation13 + $0xf80] sm:$0xff]  ;;  %v3804_v31 = vld [vmem:[#allocation13 + $0x1530] sm:$0xff] }
 0xc3d   : > { %3720 = vmatprep.subr.mxu0 %v3568_v49  ;;  %3327 = vmatpush1.msra.mxu1 %v3173_v22  ;;  %v3535_v49 = vld [vmem:[#allocation13 + $0x1210] sm:$0xff]  ;;  %v3266_v22 = vld [vmem:[#allocation13 + $0xf68] sm:$0xff] }
 0xc3e   : > { %3721 = vmatpush2.msra.mxu0 %v3567_v56  ;;  %3328 = vmatprep.subr.mxu1 %v3170_v42  ;;  %v3829_v56 = vld [vmem:[#allocation13 + $0x15f8] sm:$0xff]  ;;  %v3265_v42 = vld [vmem:[#allocation13 + $0xf60] sm:$0xff]  ;;  %v7619_v26 = vld [vmem:[#allocation2 + $0x70] sm:$0xff] }
 0xc3f   : > { %3722 = vmatprep.subr.mxu0 %v3564_v34  ;;  %3329 = vmatpush1.msra.mxu1 %v3169_v1  ;;  %v10087_v57 = vpop.f32.mrf.mxu0  ;;  %v10100_v34 = vld [vmem:[#allocation2 + $0x78] sm:$0xff]  ;;  %v10102_v1 = vld [vmem:[#allocation2 + $0x10] sm:$0xff] }
 0xc40   : > { %3723 = vmatpush2.msra.mxu0 %v3563_v41  ;;  %3330 = vmatprep.subr.mxu1 %v3166_v18  ;;  %v3825_v41 = vld [vmem:[#allocation13 + $0x15d8] sm:$0xff]  ;;  %v3261_v18 = vld [vmem:[#allocation13 + $0xf40] sm:$0xff] }
 0xc41   : > { %3724 = vmatprep.subr.mxu0 %v3560_v17  ;;  %3331 = vmatpush1.msra.mxu1 %v3165_v5  ;;  %v10089_v21 = vpop.f32.mrf.mxu0  ;;  %v3824_v17 = vld [vmem:[#allocation13 + $0x15d0] sm:$0xff] }
 0xc42   : > { %3725 = vmatpush2.msra.mxu0 %v3559_v24  ;;  %3332 = vmatprep.subr.mxu1 %v3162_v43  ;;  %v3760_v5 = vld [vmem:[#allocation2 + $0x30] sm:$0xfe]  ;;  %v3905_v43 = vrot.slane %v10100_v34, 1 }
 0xc43   : > { %3726 = vmatprep.subr.mxu0 %v3556_v3  ;;  %3333 = vmatpush1.msra.mxu1 %v3161_v20  ;;  %v3258_v24 = vld [vmem:[#allocation13 + $0xf28] sm:$0xff]  ;;  %v3821_v3 = vld [vmem:[#allocation13 + $0x15b8] sm:$0xff]  ;;  %v3257_v20 = vld [vmem:[#allocation13 + $0xf20] sm:$0xff] }
 0xc44   : > { %3727 = vmatpush2.msra.mxu0 %v3555_v39  ;;  %3334 = vmatprep.subr.mxu1 %v3158_v53  ;;  %v10107_v39 = vld [vmem:[#allocation2 + $0x40] sm:$0xff]  ;;  %v3820_v53 = vld [vmem:[#allocation13 + $0x15b0] sm:$0xff] }
 0xc45   : > { %3728 = vmatprep.subr.mxu0 %v3552_v54  ;;  %3335 = vmatpush1.msra.mxu1 %v3157_v38  ;;  %v2833_v55 = vpop.f32.mrf.mxu0  ;;  %v3904_v54 = vrot.slane %v3760_v5, 1  ;;  %v3254_v38 = vld [vmem:[#allocation13 + $0xf08] sm:$0xff]  ;;  %v3789_v5 = vld [vmem:[#allocation13 + $0x14b8] sm:$0xff] }
 0xc46   : > { %3729 = vmatpush2.msra.mxu0 %v3551_v61  ;;  %3336 = vmatprep.subr.mxu1 %v3282_v47  ;;  %v10093_v32 = vadd.f32 %v2833_v55, %v2660_v48  ;;  %v3270_v48 = vld [vmem:[#allocation13 + $0xf88] sm:$0xff]  ;;  %v3817_v61 = vld [vmem:[#allocation13 + $0x1598] sm:$0xff]  ;;  %v3249_v55 = vld [vmem:[#allocation13 + $0xee0] sm:$0xff] }
 0xc47   : > { %3730 = vmatprep.subr.mxu0 %v3548_v45  ;;  %3337 = vmatpush2.msra.mxu1 %v3281_v19  ;;  %v2835_v58 = vpop.f32.mrf.mxu0  ;;  %v10113_v47 = vsel %vm3900_vm10, %v3904_v54, %v3905_v43  ;;  %v3253_v45 = vld [vmem:[#allocation13 + $0xf00] sm:$0xff]  ;;  %v3816_v19 = vld [vmem:[#allocation13 + $0x1590] sm:$0xff] }
 0xc48   : > { %3731 = vmatpush2.msra.mxu0 %v3547_v23  ;;  %3338 = vmatprep.subr.mxu1 %v3278_v25  ;;  %v10095_v12 = vadd.f32 %v2835_v58, %v2662_v0  ;;  %v3262_v0 = vld [vmem:[#allocation13 + $0xf48] sm:$0xff]  ;;  %v3813_v25 = vld [vmem:[#allocation13 + $0x1578] sm:$0xff]  ;;  %v3808_v58 = vld [vmem:[#allocation13 + $0x1550] sm:$0xff] }
 0xc49   : > { %3732 = vmatprep.subr.mxu0 %v3544_v62  ;;  %3339 = vmatpush2.msra.mxu1 %v3277_v14  ;;  %v3250_v23 = vld [vmem:[#allocation13 + $0xee8] sm:$0xff]  ;;  %v3812_v62 = vld [vmem:[#allocation13 + $0x1570] sm:$0xff]  ;;  %v3221_v54 = vld [vmem:[#allocation13 + $0xe00] sm:$0xff] }
 0xc4a   : > { %3733 = vmatpush2.msra.mxu0 %v3543_v36  ;;  %3340 = vmatprep.subr.mxu1 %v3274_v40  ;;  %v3246_v14 = vld [vmem:[#allocation13 + $0xec8] sm:$0xff]  ;;  %v3809_v36 = vld [vmem:[#allocation13 + $0x1558] sm:$0xff]  ;;  %v3245_v40 = vld [vmem:[#allocation13 + $0xec0] sm:$0xff] }
 0xc4b   : > { %3734 = vmatprep.subr.mxu0 %v3540_v7  ;;  %3341 = vmatpush2.msra.mxu1 %v3273_v35  ;;  %v3242_v7 = vld [vmem:[#allocation13 + $0xea8] sm:$0xff]  ;;  %v3805_v35 = vld [vmem:[#allocation13 + $0x1538] sm:$0xff] }
 0xc4c   : > { %3735 = vmatpush2.msra.mxu0 %v3539_v51  ;;  %2196 = vperm.xlu0 %7554, %v7322_v6   ;;  %v3241_v51 = vld [vmem:[#allocation13 + $0xea0] sm:$0xff]  ;;  %v3238_v6 = vld [vmem:[#allocation13 + $0xe88] sm:$0xff] }
 0xc4d   : > { %3342 = vmatprep.subr.mxu1 %v3270_v48  ;;  %3736 = vmatprep.subr.mxu0 %v3536_v46  ;;  %v3801_v48 = vld [vmem:[#allocation13 + $0x1518] sm:$0xff]  ;;  %v3237_v46 = vld [vmem:[#allocation13 + $0xe80] sm:$0xff] }
 0xc4e   : > { %3343 = vmatpush2.msra.mxu1 %v3269_v60  ;;  %3737 = vmatpush2.msra.mxu0 %v3535_v49  ;;  %v3800_v60 = vld [vmem:[#allocation13 + $0x1510] sm:$0xff]  ;;  %v3234_v49 = vld [vmem:[#allocation13 + $0xe68] sm:$0xff] }
 0xc4f   : > { %3344 = vmatprep.subr.mxu1 %v3266_v22  ;;  %3739 = vmatmul.mubr.f32.vlgmr.msra.gmra.mxu0 %v10102_v1  ;;  %v3797_v22 = vld [vmem:[#allocation13 + $0x14f8] sm:$0xff] }
 0xc50   : > { %3992 = vmatprep.subr.mxu0 %v3829_v56  ;;  %3345 = vmatpush2.msra.mxu1 %v3265_v42  ;;  %v3233_v56 = vld [vmem:[#allocation13 + $0xe60] sm:$0xff]  ;;  %v3796_v42 = vld [vmem:[#allocation13 + $0x14f0] sm:$0xff] }
 0xc51   : > { %3744 = vmatprep.mubr.f32.mxu0 %v10100_v34  ;;  %3993 = vmatpush1.msra.mxu0 %v3828_v2  ;;  %v3230_v2 = vld [vmem:[#allocation13 + $0xe48] sm:$0xff] }
 0xc52   : > { %3346 = vmatprep.subr.mxu1 %v3262_v0  ;;  %3994 = vmatprep.subr.mxu0 %v3825_v41  ;;  %v3793_v0 = vld [vmem:[#allocation13 + $0x14d8] sm:$0xff]  ;;  %v3229_v41 = vld [vmem:[#allocation13 + $0xe40] sm:$0xff] }
 0xc53   : > { %3347 = vmatpush2.msra.mxu1 %v3261_v18  ;;  %3995 = vmatpush1.msra.mxu0 %v3824_v17  ;;  %v3792_v18 = vld [vmem:[#allocation13 + $0x14d0] sm:$0xff]  ;;  %v3226_v17 = vld [vmem:[#allocation13 + $0xe28] sm:$0xff] }
 0xc54   : > { %3348 = vmatprep.subr.mxu1 %v3258_v24  ;;  %3745 = vmatmul.mubr.f32.gmra.mxu0 %v10107_v39  ;;  %v3225_v24 = vld [vmem:[#allocation13 + $0xe20] sm:$0xff] }
 0xc55   : > { %3996 = vmatprep.subr.mxu0 %v3821_v3  ;;  %3349 = vmatpush2.msra.mxu1 %v3257_v20  ;;  %v3788_v3 = vld [vmem:[#allocation13 + $0x14b0] sm:$0xff]  ;;  %v3222_v20 = vld [vmem:[#allocation13 + $0xe08] sm:$0xff] }
 0xc56   : > { %3997 = vmatpush1.msra.mxu0 %v3820_v53  ;;  %4056 = vmatprep.mubr.f32.mxu0 %v10113_v47  ;;  %v3785_v53 = vld [vmem:[#allocation13 + $0x1498] sm:$0xff] }
 0xc57   : > { %3350 = vmatprep.subr.mxu1 %v3254_v38  ;;  %3998 = vmatprep.subr.mxu0 %v3817_v61  ;;  %v3784_v38 = vld [vmem:[#allocation13 + $0x1490] sm:$0xff]  ;;  %v3530_v61 = vld [vmem:[#allocation13 + $0x11e8] sm:$0xff] }
 0xc58   : > { %3351 = vmatpush2.msra.mxu1 %v3253_v45  ;;  %3999 = vmatpush1.msra.mxu0 %v3816_v19  ;;  %v3781_v45 = vld [vmem:[#allocation13 + $0x1478] sm:$0xff]  ;;  %v3529_v19 = vld [vmem:[#allocation13 + $0x11e0] sm:$0xff] }
 0xc59   : > { %3352 = vmatprep.subr.mxu1 %v3250_v23  ;;  %4000 = vmatprep.subr.mxu0 %v3813_v25  ;;  %v3780_v23 = vld [vmem:[#allocation13 + $0x1470] sm:$0xff]  ;;  %v3526_v25 = vld [vmem:[#allocation13 + $0x11c8] sm:$0xff] }
 0xc5a   : > { %3353 = vmatpush2.msra.mxu1 %v3249_v55  ;;  %4001 = vmatpush1.msra.mxu0 %v3812_v62  ;;  %v3777_v55 = vld [vmem:[#allocation13 + $0x1458] sm:$0xff]  ;;  %v3525_v62 = vld [vmem:[#allocation13 + $0x11c0] sm:$0xff] }
 0xc5b   : > { %3354 = vmatprep.subr.mxu1 %v3246_v14  ;;  %4002 = vmatprep.subr.mxu0 %v3809_v36  ;;  %v3776_v14 = vld [vmem:[#allocation13 + $0x1450] sm:$0xff]  ;;  %v3522_v36 = vld [vmem:[#allocation13 + $0x11a8] sm:$0xff] }
 0xc5c   : > { %3355 = vmatpush2.msra.mxu1 %v3245_v40  ;;  %4003 = vmatpush1.msra.mxu0 %v3808_v58  ;;  %v3773_v40 = vld [vmem:[#allocation13 + $0x1438] sm:$0xff]  ;;  %v3521_v58 = vld [vmem:[#allocation13 + $0x11a0] sm:$0xff] }
 0xc5d   : > { %3356 = vmatprep.subr.mxu1 %v3242_v7  ;;  %4004 = vmatprep.subr.mxu0 %v3805_v35  ;;  %v3772_v7 = vld [vmem:[#allocation13 + $0x1430] sm:$0xff]  ;;  %v3769_v35 = vld [vmem:[#allocation13 + $0x1418] sm:$0xff] }
 0xc5e   : > { %3357 = vmatpush2.msra.mxu1 %v3241_v51  ;;  %4005 = vmatpush1.msra.mxu0 %v3804_v31  ;;  %v3768_v51 = vld [vmem:[#allocation13 + $0x1410] sm:$0xff] }
 0xc5f   : > { %3358 = vmatprep.subr.mxu1 %v3238_v6  ;;  %4006 = vmatprep.subr.mxu0 %v3801_v48  ;;  %v7616_v31 = vld [vmem:[#allocation2 + $0x30] sm:$0xff]  ;;  %v3893_v48 = vld [vmem:[#allocation13 + $0x17f8] sm:$0xff] }
 0xc60   : > { %3359 = vmatpush2.msra.mxu1 %v3237_v46  ;;  %4007 = vmatpush1.msra.mxu0 %v3800_v60  ;;  %v3514_v6 = vld [vmem:[#allocation13 + $0x1168] sm:$0xff]  ;;  %v3513_v46 = vld [vmem:[#allocation13 + $0x1160] sm:$0xff]  ;;  %v3892_v60 = vld [vmem:[#allocation13 + $0x17f0] sm:$0xff] }
 0xc61   : > { %3360 = vmatprep.subr.mxu1 %v3234_v49  ;;  %4008 = vmatprep.subr.mxu0 %v3797_v22  ;;  %v3510_v49 = vld [vmem:[#allocation13 + $0x1148] sm:$0xff]  ;;  %v3509_v22 = vld [vmem:[#allocation13 + $0x1140] sm:$0xff] }
 0xc62   : > { %3361 = vmatpush2.msra.mxu1 %v3233_v56  ;;  %4009 = vmatpush1.msra.mxu0 %v3796_v42  ;;  %v3888_v56 = vld [vmem:[#allocation13 + $0x17d0] sm:$0xff]  ;;  %v3506_v42 = vld [vmem:[#allocation13 + $0x1128] sm:$0xff] }
 0xc63   : > { %3362 = vmatprep.subr.mxu1 %v3230_v2  ;;  %4010 = vmatprep.subr.mxu0 %v3793_v0  ;;  %v3885_v2 = vld [vmem:[#allocation13 + $0x17b8] sm:$0xff]  ;;  %v3505_v0 = vld [vmem:[#allocation13 + $0x1120] sm:$0xff] }
 0xc64   : > { %3363 = vmatpush2.msra.mxu1 %v3229_v41  ;;  %4011 = vmatpush1.msra.mxu0 %v3792_v18  ;;  %v3884_v41 = vld [vmem:[#allocation13 + $0x17b0] sm:$0xff]  ;;  %v3502_v18 = vld [vmem:[#allocation13 + $0x1108] sm:$0xff] }
 0xc65   : > { %3364 = vmatprep.subr.mxu1 %v3226_v17  ;;  %4012 = vmatprep.subr.mxu0 %v3789_v5  ;;  %v3881_v17 = vld [vmem:[#allocation13 + $0x1798] sm:$0xff]  ;;  %v3501_v5 = vld [vmem:[#allocation13 + $0x1100] sm:$0xff] }
 0xc66   : > { %3365 = vmatpush2.msra.mxu1 %v3225_v24  ;;  %4013 = vmatpush1.msra.mxu0 %v3788_v3  ;;  %v3880_v24 = vld [vmem:[#allocation13 + $0x1790] sm:$0xff]  ;;  %v3498_v3 = vld [vmem:[#allocation13 + $0x10e8] sm:$0xff] }
 0xc67   : > { %3366 = vmatprep.subr.mxu1 %v3222_v20  ;;  %4014 = vmatprep.subr.mxu0 %v3785_v53  ;;  %v3877_v20 = vld [vmem:[#allocation13 + $0x1778] sm:$0xff]  ;;  %v3497_v53 = vld [vmem:[#allocation13 + $0x10e0] sm:$0xff] }
 0xc68   : > { %3367 = vmatpush2.msra.mxu1 %v3221_v54  ;;  %4015 = vmatpush1.msra.mxu0 %v3784_v38  ;;  %v3876_v54 = vld [vmem:[#allocation13 + $0x1770] sm:$0xff]  ;;  %v3494_v38 = vld [vmem:[#allocation13 + $0x10c8] sm:$0xff] }
 0xc69   : > { %3369 = vmatmul.mubr.f32.vlgmr.msra.gmra.mxu1 %v10045_v44  ;;  %3597 = vmatprep.subr.mxu1 %v3530_v61  ;;  %v3518_v44 = vld [vmem:[#allocation13 + $0x1188] sm:$0xff]  ;;  %v3873_v61 = vld [vmem:[#allocation13 + $0x1758] sm:$0xff] }
 0xc6a   : > { %4016 = vmatprep.subr.mxu0 %v3781_v45  ;;  %3374 = vmatprep.mubr.f32.mxu1 %v10051_v59  ;;  %v3517_v59 = vld [vmem:[#allocation13 + $0x1180] sm:$0xff] }
 0xc6b   : > { %3598 = vmatpush1.msra.mxu1 %v3529_v19  ;;  %4017 = vmatpush1.msra.mxu0 %v3780_v23  ;;  %v3493_v45 = vld [vmem:[#allocation13 + $0x10c0] sm:$0xff]  ;;  %v3872_v19 = vld [vmem:[#allocation13 + $0x1750] sm:$0xff]  ;;  %v3490_v23 = vld [vmem:[#allocation13 + $0x10a8] sm:$0xff] }
 0xc6c   : > { %3599 = vmatprep.subr.mxu1 %v3526_v25  ;;  %4018 = vmatprep.subr.mxu0 %v3777_v55  ;;  %v3869_v25 = vld [vmem:[#allocation13 + $0x1738] sm:$0xff]  ;;  %v3489_v55 = vld [vmem:[#allocation13 + $0x10a0] sm:$0xff] }
 0xc6d   : > { %3600 = vmatpush1.msra.mxu1 %v3525_v62  ;;  %4019 = vmatpush1.msra.mxu0 %v3776_v14  ;;  %v3868_v62 = vld [vmem:[#allocation13 + $0x1730] sm:$0xff]  ;;  %v3486_v14 = vld [vmem:[#allocation13 + $0x1088] sm:$0xff] }
 0xc6e   : > { %3375 = vmatmul.mubr.f32.gmra.mxu1 %v10055_v8  ;;  %3601 = vmatprep.subr.mxu1 %v3522_v36  ;;  %v3889_v8 = vld [vmem:[#allocation13 + $0x17d8] sm:$0xff] }
 0xc6f   : > { %4020 = vmatprep.subr.mxu0 %v3773_v40  ;;  %3602 = vmatpush1.msra.mxu1 %v3521_v58  ;;  %v3865_v36 = vld [vmem:[#allocation13 + $0x1718] sm:$0xff]  ;;  %v3485_v40 = vld [vmem:[#allocation13 + $0x1080] sm:$0xff]  ;;  %v3864_v58 = vld [vmem:[#allocation13 + $0x1710] sm:$0xff] }
 0xc70   : > { %3661 = vmatprep.mubr.f32.mxu1 %v7616_v31  ;;  %4021 = vmatpush1.msra.mxu0 %v3772_v7  ;;  %v3482_v7 = vld [vmem:[#allocation13 + $0x1068] sm:$0xff]  ;;  %v3857_v31 = vld [vmem:[#allocation13 + $0x16d8] sm:$0xff] }
 0xc71   : > { %3603 = vmatprep.subr.mxu1 %v3518_v44  ;;  %4022 = vmatprep.subr.mxu0 %v3769_v35  ;;  %v3861_v44 = vld [vmem:[#allocation13 + $0x16f8] sm:$0xff]  ;;  %v3481_v35 = vld [vmem:[#allocation13 + $0x1060] sm:$0xff] }
 0xc72   : > { %3604 = vmatpush1.msra.mxu1 %v3517_v59  ;;  %4023 = vmatpush1.msra.mxu0 %v3768_v51  ;;  %v3860_v59 = vld [vmem:[#allocation13 + $0x16f0] sm:$0xff]  ;;  %v3478_v51 = vld [vmem:[#allocation13 + $0x1048] sm:$0xff] }
 0xc73   : > { %3605 = vmatprep.subr.mxu1 %v3514_v6  ;;  %4024 = vmatprep.subr.mxu0 %v3893_v48  ;;  %v3477_v6 = vld [vmem:[#allocation13 + $0x1040] sm:$0xff]  ;;  %v3856_v48 = vld [vmem:[#allocation13 + $0x16d0] sm:$0xff] }
 0xc74   : > { %3606 = vmatpush1.msra.mxu1 %v3513_v46  ;;  %4025 = vmatpush2.msra.mxu0 %v3892_v60  ;;  %v3474_v46 = vld [vmem:[#allocation13 + $0x1028] sm:$0xff]  ;;  %v3853_v60 = vld [vmem:[#allocation13 + $0x16b8] sm:$0xff] }
 0xc75   : > { %3607 = vmatprep.subr.mxu1 %v3510_v49  ;;  %4026 = vmatprep.subr.mxu0 %v3889_v8  ;;  %v2828_v49 = vadd.f32 %v10087_v57, %v10083_v16  ;;  %v3473_v8 = vld [vmem:[#allocation13 + $0x1020] sm:$0xff] }
 0xc76   : > { %3608 = vmatpush1.msra.mxu1 %v3509_v22  ;;  %4027 = vmatpush2.msra.mxu0 %v3888_v56  ;;  %v3852_v22 = vld [vmem:[#allocation13 + $0x16b0] sm:$0xff]  ;;  %v3470_v56 = vld [vmem:[#allocation13 + $0x1008] sm:$0xff]  ;;  %v3593_v57 = vld [vmem:[#allocation13 + $0x13e0] sm:$0xff] }
 0xc77   : > { %3609 = vmatprep.subr.mxu1 %v3506_v42  ;;  %4028 = vmatprep.subr.mxu0 %v3885_v2  ;;  %v3849_v42 = vld [vmem:[#allocation13 + $0x1698] sm:$0xff] }
 0xc78   : > { %3610 = vmatpush1.msra.mxu1 %v3505_v0  ;;  %4029 = vmatpush2.msra.mxu0 %v3884_v41  ;;  %v3469_v0 = vld [vmem:[#allocation13 + $0x1000] sm:$0xff]  ;;  %v3848_v41 = vld [vmem:[#allocation13 + $0x1690] sm:$0xff] }
 0xc79   : > { %3611 = vmatprep.subr.mxu1 %v3502_v18  ;;  %4030 = vmatprep.subr.mxu0 %v3881_v17  ;;  %v3594_v17 = vld [vmem:[#allocation13 + $0x13e8] sm:$0xff] }
 0xc7a   : > { %3612 = vmatpush1.msra.mxu1 %v3501_v5  ;;  %4031 = vmatpush2.msra.mxu0 %v3880_v24  ;;  %v3845_v5 = vld [vmem:[#allocation13 + $0x1678] sm:$0xff]  ;;  %v3844_v24 = vld [vmem:[#allocation13 + $0x1670] sm:$0xff] }
 0xc7b   : > { %3613 = vmatprep.subr.mxu1 %v3498_v3  ;;  %4032 = vmatprep.subr.mxu0 %v3877_v20  ;;  %v3590_v3 = vld [vmem:[#allocation13 + $0x13c8] sm:$0xff]  ;;  %v3841_v20 = vld [vmem:[#allocation13 + $0x1658] sm:$0xff] }
 0xc7c   : > { %3614 = vmatpush1.msra.mxu1 %v3497_v53  ;;  %4033 = vmatpush2.msra.mxu0 %v3876_v54  ;;  %v3589_v53 = vld [vmem:[#allocation13 + $0x13c0] sm:$0xff]  ;;  %v3840_v54 = vld [vmem:[#allocation13 + $0x1650] sm:$0xff] }
 0xc7d   : > { %3615 = vmatprep.subr.mxu1 %v3494_v38  ;;  %4034 = vmatprep.subr.mxu0 %v3873_v61  ;;  %v3586_v61 = vld [vmem:[#allocation13 + $0x13a8] sm:$0xff] }
 0xc7e   : > { %3616 = vmatpush1.msra.mxu1 %v3493_v45  ;;  %4035 = vmatpush2.msra.mxu0 %v3872_v19  ;;  %v3837_v45 = vld [vmem:[#allocation13 + $0x1638] sm:$0xff]  ;;  %v3764_v19 = vld [vmem:[#allocation2 + $0x58] sm:$0x1] }
 0xc7f   : > { %3617 = vmatprep.subr.mxu1 %v3490_v23  ;;  %4036 = vmatprep.subr.mxu0 %v3869_v25  ;;  %v3585_v25 = vld [vmem:[#allocation13 + $0x13a0] sm:$0xff] }
 0xc80   : > { %3618 = vmatpush1.msra.mxu1 %v3489_v55  ;;  %4037 = vmatpush2.msra.mxu0 %v3868_v62  ;;  %v3836_v55 = vld [vmem:[#allocation13 + $0x1630] sm:$0xff] }
 0xc81   : > { %3619 = vmatprep.subr.mxu1 %v3486_v14  ;;  %4038 = vmatprep.subr.mxu0 %v3865_v36  ;;  %v3759_v62 = vld [vmem:[#allocation2 + $0x10] sm:$0xfe] }
 0xc82   : > { %3620 = vmatpush1.msra.mxu1 %v3485_v40  ;;  %4039 = vmatpush2.msra.mxu0 %v3864_v58  ;;  %v3582_v36 = vld [vmem:[#allocation13 + $0x1388] sm:$0xff]  ;;  %v3833_v40 = vld [vmem:[#allocation13 + $0x1618] sm:$0xff]  ;;  %v3902_v58 = vrot.slane %v10107_v39, 1 }
 0xc83   : > { %3621 = vmatprep.subr.mxu1 %v3482_v7  ;;  %4040 = vmatprep.subr.mxu0 %v3861_v44  ;;  %v3581_v44 = vld [vmem:[#allocation13 + $0x1380] sm:$0xff] }
 0xc84   : > { %3622 = vmatpush1.msra.mxu1 %v3481_v35  ;;  %4041 = vmatpush2.msra.mxu0 %v3860_v59  ;;  %v3578_v35 = vld [vmem:[#allocation13 + $0x1368] sm:$0xff]  ;;  %v3901_v59 = vrot.slane %v3759_v62, 1  ;;  %v3561_v62 = vld [vmem:[#allocation13 + $0x12e0] sm:$0xff] }
 0xc85   : > { %3623 = vmatprep.subr.mxu1 %v3478_v51  ;;  %4042 = vmatprep.subr.mxu0 %v3857_v31  ;;  %v3909_v51 = vrot.slane %v3764_v19, 1  ;;  %v3763_v31 = vld [vmem:[#allocation2 + $0x20] sm:$0x1]  ;;  %v4132_v19 = vld [vmem:[#allocation13 + $0x1990] sm:$0xff] }
 0xc86   : > { %3624 = vmatpush1.msra.mxu1 %v3477_v6  ;;  %4043 = vmatpush2.msra.mxu0 %v3856_v48  ;;  %v3133_v2 = vpop.f32.mrf.mxu0  ;;  %v10132_v6 = vpop.f32.mrf.mxu1  ;;  %v4145_v48 = vld [vmem:[#allocation13 + $0x19f8] sm:$0xff] }
 0xc87   : > { %3625 = vmatprep.subr.mxu1 %v3474_v46  ;;  %4044 = vmatprep.subr.mxu0 %v3853_v60  ;;  %v10121_v18 = vadd.f32 %v3133_v2, %v2828_v49  ;;  %v3577_v46 = vld [vmem:[#allocation13 + $0x1360] sm:$0xff]  ;;  %v4144_v60 = vld [vmem:[#allocation13 + $0x19f0] sm:$0xff]  ;;  %v3574_v49 = vld [vmem:[#allocation13 + $0x1348] sm:$0xff] }
 0xc88   : > { %3626 = vmatpush1.msra.mxu1 %v3473_v8  ;;  %4045 = vmatpush2.msra.mxu0 %v3852_v22  ;;  %v10123_v16 = vpop.f32.mrf.mxu0  ;;  %v4141_v8 = vld [vmem:[#allocation13 + $0x19d8] sm:$0xff]  ;;  %v3907_v22 = vrot.slane %v3763_v31, 1  ;;  %v4140_v2 = vld [vmem:[#allocation13 + $0x19d0] sm:$0xff] }
 0xc89   : > { %3627 = vmatprep.subr.mxu1 %v3470_v56  ;;  %4046 = vmatprep.subr.mxu0 %v3849_v42  ;;  %v10141_v56 = vsel %vm3900_vm10, %v3905_v43, %v3909_v51  ;;  %v3573_v42 = vld [vmem:[#allocation13 + $0x1340] sm:$0xff]  ;;  %v4120_v31 = vld [vmem:[#allocation13 + $0x1930] sm:$0xff] }
 0xc8a   : > { %3628 = vmatpush1.msra.mxu1 %v3469_v0  ;;  %4047 = vmatpush2.msra.mxu0 %v3848_v41  ;;  %v4078_v0 = vld [vmem:[#allocation2 + $0x30] sm:$0xfc]  ;;  %v10143_v41 = vpop.f32.mrf.mxu1  ;;  %v10148_v43 = vsel %vm3900_vm10, %v3902_v58, %v3907_v22  ;;  %v3553_v51 = vld [vmem:[#allocation13 + $0x12a0] sm:$0xff] }
 0xc8b   : > { %3629 = vmatprep.subr.mxu1 %v3594_v17  ;;  %4048 = vmatprep.subr.mxu0 %v3845_v5  ;;  %v3139_v38 = vpop.f32.mrf.mxu0  ;;  %v3570_v17 = vld [vmem:[#allocation13 + $0x1328] sm:$0xff]  ;;  %v4219_v5 = vrot.slane %v10100_v34, 2 }
 0xc8c   : > { %3630 = vmatpush2.msra.mxu1 %v3593_v57  ;;  %4049 = vmatpush2.msra.mxu0 %v3844_v24  ;;  %v10126_v23 = vadd.f32 %v3139_v38, %v10093_v32  ;;  %v3832_v32 = vld [vmem:[#allocation13 + $0x1610] sm:$0xff]  ;;  %v4137_v57 = vld [vmem:[#allocation13 + $0x19b8] sm:$0xff]  ;;  %v3569_v24 = vld [vmem:[#allocation13 + $0x1320] sm:$0xff]  ;;  %v10151_v38 = vpop.f32.mrf.mxu1 }
 0xc8d   : > { %3631 = vmatprep.subr.mxu1 %v3590_v3  ;;  %4050 = vmatprep.subr.mxu0 %v3841_v20  ;;  %v3141_v14 = vpop.f32.mrf.mxu0  ;;  %v4136_v3 = vld [vmem:[#allocation13 + $0x19b0] sm:$0xff]  ;;  %v4218_v20 = vrot.slane %v4078_v0, 2  ;;  %v3545_v0 = vld [vmem:[#allocation13 + $0x1260] sm:$0xff] }
 0xc8e   : > { %3632 = vmatpush2.msra.mxu1 %v3589_v53  ;;  %4051 = vmatpush2.msra.mxu0 %v3840_v54  ;;  %v10130_v7 = vadd.f32 %v3141_v14, %v10095_v12  ;;  %v10135_v12 = vsel %vm3900_vm10, %v3901_v59, %v3902_v58  ;;  %v3566_v53 = vld [vmem:[#allocation13 + $0x1308] sm:$0xff]  ;;  %v4133_v54 = vld [vmem:[#allocation13 + $0x1998] sm:$0xff]  ;;  %v4128_v14 = vld [vmem:[#allocation13 + $0x1970] sm:$0xff]  ;;  %v2585_v58 = vpop.f32.mrf.mxu1 }
 0xc8f   : > { %3633 = vmatprep.subr.mxu1 %v3586_v61  ;;  %4052 = vmatprep.subr.mxu0 %v3837_v45  ;;  %v10156_v61 = vsel %vm4214_vm11, %v4218_v20, %v4219_v5  ;;  %v3565_v45 = vld [vmem:[#allocation13 + $0x1300] sm:$0xff]  ;;  %v4121_v59 = vld [vmem:[#allocation13 + $0x1938] sm:$0xff] }
 0xc90   : > { %3634 = vmatpush2.msra.mxu1 %v3585_v25  ;;  %4053 = vmatpush2.msra.mxu0 %v3836_v55  ;;  %v3562_v25 = vld [vmem:[#allocation13 + $0x12e8] sm:$0xff]  ;;  %v4129_v55 = vld [vmem:[#allocation13 + $0x1978] sm:$0xff]  ;;  %v3541_v20 = vld [vmem:[#allocation13 + $0x1240] sm:$0xff] }
 0xc91   : > { %3635 = vmatprep.subr.mxu1 %v3582_v36  ;;  %4054 = vmatprep.subr.mxu0 %v3833_v40  ;;  %v3558_v36 = vld [vmem:[#allocation13 + $0x12c8] sm:$0xff]  ;;  %v4125_v40 = vld [vmem:[#allocation13 + $0x1958] sm:$0xff] }
 0xc92   : > { %3636 = vmatpush2.msra.mxu1 %v3581_v44  ;;  %4055 = vmatpush2.msra.mxu0 %v3832_v32  ;;  %v3557_v44 = vld [vmem:[#allocation13 + $0x12c0] sm:$0xff]  ;;  %v4124_v32 = vld [vmem:[#allocation13 + $0x1950] sm:$0xff] }
 0xc93   : > { %3637 = vmatprep.subr.mxu1 %v3578_v35  ;;  %4057 = vmatmul.mubr.f32.vlgmr.msra.gmra.mxu0 %v10135_v12  ;;  %v3554_v35 = vld [vmem:[#allocation13 + $0x12a8] sm:$0xff] }
 0xc94   : > { %4306 = vmatprep.subr.mxu0 %v4145_v48  ;;  %3638 = vmatpush2.msra.mxu1 %v3577_v46  ;;  %v3550_v46 = vld [vmem:[#allocation13 + $0x1288] sm:$0xff] }
 0xc95   : > { %4062 = vmatprep.mubr.f32.mxu0 %v10141_v56  ;;  %4307 = vmatpush1.msra.mxu0 %v4144_v60  ;;  %v4117_v60 = vld [vmem:[#allocation13 + $0x1918] sm:$0xff] }
 0xc96   : > { %3639 = vmatprep.subr.mxu1 %v3574_v49  ;;  %4308 = vmatprep.subr.mxu0 %v4141_v8  ;;  %v3549_v49 = vld [vmem:[#allocation13 + $0x1280] sm:$0xff]  ;;  %v4116_v8 = vld [vmem:[#allocation13 + $0x1910] sm:$0xff] }
 0xc97   : > { %3640 = vmatpush2.msra.mxu1 %v3573_v42  ;;  %4309 = vmatpush1.msra.mxu0 %v4140_v2  ;;  %v3546_v42 = vld [vmem:[#allocation13 + $0x1268] sm:$0xff]  ;;  %v4113_v2 = vld [vmem:[#allocation13 + $0x18f8] sm:$0xff] }
 0xc98   : > { %3641 = vmatprep.subr.mxu1 %v3570_v17  ;;  %4063 = vmatmul.mubr.f32.gmra.mxu0 %v10148_v43  ;;  %v4112_v17 = vld [vmem:[#allocation13 + $0x18f0] sm:$0xff] }
 0xc99   : > { %4310 = vmatprep.subr.mxu0 %v4137_v57  ;;  %3642 = vmatpush2.msra.mxu1 %v3569_v24  ;;  %v3542_v57 = vld [vmem:[#allocation13 + $0x1248] sm:$0xff]  ;;  %v4109_v24 = vld [vmem:[#allocation13 + $0x18d8] sm:$0xff] }
 0xc9a   : > { %4311 = vmatpush1.msra.mxu0 %v4136_v3  ;;  %4370 = vmatprep.mubr.f32.mxu0 %v10156_v61 }
 0xc9b   : > { %3643 = vmatprep.subr.mxu1 %v3566_v53  ;;  %4312 = vmatprep.subr.mxu0 %v4133_v54  ;;  %v4108_v53 = vld [vmem:[#allocation13 + $0x18d0] sm:$0xff]  ;;  %v3538_v54 = vld [vmem:[#allocation13 + $0x1228] sm:$0xff] }
 0xc9c   : > { %3644 = vmatpush2.msra.mxu1 %v3565_v45  ;;  %4313 = vmatpush1.msra.mxu0 %v4132_v19  ;;  %v4105_v45 = vld [vmem:[#allocation13 + $0x18b8] sm:$0xff] }
 0xc9d   : > { %3645 = vmatprep.subr.mxu1 %v3562_v25  ;;  %4314 = vmatprep.subr.mxu0 %v4129_v55  ;;  %v3537_v25 = vld [vmem:[#allocation13 + $0x1220] sm:$0xff]  ;;  %v4104_v55 = vld [vmem:[#allocation13 + $0x18b0] sm:$0xff] }
 0xc9e   : > { %3646 = vmatpush2.msra.mxu1 %v3561_v62  ;;  %4315 = vmatpush1.msra.mxu0 %v4128_v14  ;;  %v3534_v14 = vld [vmem:[#allocation13 + $0x1208] sm:$0xff] }
 0xc9f   : > { %3647 = vmatprep.subr.mxu1 %v3558_v36  ;;  %4316 = vmatprep.subr.mxu0 %v4125_v40  ;;  %v10159_v48 = vpop.f32.mrf.mxu1  ;;  %v4101_v36 = vld [vmem:[#allocation13 + $0x1898] sm:$0xff]  ;;  %v3533_v40 = vld [vmem:[#allocation13 + $0x1200] sm:$0xff] }
 0xca0   : > { %3648 = vmatpush2.msra.mxu1 %v3557_v44  ;;  %4317 = vmatpush1.msra.mxu0 %v4124_v32  ;;  %v4100_v44 = vld [vmem:[#allocation13 + $0x1890] sm:$0xff]  ;;  %v3827_v32 = vld [vmem:[#allocation13 + $0x15e8] sm:$0xff] }
 0xca1   : > { %3649 = vmatprep.subr.mxu1 %v3554_v35  ;;  %4318 = vmatprep.subr.mxu0 %v4121_v59  ;;  %v10161_v22 = vpop.f32.mrf.mxu1  ;;  %v4097_v35 = vld [vmem:[#allocation13 + $0x1878] sm:$0xff]  ;;  %v3826_v59 = vld [vmem:[#allocation13 + $0x15e0] sm:$0xff] }
 0xca2   : > { %3650 = vmatpush2.msra.mxu1 %v3553_v51  ;;  %4319 = vmatpush1.msra.mxu0 %v4120_v31  ;;  %v4096_v51 = vld [vmem:[#allocation13 + $0x1870] sm:$0xff]  ;;  %v4093_v31 = vld [vmem:[#allocation13 + $0x1858] sm:$0xff] }
 0xca3   : > { %3651 = vmatprep.subr.mxu1 %v3550_v46  ;;  %4320 = vmatprep.subr.mxu0 %v4117_v60  ;;  %v3822_v46 = vld [vmem:[#allocation13 + $0x15c0] sm:$0xff]  ;;  %v4092_v60 = vld [vmem:[#allocation13 + $0x1850] sm:$0xff] }
 0xca4   : > { %3652 = vmatpush2.msra.mxu1 %v3549_v49  ;;  %4321 = vmatpush1.msra.mxu0 %v4116_v8  ;;  %v10163_v3 = vpop.f32.mrf.mxu1  ;;  %v3819_v49 = vld [vmem:[#allocation13 + $0x15a8] sm:$0xff]  ;;  %v4089_v8 = vld [vmem:[#allocation13 + $0x1838] sm:$0xff] }
 0xca5   : > { %3653 = vmatprep.subr.mxu1 %v3546_v42  ;;  %4322 = vmatprep.subr.mxu0 %v4113_v2  ;;  %v3818_v42 = vld [vmem:[#allocation13 + $0x15a0] sm:$0xff]  ;;  %v4088_v2 = vld [vmem:[#allocation13 + $0x1830] sm:$0xff] }
 0xca6   : > { %3654 = vmatpush2.msra.mxu1 %v3545_v0  ;;  %4323 = vmatpush1.msra.mxu0 %v4112_v17  ;;  %v2758_v19 = vpop.f32.mrf.mxu1  ;;  %v4085_v0 = vld [vmem:[#allocation13 + $0x1818] sm:$0xff]  ;;  %v3814_v17 = vld [vmem:[#allocation13 + $0x1580] sm:$0xff] }
 0xca7   : > { %3655 = vmatprep.subr.mxu1 %v3542_v57  ;;  %4324 = vmatprep.subr.mxu0 %v4109_v24  ;;  %v10165_v62 = vadd.f32 %v2758_v19, %v2585_v58  ;;  %v3823_v58 = vld [vmem:[#allocation13 + $0x15c8] sm:$0xff]  ;;  %v4084_v57 = vld [vmem:[#allocation13 + $0x1810] sm:$0xff]  ;;  %v3806_v19 = vld [vmem:[#allocation13 + $0x1540] sm:$0xff] }
 0xca8   : > { %3656 = vmatpush2.msra.mxu1 %v3541_v20  ;;  %4325 = vmatpush1.msra.mxu0 %v4108_v53  ;;  %v3811_v24 = vld [vmem:[#allocation13 + $0x1568] sm:$0xff]  ;;  %v4209_v20 = vld [vmem:[#allocation13 + $0x1bf8] sm:$0xff]  ;;  %v3810_v53 = vld [vmem:[#allocation13 + $0x1560] sm:$0xff] }
 0xca9   : > { %3657 = vmatprep.subr.mxu1 %v3538_v54  ;;  %4326 = vmatprep.subr.mxu0 %v4105_v45  ;;  %v4208_v54 = vld [vmem:[#allocation13 + $0x1bf0] sm:$0xff]  ;;  %v3807_v45 = vld [vmem:[#allocation13 + $0x1548] sm:$0xff] }
 0xcaa   : > { %3658 = vmatpush2.msra.mxu1 %v3537_v25  ;;  %4327 = vmatpush1.msra.mxu0 %v4104_v55  ;;  %v4204_v25 = vld [vmem:[#allocation13 + $0x1bd0] sm:$0xff]  ;;  %v3803_v55 = vld [vmem:[#allocation13 + $0x1528] sm:$0xff] }
 0xcab   : > { %3659 = vmatprep.subr.mxu1 %v3534_v14  ;;  %4328 = vmatprep.subr.mxu0 %v4101_v36  ;;  %v4201_v14 = vld [vmem:[#allocation13 + $0x1bb8] sm:$0xff]  ;;  %v4200_v36 = vld [vmem:[#allocation13 + $0x1bb0] sm:$0xff] }
 0xcac   : > { %3660 = vmatpush2.msra.mxu1 %v3533_v40  ;;  %4329 = vmatpush1.msra.mxu0 %v4100_v44  ;;  %v3799_v40 = vld [vmem:[#allocation13 + $0x1508] sm:$0xff]  ;;  %v4197_v44 = vld [vmem:[#allocation13 + $0x1b98] sm:$0xff] }
 0xcad   : > { %3662 = vmatmul.mubr.f32.vlgmr.msra.gmra.mxu1 %v10102_v1  ;;  %3915 = vmatprep.subr.mxu1 %v3827_v32  ;;  %v3815_v1 = vld [vmem:[#allocation13 + $0x1588] sm:$0xff]  ;;  %v3798_v32 = vld [vmem:[#allocation13 + $0x1500] sm:$0xff] }
 0xcae   : > { %4330 = vmatprep.subr.mxu0 %v4097_v35  ;;  %3667 = vmatprep.mubr.f32.mxu1 %v10100_v34  ;;  %v4196_v35 = vld [vmem:[#allocation13 + $0x1b90] sm:$0xff]  ;;  %v3866_v34 = vld [vmem:[#allocation13 + $0x1720] sm:$0xff] }
 0xcaf   : > { %3916 = vmatpush1.msra.mxu1 %v3826_v59  ;;  %4331 = vmatpush1.msra.mxu0 %v4096_v51  ;;  %v3795_v51 = vld [vmem:[#allocation13 + $0x14e8] sm:$0xff] }
 0xcb0   : > { %3917 = vmatprep.subr.mxu1 %v3823_v58  ;;  %4332 = vmatprep.subr.mxu0 %v4093_v31  ;;  %v4193_v58 = vld [vmem:[#allocation13 + $0x1b78] sm:$0xff]  ;;  %v3794_v31 = vld [vmem:[#allocation13 + $0x14e0] sm:$0xff] }
 0xcb1   : > { %3918 = vmatpush1.msra.mxu1 %v3822_v46  ;;  %4333 = vmatpush1.msra.mxu0 %v4092_v60  ;;  %v4192_v46 = vld [vmem:[#allocation13 + $0x1b70] sm:$0xff]  ;;  %v3791_v60 = vld [vmem:[#allocation13 + $0x14c8] sm:$0xff] }
 0xcb2   : > { %3668 = vmatmul.mubr.f32.gmra.mxu1 %v10107_v39  ;;  %3919 = vmatprep.subr.mxu1 %v3819_v49  ;;  %v4205_v39 = vld [vmem:[#allocation13 + $0x1bd8] sm:$0xff] }
 0xcb3   : > { %4334 = vmatprep.subr.mxu0 %v4089_v8  ;;  %3920 = vmatpush1.msra.mxu1 %v3818_v42  ;;  %v4189_v49 = vld [vmem:[#allocation13 + $0x1b58] sm:$0xff]  ;;  %v3790_v42 = vld [vmem:[#allocation13 + $0x14c0] sm:$0xff] }
 0xcb4   : > { %3979 = vmatprep.mubr.f32.mxu1 %v10113_v47  ;;  %4335 = vmatpush1.msra.mxu0 %v4088_v2  ;;  %v3802_v47 = vld [vmem:[#allocation13 + $0x1520] sm:$0xff]  ;;  %v4188_v2 = vld [vmem:[#allocation13 + $0x1b50] sm:$0xff] }
 0xcb5   : > { %3921 = vmatprep.subr.mxu1 %v3815_v1  ;;  %4336 = vmatprep.subr.mxu0 %v4085_v0  ;;  %v3787_v1 = vld [vmem:[#allocation13 + $0x14a8] sm:$0xff]  ;;  %v4185_v0 = vld [vmem:[#allocation13 + $0x1b38] sm:$0xff] }
 0xcb6   : > { %3922 = vmatpush1.msra.mxu1 %v3814_v17  ;;  %4337 = vmatpush1.msra.mxu0 %v4084_v57  ;;  %v3786_v17 = vld [vmem:[#allocation13 + $0x14a0] sm:$0xff]  ;;  %v4184_v57 = vld [vmem:[#allocation13 + $0x1b30] sm:$0xff] }
 0xcb7   : > { %3923 = vmatprep.subr.mxu1 %v3811_v24  ;;  %4338 = vmatprep.subr.mxu0 %v4209_v20 }
 0xcb8   : > { %3924 = vmatpush1.msra.mxu1 %v3810_v53  ;;  %4339 = vmatpush2.msra.mxu0 %v4208_v54  ;;  %v3783_v53 = vld [vmem:[#allocation13 + $0x1488] sm:$0xff]  ;;  %v4181_v54 = vld [vmem:[#allocation13 + $0x1b18] sm:$0xff] }
 0xcb9   : > { %3925 = vmatprep.subr.mxu1 %v3807_v45  ;;  %4340 = vmatprep.subr.mxu0 %v4205_v39  ;;  %v3782_v45 = vld [vmem:[#allocation13 + $0x1480] sm:$0xff]  ;;  %v4180_v39 = vld [vmem:[#allocation13 + $0x1b10] sm:$0xff] }
 0xcba   : > { %3926 = vmatpush1.msra.mxu1 %v3806_v19  ;;  %4341 = vmatpush2.msra.mxu0 %v4204_v25  ;;  %v2090_v59 = vpop.xlane.xlu1 %2089  ;;  %v3779_v19 = vld [vmem:[#allocation13 + $0x1468] sm:$0xff]  ;;  %v4177_v25 = vld [vmem:[#allocation13 + $0x1af8] sm:$0xff] }
 0xcbb   : > { %3927 = vmatprep.subr.mxu1 %v3803_v55  ;;  %4342 = vmatprep.subr.mxu0 %v4201_v14  ;;  %v2097_v8 = vmul.f32 0.00390625, %v2090_v59  ;;  %v3778_v55 = vld [vmem:[#allocation13 + $0x1460] sm:$0xff]  ;;  %v4176_v14 = vld [vmem:[#allocation13 + $0x1af0] sm:$0xff] }
 0xcbc   : > { %3928 = vmatpush1.msra.mxu1 %v3802_v47  ;;  %4343 = vmatpush2.msra.mxu0 %v4200_v36  ;;  %v4173_v47 = vld [vmem:[#allocation13 + $0x1ad8] sm:$0xff]  ;;  %v3770_v59 = vld [vmem:[#allocation13 + $0x1420] sm:$0xff] }
 0xcbd   : > { %3929 = vmatprep.subr.mxu1 %v3799_v40  ;;  %4344 = vmatprep.subr.mxu0 %v4197_v44  ;;  %v10172_v24 = vsub.f32 %v10070_v9, %v2097_v8  ;;  %v10175_v20 = vsub.f32 %v10065_v63, %v2097_v8  ;;  %v3775_v9 = vld [vmem:[#allocation13 + $0x1448] sm:$0xff]  ;;  %v3774_v40 = vld [vmem:[#allocation13 + $0x1440] sm:$0xff]  ;;  %v4172_v44 = vld [vmem:[#allocation13 + $0x1ad0] sm:$0xff] }
 0xcbe   : > { %3930 = vmatpush1.msra.mxu1 %v3798_v32  ;;  %4345 = vmatpush2.msra.mxu0 %v4196_v35  ;;  %v3771_v32 = vld [vmem:[#allocation13 + $0x1428] sm:$0xff]  ;;  %v4169_v35 = vld [vmem:[#allocation13 + $0x1ab8] sm:$0xff] }
 0xcbf   : > { %3931 = vmatprep.subr.mxu1 %v3795_v51  ;;  %4346 = vmatprep.subr.mxu0 %v4193_v58  ;;  %v2111_v63 = vmul.f32 %v10172_v24, %v10172_v24  ;;  %v2112_v36 = vmul.f32 %v10175_v20, %v10175_v20  ;;  %v4168_v51 = vld [vmem:[#allocation13 + $0x1ab0] sm:$0xff]  ;;  %v3767_v58 = vld [vmem:[#allocation13 + $0x1408] sm:$0xff] }
 0xcc0   : > { %3932 = vmatpush1.msra.mxu1 %v3794_v31  ;;  %4347 = vmatpush2.msra.mxu0 %v4192_v46  ;;  %v4165_v31 = vld [vmem:[#allocation13 + $0x1a98] sm:$0xff] }
 0xcc1   : > { %3933 = vmatprep.subr.mxu1 %v3791_v60  ;;  %4348 = vmatprep.subr.mxu0 %v4189_v49  ;;  %v2121_v46 = vadd.f32 %v2112_v36, %v2111_v63  ;;  %v3766_v49 = vld [vmem:[#allocation13 + $0x1400] sm:$0xff]  ;;  %v4152_v63 = vld [vmem:[#allocation13 + $0x1a30] sm:$0xff]  ;;  %v3879_v36 = vld [vmem:[#allocation13 + $0x1788] sm:$0xff] }
 0xcc2   : > { %3934 = vmatpush1.msra.mxu1 %v3790_v42  ;;  %4349 = vmatpush2.msra.mxu0 %v4188_v2  ;;  %v4164_v42 = vld [vmem:[#allocation13 + $0x1a90] sm:$0xff]  ;;  %v3891_v2 = vld [vmem:[#allocation13 + $0x17e8] sm:$0xff] }
 0xcc3   : > { %3935 = vmatprep.subr.mxu1 %v3787_v1  ;;  %4350 = vmatprep.subr.mxu0 %v4185_v0  ;;  %v4161_v0 = vld [vmem:[#allocation13 + $0x1a78] sm:$0xff] }
 0xcc4   : > { %3936 = vmatpush1.msra.mxu1 %v3786_v17  ;;  %4351 = vmatpush2.msra.mxu0 %v4184_v57  ;;  %v3890_v17 = vld [vmem:[#allocation13 + $0x17e0] sm:$0xff]  ;;  %v4160_v57 = vld [vmem:[#allocation13 + $0x1a70] sm:$0xff] }
 0xcc5   : > { %3937 = vmatprep.subr.mxu1 %v3783_v53  ;;  %4352 = vmatprep.subr.mxu0 %v4181_v54  ;;  %v3887_v53 = vld [vmem:[#allocation13 + $0x17c8] sm:$0xff]  ;;  %v4157_v54 = vld [vmem:[#allocation13 + $0x1a58] sm:$0xff] }
 0xcc6   : > { %3938 = vmatpush1.msra.mxu1 %v3782_v45  ;;  %4353 = vmatpush2.msra.mxu0 %v4180_v39  ;;  %v3886_v45 = vld [vmem:[#allocation13 + $0x17c0] sm:$0xff]  ;;  %v4156_v39 = vld [vmem:[#allocation13 + $0x1a50] sm:$0xff] }
 0xcc7   : > { %3939 = vmatprep.subr.mxu1 %v3779_v19  ;;  %4354 = vmatprep.subr.mxu0 %v4177_v25  ;;  %v3883_v19 = vld [vmem:[#allocation13 + $0x17a8] sm:$0xff] }
 0xcc8   : > { %3940 = vmatpush1.msra.mxu1 %v3778_v55  ;;  %4355 = vmatpush2.msra.mxu0 %v4176_v14  ;;  %v4153_v55 = vld [vmem:[#allocation13 + $0x1a38] sm:$0xff]  ;;  %v3882_v14 = vld [vmem:[#allocation13 + $0x17a0] sm:$0xff] }
 0xcc9   : > { %3941 = vmatprep.subr.mxu1 %v3775_v9  ;;  %4356 = vmatprep.subr.mxu0 %v4173_v47  ;;  %v4080_v9 = vld [vmem:[#allocation2 + $0x58] sm:$0x3] }
 0xcca   : > { %3942 = vmatpush1.msra.mxu1 %v3774_v40  ;;  %4357 = vmatpush2.msra.mxu0 %v4172_v44  ;;  %v3447_v60 = vpop.f32.mrf.mxu0  ;;  %v4077_v40 = vld [vmem:[#allocation2 + $0x10] sm:$0xfc] }
 0xccb   : > { %3943 = vmatprep.subr.mxu1 %v3771_v32  ;;  %4358 = vmatprep.subr.mxu0 %v4169_v35  ;;  %v10182_v8 = vadd.f32 %v3447_v60, %v10121_v18  ;;  %v4149_v32 = vld [vmem:[#allocation13 + $0x1a18] sm:$0xff]  ;;  %v3878_v35 = vld [vmem:[#allocation13 + $0x1780] sm:$0xff] }
 0xccc   : > { %3944 = vmatpush1.msra.mxu1 %v3770_v59  ;;  %4359 = vmatpush2.msra.mxu0 %v4168_v51  ;;  %v10184_v1 = vpop.f32.mrf.mxu0  ;;  %v4148_v51 = vld [vmem:[#allocation13 + $0x1a10] sm:$0xff]  ;;  %v4459_v60 = vld [vmem:[#allocation13 + $0x1df8] sm:$0xff] }
 0xccd   : > { %3945 = vmatprep.subr.mxu1 %v3767_v58  ;;  %4360 = vmatprep.subr.mxu0 %v4165_v31  ;;  %v3875_v58 = vld [vmem:[#allocation13 + $0x1768] sm:$0xff]  ;;  %v4223_v31 = vrot.slane %v4080_v9, 2 }
 0xcce   : > { %2122 = vadd.xlane.f32.xlu1 %v2121_v46  ;;  %3946 = vmatpush1.msra.mxu1 %v3766_v49  ;;  %v4215_v46 = vrot.slane %v4077_v40, 2  ;;  %v4079_v49 = vld [vmem:[#allocation2 + $0x20] sm:$0x3]  ;;  %v3862_v40 = vld [vmem:[#allocation13 + $0x1700] sm:$0xff] }
 0xccf   : > { %4361 = vmatpush2.msra.mxu0 %v4164_v42  ;;  %3947 = vmatprep.subr.mxu1 %v3891_v2  ;;  %v3453_v18 = vpop.f32.mrf.mxu0  ;;  %v4458_v2 = vld [vmem:[#allocation13 + $0x1df0] sm:$0xff] }
 0xcd0   : > { %4362 = vmatprep.subr.mxu0 %v4161_v0  ;;  %3948 = vmatpush2.msra.mxu1 %v3890_v17  ;;  %v10187_v25 = vadd.f32 %v3453_v18, %v10126_v23  ;;  %v10192_v23 = vld [vmem:[#allocation2 + $0x40] sm:$0xff]  ;;  %v3871_v0 = vld [vmem:[#allocation13 + $0x1748] sm:$0xff]  ;;  %v10202_v17 = vsel %vm4214_vm11, %v4219_v5, %v4223_v31  ;;  %v4450_v5 = vld [vmem:[#allocation13 + $0x1db0] sm:$0xff] }
 0xcd1   : > { %4363 = vmatpush2.msra.mxu0 %v4160_v57  ;;  %3949 = vmatprep.subr.mxu1 %v3887_v53  ;;  %v3455_v47 = vpop.f32.mrf.mxu0  ;;  %v4216_v59 = vrot.slane %v10192_v23, 2  ;;  %v4455_v57 = vld [vmem:[#allocation13 + $0x1dd8] sm:$0xff]  ;;  %v3870_v53 = vld [vmem:[#allocation13 + $0x1740] sm:$0xff]  ;;  %v3867_v18 = vld [vmem:[#allocation13 + $0x1728] sm:$0xff] }
 0xcd2   : > { %4364 = vmatprep.subr.mxu0 %v4157_v54  ;;  %3950 = vmatpush2.msra.mxu1 %v3886_v45  ;;  %v10190_v44 = vadd.f32 %v3455_v47, %v10130_v7  ;;  %v3874_v7 = vld [vmem:[#allocation13 + $0x1760] sm:$0xff]  ;;  %v4221_v54 = vrot.slane %v4079_v49, 2  ;;  %v4454_v45 = vld [vmem:[#allocation13 + $0x1dd0] sm:$0xff]  ;;  %v2751_v49 = vadd.f32 %v10159_v48, %v10132_v6 }
 0xcd3   : > { %4365 = vmatpush2.msra.mxu0 %v4156_v39  ;;  %3951 = vmatprep.subr.mxu1 %v3883_v19  ;;  %v10196_v42 = vsel %vm4214_vm11, %v4215_v46, %v4216_v59  ;;  %v4392_v39 = vld [vmem:[#allocation2 + $0x30] sm:$0xf8]  ;;  %v4451_v19 = vld [vmem:[#allocation13 + $0x1db8] sm:$0xff]  ;;  %v3846_v48 = vld [vmem:[#allocation13 + $0x1680] sm:$0xff] }
 0xcd4   : > { %4366 = vmatprep.subr.mxu0 %v4153_v55  ;;  %3952 = vmatpush2.msra.mxu1 %v3882_v14  ;;  %v10205_v55 = vld [vmem:[#allocation2 + $0x78] sm:$0xff]  ;;  %v10211_v9 = vsel %vm4214_vm11, %v4216_v59, %v4221_v54  ;;  %v4532_v47 = vrot.slane %v4392_v39, 3  ;;  %v3859_v59 = vld [vmem:[#allocation13 + $0x16e8] sm:$0xff]  ;;  %v3850_v54 = vld [vmem:[#allocation13 + $0x16a0] sm:$0xff] }
 0xcd5   : > { %4367 = vmatpush2.msra.mxu0 %v4152_v63  ;;  %3953 = vmatprep.subr.mxu1 %v3879_v36  ;;  %v4533_v14 = vrot.slane %v10205_v55, 3  ;;  %v3863_v63 = vld [vmem:[#allocation13 + $0x1708] sm:$0xff]  ;;  %v4447_v36 = vld [vmem:[#allocation13 + $0x1d98] sm:$0xff]  ;;  %v4442_v31 = vld [vmem:[#allocation13 + $0x1d70] sm:$0xff] }
 0xcd6   : > { %4368 = vmatprep.subr.mxu0 %v4149_v32  ;;  %3954 = vmatpush2.msra.mxu1 %v3878_v35  ;;  %v7321_v35 = vsel %vm1534_vm13, 1.0, %v7619_v26  ;;  %v3855_v46 = vld [vmem:[#allocation13 + $0x16c8] sm:$0xff] }
 0xcd7   : > { %4369 = vmatpush2.msra.mxu0 %v4148_v51  ;;  %3955 = vmatprep.subr.mxu1 %v3875_v58  ;;  %v10217_v32 = vsel %vm4528_vm12, %v4532_v47, %v4533_v14  ;;  %v4443_v51 = vld [vmem:[#allocation13 + $0x1d78] sm:$0xff]  ;;  %v3858_v58 = vld [vmem:[#allocation13 + $0x16e0] sm:$0xff]  ;;  %v3847_v39 = vld [vmem:[#allocation13 + $0x1688] sm:$0xff] }
 0xcd8   : > { %4371 = vmatmul.mubr.f32.vlgmr.msra.gmra.mxu0 %v10196_v42  ;;  %4620 = vmatprep.subr.mxu0 %v4459_v60  ;;  %v4439_v60 = vld [vmem:[#allocation13 + $0x1d58] sm:$0xff]  ;;  %v3843_v47 = vld [vmem:[#allocation13 + $0x1668] sm:$0xff] }
 0xcd9   : > { %3956 = vmatpush2.msra.mxu1 %v3874_v7  ;;  %4376 = vmatprep.mubr.f32.mxu0 %v10202_v17  ;;  %v3854_v7 = vld [vmem:[#allocation13 + $0x16c0] sm:$0xff]  ;;  %v3839_v26 = vld [vmem:[#allocation13 + $0x1648] sm:$0xff] }
 0xcda   : > { %4621 = vmatpush1.msra.mxu0 %v4458_v2  ;;  %3957 = vmatprep.subr.mxu1 %v3871_v0  ;;  %v4438_v2 = vld [vmem:[#allocation13 + $0x1d50] sm:$0xff]  ;;  %v3851_v0 = vld [vmem:[#allocation13 + $0x16a8] sm:$0xff] }
 0xcdb   : > { %4622 = vmatprep.subr.mxu0 %v4455_v57  ;;  %3958 = vmatpush2.msra.mxu1 %v3870_v53  ;;  %v4435_v57 = vld [vmem:[#allocation13 + $0x1d38] sm:$0xff] }
 0xcdc   : > { %4623 = vmatpush1.msra.mxu0 %v4454_v45  ;;  %3959 = vmatprep.subr.mxu1 %v3867_v18  ;;  %v4434_v45 = vld [vmem:[#allocation13 + $0x1d30] sm:$0xff] }
 0xcdd   : > { %4377 = vmatmul.mubr.f32.gmra.mxu0 %v10211_v9  ;;  %4624 = vmatprep.subr.mxu0 %v4451_v19  ;;  %v4431_v19 = vld [vmem:[#allocation13 + $0x1d18] sm:$0xff] }
 0xcde   : > { %3960 = vmatpush2.msra.mxu1 %v3866_v34  ;;  %4625 = vmatpush1.msra.mxu0 %v4450_v5  ;;  %v4430_v34 = vld [vmem:[#allocation13 + $0x1d10] sm:$0xff]  ;;  %v2757_v5 = vadd.f32 %v10163_v3, %v10151_v38  ;;  %v3835_v3 = vld [vmem:[#allocation13 + $0x1628] sm:$0xff] }
 0xcdf   : > { %4684 = vmatprep.mubr.f32.mxu0 %v10217_v32  ;;  %3961 = vmatprep.subr.mxu1 %v3863_v63  ;;  %v4427_v63 = vld [vmem:[#allocation13 + $0x1cf8] sm:$0xff] }
 0xce0   : > { %4626 = vmatprep.subr.mxu0 %v4447_v36  ;;  %3962 = vmatpush2.msra.mxu1 %v3862_v40  ;;  %v3842_v36 = vld [vmem:[#allocation13 + $0x1660] sm:$0xff]  ;;  %v4426_v40 = vld [vmem:[#allocation13 + $0x1cf0] sm:$0xff] }
 0xce1   : > { %4627 = vmatpush1.msra.mxu0 %v4446_v13  ;;  %2191 = vperm.xlu1 %7553, %v7321_v35   ;;  %v4423_v35 = vld [vmem:[#allocation13 + $0x1cd8] sm:$0xff] }
 0xce2   : > { %3963 = vmatprep.subr.mxu1 %v3859_v59  ;;  %4628 = vmatprep.subr.mxu0 %v4443_v51  ;;  %v3838_v51 = vld [vmem:[#allocation13 + $0x1640] sm:$0xff] }
 0xce3   : > { %3964 = vmatpush2.msra.mxu1 %v3858_v58  ;;  %4629 = vmatpush1.msra.mxu0 %v4442_v31  ;;  %v3056_v53 = vpop.f32.mrf.mxu1  ;;  %v4422_v58 = vld [vmem:[#allocation13 + $0x1cd0] sm:$0xff]  ;;  %v4419_v31 = vld [vmem:[#allocation13 + $0x1cb8] sm:$0xff] }
 0xce4   : > { %3965 = vmatprep.subr.mxu1 %v3855_v46  ;;  %4630 = vmatprep.subr.mxu0 %v4439_v60  ;;  %v10222_v18 = vadd.f32 %v3056_v53, %v2751_v49  ;;  %v3834_v60 = vld [vmem:[#allocation13 + $0x1620] sm:$0xff]  ;;  %v4418_v49 = vld [vmem:[#allocation13 + $0x1cb0] sm:$0xff]  ;;  %v4143_v53 = vld [vmem:[#allocation13 + $0x19e8] sm:$0xff] }
 0xce5   : > { %3966 = vmatpush2.msra.mxu1 %v3854_v7  ;;  %4631 = vmatpush1.msra.mxu0 %v4438_v2  ;;  %v10224_v6 = vpop.f32.mrf.mxu1  ;;  %v3831_v7 = vld [vmem:[#allocation13 + $0x1608] sm:$0xff]  ;;  %v4415_v2 = vld [vmem:[#allocation13 + $0x1c98] sm:$0xff] }
 0xce6   : > { %3967 = vmatprep.subr.mxu1 %v3851_v0  ;;  %4632 = vmatprep.subr.mxu0 %v4435_v57  ;;  %v3830_v0 = vld [vmem:[#allocation13 + $0x1600] sm:$0xff]  ;;  %v4414_v57 = vld [vmem:[#allocation13 + $0x1c90] sm:$0xff] }
 0xce7   : > { %3968 = vmatpush2.msra.mxu1 %v3850_v54  ;;  %4633 = vmatpush1.msra.mxu0 %v4434_v45  ;;  %v4411_v54 = vld [vmem:[#allocation13 + $0x1c78] sm:$0xff]  ;;  %v4410_v45 = vld [vmem:[#allocation13 + $0x1c70] sm:$0xff] }
 0xce8   : > { %3969 = vmatprep.subr.mxu1 %v3847_v39  ;;  %4634 = vmatprep.subr.mxu0 %v4431_v19  ;;  %v3062_v13 = vpop.f32.mrf.mxu1  ;;  %v4139_v39 = vld [vmem:[#allocation13 + $0x19c8] sm:$0xff]  ;;  %v4407_v19 = vld [vmem:[#allocation13 + $0x1c58] sm:$0xff] }
 0xce9   : > { %3970 = vmatpush2.msra.mxu1 %v3846_v48  ;;  %4635 = vmatpush1.msra.mxu0 %v4430_v34  ;;  %v10228_v59 = vadd.f32 %v3062_v13, %v2757_v5  ;;  %v4138_v48 = vld [vmem:[#allocation13 + $0x19c0] sm:$0xff]  ;;  %v4406_v34 = vld [vmem:[#allocation13 + $0x1c50] sm:$0xff]  ;;  %v4135_v5 = vld [vmem:[#allocation13 + $0x19a8] sm:$0xff] }
 0xcea   : > { %3971 = vmatprep.subr.mxu1 %v3843_v47  ;;  %4636 = vmatprep.subr.mxu0 %v4427_v63  ;;  %v3064_v38 = vpop.f32.mrf.mxu1  ;;  %v4403_v47 = vld [vmem:[#allocation13 + $0x1c38] sm:$0xff]  ;;  %v4134_v63 = vld [vmem:[#allocation13 + $0x19a0] sm:$0xff] }
 0xceb   : > { %3972 = vmatpush2.msra.mxu1 %v3842_v36  ;;  %4637 = vmatpush1.msra.mxu0 %v4426_v40  ;;  %v10231_v46 = vadd.f32 %v3064_v38, %v10165_v62  ;;  %v4142_v62 = vld [vmem:[#allocation13 + $0x19e0] sm:$0xff]  ;;  %v4402_v36 = vld [vmem:[#allocation13 + $0x1c30] sm:$0xff]  ;;  %v2093_v40 = vpop.xlane.xlu0 %2092  ;;  %v4399_v13 = vld [vmem:[#allocation13 + $0x1c18] sm:$0xff] }
 0xcec   : > { %3973 = vmatprep.subr.mxu1 %v3839_v26  ;;  %4638 = vmatprep.subr.mxu0 %v4423_v35  ;;  %v4398_v26 = vld [vmem:[#allocation13 + $0x1c10] sm:$0xff]  ;;  %v4127_v35 = vld [vmem:[#allocation13 + $0x1968] sm:$0xff]  ;;  %v4126_v38 = vld [vmem:[#allocation13 + $0x1960] sm:$0xff] }
 0xced   : > { %3974 = vmatpush2.msra.mxu1 %v3838_v51  ;;  %4639 = vmatpush1.msra.mxu0 %v4422_v58  ;;  %v4523_v51 = vld [vmem:[#allocation13 + $0x1ff8] sm:$0xff]  ;;  %v2098_v58 = vmul.f32 0.00390625, %v2093_v40  ;;  %v4502_v40 = vld [vmem:[#allocation13 + $0x1f50] sm:$0xff] }
 0xcee   : > { %3975 = vmatprep.subr.mxu1 %v3835_v3  ;;  %4640 = vmatprep.subr.mxu0 %v4419_v31  ;;  %v4522_v3 = vld [vmem:[#allocation13 + $0x1ff0] sm:$0xff]  ;;  %v4519_v31 = vld [vmem:[#allocation13 + $0x1fd8] sm:$0xff] }
 0xcef   : > { %3976 = vmatpush2.msra.mxu1 %v3834_v60  ;;  %4641 = vmatpush1.msra.mxu0 %v4418_v49  ;;  %v4122_v60 = vld [vmem:[#allocation13 + $0x1940] sm:$0xff]  ;;  %v4518_v49 = vld [vmem:[#allocation13 + $0x1fd0] sm:$0xff] }
 0xcf0   : > { %3977 = vmatprep.subr.mxu1 %v3831_v7  ;;  %4642 = vmatprep.subr.mxu0 %v4415_v2  ;;  %v4119_v7 = vld [vmem:[#allocation13 + $0x1928] sm:$0xff]  ;;  %v10238_v2 = vsub.f32 %v10079_v11, %v2098_v58  ;;  %v4507_v11 = vld [vmem:[#allocation13 + $0x1f78] sm:$0xff] }
 0xcf1   : > { %3978 = vmatpush2.msra.mxu1 %v3830_v0  ;;  %4643 = vmatpush1.msra.mxu0 %v4414_v57  ;;  %v10241_v0 = vsub.f32 %v10076_v33, %v2098_v58  ;;  %v4118_v57 = vld [vmem:[#allocation13 + $0x1920] sm:$0xff]  ;;  %v4495_v58 = vld [vmem:[#allocation13 + $0x1f18] sm:$0xff] }
 0xcf2   : > { %3980 = vmatmul.mubr.f32.vlgmr.msra.gmra.mxu1 %v10135_v12  ;;  %4229 = vmatprep.subr.mxu1 %v4143_v53  ;;  %v4131_v12 = vld [vmem:[#allocation13 + $0x1988] sm:$0xff]  ;;  %v4514_v53 = vld [vmem:[#allocation13 + $0x1fb0] sm:$0xff]  ;;  %v4110_v33 = vld [vmem:[#allocation13 + $0x18e0] sm:$0xff] }
 0xcf3   : > { %4644 = vmatprep.subr.mxu0 %v4411_v54  ;;  %3985 = vmatprep.mubr.f32.mxu1 %v10141_v56  ;;  %v4130_v56 = vld [vmem:[#allocation13 + $0x1980] sm:$0xff]  ;;  %v4115_v54 = vld [vmem:[#allocation13 + $0x1908] sm:$0xff] }
 0xcf4   : > { %4230 = vmatpush1.msra.mxu1 %v4142_v62  ;;  %4645 = vmatpush1.msra.mxu0 %v4410_v45  ;;  %v4511_v62 = vld [vmem:[#allocation13 + $0x1f98] sm:$0xff]  ;;  %v4114_v45 = vld [vmem:[#allocation13 + $0x1900] sm:$0xff] }
 0xcf5   : > { %4231 = vmatprep.subr.mxu1 %v4139_v39  ;;  %4646 = vmatprep.subr.mxu0 %v4407_v19  ;;  %v4510_v39 = vld [vmem:[#allocation13 + $0x1f90] sm:$0xff]  ;;  %v4111_v19 = vld [vmem:[#allocation13 + $0x18e8] sm:$0xff] }
 0xcf6   : > { %4232 = vmatpush1.msra.mxu1 %v4138_v48  ;;  %4647 = vmatpush1.msra.mxu0 %v4406_v34  ;;  %v4506_v48 = vld [vmem:[#allocation13 + $0x1f70] sm:$0xff]  ;;  %v2113_v34 = vmul.f32 %v10238_v2, %v10238_v2 }
 0xcf7   : > { %3986 = vmatmul.mubr.f32.gmra.mxu1 %v10148_v43  ;;  %4233 = vmatprep.subr.mxu1 %v4135_v5  ;;  %v4123_v43 = vld [vmem:[#allocation13 + $0x1948] sm:$0xff]  ;;  %v2114_v5 = vmul.f32 %v10241_v0, %v10241_v0 }
 0xcf8   : > { %4648 = vmatprep.subr.mxu0 %v4403_v47  ;;  %4234 = vmatpush1.msra.mxu1 %v4134_v63  ;;  %v4107_v47 = vld [vmem:[#allocation13 + $0x18c8] sm:$0xff]  ;;  %v4503_v63 = vld [vmem:[#allocation13 + $0x1f58] sm:$0xff] }
 0xcf9   : > { %4293 = vmatprep.mubr.f32.mxu1 %v10156_v61  ;;  %4649 = vmatpush1.msra.mxu0 %v4402_v36  ;;  %v4515_v61 = vld [vmem:[#allocation13 + $0x1fb8] sm:$0xff]  ;;  %v4106_v36 = vld [vmem:[#allocation13 + $0x18c0] sm:$0xff] }
 0xcfa   : > { %4235 = vmatprep.subr.mxu1 %v4131_v12  ;;  %4650 = vmatprep.subr.mxu0 %v4399_v13  ;;  %v4103_v12 = vld [vmem:[#allocation13 + $0x18a8] sm:$0xff]  ;;  %v2124_v13 = vadd.f32 %v2114_v5, %v2113_v34  ;;  %v4478_v5 = vld [vmem:[#allocation13 + $0x1e90] sm:$0xff] }
 0xcfb   : > { %4236 = vmatpush1.msra.mxu1 %v4130_v56  ;;  %4651 = vmatpush1.msra.mxu0 %v4398_v26  ;;  %v4499_v56 = vld [vmem:[#allocation13 + $0x1f38] sm:$0xff]  ;;  %v4102_v26 = vld [vmem:[#allocation13 + $0x18a0] sm:$0xff] }
 0xcfc   : > { %4237 = vmatprep.subr.mxu1 %v4127_v35  ;;  %4652 = vmatprep.subr.mxu0 %v4523_v51  ;;  %v4498_v35 = vld [vmem:[#allocation13 + $0x1f30] sm:$0xff]  ;;  %v4099_v51 = vld [vmem:[#allocation13 + $0x1888] sm:$0xff] }
 0xcfd   : > { %4238 = vmatpush1.msra.mxu1 %v4126_v38  ;;  %4653 = vmatpush2.msra.mxu0 %v4522_v3  ;;  %v4098_v38 = vld [vmem:[#allocation13 + $0x1880] sm:$0xff]  ;;  %v4494_v3 = vld [vmem:[#allocation13 + $0x1f10] sm:$0xff] }
 0xcfe   : > { %4239 = vmatprep.subr.mxu1 %v4123_v43  ;;  %4654 = vmatprep.subr.mxu0 %v4519_v31  ;;  %v4095_v43 = vld [vmem:[#allocation13 + $0x1868] sm:$0xff]  ;;  %v4491_v31 = vld [vmem:[#allocation13 + $0x1ef8] sm:$0xff] }
 0xcff   : > { %4240 = vmatpush1.msra.mxu1 %v4122_v60  ;;  %4655 = vmatpush2.msra.mxu0 %v4518_v49  ;;  %v4094_v60 = vld [vmem:[#allocation13 + $0x1860] sm:$0xff]  ;;  %v4490_v49 = vld [vmem:[#allocation13 + $0x1ef0] sm:$0xff] }
 0xd00   : > { %4241 = vmatprep.subr.mxu1 %v4119_v7  ;;  %4656 = vmatprep.subr.mxu0 %v4515_v61  ;;  %v4091_v7 = vld [vmem:[#allocation13 + $0x1848] sm:$0xff]  ;;  %v4487_v61 = vld [vmem:[#allocation13 + $0x1ed8] sm:$0xff] }
 0xd01   : > { %4242 = vmatpush1.msra.mxu1 %v4118_v57  ;;  %4657 = vmatpush2.msra.mxu0 %v4514_v53  ;;  %v4090_v57 = vld [vmem:[#allocation13 + $0x1840] sm:$0xff]  ;;  %v4486_v53 = vld [vmem:[#allocation13 + $0x1ed0] sm:$0xff] }
 0xd02   : > { %4243 = vmatprep.subr.mxu1 %v4115_v54  ;;  %4658 = vmatprep.subr.mxu0 %v4511_v62  ;;  %v4087_v54 = vld [vmem:[#allocation13 + $0x1828] sm:$0xff]  ;;  %v4483_v62 = vld [vmem:[#allocation13 + $0x1eb8] sm:$0xff] }
 0xd03   : > { %4244 = vmatpush1.msra.mxu1 %v4114_v45  ;;  %4659 = vmatpush2.msra.mxu0 %v4510_v39  ;;  %v4086_v45 = vld [vmem:[#allocation13 + $0x1820] sm:$0xff]  ;;  %v4482_v39 = vld [vmem:[#allocation13 + $0x1eb0] sm:$0xff] }
 0xd04   : > { %4245 = vmatprep.subr.mxu1 %v4111_v19  ;;  %4660 = vmatprep.subr.mxu0 %v4507_v11  ;;  %v4083_v19 = vld [vmem:[#allocation13 + $0x1808] sm:$0xff] }
 0xd05   : > { %4246 = vmatpush1.msra.mxu1 %v4110_v33  ;;  %4661 = vmatpush2.msra.mxu0 %v4506_v48  ;;  %v4479_v33 = vld [vmem:[#allocation13 + $0x1e98] sm:$0xff]  ;;  %v4082_v48 = vld [vmem:[#allocation13 + $0x1800] sm:$0xff] }
 0xd06   : > { %4247 = vmatprep.subr.mxu1 %v4107_v47  ;;  %4662 = vmatprep.subr.mxu0 %v4503_v63  ;;  %v4207_v47 = vld [vmem:[#allocation13 + $0x1be8] sm:$0xff] }
 0xd07   : > { %4248 = vmatpush1.msra.mxu1 %v4106_v36  ;;  %4663 = vmatpush2.msra.mxu0 %v4502_v40  ;;  %v4475_v36 = vld [vmem:[#allocation13 + $0x1e78] sm:$0xff]  ;;  %v4206_v40 = vld [vmem:[#allocation13 + $0x1be0] sm:$0xff] }
 0xd08   : > { %2125 = vadd.xlane.f32.xlu1 %v2124_v13  ;;  %4249 = vmatprep.subr.mxu1 %v4103_v12  ;;  %v4474_v12 = vld [vmem:[#allocation13 + $0x1e70] sm:$0xff]  ;;  %v4203_v13 = vld [vmem:[#allocation13 + $0x1bc8] sm:$0xff] }
 0xd09   : > { %4664 = vmatprep.subr.mxu0 %v4499_v56  ;;  %4250 = vmatpush1.msra.mxu1 %v4102_v26  ;;  %v4471_v56 = vld [vmem:[#allocation13 + $0x1e58] sm:$0xff]  ;;  %v4202_v26 = vld [vmem:[#allocation13 + $0x1bc0] sm:$0xff] }
 0xd0a   : > { %4665 = vmatpush2.msra.mxu0 %v4498_v35  ;;  %4251 = vmatprep.subr.mxu1 %v4099_v51  ;;  %v4470_v35 = vld [vmem:[#allocation13 + $0x1e50] sm:$0xff]  ;;  %v4199_v51 = vld [vmem:[#allocation13 + $0x1ba8] sm:$0xff] }
 0xd0b   : > { %4666 = vmatprep.subr.mxu0 %v4495_v58  ;;  %4252 = vmatpush1.msra.mxu1 %v4098_v38  ;;  %v4467_v38 = vld [vmem:[#allocation13 + $0x1e38] sm:$0xff] }
 0xd0c   : > { %4667 = vmatpush2.msra.mxu0 %v4494_v3  ;;  %4253 = vmatprep.subr.mxu1 %v4095_v43  ;;  %v4198_v3 = vld [vmem:[#allocation13 + $0x1ba0] sm:$0xff]  ;;  %v4394_v43 = vld [vmem:[#allocation2 + $0x58] sm:$0x7] }
 0xd0d   : > { %4668 = vmatprep.subr.mxu0 %v4491_v31  ;;  %4254 = vmatpush1.msra.mxu1 %v4094_v60  ;;  %v4466_v60 = vld [vmem:[#allocation13 + $0x1e30] sm:$0xff] }
 0xd0e   : > { %4669 = vmatpush2.msra.mxu0 %v4490_v49  ;;  %4255 = vmatprep.subr.mxu1 %v4091_v7  ;;  %v4195_v49 = vld [vmem:[#allocation13 + $0x1b88] sm:$0xff] }
 0xd0f   : > { %4670 = vmatprep.subr.mxu0 %v4487_v61  ;;  %4256 = vmatpush1.msra.mxu1 %v4090_v57  ;;  %v3740_v11 = vpop.f32.mrf.mxu0  ;;  %v4391_v7 = vld [vmem:[#allocation2 + $0x10] sm:$0xf8]  ;;  %v4463_v57 = vld [vmem:[#allocation13 + $0x1e18] sm:$0xff] }
 0xd10   : > { %4671 = vmatpush2.msra.mxu0 %v4486_v53  ;;  %4257 = vmatprep.subr.mxu1 %v4087_v54  ;;  %v10248_v34 = vadd.f32 %v3740_v11, %v10182_v8  ;;  %v4194_v53 = vld [vmem:[#allocation13 + $0x1b80] sm:$0xff]  ;;  %v4462_v54 = vld [vmem:[#allocation13 + $0x1e10] sm:$0xff]  ;;  %v4393_v11 = vld [vmem:[#allocation2 + $0x20] sm:$0x7] }
 0xd11   : > { %4672 = vmatprep.subr.mxu0 %v4483_v62  ;;  %4258 = vmatpush1.msra.mxu1 %v4086_v45  ;;  %v10250_v63 = vpop.f32.mrf.mxu0  ;;  %v4191_v62 = vld [vmem:[#allocation13 + $0x1b68] sm:$0xff]  ;;  %v4537_v45 = vrot.slane %v4394_v43, 3  ;;  %v4761_v43 = vld [vmem:[#allocation13 + $0x2198] sm:$0xff] }
 0xd12   : > { %4673 = vmatpush2.msra.mxu0 %v4482_v39  ;;  %4259 = vmatprep.subr.mxu1 %v4083_v19  ;;  %v4529_v39 = vrot.slane %v4391_v7, 3  ;;  %v4773_v19 = vld [vmem:[#allocation13 + $0x21f8] sm:$0xff]  ;;  %v4175_v7 = vld [vmem:[#allocation13 + $0x1ae8] sm:$0xff] }
 0xd13   : > { %4674 = vmatprep.subr.mxu0 %v4479_v33  ;;  %4260 = vmatpush1.msra.mxu1 %v4082_v48  ;;  %v4772_v48 = vld [vmem:[#allocation13 + $0x21f0] sm:$0xff] }
 0xd14   : > { %4675 = vmatpush2.msra.mxu0 %v4478_v5  ;;  %4261 = vmatprep.subr.mxu1 %v4207_v47  ;;  %v3746_v8 = vpop.f32.mrf.mxu0  ;;  %v10266_v5 = vsel %vm4528_vm12, %v4533_v14, %v4537_v45  ;;  %v4769_v47 = vld [vmem:[#allocation13 + $0x21d8] sm:$0xff]  ;;  %v4170_v45 = vld [vmem:[#allocation13 + $0x1ac0] sm:$0xff] }
 0xd15   : > { %4676 = vmatprep.subr.mxu0 %v4475_v36  ;;  %4262 = vmatpush2.msra.mxu1 %v4206_v40  ;;  %v10253_v58 = vadd.f32 %v3746_v8, %v10187_v25  ;;  %v4530_v25 = vrot.slane %v10192_v23, 3  ;;  %v4187_v23 = vld [vmem:[#allocation13 + $0x1b48] sm:$0xff]  ;;  %v4186_v36 = vld [vmem:[#allocation13 + $0x1b40] sm:$0xff]  ;;  %v4535_v40 = vrot.slane %v4393_v11, 3  ;;  %v4846_v8 = vrot.slane %v10205_v55, 4  ;;  %v4749_v11 = vld [vmem:[#allocation13 + $0x2138] sm:$0xff] }
 0xd16   : > { %4677 = vmatpush2.msra.mxu0 %v4474_v12  ;;  %4263 = vmatprep.subr.mxu1 %v4203_v13  ;;  %v3748_v31 = vpop.f32.mrf.mxu0  ;;  %v4768_v12 = vld [vmem:[#allocation13 + $0x21d0] sm:$0xff]  ;;  %v4183_v13 = vld [vmem:[#allocation13 + $0x1b28] sm:$0xff] }
 0xd17   : > { %4678 = vmatprep.subr.mxu0 %v4471_v56  ;;  %4264 = vmatpush2.msra.mxu1 %v4202_v26  ;;  %v10256_v61 = vadd.f32 %v3748_v31, %v10190_v44  ;;  %v4190_v44 = vld [vmem:[#allocation13 + $0x1b60] sm:$0xff]  ;;  %v10260_v33 = vsel %vm4528_vm12, %v4529_v39, %v4530_v25  ;;  %v4706_v56 = vld [vmem:[#allocation2 + $0x30] sm:$0xf0]  ;;  %v4765_v26 = vld [vmem:[#allocation13 + $0x21b8] sm:$0xff]  ;;  %v10271_v14 = vsel %vm4528_vm12, %v4530_v25, %v4535_v40 }
 0xd18   : > { %4679 = vmatpush2.msra.mxu0 %v4470_v35  ;;  %4265 = vmatprep.subr.mxu1 %v4199_v51  ;;  %v4182_v35 = vld [vmem:[#allocation13 + $0x1b20] sm:$0xff]  ;;  %v4764_v51 = vld [vmem:[#allocation13 + $0x21b0] sm:$0xff] }
 0xd19   : > { %4680 = vmatprep.subr.mxu0 %v4467_v38  ;;  %4266 = vmatpush2.msra.mxu1 %v4198_v3  ;;  %v4845_v38 = vrot.slane %v4706_v56, 4  ;;  %v4179_v3 = vld [vmem:[#allocation13 + $0x1b08] sm:$0xff]  ;;  %v4178_v31 = vld [vmem:[#allocation13 + $0x1b00] sm:$0xff]  ;;  %v4756_v25 = vld [vmem:[#allocation13 + $0x2170] sm:$0xff] }
 0xd1a   : > { %4681 = vmatpush2.msra.mxu0 %v4466_v60  ;;  %4267 = vmatprep.subr.mxu1 %v4195_v49  ;;  %v4760_v49 = vld [vmem:[#allocation13 + $0x2190] sm:$0xff]  ;;  %v4162_v40 = vld [vmem:[#allocation13 + $0x1a80] sm:$0xff]  ;;  %v4159_v56 = vld [vmem:[#allocation13 + $0x1a68] sm:$0xff] }
 0xd1b   : > { %4682 = vmatprep.subr.mxu0 %v4463_v57  ;;  %4268 = vmatpush2.msra.mxu1 %v4194_v53  ;;  %v10277_v60 = vsel %vm2669_vm6, %v4845_v38, %v4846_v8  ;;  %v4757_v57 = vld [vmem:[#allocation13 + $0x2178] sm:$0xff]  ;;  %v4174_v53 = vld [vmem:[#allocation13 + $0x1ae0] sm:$0xff]  ;;  %v4752_v39 = vld [vmem:[#allocation13 + $0x2150] sm:$0xff] }
 0xd1c   : > { %4683 = vmatpush2.msra.mxu0 %v4462_v54  ;;  %4269 = vmatprep.subr.mxu1 %v4191_v62  ;;  %v4171_v54 = vld [vmem:[#allocation13 + $0x1ac8] sm:$0xff]  ;;  %v4753_v62 = vld [vmem:[#allocation13 + $0x2158] sm:$0xff]  ;;  %v4740_v38 = vld [vmem:[#allocation13 + $0x20f0] sm:$0xff] }
 0xd1d   : > { %4685 = vmatmul.mubr.f32.vlgmr.msra.gmra.mxu0 %v10260_v33  ;;  %4933 = vmatprep.subr.mxu0 %v4773_v19  ;;  %v4167_v19 = vld [vmem:[#allocation13 + $0x1aa8] sm:$0xff] }
 0xd1e   : > { %4270 = vmatpush2.msra.mxu1 %v4190_v44  ;;  %4690 = vmatprep.mubr.f32.mxu0 %v10266_v5  ;;  %v4166_v44 = vld [vmem:[#allocation13 + $0x1aa0] sm:$0xff] }
 0xd1f   : > { %4934 = vmatpush1.msra.mxu0 %v4772_v48  ;;  %4271 = vmatprep.subr.mxu1 %v4187_v23  ;;  %v4748_v48 = vld [vmem:[#allocation13 + $0x2130] sm:$0xff]  ;;  %v4163_v23 = vld [vmem:[#allocation13 + $0x1a88] sm:$0xff] }
 0xd20   : > { %4935 = vmatprep.subr.mxu0 %v4769_v47  ;;  %4272 = vmatpush2.msra.mxu1 %v4186_v36  ;;  %v4745_v36 = vld [vmem:[#allocation13 + $0x2118] sm:$0xff] }
 0xd21   : > { %4936 = vmatpush1.msra.mxu0 %v4768_v12  ;;  %4273 = vmatprep.subr.mxu1 %v4183_v13  ;;  %v4744_v13 = vld [vmem:[#allocation13 + $0x2110] sm:$0xff] }
 0xd22   : > { %4691 = vmatmul.mubr.f32.gmra.mxu0 %v10271_v14  ;;  %4937 = vmatprep.subr.mxu0 %v4765_v26 }
 0xd23   : > { %4274 = vmatpush2.msra.mxu1 %v4182_v35  ;;  %4938 = vmatpush1.msra.mxu0 %v4764_v51  ;;  %v4741_v35 = vld [vmem:[#allocation13 + $0x20f8] sm:$0xff]  ;;  %v4158_v51 = vld [vmem:[#allocation13 + $0x1a60] sm:$0xff] }
 0xd24   : > { %4997 = vmatprep.mubr.f32.mxu0 %v10277_v60  ;;  %4275 = vmatprep.subr.mxu1 %v4179_v3  ;;  %v4155_v3 = vld [vmem:[#allocation13 + $0x1a48] sm:$0xff] }
 0xd25   : > { %4939 = vmatprep.subr.mxu0 %v4761_v43  ;;  %4276 = vmatpush2.msra.mxu1 %v4178_v31  ;;  %v4737_v43 = vld [vmem:[#allocation13 + $0x20d8] sm:$0xff]  ;;  %v4154_v31 = vld [vmem:[#allocation13 + $0x1a40] sm:$0xff] }
 0xd26   : > { %4940 = vmatpush1.msra.mxu0 %v4760_v49  ;;  %4277 = vmatprep.subr.mxu1 %v4175_v7  ;;  %v4736_v49 = vld [vmem:[#allocation13 + $0x20d0] sm:$0xff]  ;;  %v4151_v7 = vld [vmem:[#allocation13 + $0x1a28] sm:$0xff] }
 0xd27   : > { %4941 = vmatprep.subr.mxu0 %v4757_v57  ;;  %4278 = vmatpush2.msra.mxu1 %v4174_v53  ;;  %v4733_v53 = vld [vmem:[#allocation13 + $0x20b8] sm:$0xff] }
 0xd28   : > { %4942 = vmatpush1.msra.mxu0 %v4756_v25  ;;  %4279 = vmatprep.subr.mxu1 %v4171_v54  ;;  %v4150_v25 = vld [vmem:[#allocation13 + $0x1a20] sm:$0xff] }
 0xd29   : > { %4943 = vmatprep.subr.mxu0 %v4753_v62  ;;  %4280 = vmatpush2.msra.mxu1 %v4170_v45  ;;  %v3370_v47 = vpop.f32.mrf.mxu1  ;;  %v4732_v62 = vld [vmem:[#allocation13 + $0x20b0] sm:$0xff]  ;;  %v4147_v45 = vld [vmem:[#allocation13 + $0x1a08] sm:$0xff] }
 0xd2a   : > { %4944 = vmatpush1.msra.mxu0 %v4752_v39  ;;  %4281 = vmatprep.subr.mxu1 %v4167_v19  ;;  %v10281_v12 = vadd.f32 %v3370_v47, %v10222_v18  ;;  %v4729_v19 = vld [vmem:[#allocation13 + $0x2098] sm:$0xff]  ;;  %v4724_v47 = vld [vmem:[#allocation13 + $0x2070] sm:$0xff] }
 0xd2b   : > { %4945 = vmatprep.subr.mxu0 %v4749_v11  ;;  %4282 = vmatpush2.msra.mxu1 %v4166_v44  ;;  %v10283_v26 = vpop.f32.mrf.mxu1  ;;  %v4146_v11 = vld [vmem:[#allocation13 + $0x1a00] sm:$0xff]  ;;  %v4457_v44 = vld [vmem:[#allocation13 + $0x1de8] sm:$0xff] }
 0xd2c   : > { %4946 = vmatpush1.msra.mxu0 %v4748_v48  ;;  %4283 = vmatprep.subr.mxu1 %v4163_v23  ;;  %v4725_v48 = vld [vmem:[#allocation13 + $0x2078] sm:$0xff]  ;;  %v4456_v23 = vld [vmem:[#allocation13 + $0x1de0] sm:$0xff] }
 0xd2d   : > { %4947 = vmatprep.subr.mxu0 %v4745_v36  ;;  %4284 = vmatpush2.msra.mxu1 %v4162_v40  ;;  %v4721_v36 = vld [vmem:[#allocation13 + $0x2058] sm:$0xff]  ;;  %v4452_v40 = vld [vmem:[#allocation13 + $0x1dc0] sm:$0xff] }
 0xd2e   : > { %4948 = vmatpush1.msra.mxu0 %v4744_v13  ;;  %4285 = vmatprep.subr.mxu1 %v4159_v56  ;;  %v3376_v18 = vpop.f32.mrf.mxu1  ;;  %v4720_v13 = vld [vmem:[#allocation13 + $0x2050] sm:$0xff]  ;;  %v4449_v56 = vld [vmem:[#allocation13 + $0x1da8] sm:$0xff] }
 0xd2f   : > { %4949 = vmatprep.subr.mxu0 %v4741_v35  ;;  %4286 = vmatpush2.msra.mxu1 %v4158_v51  ;;  %v10286_v57 = vadd.f32 %v3376_v18, %v10228_v59  ;;  %v4728_v59 = vld [vmem:[#allocation13 + $0x2090] sm:$0xff]  ;;  %v4717_v35 = vld [vmem:[#allocation13 + $0x2038] sm:$0xff]  ;;  %v4448_v51 = vld [vmem:[#allocation13 + $0x1da0] sm:$0xff] }
 0xd30   : > { %4950 = vmatpush1.msra.mxu0 %v4740_v38  ;;  %4287 = vmatprep.subr.mxu1 %v4155_v3  ;;  %v3378_v54 = vpop.f32.mrf.mxu1  ;;  %v4445_v38 = vld [vmem:[#allocation13 + $0x1d88] sm:$0xff]  ;;  %v4713_v3 = vld [vmem:[#allocation13 + $0x2018] sm:$0xff] }
 0xd31   : > { %4951 = vmatprep.subr.mxu0 %v4737_v43  ;;  %4288 = vmatpush2.msra.mxu1 %v4154_v31  ;;  %v10289_v39 = vadd.f32 %v3378_v54, %v10231_v46  ;;  %v4453_v46 = vld [vmem:[#allocation13 + $0x1dc8] sm:$0xff]  ;;  %v4444_v43 = vld [vmem:[#allocation13 + $0x1d80] sm:$0xff]  ;;  %v4837_v18 = vld [vmem:[#allocation13 + $0x23f8] sm:$0xff] }
 0xd32   : > { %4952 = vmatpush1.msra.mxu0 %v4736_v49  ;;  %4289 = vmatprep.subr.mxu1 %v4151_v7  ;;  %v4441_v31 = vld [vmem:[#allocation13 + $0x1d68] sm:$0xff]  ;;  %v4440_v49 = vld [vmem:[#allocation13 + $0x1d60] sm:$0xff]  ;;  %v4836_v7 = vld [vmem:[#allocation13 + $0x23f0] sm:$0xff] }
 0xd33   : > { %4953 = vmatprep.subr.mxu0 %v4733_v53  ;;  %4290 = vmatpush2.msra.mxu1 %v4150_v25  ;;  %v4437_v53 = vld [vmem:[#allocation13 + $0x1d48] sm:$0xff]  ;;  %v4436_v25 = vld [vmem:[#allocation13 + $0x1d40] sm:$0xff]  ;;  %v4832_v54 = vld [vmem:[#allocation13 + $0x23d0] sm:$0xff] }
 0xd34   : > { %4954 = vmatpush1.msra.mxu0 %v4732_v62  ;;  %4291 = vmatprep.subr.mxu1 %v4147_v45  ;;  %v4433_v62 = vld [vmem:[#allocation13 + $0x1d28] sm:$0xff]  ;;  %v4432_v45 = vld [vmem:[#allocation13 + $0x1d20] sm:$0xff] }
 0xd35   : > { %4955 = vmatprep.subr.mxu0 %v4729_v19  ;;  %4292 = vmatpush2.msra.mxu1 %v4146_v11  ;;  %v4828_v19 = vld [vmem:[#allocation13 + $0x23b0] sm:$0xff]  ;;  %v4429_v11 = vld [vmem:[#allocation13 + $0x1d08] sm:$0xff] }
 0xd36   : > { %4956 = vmatpush1.msra.mxu0 %v4728_v59  ;;  %4294 = vmatmul.mubr.f32.vlgmr.msra.gmra.mxu1 %v10196_v42  ;;  %v4716_v42 = vld [vmem:[#allocation13 + $0x2030] sm:$0xff]  ;;  %v4825_v59 = vld [vmem:[#allocation13 + $0x2398] sm:$0xff] }
 0xd37   : > { %4543 = vmatprep.subr.mxu1 %v4457_v44  ;;  %4957 = vmatprep.subr.mxu0 %v4725_v48  ;;  %v4428_v44 = vld [vmem:[#allocation13 + $0x1d00] sm:$0xff]  ;;  %v4824_v48 = vld [vmem:[#allocation13 + $0x2390] sm:$0xff] }
 0xd38   : > { %4299 = vmatprep.mubr.f32.mxu1 %v10202_v17  ;;  %4544 = vmatpush1.msra.mxu1 %v4456_v23  ;;  %v4712_v17 = vld [vmem:[#allocation13 + $0x2010] sm:$0xff]  ;;  %v4425_v23 = vld [vmem:[#allocation13 + $0x1ce8] sm:$0xff] }
 0xd39   : > { %4958 = vmatpush1.msra.mxu0 %v4724_v47  ;;  %4545 = vmatprep.subr.mxu1 %v4453_v46  ;;  %v4821_v47 = vld [vmem:[#allocation13 + $0x2378] sm:$0xff]  ;;  %v4424_v46 = vld [vmem:[#allocation13 + $0x1ce0] sm:$0xff] }
 0xd3a   : > { %4959 = vmatprep.subr.mxu0 %v4721_v36  ;;  %4546 = vmatpush1.msra.mxu1 %v4452_v40  ;;  %v4820_v36 = vld [vmem:[#allocation13 + $0x2370] sm:$0xff]  ;;  %v4421_v40 = vld [vmem:[#allocation13 + $0x1cc8] sm:$0xff] }
 0xd3b   : > { %4960 = vmatpush1.msra.mxu0 %v4720_v13  ;;  %4300 = vmatmul.mubr.f32.gmra.mxu1 %v10211_v9  ;;  %v4833_v9 = vld [vmem:[#allocation13 + $0x23d8] sm:$0xff] }
 0xd3c   : > { %4547 = vmatprep.subr.mxu1 %v4449_v56  ;;  %4961 = vmatprep.subr.mxu0 %v4717_v35  ;;  %v4817_v13 = vld [vmem:[#allocation13 + $0x2358] sm:$0xff]  ;;  %v4420_v56 = vld [vmem:[#allocation13 + $0x1cc0] sm:$0xff]  ;;  %v4816_v35 = vld [vmem:[#allocation13 + $0x2350] sm:$0xff] }
 0xd3d   : > { %4548 = vmatpush1.msra.mxu1 %v4448_v51  ;;  %4607 = vmatprep.mubr.f32.mxu1 %v10217_v32  ;;  %v4829_v32 = vld [vmem:[#allocation13 + $0x23b8] sm:$0xff]  ;;  %v4417_v51 = vld [vmem:[#allocation13 + $0x1ca8] sm:$0xff] }
 0xd3e   : > { %4962 = vmatpush1.msra.mxu0 %v4716_v42  ;;  %4549 = vmatprep.subr.mxu1 %v4445_v38  ;;  %v4813_v42 = vld [vmem:[#allocation13 + $0x2338] sm:$0xff]  ;;  %v4416_v38 = vld [vmem:[#allocation13 + $0x1ca0] sm:$0xff] }
 0xd3f   : > { %4963 = vmatprep.subr.mxu0 %v4713_v3  ;;  %4550 = vmatpush1.msra.mxu1 %v4444_v43  ;;  %v4812_v3 = vld [vmem:[#allocation13 + $0x2330] sm:$0xff]  ;;  %v4413_v43 = vld [vmem:[#allocation13 + $0x1c88] sm:$0xff] }
 0xd40   : > { %4964 = vmatpush1.msra.mxu0 %v4712_v17  ;;  %4551 = vmatprep.subr.mxu1 %v4441_v31  ;;  %v4809_v17 = vld [vmem:[#allocation13 + $0x2318] sm:$0xff]  ;;  %v4412_v31 = vld [vmem:[#allocation13 + $0x1c80] sm:$0xff] }
 0xd41   : > { %4965 = vmatprep.subr.mxu0 %v4837_v18  ;;  %4552 = vmatpush1.msra.mxu1 %v4440_v49  ;;  %v4808_v18 = vld [vmem:[#allocation13 + $0x2310] sm:$0xff]  ;;  %v4409_v49 = vld [vmem:[#allocation13 + $0x1c68] sm:$0xff] }
 0xd42   : > { %4966 = vmatpush2.msra.mxu0 %v4836_v7  ;;  %4553 = vmatprep.subr.mxu1 %v4437_v53  ;;  %v4805_v7 = vld [vmem:[#allocation13 + $0x22f8] sm:$0xff]  ;;  %v4408_v53 = vld [vmem:[#allocation13 + $0x1c60] sm:$0xff] }
 0xd43   : > { %4967 = vmatprep.subr.mxu0 %v4833_v9  ;;  %4554 = vmatpush1.msra.mxu1 %v4436_v25  ;;  %v4804_v9 = vld [vmem:[#allocation13 + $0x22f0] sm:$0xff]  ;;  %v4405_v25 = vld [vmem:[#allocation13 + $0x1c48] sm:$0xff] }
 0xd44   : > { %4968 = vmatpush2.msra.mxu0 %v4832_v54  ;;  %4555 = vmatprep.subr.mxu1 %v4433_v62  ;;  %v4801_v54 = vld [vmem:[#allocation13 + $0x22d8] sm:$0xff]  ;;  %v4404_v62 = vld [vmem:[#allocation13 + $0x1c40] sm:$0xff] }
 0xd45   : > { %4969 = vmatprep.subr.mxu0 %v4829_v32  ;;  %4556 = vmatpush1.msra.mxu1 %v4432_v45  ;;  %v4800_v32 = vld [vmem:[#allocation13 + $0x22d0] sm:$0xff]  ;;  %v4401_v45 = vld [vmem:[#allocation13 + $0x1c28] sm:$0xff] }
 0xd46   : > { %4970 = vmatpush2.msra.mxu0 %v4828_v19  ;;  %4557 = vmatprep.subr.mxu1 %v4429_v11  ;;  %v4797_v19 = vld [vmem:[#allocation13 + $0x22b8] sm:$0xff]  ;;  %v4400_v11 = vld [vmem:[#allocation13 + $0x1c20] sm:$0xff] }
 0xd47   : > { %4971 = vmatprep.subr.mxu0 %v4825_v59  ;;  %4558 = vmatpush1.msra.mxu1 %v4428_v44  ;;  %v4796_v59 = vld [vmem:[#allocation13 + $0x22b0] sm:$0xff]  ;;  %v4397_v44 = vld [vmem:[#allocation13 + $0x1c08] sm:$0xff] }
 0xd48   : > { %4972 = vmatpush2.msra.mxu0 %v4824_v48  ;;  %4559 = vmatprep.subr.mxu1 %v4425_v23  ;;  %v4793_v23 = vld [vmem:[#allocation13 + $0x2298] sm:$0xff] }
 0xd49   : > { %4973 = vmatprep.subr.mxu0 %v4821_v47  ;;  %4560 = vmatpush1.msra.mxu1 %v4424_v46  ;;  %v4396_v47 = vld [vmem:[#allocation13 + $0x1c00] sm:$0xff] }
 0xd4a   : > { %4974 = vmatpush2.msra.mxu0 %v4820_v36  ;;  %4561 = vmatprep.subr.mxu1 %v4421_v40  ;;  %v4792_v36 = vld [vmem:[#allocation13 + $0x2290] sm:$0xff]  ;;  %v4521_v40 = vld [vmem:[#allocation13 + $0x1fe8] sm:$0xff] }
 0xd4b   : > { %4975 = vmatprep.subr.mxu0 %v4817_v13  ;;  %4562 = vmatpush1.msra.mxu1 %v4420_v56  ;;  %v4789_v56 = vld [vmem:[#allocation13 + $0x2278] sm:$0xff] }
 0xd4c   : > { %4976 = vmatpush2.msra.mxu0 %v4816_v35  ;;  %4563 = vmatprep.subr.mxu1 %v4417_v51  ;;  %v4520_v35 = vld [vmem:[#allocation13 + $0x1fe0] sm:$0xff]  ;;  %v4788_v51 = vld [vmem:[#allocation13 + $0x2270] sm:$0xff] }
 0xd4d   : > { %4977 = vmatprep.subr.mxu0 %v4813_v42  ;;  %4564 = vmatpush1.msra.mxu1 %v4416_v38  ;;  %v4517_v42 = vld [vmem:[#allocation13 + $0x1fc8] sm:$0xff] }
 0xd4e   : > { %4978 = vmatpush2.msra.mxu0 %v4812_v3  ;;  %4565 = vmatprep.subr.mxu1 %v4413_v43  ;;  %v4785_v3 = vld [vmem:[#allocation13 + $0x2258] sm:$0xff] }
 0xd4f   : > { %4979 = vmatprep.subr.mxu0 %v4809_v17  ;;  %4566 = vmatpush1.msra.mxu1 %v4412_v31  ;;  %v4784_v31 = vld [vmem:[#allocation13 + $0x2250] sm:$0xff] }
 0xd50   : > { %4980 = vmatpush2.msra.mxu0 %v4808_v18  ;;  %4567 = vmatprep.subr.mxu1 %v4409_v49  ;;  %v4513_v18 = vld [vmem:[#allocation13 + $0x1fa8] sm:$0xff] }
 0xd51   : > { %4981 = vmatprep.subr.mxu0 %v4805_v7  ;;  %4568 = vmatpush1.msra.mxu1 %v4408_v53  ;;  %v4781_v7 = vld [vmem:[#allocation13 + $0x2238] sm:$0xff]  ;;  %v4512_v53 = vld [vmem:[#allocation13 + $0x1fa0] sm:$0xff] }
 0xd52   : > { %4982 = vmatpush2.msra.mxu0 %v4804_v9  ;;  %4569 = vmatprep.subr.mxu1 %v4405_v25  ;;  %v4708_v25 = vld [vmem:[#allocation2 + $0x58] sm:$0xf] }
 0xd53   : > { %4983 = vmatprep.subr.mxu0 %v4801_v54  ;;  %4570 = vmatpush1.msra.mxu1 %v4404_v62  ;;  %v4058_v48 = vpop.f32.mrf.mxu0  ;;  %v4780_v62 = vld [vmem:[#allocation13 + $0x2230] sm:$0xff] }
 0xd54   : > { %4984 = vmatpush2.msra.mxu0 %v4800_v32  ;;  %4571 = vmatprep.subr.mxu1 %v4401_v45  ;;  %v10296_v46 = vadd.f32 %v4058_v48, %v10248_v34  ;;  %v4516_v34 = vld [vmem:[#allocation13 + $0x1fc0] sm:$0xff]  ;;  %v4509_v32 = vld [vmem:[#allocation13 + $0x1f88] sm:$0xff]  ;;  %v4776_v48 = vld [vmem:[#allocation13 + $0x2210] sm:$0xff] }
 0xd55   : > { %4985 = vmatprep.subr.mxu0 %v4797_v19  ;;  %4572 = vmatpush1.msra.mxu1 %v4400_v11  ;;  %v10298_v13 = vpop.f32.mrf.mxu0  ;;  %v4705_v45 = vld [vmem:[#allocation2 + $0x10] sm:$0xf0]  ;;  %v4777_v11 = vld [vmem:[#allocation13 + $0x2218] sm:$0xff] }
 0xd56   : > { %4986 = vmatpush2.msra.mxu0 %v4796_v59  ;;  %4573 = vmatprep.subr.mxu1 %v4397_v44  ;;  %v7620_v59 = vld [vmem:[#allocation2 + $0x40] sm:$0xff] }
 0xd57   : > { %4987 = vmatprep.subr.mxu0 %v4793_v23  ;;  %4574 = vmatpush1.msra.mxu1 %v4396_v47  ;;  %v2123_v38 = vpop.xlane.xlu1 %2122  ;;  %v4843_v44 = vrot.slane %v7620_v59, 4  ;;  %v4505_v23 = vld [vmem:[#allocation13 + $0x1f68] sm:$0xff]  ;;  %v4850_v47 = vrot.slane %v4708_v25, 4 }
 0xd58   : > { %4988 = vmatpush2.msra.mxu0 %v4792_v36  ;;  %4575 = vmatprep.subr.mxu1 %v4521_v40  ;;  %v2129_v43 = vmul.f32 0.00390625, %v2123_v38  ;;  %v4064_v17 = vpop.f32.mrf.mxu0  ;;  %v4842_v36 = vrot.slane %v4705_v45, 4  ;;  %v4707_v40 = vld [vmem:[#allocation2 + $0x20] sm:$0xf]  ;;  %v4500_v38 = vld [vmem:[#allocation13 + $0x1f40] sm:$0xff]  ;;  %v4489_v25 = vld [vmem:[#allocation13 + $0x1ee8] sm:$0xff] }
 0xd59   : > { %4989 = vmatprep.subr.mxu0 %v4789_v56  ;;  %4576 = vmatpush2.msra.mxu1 %v4520_v35  ;;  %v10301_v49 = vadd.f32 %v4064_v17, %v10253_v58  ;;  %v4508_v58 = vld [vmem:[#allocation13 + $0x1f80] sm:$0xff]  ;;  %v4501_v35 = vld [vmem:[#allocation13 + $0x1f48] sm:$0xff]  ;;  %v7623_v17 = vld [vmem:[#allocation13 + $0x5d8] sm:$0xff] }
 0xd5a   : > { %4990 = vmatpush2.msra.mxu0 %v4788_v51  ;;  %4577 = vmatprep.subr.mxu1 %v4517_v42  ;;  %v2133_v9 = vadd.f32 1e-05, %v2129_v43  ;;  %v4066_v54 = vpop.f32.mrf.mxu0  ;;  %v10307_v56 = vsel %vm2669_vm6, %v4842_v36, %v4843_v44  ;;  %v7621_v51 = vld [vmem:[#allocation13 + $0x5f8] sm:$0xff]  ;;  %v10313_v42 = vsel %vm2669_vm6, %v4846_v8, %v4850_v47  ;;  %v7622_v43 = vld [vmem:[#allocation13 + $0x5f0] sm:$0xff]  ;;  %v4493_v8 = vld [vmem:[#allocation13 + $0x1f08] sm:$0xff] }
 0xd5b   : > { %4991 = vmatprep.subr.mxu0 %v4785_v3  ;;  %4578 = vmatpush2.msra.mxu1 %v4516_v34  ;;  %v10304_v19 = vadd.f32 %v4066_v54, %v10256_v61  ;;  %v4504_v61 = vld [vmem:[#allocation13 + $0x1f60] sm:$0xff]  ;;  %v4848_v3 = vrot.slane %v4707_v40, 4  ;;  %v4497_v34 = vld [vmem:[#allocation13 + $0x1f28] sm:$0xff]  ;;  %v7627_v54 = vld [vmem:[#allocation13 + $0x598] sm:$0xff] }
 0xd5c   : > { %4992 = vmatpush2.msra.mxu0 %v4784_v31  ;;  %4579 = vmatprep.subr.mxu1 %v4513_v18  ;;  %7591 = vrsqrt.f32 %v2133_v9  ;;  %v4496_v31 = vld [vmem:[#allocation13 + $0x1f20] sm:$0xff]  ;;  %v7624_v18 = vld [vmem:[#allocation13 + $0x5d0] sm:$0xff]  ;;  %v4481_v47 = vld [vmem:[#allocation13 + $0x1ea8] sm:$0xff] }
 0xd5d   : > { %4993 = vmatprep.subr.mxu0 %v4781_v7  ;;  %4580 = vmatpush2.msra.mxu1 %v4512_v53  ;;  %v10317_v55 = vsel %vm2669_vm6, %v4843_v44, %v4848_v3  ;;  %v7625_v7 = vld [vmem:[#allocation13 + $0x5b8] sm:$0xff]  ;;  %v4492_v53 = vld [vmem:[#allocation13 + $0x1f00] sm:$0xff]  ;;  %v7626_v9 = vld [vmem:[#allocation13 + $0x5b0] sm:$0xff] }
 0xd5e   : > { %4994 = vmatpush2.msra.mxu0 %v4780_v62  ;;  %4581 = vmatprep.subr.mxu1 %v4509_v32  ;;  %v4488_v62 = vld [vmem:[#allocation13 + $0x1ee0] sm:$0xff]  ;;  %v7628_v45 = vld [vmem:[#allocation13 + $0x590] sm:$0xff]  ;;  %v7629_v44 = vld [vmem:[#allocation13 + $0x578] sm:$0xff] }
 0xd5f   : > { %4995 = vmatprep.subr.mxu0 %v4777_v11  ;;  %4582 = vmatpush2.msra.mxu1 %v4508_v58  ;;  %v4485_v11 = vld [vmem:[#allocation13 + $0x1ec8] sm:$0xff] }
 0xd60   : > { %4996 = vmatpush2.msra.mxu0 %v4776_v48  ;;  %4583 = vmatprep.subr.mxu1 %v4505_v23  ;;  %v4484_v48 = vld [vmem:[#allocation13 + $0x1ec0] sm:$0xff]  ;;  %v7630_v23 = vld [vmem:[#allocation13 + $0x570] sm:$0xff] }
 0xd61   : > { %4998 = vmatmul.mubr.f32.vlgmr.msra.gmra.mxu0 %v10307_v56  ;;  %5126 = vmatprep.subr.mxu0 %v7621_v51 }
 0xd62   : > { %4584 = vmatpush2.msra.mxu1 %v4504_v61  ;;  %5003 = vmatprep.mubr.f32.mxu0 %v10313_v42  ;;  %v7631_v61 = vld [vmem:[#allocation13 + $0x558] sm:$0xff] }
 0xd63   : > { %5127 = vmatpush1.msra.mxu0 %v7622_v43  ;;  %4585 = vmatprep.subr.mxu1 %v4501_v35  ;;  %v4480_v35 = vld [vmem:[#allocation13 + $0x1ea0] sm:$0xff] }
 0xd64   : > { %5128 = vmatprep.subr.mxu0 %v7623_v17  ;;  %4586 = vmatpush2.msra.mxu1 %v4500_v38  ;;  %v4476_v43 = vld [vmem:[#allocation13 + $0x1e80] sm:$0xff] }
 0xd65   : > { %5129 = vmatpush1.msra.mxu0 %v7624_v18  ;;  %4587 = vmatprep.subr.mxu1 %v4497_v34  ;;  %v7633_v34 = vld [vmem:[#allocation13 + $0x538] sm:$0xff]  ;;  %v7634_v18 = vld [vmem:[#allocation13 + $0x530] sm:$0xff] }
 0xd66   : > { %5004 = vmatmul.mubr.f32.gmra.mxu0 %v10317_v55  ;;  %5130 = vmatprep.subr.mxu0 %v7625_v7 }
 0xd67   : > { %4588 = vmatpush2.msra.mxu1 %v4496_v31  ;;  %5131 = vmatpush1.msra.mxu0 %v7626_v9  ;;  %v10329_v31 = vpop.permute.xlu1 %2191 }
 0xd68   : > { %4589 = vmatprep.subr.mxu1 %v4493_v8  ;;  %5132 = vmatprep.subr.mxu0 %v7627_v54  ;;  %v4473_v8 = vld [vmem:[#allocation13 + $0x1e68] sm:$0xff]  ;;  %v4472_v54 = vld [vmem:[#allocation13 + $0x1e60] sm:$0xff] }
 0xd69   : > { %v7592_v32 = vpop.eup %7591  ;;  %4590 = vmatpush2.msra.mxu1 %v4492_v53  ;;  %5133 = vmatpush1.msra.mxu0 %v7628_v45  ;;  %v4468_v45 = vld [vmem:[#allocation13 + $0x1e40] sm:$0xff] }
 0xd6a   : > { %v2143_v58 = vmul.f32 %v7592_v32, %v10172_v24  ;;  %v2144_v59 = vmul.f32 %v7592_v32, %v10175_v20  ;;  %4591 = vmatprep.subr.mxu1 %v4489_v25  ;;  %5134 = vmatprep.subr.mxu0 %v7629_v44  ;;  %v7632_v24 = vld [vmem:[#allocation13 + $0x550] sm:$0xff]  ;;  %v4477_v20 = vld [vmem:[#allocation13 + $0x1e88] sm:$0xff]  ;;  %v7635_v25 = vld [vmem:[#allocation13 + $0x518] sm:$0xff] }
 0xd6b   : > { %4592 = vmatpush2.msra.mxu1 %v4488_v62  ;;  %5135 = vmatpush1.msra.mxu0 %v7630_v23  ;;  %v4469_v62 = vld [vmem:[#allocation13 + $0x1e48] sm:$0xff]  ;;  %v7637_v32 = vld [vmem:[#allocation13 + $0x4f8] sm:$0xff]  ;;  %v4464_v23 = vld [vmem:[#allocation13 + $0x1e20] sm:$0xff] }
 0xd6c   : > { %v2159_v36 = vmul.f32 %v9920_v28, %v2143_v58  ;;  %v2160_v40 = vmul.f32 %v9924_v30, %v2144_v59  ;;  %4593 = vmatprep.subr.mxu1 %v4485_v11  ;;  %5136 = vmatprep.subr.mxu0 %v7631_v61  ;;  %v7638_v58 = vld [vmem:[#allocation13 + $0x4f0] sm:$0xff]  ;;  %v4465_v59 = vld [vmem:[#allocation13 + $0x1e28] sm:$0xff] }
 0xd6d   : > { %4594 = vmatpush2.msra.mxu1 %v4484_v48  ;;  %5137 = vmatpush1.msra.mxu0 %v7632_v24  ;;  %v3663_v51 = vpop.f32.mrf.mxu1  ;;  %v7639_v48 = vld [vmem:[#allocation13 + $0x4d8] sm:$0xff]  ;;  %v4460_v24 = vld [vmem:[#allocation13 + $0x1e00] sm:$0xff] }
 0xd6e   : > { %v2175_v38 = vadd.f32 %v9930_v50, %v2159_v36  ;;  %v2176_v3 = vadd.f32 %v9934_v52, %v2160_v40  ;;  %4595 = vmatprep.subr.mxu1 %v4481_v47  ;;  %5138 = vmatprep.subr.mxu0 %v7633_v34  ;;  %v10327_v17 = vadd.f32 %v3663_v51, %v10281_v12  ;;  %v7636_v12 = vld [vmem:[#allocation13 + $0x510] sm:$0xff]  ;;  %v4461_v40 = vld [vmem:[#allocation13 + $0x1e08] sm:$0xff]  ;;  %v7643_v51 = vld [vmem:[#allocation13 + $0x498] sm:$0xff] }
 0xd6f   : > { %4596 = vmatpush2.msra.mxu1 %v4480_v35  ;;  %5139 = vmatpush1.msra.mxu0 %v7634_v18  ;;  %v10331_v7 = vpop.f32.mrf.mxu1  ;;  %v7640_v36 = vld [vmem:[#allocation13 + $0x4d0] sm:$0xff]  ;;  %v7641_v35 = vld [vmem:[#allocation13 + $0x4b8] sm:$0xff] }
 0xd70   : > { %v10334_v53 = vmul.f32 %v10329_v31, %v2175_v38  ;;  %v10337_v9 = vmul.f32 %v10329_v31, %v2176_v3  ;;  %4597 = vmatprep.subr.mxu1 %v4477_v20  ;;  %5140 = vmatprep.subr.mxu0 %v7635_v25  ;;  %v7642_v20 = vld [vmem:[#allocation13 + $0x4b0] sm:$0xff]  ;;  %v4770_v3 = vld [vmem:[#allocation13 + $0x21e0] sm:$0xff]  ;;  %v7645_v34 = vld [vmem:[#allocation13 + $0x478] sm:$0xff] }
 0xd71   : > { %4598 = vmatpush2.msra.mxu1 %v4476_v43  ;;  %5141 = vmatpush1.msra.mxu0 %v7636_v12  ;;  %v7644_v38 = vld [vmem:[#allocation13 + $0x490] sm:$0xff]  ;;  %v4766_v43 = vld [vmem:[#allocation13 + $0x21c0] sm:$0xff]  ;;  %v7647_v25 = vld [vmem:[#allocation13 + $0x458] sm:$0xff] }
 0xd72   : > { %2219 = vst [vmem:[#allocation2 + $0x50] sm:$0xff] %v10334_v53  ;;  %2220 = vst [vmem:[#allocation2 + $0x60] sm:$0xff] %v10337_v9  ;;  %4599 = vmatprep.subr.mxu1 %v4473_v8  ;;  %5142 = vmatprep.subr.mxu0 %v7637_v32  ;;  %v3669_v11 = vpop.f32.mrf.mxu1  ;;  %v7646_v18 = vld [vmem:[#allocation13 + $0x470] sm:$0xff]  ;;  %v4763_v8 = vld [vmem:[#allocation13 + $0x21a8] sm:$0xff] }
 0xd73   : > { %4600 = vmatpush2.msra.mxu1 %v4472_v54  ;;  %5143 = vmatpush1.msra.mxu0 %v7638_v58  ;;  %v10342_v44 = vadd.f32 %v3669_v11, %v10286_v57  ;;  %v4771_v57 = vld [vmem:[#allocation13 + $0x21e8] sm:$0xff]  ;;  %v4762_v54 = vld [vmem:[#allocation13 + $0x21a0] sm:$0xff]  ;;  %v7648_v12 = vld [vmem:[#allocation13 + $0x450] sm:$0xff] }
 0xd74   : > { %4601 = vmatprep.subr.mxu1 %v4469_v62  ;;  %5144 = vmatprep.subr.mxu0 %v7639_v48  ;;  %v3671_v47 = vpop.f32.mrf.mxu1  ;;  %v7649_v62 = vld [vmem:[#allocation13 + $0x438] sm:$0xff]  ;;  %v5026_v32 = vld [vmem:[#allocation2 + $0x48] sm:$0xe0]  ;;  %v7652_v48 = vld [vmem:[#allocation13 + $0x410] sm:$0xff] }
 0xd75   : > { %4602 = vmatpush2.msra.mxu1 %v4468_v45  ;;  %5145 = vmatpush1.msra.mxu0 %v7640_v36  ;;  %v10345_v61 = vadd.f32 %v3671_v47, %v10289_v39  ;;  %v4767_v39 = vld [vmem:[#allocation13 + $0x21c8] sm:$0xff]  ;;  %v7650_v45 = vld [vmem:[#allocation13 + $0x430] sm:$0xff]  ;;  %v7651_v58 = vld [vmem:[#allocation13 + $0x418] sm:$0xff]  ;;  %v5039_v47 = vrot.slane %v10337_v9, 5 }
 0xd76   : > { %4603 = vmatprep.subr.mxu1 %v4465_v59  ;;  %5146 = vmatprep.subr.mxu0 %v7641_v35  ;;  %v4755_v11 = vld [vmem:[#allocation13 + $0x2168] sm:$0xff]  ;;  %v4754_v59 = vld [vmem:[#allocation13 + $0x2160] sm:$0xff]  ;;  %v7653_v36 = vld [vmem:[#allocation13 + $0x7f8] sm:$0xff] }
 0xd77   : > { %4604 = vmatpush2.msra.mxu1 %v4464_v23  ;;  %5147 = vmatpush1.msra.mxu0 %v7642_v20  ;;  %v5038_v23 = vrot.slane %v5026_v32, 5  ;;  %v4747_v35 = vld [vmem:[#allocation13 + $0x2128] sm:$0xff]  ;;  %v4746_v20 = vld [vmem:[#allocation13 + $0x2120] sm:$0xff] }
 0xd78   : > { %4605 = vmatprep.subr.mxu1 %v4461_v40  ;;  %5148 = vmatprep.subr.mxu0 %v7643_v51  ;;  %v4750_v40 = vld [vmem:[#allocation13 + $0x2140] sm:$0xff] }
 0xd79   : > { %4606 = vmatpush2.msra.mxu1 %v4460_v24  ;;  %5149 = vmatpush1.msra.mxu0 %v7644_v38  ;;  %v7655_v24 = vld [vmem:[#allocation13 + $0x7d8] sm:$0xff]  ;;  %v10355_v51 = vsel %vm2496_vm5, %v5038_v23, %v5039_v47  ;;  %v4743_v38 = vld [vmem:[#allocation13 + $0x2108] sm:$0xff]  ;;  %v4730_v32 = vld [vmem:[#allocation13 + $0x20a0] sm:$0xff] }
 0xd7a   : > { %4608 = vmatmul.mubr.f32.vlgmr.msra.gmra.mxu1 %v10260_v33  ;;  %4856 = vmatprep.subr.mxu1 %v4771_v57  ;;  %v4759_v33 = vld [vmem:[#allocation13 + $0x2188] sm:$0xff]  ;;  %v7656_v57 = vld [vmem:[#allocation13 + $0x7d0] sm:$0xff] }
 0xd7b   : > { %5150 = vmatprep.subr.mxu0 %v7645_v34  ;;  %4613 = vmatprep.mubr.f32.mxu1 %v10266_v5  ;;  %v4758_v5 = vld [vmem:[#allocation13 + $0x2180] sm:$0xff]  ;;  %v7658_v34 = vld [vmem:[#allocation13 + $0x7b0] sm:$0xff] }
 0xd7c   : > { %4857 = vmatpush1.msra.mxu1 %v4770_v3  ;;  %5151 = vmatpush1.msra.mxu0 %v7646_v18  ;;  %v7657_v3 = vld [vmem:[#allocation13 + $0x7b8] sm:$0xff]  ;;  %v4738_v18 = vld [vmem:[#allocation13 + $0x20e0] sm:$0xff] }
 0xd7d   : > { %4858 = vmatprep.subr.mxu1 %v4767_v39  ;;  %5152 = vmatprep.subr.mxu0 %v7647_v25  ;;  %v4742_v39 = vld [vmem:[#allocation13 + $0x2100] sm:$0xff]  ;;  %v4735_v25 = vld [vmem:[#allocation13 + $0x20c8] sm:$0xff] }
 0xd7e   : > { %4859 = vmatpush1.msra.mxu1 %v4766_v43  ;;  %5153 = vmatpush1.msra.mxu0 %v7648_v12  ;;  %v4739_v43 = vld [vmem:[#allocation13 + $0x20e8] sm:$0xff]  ;;  %v4734_v12 = vld [vmem:[#allocation13 + $0x20c0] sm:$0xff] }
 0xd7f   : > { %4614 = vmatmul.mubr.f32.gmra.mxu1 %v10271_v14  ;;  %4860 = vmatprep.subr.mxu1 %v4763_v8  ;;  %v4751_v14 = vld [vmem:[#allocation13 + $0x2148] sm:$0xff]  ;;  %v7659_v8 = vld [vmem:[#allocation13 + $0x798] sm:$0xff] }
 0xd80   : > { %5154 = vmatprep.subr.mxu0 %v7649_v62  ;;  %4861 = vmatpush1.msra.mxu1 %v4762_v54  ;;  %v7660_v54 = vld [vmem:[#allocation13 + $0x790] sm:$0xff]  ;;  %v4731_v62 = vld [vmem:[#allocation13 + $0x20a8] sm:$0xff] }
 0xd81   : > { %4920 = vmatprep.mubr.f32.mxu1 %v10277_v60  ;;  %5155 = vmatpush1.msra.mxu0 %v7650_v45  ;;  %v7654_v60 = vld [vmem:[#allocation13 + $0x7f0] sm:$0xff]  ;;  %v7663_v45 = vld [vmem:[#allocation13 + $0x758] sm:$0xff] }
 0xd82   : > { %4862 = vmatprep.subr.mxu1 %v4759_v33  ;;  %5156 = vmatprep.subr.mxu0 %v7651_v58  ;;  %v7661_v33 = vld [vmem:[#allocation13 + $0x778] sm:$0xff]  ;;  %v7664_v58 = vld [vmem:[#allocation13 + $0x750] sm:$0xff] }
 0xd83   : > { %4863 = vmatpush1.msra.mxu1 %v4758_v5  ;;  %5157 = vmatpush1.msra.mxu0 %v7652_v48  ;;  %v7662_v5 = vld [vmem:[#allocation13 + $0x770] sm:$0xff]  ;;  %v7665_v48 = vld [vmem:[#allocation13 + $0x738] sm:$0xff] }
 0xd84   : > { %4864 = vmatprep.subr.mxu1 %v4755_v11  ;;  %5158 = vmatprep.subr.mxu0 %v7653_v36  ;;  %v4727_v11 = vld [vmem:[#allocation13 + $0x2088] sm:$0xff]  ;;  %v7666_v36 = vld [vmem:[#allocation13 + $0x730] sm:$0xff] }
 0xd85   : > { %4865 = vmatpush1.msra.mxu1 %v4754_v59  ;;  %5159 = vmatpush2.msra.mxu0 %v7654_v60  ;;  %v4726_v59 = vld [vmem:[#allocation13 + $0x2080] sm:$0xff] }
 0xd86   : > { %4866 = vmatprep.subr.mxu1 %v4751_v14  ;;  %5160 = vmatprep.subr.mxu0 %v7655_v24  ;;  %v4723_v14 = vld [vmem:[#allocation13 + $0x2068] sm:$0xff] }
 0xd87   : > { %4867 = vmatpush1.msra.mxu1 %v4750_v40  ;;  %5161 = vmatpush2.msra.mxu0 %v7656_v57  ;;  %v4722_v40 = vld [vmem:[#allocation13 + $0x2060] sm:$0xff]  ;;  %v4719_v24 = vld [vmem:[#allocation13 + $0x2048] sm:$0xff] }
 0xd88   : > { %4868 = vmatprep.subr.mxu1 %v4747_v35  ;;  %5162 = vmatprep.subr.mxu0 %v7657_v3  ;;  %v7667_v35 = vld [vmem:[#allocation13 + $0x718] sm:$0xff]  ;;  %v4718_v57 = vld [vmem:[#allocation13 + $0x2040] sm:$0xff] }
 0xd89   : > { %4869 = vmatpush1.msra.mxu1 %v4746_v20  ;;  %5163 = vmatpush2.msra.mxu0 %v7658_v34  ;;  %v7668_v20 = vld [vmem:[#allocation13 + $0x710] sm:$0xff]  ;;  %v7669_v3 = vld [vmem:[#allocation13 + $0x6f8] sm:$0xff] }
 0xd8a   : > { %5190 = vmatprep.mubr.f32.mxu0 %v10355_v51  ;;  %4870 = vmatprep.subr.mxu1 %v4743_v38  ;;  %v7670_v34 = vld [vmem:[#allocation13 + $0x6f0] sm:$0xff] }
 0xd8b   : > { %5164 = vmatprep.subr.mxu0 %v7659_v8  ;;  %4871 = vmatpush1.msra.mxu1 %v4742_v39  ;;  %v4715_v39 = vld [vmem:[#allocation13 + $0x2028] sm:$0xff] }
 0xd8c   : > { %5165 = vmatpush2.msra.mxu0 %v7660_v54  ;;  %4872 = vmatprep.subr.mxu1 %v4739_v43  ;;  %v4714_v43 = vld [vmem:[#allocation13 + $0x2020] sm:$0xff]  ;;  %v4711_v8 = vld [vmem:[#allocation13 + $0x2008] sm:$0xff] }
 0xd8d   : > { %5166 = vmatprep.subr.mxu0 %v7661_v33  ;;  %4873 = vmatpush1.msra.mxu1 %v4738_v18  ;;  %v7671_v18 = vld [vmem:[#allocation13 + $0x6d8] sm:$0xff]  ;;  %v4710_v54 = vld [vmem:[#allocation13 + $0x2000] sm:$0xff] }
 0xd8e   : > { %5167 = vmatpush2.msra.mxu0 %v7662_v5  ;;  %4874 = vmatprep.subr.mxu1 %v4735_v25  ;;  %v7672_v25 = vld [vmem:[#allocation13 + $0x6d0] sm:$0xff]  ;;  %v7673_v33 = vld [vmem:[#allocation13 + $0x6b8] sm:$0xff] }
 0xd8f   : > { %5168 = vmatprep.subr.mxu0 %v7663_v45  ;;  %4875 = vmatpush1.msra.mxu1 %v4734_v12  ;;  %v4834_v45 = vld [vmem:[#allocation13 + $0x23e0] sm:$0xff] }
 0xd90   : > { %5169 = vmatpush2.msra.mxu0 %v7664_v58  ;;  %4876 = vmatprep.subr.mxu1 %v4731_v62  ;;  %v4835_v62 = vld [vmem:[#allocation13 + $0x23e8] sm:$0xff]  ;;  %v7675_v58 = vld [vmem:[#allocation13 + $0x698] sm:$0xff] }
 0xd91   : > { %5170 = vmatprep.subr.mxu0 %v7665_v48  ;;  %4877 = vmatpush1.msra.mxu1 %v4730_v32  ;;  %v2126_v23 = vpop.xlane.xlu1 %2125  ;;  %v7674_v32 = vld [vmem:[#allocation13 + $0x6b0] sm:$0xff] }
 0xd92   : > { %5171 = vmatpush2.msra.mxu0 %v7666_v36  ;;  %4878 = vmatprep.subr.mxu1 %v4727_v11  ;;  %v2130_v60 = vmul.f32 0.00390625, %v2126_v23  ;;  %v7676_v48 = vld [vmem:[#allocation13 + $0x690] sm:$0xff]  ;;  %v7677_v23 = vld [vmem:[#allocation13 + $0x678] sm:$0xff]  ;;  %v4827_v36 = vld [vmem:[#allocation13 + $0x23a8] sm:$0xff] }
 0xd93   : > { %5172 = vmatprep.subr.mxu0 %v7667_v35  ;;  %4879 = vmatpush1.msra.mxu1 %v4726_v59  ;;  %v4831_v59 = vld [vmem:[#allocation13 + $0x23c8] sm:$0xff]  ;;  %v4826_v35 = vld [vmem:[#allocation13 + $0x23a0] sm:$0xff] }
 0xd94   : > { %5173 = vmatpush2.msra.mxu0 %v7668_v20  ;;  %4880 = vmatprep.subr.mxu1 %v4723_v14  ;;  %v2134_v38 = vadd.f32 1e-05, %v2130_v60  ;;  %v4830_v14 = vld [vmem:[#allocation13 + $0x23c0] sm:$0xff]  ;;  %v7678_v60 = vld [vmem:[#allocation13 + $0x670] sm:$0xff]  ;;  %v7679_v20 = vld [vmem:[#allocation13 + $0x658] sm:$0xff] }
 0xd95   : > { %5174 = vmatprep.subr.mxu0 %v7669_v3  ;;  %4881 = vmatpush1.msra.mxu1 %v4722_v40  ;;  %v7680_v3 = vld [vmem:[#allocation13 + $0x650] sm:$0xff] }
 0xd96   : > { %5175 = vmatpush2.msra.mxu0 %v7670_v34  ;;  %4882 = vmatprep.subr.mxu1 %v4719_v24  ;;  %7593 = vrsqrt.f32 %v2134_v38 }
 0xd97   : > { %5176 = vmatprep.subr.mxu0 %v7671_v18  ;;  %4883 = vmatpush1.msra.mxu1 %v4718_v57  ;;  %v4823_v57 = vld [vmem:[#allocation13 + $0x2388] sm:$0xff] }
 0xd98   : > { %5177 = vmatpush2.msra.mxu0 %v7672_v25  ;;  %4884 = vmatprep.subr.mxu1 %v4715_v39  ;;  %v4372_v12 = vpop.f32.mrf.mxu0  ;;  %v4822_v39 = vld [vmem:[#allocation13 + $0x2380] sm:$0xff]  ;;  %v7682_v25 = vld [vmem:[#allocation13 + $0x630] sm:$0xff] }
 0xd99   : > { %5178 = vmatprep.subr.mxu0 %v7673_v33  ;;  %4885 = vmatpush1.msra.mxu1 %v4714_v43  ;;  %v10359_v5 = vadd.f32 %v4372_v12, %v10296_v46  ;;  %v5025_v46 = vld [vmem:[#allocation2 + $0x28] sm:$0xe0]  ;;  %v5036_v43 = vrot.slane %v10334_v53, 5  ;;  %v7683_v12 = vld [vmem:[#allocation13 + $0x618] sm:$0xff] }
 0xd9a   : > { %5179 = vmatpush2.msra.mxu0 %v7674_v32  ;;  %4886 = vmatprep.subr.mxu1 %v4711_v8  ;;  %v10361_v11 = vpop.f32.mrf.mxu0  ;;  %v5035_v34 = vrot.slane %v5025_v46, 5  ;;  %v7681_v8 = vld [vmem:[#allocation13 + $0x638] sm:$0xff]  ;;  %v4818_v33 = vld [vmem:[#allocation13 + $0x2360] sm:$0xff] }
 0xd9b   : > { %5180 = vmatprep.subr.mxu0 %v7675_v58  ;;  %4887 = vmatpush1.msra.mxu1 %v4710_v54  ;;  %v4815_v58 = vld [vmem:[#allocation13 + $0x2348] sm:$0xff]  ;;  %v4810_v46 = vld [vmem:[#allocation13 + $0x2320] sm:$0xff] }
 0xd9c   : > { %5181 = vmatpush2.msra.mxu0 %v7676_v48  ;;  %4888 = vmatprep.subr.mxu1 %v4835_v62  ;;  %v4814_v48 = vld [vmem:[#allocation13 + $0x2340] sm:$0xff] }
 0xd9d   : > { %5182 = vmatprep.subr.mxu0 %v7677_v23  ;;  %4889 = vmatpush2.msra.mxu1 %v4834_v45  ;;  %v4378_v40 = vpop.f32.mrf.mxu0  ;;  %v7684_v45 = vld [vmem:[#allocation13 + $0x610] sm:$0xff]  ;;  %v4811_v23 = vld [vmem:[#allocation13 + $0x2328] sm:$0xff] }
 0xd9e   : > { %5183 = vmatpush2.msra.mxu0 %v7678_v60  ;;  %4890 = vmatprep.subr.mxu1 %v4831_v59  ;;  %v10364_v24 = vadd.f32 %v4378_v40, %v10301_v49  ;;  %v4819_v49 = vld [vmem:[#allocation13 + $0x2368] sm:$0xff]  ;;  %v7685_v59 = vld [vmem:[#allocation13 + $0x1f8] sm:$0xff] }
 0xd9f   : > { %5184 = vmatprep.subr.mxu0 %v7679_v20  ;;  %4891 = vmatpush2.msra.mxu1 %v4830_v14  ;;  %v4380_v38 = vpop.f32.mrf.mxu0  ;;  %v4807_v20 = vld [vmem:[#allocation13 + $0x2308] sm:$0xff] }
 0xda0   : > { %5185 = vmatpush2.msra.mxu0 %v7680_v3  ;;  %4892 = vmatprep.subr.mxu1 %v4827_v36  ;;  %v10368_v18 = vadd.f32 %v4380_v38, %v10304_v19  ;;  %v10375_v19 = vsel %vm2496_vm5, %v5035_v34, %v5036_v43  ;;  %v7687_v36 = vld [vmem:[#allocation13 + $0x1d8] sm:$0xff]  ;;  %v4802_v34 = vld [vmem:[#allocation13 + $0x22e0] sm:$0xff] }
 0xda1   : > { %5186 = vmatprep.subr.mxu0 %v7681_v8  ;;  %4893 = vmatpush2.msra.mxu1 %v4826_v35  ;;  %v7688_v35 = vld [vmem:[#allocation13 + $0x1d0] sm:$0xff] }
 0xda2   : > { %5187 = vmatpush2.msra.mxu0 %v7682_v25  ;;  %4894 = vmatprep.subr.mxu1 %v4823_v57  ;;  %v10382_v57 = vpop.permute.xlu0 %2196  ;;  %v7692_v8 = vld [vmem:[#allocation13 + $0x190] sm:$0xff]  ;;  %v7693_v25 = vld [vmem:[#allocation13 + $0x178] sm:$0xff] }
 0xda3   : > { %v7594_v54 = vpop.eup %7593  ;;  %5188 = vmatprep.subr.mxu0 %v7683_v12  ;;  %4895 = vmatpush2.msra.mxu1 %v4822_v39  ;;  %v7690_v39 = vld [vmem:[#allocation13 + $0x1b0] sm:$0xff] }
 0xda4   : > { %v2145_v62 = vmul.f32 %v7594_v54, %v10238_v2  ;;  %v2146_v32 = vmul.f32 %v7594_v54, %v10241_v0  ;;  %5189 = vmatpush2.msra.mxu0 %v7684_v45  ;;  %4896 = vmatprep.subr.mxu1 %v4819_v49  ;;  %v7686_v0 = vld [vmem:[#allocation13 + $0x1f0] sm:$0xff]  ;;  %v4799_v49 = vld [vmem:[#allocation13 + $0x22c8] sm:$0xff]  ;;  %v4798_v54 = vld [vmem:[#allocation13 + $0x22c0] sm:$0xff] }
 0xda5   : > { %5191 = vmatmul.mubr.f32.vlgmr.msra.gmra.mxu0 %v10375_v19  ;;  %5298 = vmatprep.subr.mxu0 %v7685_v59  ;;  %v7694_v12 = vld [vmem:[#allocation13 + $0x170] sm:$0xff]  ;;  %v7697_v59 = vld [vmem:[#allocation13 + $0x138] sm:$0xff] }
 0xda6   : > { %v2161_v14 = vmul.f32 %v9920_v28, %v2145_v62  ;;  %v2162_v2 = vmul.f32 %v9924_v30, %v2146_v32  ;;  %4897 = vmatpush2.msra.mxu1 %v4818_v33  ;;  %5299 = vmatpush1.msra.mxu0 %v7686_v0  ;;  %v7689_v28 = vld [vmem:[#allocation13 + $0x1b8] sm:$0xff]  ;;  %v4806_v30 = vld [vmem:[#allocation13 + $0x2300] sm:$0xff]  ;;  %v4795_v33 = vld [vmem:[#allocation13 + $0x22a8] sm:$0xff] }
 0xda7   : > { %4898 = vmatprep.subr.mxu1 %v4815_v58  ;;  %5300 = vmatprep.subr.mxu0 %v7687_v36  ;;  %v7695_v62 = vld [vmem:[#allocation13 + $0x158] sm:$0xff]  ;;  %v4794_v32 = vld [vmem:[#allocation13 + $0x22a0] sm:$0xff]  ;;  %v7696_v45 = vld [vmem:[#allocation13 + $0x150] sm:$0xff] }
 0xda8   : > { %v2177_v40 = vadd.f32 %v9930_v50, %v2161_v14  ;;  %v2178_v60 = vadd.f32 %v9934_v52, %v2162_v2  ;;  %4899 = vmatpush2.msra.mxu1 %v4814_v48  ;;  %5301 = vmatpush1.msra.mxu0 %v7688_v35  ;;  %v4803_v50 = vld [vmem:[#allocation13 + $0x22e8] sm:$0xff]  ;;  %v7691_v52 = vld [vmem:[#allocation13 + $0x198] sm:$0xff]  ;;  %v4790_v48 = vld [vmem:[#allocation13 + $0x2280] sm:$0xff] }
 0xda9   : > { %4900 = vmatprep.subr.mxu1 %v4811_v23  ;;  %5302 = vmatprep.subr.mxu0 %v7689_v28  ;;  %v4791_v58 = vld [vmem:[#allocation13 + $0x2288] sm:$0xff]  ;;  %v7698_v14 = vld [vmem:[#allocation13 + $0x130] sm:$0xff]  ;;  %v7699_v23 = vld [vmem:[#allocation13 + $0x118] sm:$0xff] }
 0xdaa   : > { %v2205_v38 = vmul.f32 %v10382_v57, %v2177_v40  ;;  %v2206_v3 = vmul.f32 %v10382_v57, %v2178_v60  ;;  %4901 = vmatpush2.msra.mxu1 %v4810_v46  ;;  %5303 = vmatpush1.msra.mxu0 %v7690_v39  ;;  %v4787_v2 = vld [vmem:[#allocation13 + $0x2268] sm:$0xff]  ;;  %v4786_v36 = vld [vmem:[#allocation13 + $0x2260] sm:$0xff]  ;;  %v7700_v40 = vld [vmem:[#allocation13 + $0x110] sm:$0xff] }
 0xdab   : > { %4902 = vmatprep.subr.mxu1 %v4807_v20  ;;  %5304 = vmatprep.subr.mxu0 %v7691_v52  ;;  %v4783_v60 = vld [vmem:[#allocation13 + $0x2248] sm:$0xff]  ;;  %v7701_v20 = vld [vmem:[#allocation13 + $0xf8] sm:$0xff]  ;;  %v4782_v28 = vld [vmem:[#allocation13 + $0x2240] sm:$0xff] }
 0xdac   : > { %2221 = vst [vmem:[#allocation2 + $0x68] sm:$0xff] %v2205_v38  ;;  %2222 = vst [vmem:[#allocation2 + $0x38] sm:$0xff] %v2206_v3  ;;  %4903 = vmatpush2.msra.mxu1 %v4806_v30  ;;  %5305 = vmatpush1.msra.mxu0 %v7692_v8  ;;  %v7702_v30 = vld [vmem:[#allocation13 + $0xf0] sm:$0xff]  ;;  %v4779_v38 = vld [vmem:[#allocation13 + $0x2228] sm:$0xff] }
 0xdad   : > { %4904 = vmatprep.subr.mxu1 %v4803_v50  ;;  %5306 = vmatprep.subr.mxu0 %v7693_v25  ;;  %v7703_v39 = vld [vmem:[#allocation13 + $0xd8] sm:$0xff]  ;;  %v7704_v52 = vld [vmem:[#allocation13 + $0xd0] sm:$0xff] }
 0xdae   : > { %4905 = vmatpush2.msra.mxu1 %v4802_v34  ;;  %5307 = vmatpush1.msra.mxu0 %v7694_v12  ;;  %v4775_v34 = vld [vmem:[#allocation13 + $0x2208] sm:$0xff]  ;;  %v7705_v25 = vld [vmem:[#allocation13 + $0xb8] sm:$0xff] }
 0xdaf   : > { %4906 = vmatprep.subr.mxu1 %v4799_v49  ;;  %5308 = vmatprep.subr.mxu0 %v7695_v62  ;;  %v7706_v62 = vld [vmem:[#allocation13 + $0xb0] sm:$0xff] }
 0xdb0   : > { %4907 = vmatpush2.msra.mxu1 %v4798_v54  ;;  %5309 = vmatpush1.msra.mxu0 %v7696_v45  ;;  %v4774_v54 = vld [vmem:[#allocation13 + $0x2200] sm:$0xff]  ;;  %v7707_v45 = vld [vmem:[#allocation13 + $0x98] sm:$0xff] }
 0xdb1   : > { %4908 = vmatprep.subr.mxu1 %v4795_v33  ;;  %5310 = vmatprep.subr.mxu0 %v7697_v59  ;;  %v7708_v59 = vld [vmem:[#allocation13 + $0x90] sm:$0xff] }
 0xdb2   : > { %4909 = vmatpush2.msra.mxu1 %v4794_v32  ;;  %5311 = vmatpush1.msra.mxu0 %v7698_v14  ;;  %v3981_v0 = vpop.f32.mrf.mxu1 }
 0xdb3   : > { %4910 = vmatprep.subr.mxu1 %v4791_v58  ;;  %5312 = vmatprep.subr.mxu0 %v7699_v23  ;;  %v10387_v46 = vadd.f32 %v3981_v0, %v10327_v17  ;;  %v5028_v3 = vld [vmem:[#allocation2 + $0x38] sm:$0x1f]  ;;  %v4778_v17 = vld [vmem:[#allocation13 + $0x2220] sm:$0xff] }
 0xdb4   : > { %4911 = vmatpush2.msra.mxu1 %v4790_v48  ;;  %5313 = vmatpush1.msra.mxu0 %v7700_v40  ;;  %v10389_v35 = vpop.f32.mrf.mxu1  ;;  %v5027_v8 = vld [vmem:[#allocation2 + $0x68] sm:$0x1f]  ;;  %v5043_v12 = vrot.slane %v5028_v3, 5  ;;  %v7709_v48 = vld [vmem:[#allocation13 + $0x5e8] sm:$0xff]  ;;  %v7712_v0 = vld [vmem:[#allocation13 + $0x70] sm:$0xff] }
 0xdb5   : > { %4912 = vmatprep.subr.mxu1 %v4787_v2  ;;  %5314 = vmatprep.subr.mxu0 %v7701_v20  ;;  %v5041_v58 = vrot.slane %v5027_v8, 5  ;;  %v7710_v2 = vld [vmem:[#allocation13 + $0x78] sm:$0xff]  ;;  %v7713_v40 = vld [vmem:[#allocation13 + $0x5c8] sm:$0xff]  ;;  %v7728_v8 = vld [vmem:[#allocation13 + $0x3f0] sm:$0xff] }
 0xdb6   : > { %4913 = vmatpush2.msra.mxu1 %v4786_v36  ;;  %5315 = vmatpush1.msra.mxu0 %v7702_v30  ;;  %v10401_v14 = vsel %vm2496_vm5, %v5039_v47, %v5043_v12  ;;  %v5211_v36 = vrot.slane %v10337_v9, 4  ;;  %v7714_v47 = vld [vmem:[#allocation13 + $0x58] sm:$0xff]  ;;  %v7717_v20 = vld [vmem:[#allocation13 + $0x5a8] sm:$0xff]  ;;  %v7719_v30 = vld [vmem:[#allocation13 + $0x5a0] sm:$0xff] }
 0xdb7   : > { %4914 = vmatprep.subr.mxu1 %v4783_v60  ;;  %5316 = vmatprep.subr.mxu0 %v7703_v39  ;;  %v3987_v50 = vpop.f32.mrf.mxu1  ;;  %v10407_v23 = vsel %vm2496_vm5, %v5036_v43, %v5041_v58  ;;  %v7715_v60 = vld [vmem:[#allocation13 + $0x5c0] sm:$0xff]  ;;  %v7722_v3 = vld [vmem:[#allocation13 + $0x18] sm:$0xff]  ;;  %v7732_v12 = vld [vmem:[#allocation13 + $0x3d0] sm:$0xff] }
 0xdb8   : > { %4915 = vmatpush2.msra.mxu1 %v4782_v28  ;;  %5317 = vmatpush1.msra.mxu0 %v7704_v52  ;;  %v10392_v49 = vadd.f32 %v3987_v50, %v10342_v44  ;;  %v5020_v44 = vld [vmem:[#allocation2 + $0x48] sm:$0xf0]  ;;  %v7718_v28 = vld [vmem:[#allocation13 + $0x38] sm:$0xff]  ;;  %v7736_v58 = vld [vmem:[#allocation13 + $0x3b0] sm:$0xff] }
 0xdb9   : > { %4916 = vmatprep.subr.mxu1 %v4779_v38  ;;  %5318 = vmatprep.subr.mxu0 %v7705_v25  ;;  %v3989_v33 = vpop.f32.mrf.mxu1  ;;  %v7720_v38 = vld [vmem:[#allocation13 + $0x30] sm:$0xff]  ;;  %v7723_v39 = vld [vmem:[#allocation13 + $0x580] sm:$0xff]  ;;  %v7725_v50 = vld [vmem:[#allocation13 + $0x568] sm:$0xff] }
 0xdba   : > { %4917 = vmatpush2.msra.mxu1 %v4778_v17  ;;  %5319 = vmatpush1.msra.mxu0 %v7706_v62  ;;  %v10395_v32 = vadd.f32 %v3989_v33, %v10345_v61  ;;  %v7711_v61 = vld [vmem:[#allocation13 + $0x5e0] sm:$0xff]  ;;  %v7724_v17 = vld [vmem:[#allocation13 + $0x10] sm:$0xff]  ;;  %v7726_v52 = vld [vmem:[#allocation13 + $0x3f8] sm:$0xff] }
 0xdbb   : > { %4918 = vmatprep.subr.mxu1 %v4775_v34  ;;  %5320 = vmatprep.subr.mxu0 %v7707_v45  ;;  %v7727_v34 = vld [vmem:[#allocation13 + $0x560] sm:$0xff]  ;;  %v7729_v25 = vld [vmem:[#allocation13 + $0x548] sm:$0xff]  ;;  %v7734_v62 = vld [vmem:[#allocation13 + $0x3b8] sm:$0xff] }
 0xdbc   : > { %4919 = vmatpush2.msra.mxu1 %v4774_v54  ;;  %5321 = vmatpush1.msra.mxu0 %v7708_v59  ;;  %v7731_v54 = vld [vmem:[#allocation13 + $0x540] sm:$0xff]  ;;  %v7733_v33 = vld [vmem:[#allocation13 + $0x528] sm:$0xff] }
 0xdbd   : > { %4921 = vmatmul.mubr.f32.vlgmr.msra.gmra.mxu1 %v10307_v56  ;;  %5049 = vmatprep.subr.mxu1 %v7709_v48  ;;  %v5210_v56 = vrot.slane %v5020_v44, 4  ;;  %v7735_v45 = vld [vmem:[#allocation13 + $0x520] sm:$0xff]  ;;  %v7737_v59 = vld [vmem:[#allocation13 + $0x508] sm:$0xff]  ;;  %v7738_v44 = vld [vmem:[#allocation13 + $0x398] sm:$0xff] }
 0xdbe   : > { %5322 = vmatprep.subr.mxu0 %v7710_v2  ;;  %4926 = vmatprep.mubr.f32.mxu1 %v10313_v42  ;;  %v7716_v42 = vld [vmem:[#allocation13 + $0x50] sm:$0xff]  ;;  %v7739_v48 = vld [vmem:[#allocation13 + $0x500] sm:$0xff] }
 0xdbf   : > { %5050 = vmatpush1.msra.mxu1 %v7711_v61  ;;  %5323 = vmatpush1.msra.mxu0 %v7712_v0  ;;  %v10416_v43 = vsel %vm2669_vm6, %v5210_v56, %v5211_v36  ;;  %v7740_v2 = vld [vmem:[#allocation13 + $0x390] sm:$0xff]  ;;  %v7741_v61 = vld [vmem:[#allocation13 + $0x4e8] sm:$0xff]  ;;  %v7742_v0 = vld [vmem:[#allocation13 + $0x378] sm:$0xff] }
 0xdc0   : > { %5051 = vmatprep.subr.mxu1 %v7713_v40  ;;  %5196 = vmatprep.mubr.f32.mxu0 %v10401_v14  ;;  %v7743_v56 = vld [vmem:[#allocation13 + $0x4e0] sm:$0xff]  ;;  %v7744_v40 = vld [vmem:[#allocation13 + $0x370] sm:$0xff] }
 0xdc1   : > { %5324 = vmatprep.subr.mxu0 %v7714_v47  ;;  %5052 = vmatpush1.msra.mxu1 %v7715_v60  ;;  %v7745_v47 = vld [vmem:[#allocation13 + $0x4c8] sm:$0xff]  ;;  %v7746_v60 = vld [vmem:[#allocation13 + $0x358] sm:$0xff] }
 0xdc2   : > { %5197 = vmatmul.mubr.f32.gmra.mxu0 %v10407_v23  ;;  %4927 = vmatmul.mubr.f32.gmra.mxu1 %v10317_v55  ;;  %v7721_v55 = vld [vmem:[#allocation13 + $0x588] sm:$0xff] }
 0xdc3   : > { %5325 = vmatpush1.msra.mxu0 %v7716_v42  ;;  %5053 = vmatprep.subr.mxu1 %v7717_v20  ;;  %v7747_v42 = vld [vmem:[#allocation13 + $0x4c0] sm:$0xff]  ;;  %v7748_v20 = vld [vmem:[#allocation13 + $0x350] sm:$0xff] }
 0xdc4   : > { %5326 = vmatprep.subr.mxu0 %v7718_v28  ;;  %5362 = vmatprep.mubr.f32.mxu0 %v10416_v43  ;;  %v7749_v28 = vld [vmem:[#allocation13 + $0x4a8] sm:$0xff] }
 0xdc5   : > { %5054 = vmatpush1.msra.mxu1 %v7719_v30  ;;  %5113 = vmatprep.mubr.f32.mxu1 %v10355_v51  ;;  %v7730_v51 = vld [vmem:[#allocation13 + $0x3d8] sm:$0xff] }
 0xdc6   : > { %5327 = vmatpush1.msra.mxu0 %v7720_v38  ;;  %5055 = vmatprep.subr.mxu1 %v7721_v55  ;;  %v7750_v30 = vld [vmem:[#allocation13 + $0x338] sm:$0xff]  ;;  %v7751_v38 = vld [vmem:[#allocation13 + $0x4a0] sm:$0xff]  ;;  %v7752_v55 = vld [vmem:[#allocation13 + $0x330] sm:$0xff] }
 0xdc7   : > { %5328 = vmatprep.subr.mxu0 %v7722_v3  ;;  %5056 = vmatpush1.msra.mxu1 %v7723_v39  ;;  %v7753_v3 = vld [vmem:[#allocation13 + $0x488] sm:$0xff]  ;;  %v7754_v39 = vld [vmem:[#allocation13 + $0x318] sm:$0xff] }
 0xdc8   : > { %5329 = vmatpush1.msra.mxu0 %v7724_v17  ;;  %5057 = vmatprep.subr.mxu1 %v7725_v50  ;;  %v7755_v17 = vld [vmem:[#allocation13 + $0x480] sm:$0xff]  ;;  %v7756_v50 = vld [vmem:[#allocation13 + $0x310] sm:$0xff] }
 0xdc9   : > { %5330 = vmatprep.subr.mxu0 %v7726_v52  ;;  %5058 = vmatpush1.msra.mxu1 %v7727_v34  ;;  %v7757_v52 = vld [vmem:[#allocation13 + $0x468] sm:$0xff]  ;;  %v7758_v34 = vld [vmem:[#allocation13 + $0x2f8] sm:$0xff] }
 0xdca   : > { %5331 = vmatpush2.msra.mxu0 %v7728_v8  ;;  %5059 = vmatprep.subr.mxu1 %v7729_v25  ;;  %v7759_v8 = vld [vmem:[#allocation13 + $0x460] sm:$0xff]  ;;  %v7760_v25 = vld [vmem:[#allocation13 + $0x2f0] sm:$0xff] }
 0xdcb   : > { %5332 = vmatprep.subr.mxu0 %v7730_v51  ;;  %5060 = vmatpush1.msra.mxu1 %v7731_v54  ;;  %v7761_v51 = vld [vmem:[#allocation13 + $0x448] sm:$0xff]  ;;  %v7762_v54 = vld [vmem:[#allocation13 + $0x2d8] sm:$0xff] }
 0xdcc   : > { %5333 = vmatpush2.msra.mxu0 %v7732_v12  ;;  %5061 = vmatprep.subr.mxu1 %v7733_v33  ;;  %v7763_v12 = vld [vmem:[#allocation13 + $0x440] sm:$0xff]  ;;  %v7764_v33 = vld [vmem:[#allocation13 + $0x2d0] sm:$0xff] }
 0xdcd   : > { %5334 = vmatprep.subr.mxu0 %v7734_v62  ;;  %5062 = vmatpush1.msra.mxu1 %v7735_v45  ;;  %v7765_v62 = vld [vmem:[#allocation13 + $0x428] sm:$0xff]  ;;  %v7766_v45 = vld [vmem:[#allocation13 + $0x2b8] sm:$0xff] }
 0xdce   : > { %5335 = vmatpush2.msra.mxu0 %v7736_v58  ;;  %5063 = vmatprep.subr.mxu1 %v7737_v59  ;;  %v7767_v58 = vld [vmem:[#allocation13 + $0x420] sm:$0xff] }
 0xdcf   : > { %5336 = vmatprep.subr.mxu0 %v7738_v44  ;;  %5064 = vmatpush1.msra.mxu1 %v7739_v48  ;;  %v7768_v44 = vld [vmem:[#allocation13 + $0x2b0] sm:$0xff]  ;;  %v7769_v48 = vld [vmem:[#allocation13 + $0x408] sm:$0xff] }
 0xdd0   : > { %5337 = vmatpush2.msra.mxu0 %v7740_v2  ;;  %5065 = vmatprep.subr.mxu1 %v7741_v61  ;;  %v7770_v61 = vld [vmem:[#allocation13 + $0x298] sm:$0xff] }
 0xdd1   : > { %5338 = vmatprep.subr.mxu0 %v7742_v0  ;;  %5066 = vmatpush1.msra.mxu1 %v7743_v56  ;;  %v7771_v0 = vld [vmem:[#allocation13 + $0x400] sm:$0xff] }
 0xdd2   : > { %5339 = vmatpush2.msra.mxu0 %v7744_v40  ;;  %5067 = vmatprep.subr.mxu1 %v7745_v47  ;;  %v7772_v40 = vld [vmem:[#allocation13 + $0x290] sm:$0xff]  ;;  %v7773_v47 = vld [vmem:[#allocation13 + $0x7e8] sm:$0xff] }
 0xdd3   : > { %5340 = vmatprep.subr.mxu0 %v7746_v60  ;;  %5068 = vmatpush1.msra.mxu1 %v7747_v42  ;;  %v7774_v60 = vld [vmem:[#allocation13 + $0x278] sm:$0xff]  ;;  %v7775_v42 = vld [vmem:[#allocation13 + $0x7e0] sm:$0xff] }
 0xdd4   : > { %5341 = vmatpush2.msra.mxu0 %v7748_v20  ;;  %5069 = vmatprep.subr.mxu1 %v7749_v28  ;;  %v5019_v20 = vld [vmem:[#allocation2 + $0x28] sm:$0xf0]  ;;  %v7776_v28 = vld [vmem:[#allocation13 + $0x270] sm:$0xff] }
 0xdd5   : > { %5342 = vmatprep.subr.mxu0 %v7750_v30  ;;  %5070 = vmatpush1.msra.mxu1 %v7751_v38  ;;  %v7777_v30 = vld [vmem:[#allocation13 + $0x7c8] sm:$0xff] }
 0xdd6   : > { %5343 = vmatpush2.msra.mxu0 %v7752_v55  ;;  %5071 = vmatprep.subr.mxu1 %v7753_v3  ;;  %v7778_v55 = vld [vmem:[#allocation13 + $0x258] sm:$0xff]  ;;  %v7779_v3 = vld [vmem:[#allocation13 + $0x7c0] sm:$0xff] }
 0xdd7   : > { %5344 = vmatprep.subr.mxu0 %v7754_v39  ;;  %5072 = vmatpush1.msra.mxu1 %v7755_v17  ;;  %v7780_v17 = vld [vmem:[#allocation13 + $0x250] sm:$0xff] }
 0xdd8   : > { %5345 = vmatpush2.msra.mxu0 %v7756_v50  ;;  %5073 = vmatprep.subr.mxu1 %v7757_v52  ;;  %v7781_v50 = vld [vmem:[#allocation13 + $0x7a8] sm:$0xff]  ;;  %v5207_v52 = vrot.slane %v5019_v20, 4  ;;  %v5387_v20 = vrot.slane %v10337_v9, 6  ;;  %v7925_v9 = vld [vmem:[#allocation13 + $0x340] sm:$0xff] }
 0xdd9   : > { %5346 = vmatprep.subr.mxu0 %v7758_v34  ;;  %5074 = vmatpush1.msra.mxu1 %v7759_v8  ;;  %v5208_v34 = vrot.slane %v10334_v53, 4  ;;  %v7789_v53 = vld [vmem:[#allocation13 + $0x768] sm:$0xff] }
 0xdda   : > { %5347 = vmatpush2.msra.mxu0 %v7760_v25  ;;  %5075 = vmatprep.subr.mxu1 %v7761_v51  ;;  %v7782_v25 = vld [vmem:[#allocation13 + $0x238] sm:$0xff]  ;;  %v7783_v51 = vld [vmem:[#allocation13 + $0x7a0] sm:$0xff] }
 0xddb   : > { %5348 = vmatprep.subr.mxu0 %v7762_v54  ;;  %5076 = vmatpush1.msra.mxu1 %v7763_v12 }
 0xddc   : > { %5349 = vmatpush2.msra.mxu0 %v7764_v33  ;;  %5077 = vmatprep.subr.mxu1 %v7765_v62  ;;  %v7784_v33 = vld [vmem:[#allocation13 + $0x230] sm:$0xff]  ;;  %v5023_v62 = vld [vmem:[#allocation2 + $0x68] sm:$0xf] }
 0xddd   : > { %5350 = vmatprep.subr.mxu0 %v7766_v45  ;;  %5078 = vmatpush1.msra.mxu1 %v7767_v58  ;;  %v4686_v59 = vpop.f32.mrf.mxu0  ;;  %v7786_v45 = vld [vmem:[#allocation13 + $0x218] sm:$0xff]  ;;  %v7787_v58 = vld [vmem:[#allocation13 + $0x780] sm:$0xff] }
 0xdde   : > { %5351 = vmatpush2.msra.mxu0 %v7768_v44  ;;  %5079 = vmatprep.subr.mxu1 %v7769_v48  ;;  %v10421_v2 = vadd.f32 %v4686_v59, %v10359_v5  ;;  %v5024_v5 = vld [vmem:[#allocation2 + $0x38] sm:$0xf]  ;;  %v10433_v44 = vsel %vm2669_vm6, %v5207_v52, %v5208_v34  ;;  %v5376_v48 = vld [vmem:[#allocation2 + $0x48] sm:$0xc0] }
 0xddf   : > { %5352 = vmatprep.subr.mxu0 %v7770_v61  ;;  %5080 = vmatpush1.msra.mxu1 %v7771_v0  ;;  %v10423_v56 = vpop.f32.mrf.mxu0  ;;  %v5215_v54 = vrot.slane %v5024_v5, 4  ;;  %v7788_v59 = vld [vmem:[#allocation13 + $0x210] sm:$0xff]  ;;  %v5213_v0 = vrot.slane %v5023_v62, 4  ;;  %v7801_v52 = vld [vmem:[#allocation13 + $0x708] sm:$0xff] }
 0xde0   : > { %5353 = vmatpush2.msra.mxu0 %v7772_v40  ;;  %5081 = vmatprep.subr.mxu1 %v7773_v47  ;;  %v7791_v40 = vld [vmem:[#allocation13 + $0x760] sm:$0xff]  ;;  %v7792_v47 = vld [vmem:[#allocation13 + $0x9f0] sm:$0xff]  ;;  %v7809_v62 = vld [vmem:[#allocation13 + $0x6c8] sm:$0xff] }
 0xde1   : > { %5354 = vmatprep.subr.mxu0 %v7774_v60  ;;  %5082 = vmatpush2.msra.mxu1 %v7775_v42  ;;  %v10439_v61 = vsel %vm2669_vm6, %v5211_v36, %v5215_v54  ;;  %v7793_v60 = vld [vmem:[#allocation13 + $0x748] sm:$0xff]  ;;  %v5386_v42 = vrot.slane %v5376_v48, 6  ;;  %v7796_v5 = vld [vmem:[#allocation13 + $0x9d0] sm:$0xff]  ;;  %v7806_v54 = vld [vmem:[#allocation13 + $0x978] sm:$0xff] }
 0xde2   : > { %5355 = vmatpush2.msra.mxu0 %v7776_v28  ;;  %5083 = vmatprep.subr.mxu1 %v7777_v30  ;;  %v4692_v38 = vpop.f32.mrf.mxu0  ;;  %v7794_v28 = vld [vmem:[#allocation13 + $0x9d8] sm:$0xff]  ;;  %v7795_v30 = vld [vmem:[#allocation13 + $0x740] sm:$0xff]  ;;  %v7797_v36 = vld [vmem:[#allocation13 + $0x728] sm:$0xff] }
 0xde3   : > { %5356 = vmatprep.subr.mxu0 %v7778_v55  ;;  %5084 = vmatpush2.msra.mxu1 %v7779_v3  ;;  %v10426_v39 = vadd.f32 %v4692_v38, %v10364_v24  ;;  %v7785_v24 = vld [vmem:[#allocation13 + $0x788] sm:$0xff]  ;;  %v10444_v38 = vsel %vm2669_vm6, %v5208_v34, %v5213_v0  ;;  %v7798_v55 = vld [vmem:[#allocation13 + $0x9b8] sm:$0xff]  ;;  %v7799_v3 = vld [vmem:[#allocation13 + $0x720] sm:$0xff] }
 0xde4   : > { %5357 = vmatpush2.msra.mxu0 %v7780_v17  ;;  %5085 = vmatprep.subr.mxu1 %v7781_v50  ;;  %v4694_v8 = vpop.f32.mrf.mxu0  ;;  %v7800_v17 = vld [vmem:[#allocation13 + $0x9b0] sm:$0xff]  ;;  %v10450_v50 = vsel %vm2975_vm7, %v5386_v42, %v5387_v20  ;;  %v7803_v34 = vld [vmem:[#allocation13 + $0x700] sm:$0xff] }
 0xde5   : > { %5358 = vmatprep.subr.mxu0 %v7782_v25  ;;  %5086 = vmatpush2.msra.mxu1 %v7783_v51  ;;  %v10430_v12 = vadd.f32 %v4694_v8, %v10368_v18  ;;  %v7790_v18 = vld [vmem:[#allocation13 + $0x9f8] sm:$0xff]  ;;  %v7804_v25 = vld [vmem:[#allocation13 + $0x990] sm:$0xff]  ;;  %v7805_v51 = vld [vmem:[#allocation13 + $0x6e8] sm:$0xff] }
 0xde6   : > { %5359 = vmatpush2.msra.mxu0 %v7784_v33  ;;  %5087 = vmatprep.subr.mxu1 %v7785_v24  ;;  %v7802_v8 = vld [vmem:[#allocation13 + $0x998] sm:$0xff]  ;;  %v7807_v33 = vld [vmem:[#allocation13 + $0x6e0] sm:$0xff]  ;;  %v7808_v24 = vld [vmem:[#allocation13 + $0x970] sm:$0xff] }
 0xde7   : > { %5360 = vmatprep.subr.mxu0 %v7786_v45  ;;  %5088 = vmatpush2.msra.mxu1 %v7787_v58  ;;  %v7810_v45 = vld [vmem:[#allocation13 + $0x958] sm:$0xff]  ;;  %v7811_v58 = vld [vmem:[#allocation13 + $0x6c0] sm:$0xff] }
 0xde8   : > { %5361 = vmatpush2.msra.mxu0 %v7788_v59  ;;  %5089 = vmatprep.subr.mxu1 %v7789_v53  ;;  %v7812_v59 = vld [vmem:[#allocation13 + $0x950] sm:$0xff]  ;;  %v7813_v53 = vld [vmem:[#allocation13 + $0x6a8] sm:$0xff]  ;;  %v7815_v0 = vld [vmem:[#allocation13 + $0x6a0] sm:$0xff] }
 0xde9   : > { %5363 = vmatmul.mubr.f32.vlgmr.msra.gmra.mxu0 %v10433_v44  ;;  %5474 = vmatprep.subr.mxu0 %v7790_v18  ;;  %v7814_v18 = vld [vmem:[#allocation13 + $0x938] sm:$0xff] }
 0xdea   : > { %5090 = vmatpush2.msra.mxu1 %v7791_v40  ;;  %5368 = vmatprep.mubr.f32.mxu0 %v10439_v61 }
 0xdeb   : > { %5475 = vmatpush1.msra.mxu0 %v7792_v47  ;;  %5091 = vmatprep.subr.mxu1 %v7793_v60  ;;  %v7816_v47 = vld [vmem:[#allocation13 + $0x930] sm:$0xff]  ;;  %v7817_v60 = vld [vmem:[#allocation13 + $0x688] sm:$0xff] }
 0xdec   : > { %5476 = vmatprep.subr.mxu0 %v7794_v28  ;;  %5092 = vmatpush2.msra.mxu1 %v7795_v30  ;;  %v7818_v28 = vld [vmem:[#allocation13 + $0x918] sm:$0xff]  ;;  %v7819_v30 = vld [vmem:[#allocation13 + $0x680] sm:$0xff] }
 0xded   : > { %5477 = vmatpush1.msra.mxu0 %v7796_v5  ;;  %5093 = vmatprep.subr.mxu1 %v7797_v36  ;;  %v7820_v5 = vld [vmem:[#allocation13 + $0x910] sm:$0xff]  ;;  %v7821_v36 = vld [vmem:[#allocation13 + $0x668] sm:$0xff] }
 0xdee   : > { %5369 = vmatmul.mubr.f32.gmra.mxu0 %v10444_v38  ;;  %5478 = vmatprep.subr.mxu0 %v7798_v55  ;;  %v7822_v55 = vld [vmem:[#allocation13 + $0x8f8] sm:$0xff] }
 0xdef   : > { %5094 = vmatpush2.msra.mxu1 %v7799_v3  ;;  %5479 = vmatpush1.msra.mxu0 %v7800_v17  ;;  %v7823_v3 = vld [vmem:[#allocation13 + $0x660] sm:$0xff]  ;;  %v7824_v17 = vld [vmem:[#allocation13 + $0x8f0] sm:$0xff] }
 0xdf0   : > { %5538 = vmatprep.mubr.f32.mxu0 %v10450_v50  ;;  %5095 = vmatprep.subr.mxu1 %v7801_v52  ;;  %v7825_v52 = vld [vmem:[#allocation13 + $0x648] sm:$0xff] }
 0xdf1   : > { %5480 = vmatprep.subr.mxu0 %v7802_v8  ;;  %5096 = vmatpush2.msra.mxu1 %v7803_v34  ;;  %v7826_v34 = vld [vmem:[#allocation13 + $0x8d8] sm:$0xff] }
 0xdf2   : > { %5481 = vmatpush1.msra.mxu0 %v7804_v25  ;;  %5097 = vmatprep.subr.mxu1 %v7805_v51  ;;  %v7827_v25 = vld [vmem:[#allocation13 + $0x640] sm:$0xff] }
 0xdf3   : > { %5482 = vmatprep.subr.mxu0 %v7806_v54  ;;  %5098 = vmatpush2.msra.mxu1 %v7807_v33  ;;  %v7828_v54 = vld [vmem:[#allocation13 + $0x8d0] sm:$0xff]  ;;  %v7829_v33 = vld [vmem:[#allocation13 + $0x628] sm:$0xff] }
 0xdf4   : > { %5483 = vmatpush1.msra.mxu0 %v7808_v24  ;;  %5099 = vmatprep.subr.mxu1 %v7809_v62  ;;  %v7830_v62 = vld [vmem:[#allocation13 + $0x8b8] sm:$0xff] }
 0xdf5   : > { %5484 = vmatprep.subr.mxu0 %v7810_v45  ;;  %5100 = vmatpush2.msra.mxu1 %v7811_v58  ;;  %v7831_v45 = vld [vmem:[#allocation13 + $0x620] sm:$0xff]  ;;  %v7832_v58 = vld [vmem:[#allocation13 + $0x8b0] sm:$0xff] }
 0xdf6   : > { %5485 = vmatpush1.msra.mxu0 %v7812_v59  ;;  %5101 = vmatprep.subr.mxu1 %v7813_v53  ;;  %v4295_v48 = vpop.f32.mrf.mxu1  ;;  %v7834_v59 = vld [vmem:[#allocation13 + $0x898] sm:$0xff]  ;;  %v7835_v53 = vld [vmem:[#allocation13 + $0x600] sm:$0xff] }
 0xdf7   : > { %5486 = vmatprep.subr.mxu0 %v7814_v18  ;;  %5102 = vmatpush2.msra.mxu1 %v7815_v0  ;;  %v10454_v40 = vadd.f32 %v4295_v48, %v10387_v46  ;;  %v7836_v48 = vld [vmem:[#allocation13 + $0x890] sm:$0xff]  ;;  %v7837_v18 = vld [vmem:[#allocation13 + $0x1e8] sm:$0xff]  ;;  %v7839_v0 = vld [vmem:[#allocation13 + $0x1e0] sm:$0xff] }
 0xdf8   : > { %5487 = vmatpush1.msra.mxu0 %v7816_v47  ;;  %5103 = vmatprep.subr.mxu1 %v7817_v60  ;;  %v10456_v42 = vpop.f32.mrf.mxu1  ;;  %v7840_v47 = vld [vmem:[#allocation13 + $0x870] sm:$0xff]  ;;  %v7841_v60 = vld [vmem:[#allocation13 + $0x1c8] sm:$0xff] }
 0xdf9   : > { %5488 = vmatprep.subr.mxu0 %v7818_v28  ;;  %5104 = vmatpush2.msra.mxu1 %v7819_v30  ;;  %v7842_v28 = vld [vmem:[#allocation13 + $0x858] sm:$0xff]  ;;  %v7843_v30 = vld [vmem:[#allocation13 + $0x1c0] sm:$0xff] }
 0xdfa   : > { %5489 = vmatpush1.msra.mxu0 %v7820_v5  ;;  %5105 = vmatprep.subr.mxu1 %v7821_v36  ;;  %v7844_v5 = vld [vmem:[#allocation13 + $0x850] sm:$0xff]  ;;  %v7846_v36 = vld [vmem:[#allocation13 + $0x838] sm:$0xff] }
 0xdfb   : > { %5490 = vmatprep.subr.mxu0 %v7822_v55  ;;  %5106 = vmatpush2.msra.mxu1 %v7823_v3  ;;  %v4301_v46 = vpop.f32.mrf.mxu1  ;;  %v7847_v55 = vld [vmem:[#allocation13 + $0x1a0] sm:$0xff]  ;;  %v7849_v3 = vld [vmem:[#allocation13 + $0x188] sm:$0xff] }
 0xdfc   : > { %5491 = vmatpush1.msra.mxu0 %v7824_v17  ;;  %5107 = vmatprep.subr.mxu1 %v7825_v52  ;;  %v10459_v8 = vadd.f32 %v4301_v46, %v10392_v49  ;;  %v7833_v49 = vld [vmem:[#allocation13 + $0x608] sm:$0xff]  ;;  %v7850_v46 = vld [vmem:[#allocation13 + $0x818] sm:$0xff]  ;;  %v7851_v17 = vld [vmem:[#allocation13 + $0x180] sm:$0xff] }
 0xdfd   : > { %5492 = vmatprep.subr.mxu0 %v7826_v34  ;;  %5108 = vmatpush2.msra.mxu1 %v7827_v25  ;;  %v4303_v51 = vpop.f32.mrf.mxu1  ;;  %v7852_v52 = vld [vmem:[#allocation13 + $0x810] sm:$0xff]  ;;  %v7853_v34 = vld [vmem:[#allocation13 + $0x168] sm:$0xff]  ;;  %v7855_v25 = vld [vmem:[#allocation13 + $0x160] sm:$0xff] }
 0xdfe   : > { %5493 = vmatpush1.msra.mxu0 %v7828_v54  ;;  %5109 = vmatprep.subr.mxu1 %v7829_v33  ;;  %v10462_v24 = vadd.f32 %v4303_v51, %v10395_v32  ;;  %v7838_v32 = vld [vmem:[#allocation13 + $0x878] sm:$0xff]  ;;  %v7856_v51 = vld [vmem:[#allocation13 + $0xbf0] sm:$0xff]  ;;  %v7857_v54 = vld [vmem:[#allocation13 + $0x148] sm:$0xff] }
 0xdff   : > { %5494 = vmatprep.subr.mxu0 %v7830_v62  ;;  %5110 = vmatpush2.msra.mxu1 %v7831_v45  ;;  %v7859_v33 = vld [vmem:[#allocation13 + $0x140] sm:$0xff]  ;;  %v7860_v62 = vld [vmem:[#allocation13 + $0xbd0] sm:$0xff]  ;;  %v7861_v45 = vld [vmem:[#allocation13 + $0x128] sm:$0xff] }
 0xe00   : > { %5495 = vmatpush1.msra.mxu0 %v7832_v58  ;;  %5111 = vmatprep.subr.mxu1 %v7833_v49  ;;  %v7862_v58 = vld [vmem:[#allocation13 + $0xbb8] sm:$0xff]  ;;  %v7863_v49 = vld [vmem:[#allocation13 + $0x120] sm:$0xff] }
 0xe01   : > { %5496 = vmatprep.subr.mxu0 %v7834_v59  ;;  %5112 = vmatpush2.msra.mxu1 %v7835_v53  ;;  %v7864_v59 = vld [vmem:[#allocation13 + $0xbb0] sm:$0xff]  ;;  %v7865_v53 = vld [vmem:[#allocation13 + $0x108] sm:$0xff] }
 0xe02   : > { %5497 = vmatpush1.msra.mxu0 %v7836_v48  ;;  %5114 = vmatmul.mubr.f32.vlgmr.msra.gmra.mxu1 %v10375_v19  ;;  %v7845_v19 = vld [vmem:[#allocation13 + $0x1a8] sm:$0xff]  ;;  %v7866_v48 = vld [vmem:[#allocation13 + $0xb98] sm:$0xff] }
 0xe03   : > { %5221 = vmatprep.subr.mxu1 %v7837_v18  ;;  %5498 = vmatprep.subr.mxu0 %v7838_v32  ;;  %v7867_v18 = vld [vmem:[#allocation13 + $0x100] sm:$0xff]  ;;  %v7868_v32 = vld [vmem:[#allocation13 + $0xb90] sm:$0xff] }
 0xe04   : > { %5119 = vmatprep.mubr.f32.mxu1 %v10401_v14  ;;  %5222 = vmatpush1.msra.mxu1 %v7839_v0  ;;  %v7848_v14 = vld [vmem:[#allocation13 + $0x830] sm:$0xff]  ;;  %v7869_v0 = vld [vmem:[#allocation13 + $0xe8] sm:$0xff] }
 0xe05   : > { %5499 = vmatpush1.msra.mxu0 %v7840_v47  ;;  %5223 = vmatprep.subr.mxu1 %v7841_v60  ;;  %v7870_v47 = vld [vmem:[#allocation13 + $0xb78] sm:$0xff]  ;;  %v7871_v60 = vld [vmem:[#allocation13 + $0xe0] sm:$0xff] }
 0xe06   : > { %5500 = vmatprep.subr.mxu0 %v7842_v28  ;;  %5224 = vmatpush1.msra.mxu1 %v7843_v30  ;;  %v7872_v28 = vld [vmem:[#allocation13 + $0xb70] sm:$0xff]  ;;  %v7873_v30 = vld [vmem:[#allocation13 + $0xc8] sm:$0xff] }
 0xe07   : > { %5501 = vmatpush1.msra.mxu0 %v7844_v5  ;;  %5120 = vmatmul.mubr.f32.gmra.mxu1 %v10407_v23  ;;  %v7854_v23 = vld [vmem:[#allocation13 + $0xbf8] sm:$0xff] }
 0xe08   : > { %5225 = vmatprep.subr.mxu1 %v7845_v19  ;;  %5502 = vmatprep.subr.mxu0 %v7846_v36  ;;  %v7874_v5 = vld [vmem:[#allocation13 + $0xb58] sm:$0xff]  ;;  %v7875_v19 = vld [vmem:[#allocation13 + $0xc0] sm:$0xff]  ;;  %v7876_v36 = vld [vmem:[#allocation13 + $0xb50] sm:$0xff] }
 0xe09   : > { %5226 = vmatpush1.msra.mxu1 %v7847_v55  ;;  %5285 = vmatprep.mubr.f32.mxu1 %v10416_v43  ;;  %v7858_v43 = vld [vmem:[#allocation13 + $0xbd8] sm:$0xff]  ;;  %v7877_v55 = vld [vmem:[#allocation13 + $0xa8] sm:$0xff] }
 0xe0a   : > { %5503 = vmatpush1.msra.mxu0 %v7848_v14  ;;  %5227 = vmatprep.subr.mxu1 %v7849_v3  ;;  %v7878_v14 = vld [vmem:[#allocation13 + $0xb38] sm:$0xff]  ;;  %v7879_v3 = vld [vmem:[#allocation13 + $0xa0] sm:$0xff] }
 0xe0b   : > { %5504 = vmatprep.subr.mxu0 %v7850_v46  ;;  %5228 = vmatpush1.msra.mxu1 %v7851_v17  ;;  %v7880_v46 = vld [vmem:[#allocation13 + $0xb30] sm:$0xff]  ;;  %v7881_v17 = vld [vmem:[#allocation13 + $0x88] sm:$0xff] }
 0xe0c   : > { %5505 = vmatpush1.msra.mxu0 %v7852_v52  ;;  %5229 = vmatprep.subr.mxu1 %v7853_v34  ;;  %v7882_v52 = vld [vmem:[#allocation13 + $0xb18] sm:$0xff]  ;;  %v7883_v34 = vld [vmem:[#allocation13 + $0x80] sm:$0xff] }
 0xe0d   : > { %5506 = vmatprep.subr.mxu0 %v7854_v23  ;;  %5230 = vmatpush1.msra.mxu1 %v7855_v25  ;;  %v7884_v23 = vld [vmem:[#allocation13 + $0xb10] sm:$0xff]  ;;  %v7885_v25 = vld [vmem:[#allocation13 + $0x68] sm:$0xff] }
 0xe0e   : > { %5507 = vmatpush2.msra.mxu0 %v7856_v51  ;;  %5231 = vmatprep.subr.mxu1 %v7857_v54  ;;  %v7886_v51 = vld [vmem:[#allocation13 + $0xaf8] sm:$0xff]  ;;  %v7887_v54 = vld [vmem:[#allocation13 + $0x60] sm:$0xff] }
 0xe0f   : > { %5508 = vmatprep.subr.mxu0 %v7858_v43  ;;  %5232 = vmatpush1.msra.mxu1 %v7859_v33  ;;  %v7888_v43 = vld [vmem:[#allocation13 + $0xaf0] sm:$0xff]  ;;  %v7889_v33 = vld [vmem:[#allocation13 + $0x48] sm:$0xff] }
 0xe10   : > { %5509 = vmatpush2.msra.mxu0 %v7860_v62  ;;  %5233 = vmatprep.subr.mxu1 %v7861_v45  ;;  %v7890_v62 = vld [vmem:[#allocation13 + $0xad8] sm:$0xff]  ;;  %v7891_v45 = vld [vmem:[#allocation13 + $0x40] sm:$0xff] }
 0xe11   : > { %5510 = vmatprep.subr.mxu0 %v7862_v58  ;;  %5234 = vmatpush1.msra.mxu1 %v7863_v49  ;;  %v7892_v58 = vld [vmem:[#allocation13 + $0xad0] sm:$0xff]  ;;  %v7893_v49 = vld [vmem:[#allocation13 + $0x28] sm:$0xff] }
 0xe12   : > { %5511 = vmatpush2.msra.mxu0 %v7864_v59  ;;  %5235 = vmatprep.subr.mxu1 %v7865_v53  ;;  %v7894_v59 = vld [vmem:[#allocation13 + $0xab8] sm:$0xff]  ;;  %v7895_v53 = vld [vmem:[#allocation13 + $0x20] sm:$0xff] }
 0xe13   : > { %5512 = vmatprep.subr.mxu0 %v7866_v48  ;;  %5236 = vmatpush1.msra.mxu1 %v7867_v18  ;;  %v7896_v48 = vld [vmem:[#allocation13 + $0xab0] sm:$0xff]  ;;  %v7897_v18 = vld [vmem:[#allocation13 + $0x8] sm:$0xff] }
 0xe14   : > { %5513 = vmatpush2.msra.mxu0 %v7868_v32  ;;  %5237 = vmatprep.subr.mxu1 %v7869_v0  ;;  %v7898_v32 = vld [vmem:[#allocation13 + $0xa98] sm:$0xff]  ;;  %v7899_v0 = vld [vmem:[#allocation13] sm:$0xff] }
 0xe15   : > { %5514 = vmatprep.subr.mxu0 %v7870_v47  ;;  %5238 = vmatpush1.msra.mxu1 %v7871_v60  ;;  %v7900_v47 = vld [vmem:[#allocation13 + $0xa90] sm:$0xff]  ;;  %v7901_v60 = vld [vmem:[#allocation13 + $0x3e8] sm:$0xff] }
 0xe16   : > { %5515 = vmatpush2.msra.mxu0 %v7872_v28  ;;  %5239 = vmatprep.subr.mxu1 %v7873_v30  ;;  %v7902_v28 = vld [vmem:[#allocation13 + $0xa78] sm:$0xff]  ;;  %v7903_v30 = vld [vmem:[#allocation13 + $0x3e0] sm:$0xff] }
 0xe17   : > { %5516 = vmatprep.subr.mxu0 %v7874_v5  ;;  %5240 = vmatpush1.msra.mxu1 %v7875_v19  ;;  %v5375_v5 = vld [vmem:[#allocation2 + $0x28] sm:$0xc0]  ;;  %v7904_v19 = vld [vmem:[#allocation13 + $0xa70] sm:$0xff] }
 0xe18   : > { %5517 = vmatpush2.msra.mxu0 %v7876_v36  ;;  %5241 = vmatprep.subr.mxu1 %v7877_v55  ;;  %v7905_v36 = vld [vmem:[#allocation13 + $0x3c8] sm:$0xff]  ;;  %v5378_v55 = vld [vmem:[#allocation2 + $0x38] sm:$0x3f] }
 0xe19   : > { %5518 = vmatprep.subr.mxu0 %v7878_v14  ;;  %5242 = vmatpush1.msra.mxu1 %v7879_v3  ;;  %v7906_v14 = vld [vmem:[#allocation13 + $0xa58] sm:$0xff]  ;;  %v7907_v3 = vld [vmem:[#allocation13 + $0x3c0] sm:$0xff] }
 0xe1a   : > { %5519 = vmatpush2.msra.mxu0 %v7880_v46  ;;  %5243 = vmatprep.subr.mxu1 %v7881_v17  ;;  %v7908_v46 = vld [vmem:[#allocation13 + $0xa50] sm:$0xff]  ;;  %v7909_v17 = vld [vmem:[#allocation13 + $0x3a8] sm:$0xff] }
 0xe1b   : > { %5520 = vmatprep.subr.mxu0 %v7882_v52  ;;  %5244 = vmatpush1.msra.mxu1 %v7883_v34  ;;  %v5383_v52 = vrot.slane %v5375_v5, 6  ;;  %v10468_v34 = vld [vmem:[#allocation2 + $0x50] sm:$0xff]  ;;  %v10481_v5 = vld [vmem:[#allocation2 + $0x60] sm:$0xff] }
 0xe1c   : > { %5521 = vmatpush2.msra.mxu0 %v7884_v23  ;;  %5245 = vmatprep.subr.mxu1 %v7885_v25  ;;  %v5384_v23 = vrot.slane %v10468_v34, 6  ;;  %v7911_v25 = vld [vmem:[#allocation13 + $0xa38] sm:$0xff] }
 0xe1d   : > { %5522 = vmatprep.subr.mxu0 %v7886_v51  ;;  %5246 = vmatpush1.msra.mxu1 %v7887_v54  ;;  %v7912_v51 = vld [vmem:[#allocation13 + $0x3a0] sm:$0xff]  ;;  %v5391_v54 = vrot.slane %v5378_v55, 6  ;;  %v7927_v55 = vld [vmem:[#allocation13 + $0x328] sm:$0xff] }
 0xe1e   : > { %5523 = vmatpush2.msra.mxu0 %v7888_v43  ;;  %5247 = vmatprep.subr.mxu1 %v7889_v33  ;;  %v7913_v43 = vld [vmem:[#allocation13 + $0xa30] sm:$0xff]  ;;  %v7914_v33 = vld [vmem:[#allocation13 + $0x388] sm:$0xff] }
 0xe1f   : > { %5524 = vmatprep.subr.mxu0 %v7890_v62  ;;  %5248 = vmatpush1.msra.mxu1 %v7891_v45  ;;  %v5377_v62 = vld [vmem:[#allocation2 + $0x68] sm:$0x3f]  ;;  %v7915_v45 = vld [vmem:[#allocation13 + $0xa18] sm:$0xff] }
 0xe20   : > { %5525 = vmatpush2.msra.mxu0 %v7892_v58  ;;  %5249 = vmatprep.subr.mxu1 %v7893_v49  ;;  %v7916_v58 = vld [vmem:[#allocation13 + $0x380] sm:$0xff]  ;;  %v7917_v49 = vld [vmem:[#allocation13 + $0xa10] sm:$0xff] }
 0xe21   : > { %5526 = vmatprep.subr.mxu0 %v7894_v59  ;;  %5250 = vmatpush1.msra.mxu1 %v7895_v53  ;;  %v7918_v59 = vld [vmem:[#allocation13 + $0x368] sm:$0xff]  ;;  %v10472_v53 = vsel %vm2975_vm7, %v5383_v52, %v5384_v23 }
 0xe22   : > { %5527 = vmatpush2.msra.mxu0 %v7896_v48  ;;  %5251 = vmatprep.subr.mxu1 %v7897_v18  ;;  %v5560_v48 = vld [vmem:[#allocation2 + $0x48] sm:$0x80]  ;;  %v7919_v18 = vld [vmem:[#allocation13 + $0xdf8] sm:$0xff] }
 0xe23   : > { %5528 = vmatprep.subr.mxu0 %v7898_v32  ;;  %5252 = vmatpush1.msra.mxu1 %v7899_v0  ;;  %v10478_v32 = vsel %vm2975_vm7, %v5387_v20, %v5391_v54  ;;  %v5389_v0 = vrot.slane %v5377_v62, 6  ;;  %v7926_v20 = vld [vmem:[#allocation13 + $0xdd0] sm:$0xff]  ;;  %v7937_v62 = vld [vmem:[#allocation13 + $0x2e0] sm:$0xff] }
 0xe24   : > { %5529 = vmatpush2.msra.mxu0 %v7900_v47  ;;  %5253 = vmatprep.subr.mxu1 %v7901_v60  ;;  %v7920_v47 = vld [vmem:[#allocation13 + $0x360] sm:$0xff]  ;;  %v7921_v60 = vld [vmem:[#allocation13 + $0xdf0] sm:$0xff] }
 0xe25   : > { %5530 = vmatprep.subr.mxu0 %v7902_v28  ;;  %5254 = vmatpush2.msra.mxu1 %v7903_v30  ;;  %v7922_v28 = vld [vmem:[#allocation13 + $0x348] sm:$0xff]  ;;  %v5570_v30 = vrot.slane %v5560_v48, 7  ;;  %v7934_v54 = vld [vmem:[#allocation13 + $0xd90] sm:$0xff] }
 0xe26   : > { %5531 = vmatpush2.msra.mxu0 %v7904_v19  ;;  %5255 = vmatprep.subr.mxu1 %v7905_v36  ;;  %v5571_v19 = vrot.slane %v10481_v5, 7  ;;  %v7924_v36 = vld [vmem:[#allocation13 + $0xdd8] sm:$0xff]  ;;  %v7942_v48 = vld [vmem:[#allocation13 + $0xd50] sm:$0xff] }
 0xe27   : > { %5532 = vmatprep.subr.mxu0 %v7906_v14  ;;  %5256 = vmatpush2.msra.mxu1 %v7907_v3  ;;  %v10485_v14 = vsel %vm2975_vm7, %v5384_v23, %v5389_v0  ;;  %v7928_v3 = vld [vmem:[#allocation13 + $0xdb8] sm:$0xff]  ;;  %v7933_v23 = vld [vmem:[#allocation13 + $0x300] sm:$0xff] }
 0xe28   : > { %5533 = vmatpush2.msra.mxu0 %v7908_v46  ;;  %5257 = vmatprep.subr.mxu1 %v7909_v17  ;;  %v7929_v46 = vld [vmem:[#allocation13 + $0x320] sm:$0xff]  ;;  %v7930_v17 = vld [vmem:[#allocation13 + $0xdb0] sm:$0xff]  ;;  %v10491_v52 = vsel %vm3289_vm8, %v5570_v30, %v5571_v19 }
 0xe29   : > { %5534 = vmatprep.subr.mxu0 %v7911_v25  ;;  %5258 = vmatpush2.msra.mxu1 %v7912_v51  ;;  %v7931_v25 = vld [vmem:[#allocation13 + $0x308] sm:$0xff]  ;;  %v7932_v51 = vld [vmem:[#allocation13 + $0xd98] sm:$0xff]  ;;  %v7946_v30 = vld [vmem:[#allocation13 + $0xd30] sm:$0xff] }
 0xe2a   : > { %5535 = vmatpush2.msra.mxu0 %v7913_v43  ;;  %5259 = vmatprep.subr.mxu1 %v7914_v33  ;;  %v7935_v43 = vld [vmem:[#allocation13 + $0x2e8] sm:$0xff]  ;;  %v7936_v33 = vld [vmem:[#allocation13 + $0xd78] sm:$0xff] }
 0xe2b   : > { %5536 = vmatprep.subr.mxu0 %v7915_v45  ;;  %5260 = vmatpush2.msra.mxu1 %v7916_v58  ;;  %v7938_v45 = vld [vmem:[#allocation13 + $0xd70] sm:$0xff]  ;;  %v7939_v58 = vld [vmem:[#allocation13 + $0x2c8] sm:$0xff] }
 0xe2c   : > { %5537 = vmatpush2.msra.mxu0 %v7917_v49  ;;  %5261 = vmatprep.subr.mxu1 %v7918_v59  ;;  %v7940_v49 = vld [vmem:[#allocation13 + $0xd58] sm:$0xff]  ;;  %v7941_v59 = vld [vmem:[#allocation13 + $0x2c0] sm:$0xff] }
 0xe2d   : > { %5539 = vmatmul.mubr.f32.vlgmr.msra.gmra.mxu0 %v10472_v53  ;;  %5658 = vmatprep.subr.mxu0 %v7919_v18  ;;  %v7943_v18 = vld [vmem:[#allocation13 + $0x2a8] sm:$0xff] }
 0xe2e   : > { %5262 = vmatpush2.msra.mxu1 %v7920_v47  ;;  %5544 = vmatprep.mubr.f32.mxu0 %v10478_v32  ;;  %v7944_v47 = vld [vmem:[#allocation13 + $0xd38] sm:$0xff] }
 0xe2f   : > { %5659 = vmatpush1.msra.mxu0 %v7921_v60  ;;  %5263 = vmatprep.subr.mxu1 %v7922_v28  ;;  %v7945_v60 = vld [vmem:[#allocation13 + $0x2a0] sm:$0xff] }
 0xe30   : > { %5660 = vmatprep.subr.mxu0 %v7924_v36  ;;  %5264 = vmatpush2.msra.mxu1 %v7925_v9  ;;  %v7947_v36 = vld [vmem:[#allocation13 + $0x288] sm:$0xff] }
 0xe31   : > { %5661 = vmatpush1.msra.mxu0 %v7926_v20  ;;  %5265 = vmatprep.subr.mxu1 %v7927_v55  ;;  %v7948_v20 = vld [vmem:[#allocation13 + $0xd18] sm:$0xff]  ;;  %v7949_v55 = vld [vmem:[#allocation13 + $0x280] sm:$0xff] }
 0xe32   : > { %5545 = vmatmul.mubr.f32.gmra.mxu0 %v10485_v14  ;;  %5662 = vmatprep.subr.mxu0 %v7928_v3  ;;  %v7950_v3 = vld [vmem:[#allocation13 + $0xd10] sm:$0xff] }
 0xe33   : > { %5266 = vmatpush2.msra.mxu1 %v7929_v46  ;;  %5663 = vmatpush1.msra.mxu0 %v7930_v17  ;;  %v7951_v46 = vld [vmem:[#allocation13 + $0x268] sm:$0xff]  ;;  %v7952_v17 = vld [vmem:[#allocation13 + $0xcf8] sm:$0xff] }
 0xe34   : > { %5722 = vmatprep.mubr.f32.mxu0 %v10491_v52  ;;  %5267 = vmatprep.subr.mxu1 %v7931_v25  ;;  %v7953_v25 = vld [vmem:[#allocation13 + $0x260] sm:$0xff] }
 0xe35   : > { %5664 = vmatprep.subr.mxu0 %v7932_v51  ;;  %5268 = vmatpush2.msra.mxu1 %v7933_v23  ;;  %v7954_v51 = vld [vmem:[#allocation13 + $0xcf0] sm:$0xff]  ;;  %v7955_v23 = vld [vmem:[#allocation13 + $0x248] sm:$0xff] }
 0xe36   : > { %5665 = vmatpush1.msra.mxu0 %v7934_v54  ;;  %5269 = vmatprep.subr.mxu1 %v7935_v43  ;;  %v7956_v43 = vld [vmem:[#allocation13 + $0xcd8] sm:$0xff] }
 0xe37   : > { %5666 = vmatprep.subr.mxu0 %v7936_v33  ;;  %5270 = vmatpush2.msra.mxu1 %v7937_v62  ;;  %v7957_v33 = vld [vmem:[#allocation13 + $0x240] sm:$0xff]  ;;  %v7958_v62 = vld [vmem:[#allocation13 + $0xcd0] sm:$0xff] }
 0xe38   : > { %5667 = vmatpush1.msra.mxu0 %v7938_v45  ;;  %5271 = vmatprep.subr.mxu1 %v7939_v58  ;;  %v7959_v45 = vld [vmem:[#allocation13 + $0x228] sm:$0xff]  ;;  %v7960_v58 = vld [vmem:[#allocation13 + $0xcb8] sm:$0xff] }
 0xe39   : > { %5668 = vmatprep.subr.mxu0 %v7940_v49  ;;  %5272 = vmatpush2.msra.mxu1 %v7941_v59  ;;  %v7961_v49 = vld [vmem:[#allocation13 + $0x220] sm:$0xff]  ;;  %v7962_v59 = vld [vmem:[#allocation13 + $0xcb0] sm:$0xff] }
 0xe3a   : > { %5669 = vmatpush1.msra.mxu0 %v7942_v48  ;;  %5273 = vmatprep.subr.mxu1 %v7943_v18  ;;  %v4609_v0 = vpop.f32.mrf.mxu1  ;;  %v7963_v48 = vld [vmem:[#allocation13 + $0x208] sm:$0xff]  ;;  %v7964_v18 = vld [vmem:[#allocation13 + $0xc98] sm:$0xff] }
 0xe3b   : > { %5670 = vmatprep.subr.mxu0 %v7944_v47  ;;  %5274 = vmatpush2.msra.mxu1 %v7945_v60  ;;  %v10495_v28 = vadd.f32 %v4609_v0, %v10454_v40  ;;  %v7966_v0 = vld [vmem:[#allocation13 + $0xc90] sm:$0xff]  ;;  %v7967_v47 = vld [vmem:[#allocation13 + $0x9e8] sm:$0xff]  ;;  %v7968_v60 = vld [vmem:[#allocation13 + $0xc78] sm:$0xff] }
 0xe3c   : > { %5671 = vmatpush1.msra.mxu0 %v7946_v30  ;;  %5275 = vmatprep.subr.mxu1 %v7947_v36  ;;  %v10497_v9 = vpop.f32.mrf.mxu1  ;;  %v7969_v30 = vld [vmem:[#allocation13 + $0x9e0] sm:$0xff]  ;;  %v7970_v36 = vld [vmem:[#allocation13 + $0xc70] sm:$0xff] }
 0xe3d   : > { %5672 = vmatprep.subr.mxu0 %v7948_v20  ;;  %5276 = vmatpush2.msra.mxu1 %v7949_v55  ;;  %v7971_v20 = vld [vmem:[#allocation13 + $0x9c8] sm:$0xff]  ;;  %v7972_v55 = vld [vmem:[#allocation13 + $0xc58] sm:$0xff] }
 0xe3e   : > { %5673 = vmatpush1.msra.mxu0 %v7950_v3  ;;  %5277 = vmatprep.subr.mxu1 %v7951_v46  ;;  %v7973_v3 = vld [vmem:[#allocation13 + $0x9c0] sm:$0xff]  ;;  %v7974_v46 = vld [vmem:[#allocation13 + $0xc50] sm:$0xff] }
 0xe3f   : > { %5674 = vmatprep.subr.mxu0 %v7952_v17  ;;  %5278 = vmatpush2.msra.mxu1 %v7953_v25  ;;  %v4615_v40 = vpop.f32.mrf.mxu1  ;;  %v7976_v17 = vld [vmem:[#allocation13 + $0xc38] sm:$0xff]  ;;  %v7977_v25 = vld [vmem:[#allocation13 + $0x9a0] sm:$0xff] }
 0xe40   : > { %5675 = vmatpush1.msra.mxu0 %v7954_v51  ;;  %5279 = vmatprep.subr.mxu1 %v7955_v23  ;;  %v10500_v54 = vadd.f32 %v4615_v40, %v10459_v8  ;;  %v7965_v8 = vld [vmem:[#allocation13 + $0x200] sm:$0xff]  ;;  %v7979_v40 = vld [vmem:[#allocation13 + $0x988] sm:$0xff]  ;;  %v7980_v51 = vld [vmem:[#allocation13 + $0xc18] sm:$0xff] }
 0xe41   : > { %5676 = vmatprep.subr.mxu0 %v7956_v43  ;;  %5280 = vmatpush2.msra.mxu1 %v7957_v33  ;;  %v7981_v23 = vld [vmem:[#allocation13 + $0x980] sm:$0xff]  ;;  %v7982_v43 = vld [vmem:[#allocation13 + $0xc10] sm:$0xff]  ;;  %v7983_v33 = vld [vmem:[#allocation13 + $0x968] sm:$0xff] }
 0xe42   : > { %5677 = vmatpush1.msra.mxu0 %v7958_v62  ;;  %5281 = vmatprep.subr.mxu1 %v7959_v45  ;;  %v7985_v62 = vld [vmem:[#allocation13 + $0x960] sm:$0xff]  ;;  %v7986_v45 = vld [vmem:[#allocation13 + $0xff0] sm:$0xff] }
 0xe43   : > { %5678 = vmatprep.subr.mxu0 %v7960_v58  ;;  %5282 = vmatpush2.msra.mxu1 %v7961_v49  ;;  %v7987_v58 = vld [vmem:[#allocation13 + $0x948] sm:$0xff]  ;;  %v7989_v49 = vld [vmem:[#allocation13 + $0x940] sm:$0xff] }
 0xe44   : > { %5679 = vmatpush1.msra.mxu0 %v7962_v59  ;;  %5283 = vmatprep.subr.mxu1 %v7963_v48  ;;  %v7990_v59 = vld [vmem:[#allocation13 + $0xfd0] sm:$0xff]  ;;  %v7991_v48 = vld [vmem:[#allocation13 + $0x928] sm:$0xff] }
 0xe45   : > { %5680 = vmatprep.subr.mxu0 %v7964_v18  ;;  %5284 = vmatpush2.msra.mxu1 %v7965_v8  ;;  %v7992_v18 = vld [vmem:[#allocation13 + $0xfb8] sm:$0xff]  ;;  %v7993_v8 = vld [vmem:[#allocation13 + $0x920] sm:$0xff] }
 0xe46   : > { %5681 = vmatpush1.msra.mxu0 %v7966_v0  ;;  %5286 = vmatmul.mubr.f32.vlgmr.msra.gmra.mxu1 %v10433_v44  ;;  %v7975_v44 = vld [vmem:[#allocation13 + $0x9a8] sm:$0xff]  ;;  %v7994_v0 = vld [vmem:[#allocation13 + $0xfb0] sm:$0xff] }
 0xe47   : > { %5397 = vmatprep.subr.mxu1 %v7967_v47  ;;  %5682 = vmatprep.subr.mxu0 %v7968_v60  ;;  %v7995_v47 = vld [vmem:[#allocation13 + $0x908] sm:$0xff]  ;;  %v7996_v60 = vld [vmem:[#allocation13 + $0xf98] sm:$0xff] }
 0xe48   : > { %5291 = vmatprep.mubr.f32.mxu1 %v10439_v61  ;;  %5398 = vmatpush1.msra.mxu1 %v7969_v30  ;;  %v7978_v61 = vld [vmem:[#allocation13 + $0xc30] sm:$0xff]  ;;  %v7997_v30 = vld [vmem:[#allocation13 + $0x900] sm:$0xff] }
 0xe49   : > { %5683 = vmatpush1.msra.mxu0 %v7970_v36  ;;  %5399 = vmatprep.subr.mxu1 %v7971_v20  ;;  %v7998_v36 = vld [vmem:[#allocation13 + $0xf90] sm:$0xff]  ;;  %v7999_v20 = vld [vmem:[#allocation13 + $0x8e8] sm:$0xff] }
 0xe4a   : > { %5684 = vmatprep.subr.mxu0 %v7972_v55  ;;  %5400 = vmatpush1.msra.mxu1 %v7973_v3  ;;  %v8000_v55 = vld [vmem:[#allocation13 + $0xf78] sm:$0xff]  ;;  %v8001_v3 = vld [vmem:[#allocation13 + $0x8e0] sm:$0xff] }
 0xe4b   : > { %5685 = vmatpush1.msra.mxu0 %v7974_v46  ;;  %5292 = vmatmul.mubr.f32.gmra.mxu1 %v10444_v38  ;;  %v7984_v38 = vld [vmem:[#allocation13 + $0xff8] sm:$0xff]  ;;  %v8002_v46 = vld [vmem:[#allocation13 + $0xf70] sm:$0xff] }
 0xe4c   : > { %5401 = vmatprep.subr.mxu1 %v7975_v44  ;;  %5686 = vmatprep.subr.mxu0 %v7976_v17  ;;  %v8003_v44 = vld [vmem:[#allocation13 + $0x8c8] sm:$0xff]  ;;  %v8004_v17 = vld [vmem:[#allocation13 + $0xf58] sm:$0xff] }
 0xe4d   : > { %5402 = vmatpush1.msra.mxu1 %v7977_v25  ;;  %5461 = vmatprep.mubr.f32.mxu1 %v10450_v50  ;;  %v7988_v50 = vld [vmem:[#allocation13 + $0xfd8] sm:$0xff]  ;;  %v8005_v25 = vld [vmem:[#allocation13 + $0x8c0] sm:$0xff] }
 0xe4e   : > { %5687 = vmatpush1.msra.mxu0 %v7978_v61  ;;  %5403 = vmatprep.subr.mxu1 %v7979_v40  ;;  %v8006_v61 = vld [vmem:[#allocation13 + $0xf50] sm:$0xff]  ;;  %v8007_v40 = vld [vmem:[#allocation13 + $0x8a8] sm:$0xff] }
 0xe4f   : > { %5688 = vmatprep.subr.mxu0 %v7980_v51  ;;  %5404 = vmatpush1.msra.mxu1 %v7981_v23  ;;  %v8008_v51 = vld [vmem:[#allocation13 + $0xf38] sm:$0xff]  ;;  %v8009_v23 = vld [vmem:[#allocation13 + $0x8a0] sm:$0xff] }
 0xe50   : > { %5689 = vmatpush1.msra.mxu0 %v7982_v43  ;;  %5405 = vmatprep.subr.mxu1 %v7983_v33  ;;  %v8010_v43 = vld [vmem:[#allocation13 + $0xf30] sm:$0xff]  ;;  %v8011_v33 = vld [vmem:[#allocation13 + $0x888] sm:$0xff] }
 0xe51   : > { %5690 = vmatprep.subr.mxu0 %v7984_v38  ;;  %5406 = vmatpush1.msra.mxu1 %v7985_v62  ;;  %v8012_v38 = vld [vmem:[#allocation13 + $0xf18] sm:$0xff]  ;;  %v8013_v62 = vld [vmem:[#allocation13 + $0x880] sm:$0xff] }
 0xe52   : > { %5691 = vmatpush2.msra.mxu0 %v7986_v45  ;;  %5407 = vmatprep.subr.mxu1 %v7987_v58  ;;  %v8014_v45 = vld [vmem:[#allocation13 + $0xf10] sm:$0xff]  ;;  %v8015_v58 = vld [vmem:[#allocation13 + $0x868] sm:$0xff] }
 0xe53   : > { %5692 = vmatprep.subr.mxu0 %v7988_v50  ;;  %5408 = vmatpush1.msra.mxu1 %v7989_v49  ;;  %v8016_v50 = vld [vmem:[#allocation13 + $0xef8] sm:$0xff]  ;;  %v8017_v49 = vld [vmem:[#allocation13 + $0x860] sm:$0xff] }
 0xe54   : > { %5693 = vmatpush2.msra.mxu0 %v7990_v59  ;;  %5409 = vmatprep.subr.mxu1 %v7991_v48  ;;  %v8018_v59 = vld [vmem:[#allocation13 + $0xef0] sm:$0xff]  ;;  %v8019_v48 = vld [vmem:[#allocation13 + $0x848] sm:$0xff] }
 0xe55   : > { %5694 = vmatprep.subr.mxu0 %v7992_v18  ;;  %5410 = vmatpush1.msra.mxu1 %v7993_v8  ;;  %v8020_v18 = vld [vmem:[#allocation13 + $0xed8] sm:$0xff]  ;;  %v8021_v8 = vld [vmem:[#allocation13 + $0x840] sm:$0xff] }
 0xe56   : > { %5695 = vmatpush2.msra.mxu0 %v7994_v0  ;;  %5411 = vmatprep.subr.mxu1 %v7995_v47  ;;  %v8022_v0 = vld [vmem:[#allocation13 + $0xed0] sm:$0xff]  ;;  %v8023_v47 = vld [vmem:[#allocation13 + $0x828] sm:$0xff] }
 0xe57   : > { %5696 = vmatprep.subr.mxu0 %v7996_v60  ;;  %5412 = vmatpush1.msra.mxu1 %v7997_v30  ;;  %v8024_v60 = vld [vmem:[#allocation13 + $0xeb8] sm:$0xff]  ;;  %v8025_v30 = vld [vmem:[#allocation13 + $0x820] sm:$0xff] }
 0xe58   : > { %5697 = vmatpush2.msra.mxu0 %v7998_v36  ;;  %5413 = vmatprep.subr.mxu1 %v7999_v20  ;;  %v8026_v36 = vld [vmem:[#allocation13 + $0xeb0] sm:$0xff]  ;;  %v8027_v20 = vld [vmem:[#allocation13 + $0x808] sm:$0xff] }
 0xe59   : > { %5698 = vmatprep.subr.mxu0 %v8000_v55  ;;  %5414 = vmatpush1.msra.mxu1 %v8001_v3  ;;  %v8028_v55 = vld [vmem:[#allocation13 + $0xe98] sm:$0xff]  ;;  %v8029_v3 = vld [vmem:[#allocation13 + $0x800] sm:$0xff] }
 0xe5a   : > { %5699 = vmatpush2.msra.mxu0 %v8002_v46  ;;  %5415 = vmatprep.subr.mxu1 %v8003_v44  ;;  %v8030_v46 = vld [vmem:[#allocation13 + $0xe90] sm:$0xff]  ;;  %v8031_v44 = vld [vmem:[#allocation13 + $0xbe8] sm:$0xff] }
 0xe5b   : > { %5700 = vmatprep.subr.mxu0 %v8004_v17  ;;  %5416 = vmatpush1.msra.mxu1 %v8005_v25  ;;  %v8032_v17 = vld [vmem:[#allocation13 + $0xe78] sm:$0xff]  ;;  %v8033_v25 = vld [vmem:[#allocation13 + $0xbe0] sm:$0xff] }
 0xe5c   : > { %5701 = vmatpush2.msra.mxu0 %v8006_v61  ;;  %5417 = vmatprep.subr.mxu1 %v8007_v40  ;;  %v5559_v61 = vld [vmem:[#allocation2 + $0x28] sm:$0x80]  ;;  %v8034_v40 = vld [vmem:[#allocation13 + $0xe70] sm:$0xff] }
 0xe5d   : > { %5702 = vmatprep.subr.mxu0 %v8008_v51  ;;  %5418 = vmatpush1.msra.mxu1 %v8009_v23  ;;  %v8035_v51 = vld [vmem:[#allocation13 + $0xbc8] sm:$0xff]  ;;  %v5562_v23 = vld [vmem:[#allocation2 + $0x38] sm:$0x7f] }
 0xe5e   : > { %5703 = vmatpush2.msra.mxu0 %v8010_v43  ;;  %5419 = vmatprep.subr.mxu1 %v8011_v33  ;;  %v8036_v43 = vld [vmem:[#allocation13 + $0xe58] sm:$0xff]  ;;  %v8037_v33 = vld [vmem:[#allocation13 + $0xbc0] sm:$0xff] }
 0xe5f   : > { %5704 = vmatprep.subr.mxu0 %v8012_v38  ;;  %5420 = vmatpush1.msra.mxu1 %v8013_v62  ;;  %v8038_v38 = vld [vmem:[#allocation13 + $0xe50] sm:$0xff]  ;;  %v8039_v62 = vld [vmem:[#allocation13 + $0xba8] sm:$0xff] }
 0xe60   : > { %5705 = vmatpush2.msra.mxu0 %v8014_v45  ;;  %5421 = vmatprep.subr.mxu1 %v8015_v58  ;;  %v5567_v45 = vrot.slane %v5559_v61, 7  ;;  %v5568_v58 = vrot.slane %v10468_v34, 7  ;;  %v8053_v61 = vld [vmem:[#allocation13 + $0xb40] sm:$0xff] }
 0xe61   : > { %5706 = vmatprep.subr.mxu0 %v8016_v50  ;;  %5422 = vmatpush1.msra.mxu1 %v8017_v49  ;;  %v8040_v50 = vld [vmem:[#allocation13 + $0xe38] sm:$0xff]  ;;  %v8041_v49 = vld [vmem:[#allocation13 + $0xba0] sm:$0xff] }
 0xe62   : > { %5707 = vmatpush2.msra.mxu0 %v8018_v59  ;;  %5423 = vmatprep.subr.mxu1 %v8019_v48  ;;  %v5575_v59 = vrot.slane %v5562_v23, 7  ;;  %v8042_v48 = vld [vmem:[#allocation13 + $0xe30] sm:$0xff]  ;;  %v8056_v23 = vld [vmem:[#allocation13 + $0x11b8] sm:$0xff] }
 0xe63   : > { %5708 = vmatprep.subr.mxu0 %v8020_v18  ;;  %5424 = vmatpush1.msra.mxu1 %v8021_v8  ;;  %v8043_v18 = vld [vmem:[#allocation13 + $0xb88] sm:$0xff] }
 0xe64   : > { %5709 = vmatpush2.msra.mxu0 %v8022_v0  ;;  %5425 = vmatprep.subr.mxu1 %v8023_v47  ;;  %v5561_v8 = vld [vmem:[#allocation2 + $0x68] sm:$0x7f]  ;;  %v8044_v0 = vld [vmem:[#allocation13 + $0xe18] sm:$0xff] }
 0xe65   : > { %5710 = vmatprep.subr.mxu0 %v8024_v60  ;;  %5426 = vmatpush1.msra.mxu1 %v8025_v30  ;;  %v8045_v47 = vld [vmem:[#allocation13 + $0xb80] sm:$0xff]  ;;  %v8046_v60 = vld [vmem:[#allocation13 + $0xe10] sm:$0xff]  ;;  %v8047_v30 = vld [vmem:[#allocation13 + $0xb68] sm:$0xff] }
 0xe66   : > { %5711 = vmatpush2.msra.mxu0 %v8026_v36  ;;  %5427 = vmatprep.subr.mxu1 %v8027_v20  ;;  %v10508_v36 = vsel %vm3289_vm8, %v5567_v45, %v5568_v58  ;;  %v8048_v20 = vld [vmem:[#allocation13 + $0x11f8] sm:$0xff]  ;;  %v8061_v45 = vld [vmem:[#allocation13 + $0xb00] sm:$0xff] }
 0xe67   : > { %5712 = vmatprep.subr.mxu0 %v8028_v55  ;;  %5428 = vmatpush1.msra.mxu1 %v8029_v3  ;;  %v10514_v55 = vsel %vm3289_vm8, %v5571_v19, %v5575_v59  ;;  %v5573_v3 = vrot.slane %v5561_v8, 7  ;;  %v8065_v59 = vld [vmem:[#allocation13 + $0xae0] sm:$0xff]  ;;  %v8068_v8 = vld [vmem:[#allocation13 + $0x1158] sm:$0xff] }
 0xe68   : > { %5713 = vmatpush2.msra.mxu0 %v8030_v46  ;;  %5429 = vmatprep.subr.mxu1 %v8031_v44  ;;  %v8049_v46 = vld [vmem:[#allocation13 + $0xb60] sm:$0xff]  ;;  %v8050_v44 = vld [vmem:[#allocation13 + $0x11f0] sm:$0xff] }
 0xe69   : > { %5714 = vmatprep.subr.mxu0 %v8032_v17  ;;  %5430 = vmatpush2.msra.mxu1 %v8033_v25  ;;  %v8051_v17 = vld [vmem:[#allocation13 + $0xb48] sm:$0xff]  ;;  %v8052_v25 = vld [vmem:[#allocation13 + $0x11d8] sm:$0xff]  ;;  %v10518_v19 = vsel %vm3289_vm8, %v5568_v58, %v5573_v3  ;;  %v8074_v3 = vld [vmem:[#allocation13 + $0x1130] sm:$0xff] }
 0xe6a   : > { %5715 = vmatpush2.msra.mxu0 %v8034_v40  ;;  %5431 = vmatprep.subr.mxu1 %v8035_v51  ;;  %v8054_v40 = vld [vmem:[#allocation13 + $0x11d0] sm:$0xff]  ;;  %v8055_v51 = vld [vmem:[#allocation13 + $0xb28] sm:$0xff] }
 0xe6b   : > { %5716 = vmatprep.subr.mxu0 %v8036_v43  ;;  %5432 = vmatpush2.msra.mxu1 %v8037_v33  ;;  %v8057_v43 = vld [vmem:[#allocation13 + $0xb20] sm:$0xff]  ;;  %v8058_v33 = vld [vmem:[#allocation13 + $0x11b0] sm:$0xff]  ;;  %v8063_v58 = vld [vmem:[#allocation13 + $0xae8] sm:$0xff] }
 0xe6c   : > { %5717 = vmatpush2.msra.mxu0 %v8038_v38  ;;  %5433 = vmatprep.subr.mxu1 %v8039_v62  ;;  %v8059_v38 = vld [vmem:[#allocation13 + $0xb08] sm:$0xff]  ;;  %v8060_v62 = vld [vmem:[#allocation13 + $0x1198] sm:$0xff] }
 0xe6d   : > { %5718 = vmatprep.subr.mxu0 %v8040_v50  ;;  %5434 = vmatpush2.msra.mxu1 %v8041_v49  ;;  %v8062_v50 = vld [vmem:[#allocation13 + $0x1190] sm:$0xff]  ;;  %v8064_v49 = vld [vmem:[#allocation13 + $0x1178] sm:$0xff] }
 0xe6e   : > { %5719 = vmatpush2.msra.mxu0 %v8042_v48  ;;  %5435 = vmatprep.subr.mxu1 %v8043_v18  ;;  %v8066_v48 = vld [vmem:[#allocation13 + $0x1170] sm:$0xff]  ;;  %v8067_v18 = vld [vmem:[#allocation13 + $0xac8] sm:$0xff] }
 0xe6f   : > { %5720 = vmatprep.subr.mxu0 %v8044_v0  ;;  %5436 = vmatpush2.msra.mxu1 %v8045_v47  ;;  %v8069_v0 = vld [vmem:[#allocation13 + $0xac0] sm:$0xff]  ;;  %v8070_v47 = vld [vmem:[#allocation13 + $0x1150] sm:$0xff] }
 0xe70   : > { %5721 = vmatpush2.msra.mxu0 %v8046_v60  ;;  %5437 = vmatprep.subr.mxu1 %v8047_v30  ;;  %v8071_v60 = vld [vmem:[#allocation13 + $0xaa8] sm:$0xff]  ;;  %v8072_v30 = vld [vmem:[#allocation13 + $0x1138] sm:$0xff] }
 0xe71   : > { %5723 = vmatmul.mubr.f32.vlgmr.msra.gmra.mxu0 %v10508_v36  ;;  %5822 = vmatprep.subr.mxu0 %v8048_v20  ;;  %v8073_v20 = vld [vmem:[#allocation13 + $0xaa0] sm:$0xff] }
 0xe72   : > { %5438 = vmatpush2.msra.mxu1 %v8049_v46  ;;  %5728 = vmatprep.mubr.f32.mxu0 %v10514_v55  ;;  %v8075_v46 = vld [vmem:[#allocation13 + $0xa88] sm:$0xff] }
 0xe73   : > { %5823 = vmatpush1.msra.mxu0 %v8050_v44  ;;  %5439 = vmatprep.subr.mxu1 %v8051_v17  ;;  %v8076_v44 = vld [vmem:[#allocation13 + $0x1118] sm:$0xff]  ;;  %v8077_v17 = vld [vmem:[#allocation13 + $0xa80] sm:$0xff] }
 0xe74   : > { %5824 = vmatprep.subr.mxu0 %v8052_v25  ;;  %5440 = vmatpush2.msra.mxu1 %v8053_v61  ;;  %v8078_v25 = vld [vmem:[#allocation13 + $0x1110] sm:$0xff]  ;;  %v8079_v61 = vld [vmem:[#allocation13 + $0xa68] sm:$0xff] }
 0xe75   : > { %5825 = vmatpush1.msra.mxu0 %v8054_v40  ;;  %5441 = vmatprep.subr.mxu1 %v8055_v51  ;;  %v8080_v40 = vld [vmem:[#allocation13 + $0x10f8] sm:$0xff]  ;;  %v8081_v51 = vld [vmem:[#allocation13 + $0xa60] sm:$0xff] }
 0xe76   : > { %5729 = vmatmul.mubr.f32.gmra.mxu0 %v10518_v19  ;;  %5826 = vmatprep.subr.mxu0 %v8056_v23  ;;  %v8082_v23 = vld [vmem:[#allocation13 + $0x10f0] sm:$0xff] }
 0xe77   : > { %5442 = vmatpush2.msra.mxu1 %v8057_v43  ;;  %5827 = vmatpush1.msra.mxu0 %v8058_v33  ;;  %v8083_v43 = vld [vmem:[#allocation13 + $0xa48] sm:$0xff]  ;;  %v8084_v33 = vld [vmem:[#allocation13 + $0x10d8] sm:$0xff] }
 0xe78   : > { %5886 = vmatprep.mubr.f32.mxu0 %v10481_v5  ;;  %5443 = vmatprep.subr.mxu1 %v8059_v38  ;;  %v8085_v38 = vld [vmem:[#allocation13 + $0xa40] sm:$0xff] }
 0xe79   : > { %5828 = vmatprep.subr.mxu0 %v8060_v62  ;;  %5444 = vmatpush2.msra.mxu1 %v8061_v45  ;;  %v8086_v62 = vld [vmem:[#allocation13 + $0x10d0] sm:$0xff]  ;;  %v8087_v45 = vld [vmem:[#allocation13 + $0xa28] sm:$0xff] }
 0xe7a   : > { %5829 = vmatpush1.msra.mxu0 %v8062_v50  ;;  %5445 = vmatprep.subr.mxu1 %v8063_v58  ;;  %v8088_v50 = vld [vmem:[#allocation13 + $0x10b8] sm:$0xff]  ;;  %v8089_v58 = vld [vmem:[#allocation13 + $0xa20] sm:$0xff] }
 0xe7b   : > { %5830 = vmatprep.subr.mxu0 %v8064_v49  ;;  %5446 = vmatpush2.msra.mxu1 %v8065_v59  ;;  %v8090_v49 = vld [vmem:[#allocation13 + $0x10b0] sm:$0xff]  ;;  %v8091_v59 = vld [vmem:[#allocation13 + $0xa08] sm:$0xff] }
 0xe7c   : > { %5831 = vmatpush1.msra.mxu0 %v8066_v48  ;;  %5447 = vmatprep.subr.mxu1 %v8067_v18  ;;  %v8092_v48 = vld [vmem:[#allocation13 + $0x1098] sm:$0xff]  ;;  %v8093_v18 = vld [vmem:[#allocation13 + $0xa00] sm:$0xff] }
 0xe7d   : > { %5832 = vmatprep.subr.mxu0 %v8068_v8  ;;  %5448 = vmatpush2.msra.mxu1 %v8069_v0  ;;  %v8094_v8 = vld [vmem:[#allocation13 + $0x1090] sm:$0xff]  ;;  %v8095_v0 = vld [vmem:[#allocation13 + $0xde8] sm:$0xff] }
 0xe7e   : > { %5833 = vmatpush1.msra.mxu0 %v8070_v47  ;;  %5449 = vmatprep.subr.mxu1 %v8071_v60  ;;  %v8096_v47 = vld [vmem:[#allocation13 + $0x1078] sm:$0xff]  ;;  %v8097_v60 = vld [vmem:[#allocation13 + $0xde0] sm:$0xff] }
 0xe7f   : > { %5834 = vmatprep.subr.mxu0 %v8072_v30  ;;  %5450 = vmatpush2.msra.mxu1 %v8073_v20  ;;  %v8098_v30 = vld [vmem:[#allocation13 + $0x1070] sm:$0xff]  ;;  %v8099_v20 = vld [vmem:[#allocation13 + $0xdc8] sm:$0xff] }
 0xe80   : > { %5835 = vmatpush1.msra.mxu0 %v8074_v3  ;;  %5451 = vmatprep.subr.mxu1 %v8075_v46  ;;  %v8100_v3 = vld [vmem:[#allocation13 + $0x1058] sm:$0xff]  ;;  %v8101_v46 = vld [vmem:[#allocation13 + $0xdc0] sm:$0xff] }
 0xe81   : > { %5836 = vmatprep.subr.mxu0 %v8076_v44  ;;  %5452 = vmatpush2.msra.mxu1 %v8077_v17  ;;  %v8102_v44 = vld [vmem:[#allocation13 + $0x1050] sm:$0xff]  ;;  %v8104_v17 = vld [vmem:[#allocation13 + $0x1038] sm:$0xff] }
 0xe82   : > { %5837 = vmatpush1.msra.mxu0 %v8078_v25  ;;  %5453 = vmatprep.subr.mxu1 %v8079_v61  ;;  %v8105_v25 = vld [vmem:[#allocation13 + $0xda0] sm:$0xff]  ;;  %v8107_v61 = vld [vmem:[#allocation13 + $0xd88] sm:$0xff] }
 0xe83   : > { %5838 = vmatprep.subr.mxu0 %v8080_v40  ;;  %5454 = vmatpush2.msra.mxu1 %v8081_v51  ;;  %v8108_v40 = vld [vmem:[#allocation13 + $0x1018] sm:$0xff]  ;;  %v8109_v51 = vld [vmem:[#allocation13 + $0xd80] sm:$0xff] }
 0xe84   : > { %5839 = vmatpush1.msra.mxu0 %v8082_v23  ;;  %5455 = vmatprep.subr.mxu1 %v8083_v43  ;;  %v8110_v23 = vld [vmem:[#allocation13 + $0x1010] sm:$0xff]  ;;  %v8111_v43 = vld [vmem:[#allocation13 + $0xd68] sm:$0xff] }
 0xe85   : > { %5840 = vmatprep.subr.mxu0 %v8084_v33  ;;  %5456 = vmatpush2.msra.mxu1 %v8085_v38  ;;  %v8113_v33 = vld [vmem:[#allocation13 + $0xd60] sm:$0xff]  ;;  %v8114_v38 = vld [vmem:[#allocation13 + $0x13f0] sm:$0xff] }
 0xe86   : > { %5841 = vmatpush1.msra.mxu0 %v8086_v62  ;;  %5457 = vmatprep.subr.mxu1 %v8087_v45  ;;  %v8115_v62 = vld [vmem:[#allocation13 + $0xd48] sm:$0xff]  ;;  %v8117_v45 = vld [vmem:[#allocation13 + $0xd40] sm:$0xff] }
 0xe87   : > { %5842 = vmatprep.subr.mxu0 %v8088_v50  ;;  %5458 = vmatpush2.msra.mxu1 %v8089_v58  ;;  %v8118_v50 = vld [vmem:[#allocation13 + $0x13d0] sm:$0xff]  ;;  %v8119_v58 = vld [vmem:[#allocation13 + $0xd28] sm:$0xff] }
 0xe88   : > { %5843 = vmatpush1.msra.mxu0 %v8090_v49  ;;  %5459 = vmatprep.subr.mxu1 %v8091_v59  ;;  %v8120_v49 = vld [vmem:[#allocation13 + $0x13b8] sm:$0xff]  ;;  %v8121_v59 = vld [vmem:[#allocation13 + $0xd20] sm:$0xff] }
 0xe89   : > { %5844 = vmatprep.subr.mxu0 %v8092_v48  ;;  %5460 = vmatpush2.msra.mxu1 %v8093_v18  ;;  %v8122_v48 = vld [vmem:[#allocation13 + $0x13b0] sm:$0xff]  ;;  %v8123_v18 = vld [vmem:[#allocation13 + $0xd08] sm:$0xff] }
 0xe8a   : > { %5845 = vmatpush1.msra.mxu0 %v8094_v8  ;;  %5462 = vmatmul.mubr.f32.vlgmr.msra.gmra.mxu1 %v10472_v53  ;;  %v8103_v53 = vld [vmem:[#allocation13 + $0xda8] sm:$0xff]  ;;  %v8124_v8 = vld [vmem:[#allocation13 + $0x1398] sm:$0xff] }
 0xe8b   : > { %5581 = vmatprep.subr.mxu1 %v8095_v0  ;;  %5846 = vmatprep.subr.mxu0 %v8096_v47  ;;  %v8125_v0 = vld [vmem:[#allocation13 + $0xd00] sm:$0xff]  ;;  %v8126_v47 = vld [vmem:[#allocation13 + $0x1390] sm:$0xff] }
 0xe8c   : > { %5467 = vmatprep.mubr.f32.mxu1 %v10478_v32  ;;  %5582 = vmatpush1.msra.mxu1 %v8097_v60  ;;  %v8106_v32 = vld [vmem:[#allocation13 + $0x1030] sm:$0xff]  ;;  %v8127_v60 = vld [vmem:[#allocation13 + $0xce8] sm:$0xff] }
 0xe8d   : > { %5847 = vmatpush1.msra.mxu0 %v8098_v30  ;;  %5583 = vmatprep.subr.mxu1 %v8099_v20  ;;  %v8128_v30 = vld [vmem:[#allocation13 + $0x1378] sm:$0xff]  ;;  %v8129_v20 = vld [vmem:[#allocation13 + $0xce0] sm:$0xff] }
 0xe8e   : > { %5848 = vmatprep.subr.mxu0 %v8100_v3  ;;  %5584 = vmatpush1.msra.mxu1 %v8101_v46  ;;  %v8130_v3 = vld [vmem:[#allocation13 + $0x1370] sm:$0xff]  ;;  %v8131_v46 = vld [vmem:[#allocation13 + $0xcc8] sm:$0xff] }
 0xe8f   : > { %5849 = vmatpush1.msra.mxu0 %v8102_v44  ;;  %5468 = vmatmul.mubr.f32.gmra.mxu1 %v10485_v14  ;;  %v8112_v14 = vld [vmem:[#allocation13 + $0x13f8] sm:$0xff] }
 0xe90   : > { %5585 = vmatprep.subr.mxu1 %v8103_v53  ;;  %5850 = vmatprep.subr.mxu0 %v8104_v17  ;;  %v8132_v44 = vld [vmem:[#allocation13 + $0x1358] sm:$0xff]  ;;  %v8133_v53 = vld [vmem:[#allocation13 + $0xcc0] sm:$0xff]  ;;  %v8134_v17 = vld [vmem:[#allocation13 + $0x1350] sm:$0xff] }
 0xe91   : > { %5586 = vmatpush1.msra.mxu1 %v8105_v25  ;;  %5645 = vmatprep.mubr.f32.mxu1 %v10491_v52  ;;  %v8116_v52 = vld [vmem:[#allocation13 + $0x13d8] sm:$0xff]  ;;  %v8135_v25 = vld [vmem:[#allocation13 + $0xca8] sm:$0xff] }
 0xe92   : > { %5851 = vmatpush1.msra.mxu0 %v8106_v32  ;;  %5587 = vmatprep.subr.mxu1 %v8107_v61  ;;  %v8136_v32 = vld [vmem:[#allocation13 + $0x1338] sm:$0xff]  ;;  %v8137_v61 = vld [vmem:[#allocation13 + $0xca0] sm:$0xff] }
 0xe93   : > { %5852 = vmatprep.subr.mxu0 %v8108_v40  ;;  %5588 = vmatpush1.msra.mxu1 %v8109_v51  ;;  %v8138_v40 = vld [vmem:[#allocation13 + $0x1330] sm:$0xff]  ;;  %v8139_v51 = vld [vmem:[#allocation13 + $0xc88] sm:$0xff] }
 0xe94   : > { %5853 = vmatpush1.msra.mxu0 %v8110_v23  ;;  %5589 = vmatprep.subr.mxu1 %v8111_v43  ;;  %v8140_v23 = vld [vmem:[#allocation13 + $0x1318] sm:$0xff]  ;;  %v8141_v43 = vld [vmem:[#allocation13 + $0xc80] sm:$0xff] }
 0xe95   : > { %5854 = vmatprep.subr.mxu0 %v8112_v14  ;;  %5590 = vmatpush1.msra.mxu1 %v8113_v33  ;;  %v8142_v14 = vld [vmem:[#allocation13 + $0x1310] sm:$0xff]  ;;  %v8143_v33 = vld [vmem:[#allocation13 + $0xc68] sm:$0xff] }
 0xe96   : > { %5855 = vmatpush2.msra.mxu0 %v8114_v38  ;;  %5591 = vmatprep.subr.mxu1 %v8115_v62  ;;  %v8144_v38 = vld [vmem:[#allocation13 + $0x12f8] sm:$0xff]  ;;  %v8145_v62 = vld [vmem:[#allocation13 + $0xc60] sm:$0xff] }
 0xe97   : > { %5856 = vmatprep.subr.mxu0 %v8116_v52  ;;  %5592 = vmatpush1.msra.mxu1 %v8117_v45  ;;  %v8146_v52 = vld [vmem:[#allocation13 + $0x12f0] sm:$0xff]  ;;  %v8147_v45 = vld [vmem:[#allocation13 + $0xc48] sm:$0xff] }
 0xe98   : > { %5857 = vmatpush2.msra.mxu0 %v8118_v50  ;;  %5593 = vmatprep.subr.mxu1 %v8119_v58  ;;  %v8148_v50 = vld [vmem:[#allocation13 + $0x12d8] sm:$0xff]  ;;  %v8149_v58 = vld [vmem:[#allocation13 + $0xc40] sm:$0xff] }
 0xe99   : > { %5858 = vmatprep.subr.mxu0 %v8120_v49  ;;  %5594 = vmatpush1.msra.mxu1 %v8121_v59  ;;  %v8150_v49 = vld [vmem:[#allocation13 + $0x12d0] sm:$0xff]  ;;  %v8151_v59 = vld [vmem:[#allocation13 + $0xc28] sm:$0xff] }
 0xe9a   : > { %5859 = vmatpush2.msra.mxu0 %v8122_v48  ;;  %5595 = vmatprep.subr.mxu1 %v8123_v18  ;;  %v8152_v48 = vld [vmem:[#allocation13 + $0x12b8] sm:$0xff]  ;;  %v8153_v18 = vld [vmem:[#allocation13 + $0xc20] sm:$0xff] }
 0xe9b   : > { %5860 = vmatprep.subr.mxu0 %v8124_v8  ;;  %5596 = vmatpush1.msra.mxu1 %v8125_v0  ;;  %v8154_v8 = vld [vmem:[#allocation13 + $0x12b0] sm:$0xff]  ;;  %v8155_v0 = vld [vmem:[#allocation13 + $0xc08] sm:$0xff] }
 0xe9c   : > { %5861 = vmatpush2.msra.mxu0 %v8126_v47  ;;  %5597 = vmatprep.subr.mxu1 %v8127_v60  ;;  %v8156_v47 = vld [vmem:[#allocation13 + $0x1298] sm:$0xff]  ;;  %v8157_v60 = vld [vmem:[#allocation13 + $0xc00] sm:$0xff] }
 0xe9d   : > { %5862 = vmatprep.subr.mxu0 %v8128_v30  ;;  %5598 = vmatpush1.msra.mxu1 %v8129_v20  ;;  %v8158_v30 = vld [vmem:[#allocation13 + $0x1290] sm:$0xff]  ;;  %v8159_v20 = vld [vmem:[#allocation13 + $0xfe8] sm:$0xff] }
 0xe9e   : > { %5863 = vmatpush2.msra.mxu0 %v8130_v3  ;;  %5599 = vmatprep.subr.mxu1 %v8131_v46  ;;  %v8160_v3 = vld [vmem:[#allocation13 + $0x1278] sm:$0xff]  ;;  %v8161_v46 = vld [vmem:[#allocation13 + $0xfe0] sm:$0xff] }
 0xe9f   : > { %5864 = vmatprep.subr.mxu0 %v8132_v44  ;;  %5600 = vmatpush1.msra.mxu1 %v8133_v53  ;;  %v8162_v44 = vld [vmem:[#allocation13 + $0x1270] sm:$0xff]  ;;  %v8163_v53 = vld [vmem:[#allocation13 + $0xfc8] sm:$0xff] }
 0xea0   : > { %5865 = vmatpush2.msra.mxu0 %v8134_v17  ;;  %5601 = vmatprep.subr.mxu1 %v8135_v25  ;;  %v8164_v17 = vld [vmem:[#allocation13 + $0x1258] sm:$0xff]  ;;  %v8165_v25 = vld [vmem:[#allocation13 + $0xfc0] sm:$0xff] }
 0xea1   : > { %5866 = vmatprep.subr.mxu0 %v8136_v32  ;;  %5602 = vmatpush1.msra.mxu1 %v8137_v61  ;;  %v8166_v32 = vld [vmem:[#allocation13 + $0x1250] sm:$0xff]  ;;  %v8167_v61 = vld [vmem:[#allocation13 + $0xfa8] sm:$0xff] }
 0xea2   : > { %5867 = vmatpush2.msra.mxu0 %v8138_v40  ;;  %5603 = vmatprep.subr.mxu1 %v8139_v51  ;;  %v8168_v40 = vld [vmem:[#allocation13 + $0x1238] sm:$0xff]  ;;  %v8169_v51 = vld [vmem:[#allocation13 + $0xfa0] sm:$0xff] }
 0xea3   : > { %5868 = vmatprep.subr.mxu0 %v8140_v23  ;;  %5604 = vmatpush1.msra.mxu1 %v8141_v43  ;;  %v8170_v23 = vld [vmem:[#allocation13 + $0x1230] sm:$0xff]  ;;  %v8171_v43 = vld [vmem:[#allocation13 + $0xf88] sm:$0xff] }
 0xea4   : > { %5869 = vmatpush2.msra.mxu0 %v8142_v14  ;;  %5605 = vmatprep.subr.mxu1 %v8143_v33  ;;  %v8172_v14 = vld [vmem:[#allocation13 + $0x1218] sm:$0xff]  ;;  %v8173_v33 = vld [vmem:[#allocation13 + $0xf80] sm:$0xff] }
 0xea5   : > { %5870 = vmatprep.subr.mxu0 %v8144_v38  ;;  %5606 = vmatpush1.msra.mxu1 %v8145_v62  ;;  %v8174_v38 = vld [vmem:[#allocation13 + $0x1210] sm:$0xff]  ;;  %v8175_v62 = vld [vmem:[#allocation13 + $0xf68] sm:$0xff] }
 0xea6   : > { %5871 = vmatpush2.msra.mxu0 %v8146_v52  ;;  %5607 = vmatprep.subr.mxu1 %v8147_v45  ;;  %v10526_v52 = vld [vmem:[#allocation2 + $0x38] sm:$0xff] }
 0xea7   : > { %5872 = vmatprep.subr.mxu0 %v8148_v50  ;;  %5608 = vmatpush1.msra.mxu1 %v8149_v58  ;;  %v8176_v45 = vld [vmem:[#allocation13 + $0x15f8] sm:$0xff]  ;;  %v8177_v50 = vld [vmem:[#allocation13 + $0xf60] sm:$0xff] }
 0xea8   : > { %5873 = vmatpush2.msra.mxu0 %v8150_v49  ;;  %5609 = vmatprep.subr.mxu1 %v8151_v59  ;;  %v5908_v58 = vld [vmem:[#allocation2 + $0x60] sm:$0xfe]  ;;  %v8178_v49 = vld [vmem:[#allocation13 + $0x15f0] sm:$0xff]  ;;  %v8179_v59 = vld [vmem:[#allocation13 + $0xf48] sm:$0xff] }
 0xea9   : > { %5874 = vmatprep.subr.mxu0 %v8152_v48  ;;  %5610 = vmatpush1.msra.mxu1 %v8153_v18  ;;  %v5923_v48 = vrot.slane %v10526_v52, 1  ;;  %v8180_v18 = vld [vmem:[#allocation13 + $0x15d8] sm:$0xff] }
 0xeaa   : > { %5875 = vmatpush2.msra.mxu0 %v8154_v8  ;;  %5611 = vmatprep.subr.mxu1 %v8155_v0  ;;  %v8181_v8 = vld [vmem:[#allocation13 + $0xf40] sm:$0xff]  ;;  %v8182_v0 = vld [vmem:[#allocation13 + $0x15d0] sm:$0xff] }
 0xeab   : > { %5876 = vmatprep.subr.mxu0 %v8156_v47  ;;  %5612 = vmatpush1.msra.mxu1 %v8157_v60  ;;  %v10531_v47 = vld [vmem:[#allocation2 + $0x68] sm:$0xff]  ;;  %v5922_v60 = vrot.slane %v5908_v58, 1 }
 0xeac   : > { %5877 = vmatpush2.msra.mxu0 %v8158_v30  ;;  %5613 = vmatprep.subr.mxu1 %v8159_v20  ;;  %v8184_v30 = vld [vmem:[#allocation13 + $0x15b8] sm:$0xff]  ;;  %v8185_v20 = vld [vmem:[#allocation13 + $0xf20] sm:$0xff]  ;;  %v8203_v58 = vld [vmem:[#allocation13 + $0xe88] sm:$0xff] }
 0xead   : > { %5878 = vmatprep.subr.mxu0 %v8160_v3  ;;  %5614 = vmatpush2.msra.mxu1 %v8161_v46  ;;  %v8186_v3 = vld [vmem:[#allocation13 + $0x15b0] sm:$0xff]  ;;  %v10537_v46 = vsel %vm3900_vm10, %v5922_v60, %v5923_v48 }
 0xeae   : > { %5879 = vmatpush2.msra.mxu0 %v8162_v44  ;;  %5615 = vmatprep.subr.mxu1 %v8163_v53  ;;  %v8187_v44 = vld [vmem:[#allocation13 + $0xf08] sm:$0xff]  ;;  %v8188_v53 = vld [vmem:[#allocation13 + $0x1598] sm:$0xff]  ;;  %v8210_v60 = vld [vmem:[#allocation13 + $0x14f0] sm:$0xff] }
 0xeaf   : > { %5880 = vmatprep.subr.mxu0 %v8164_v17  ;;  %5616 = vmatpush2.msra.mxu1 %v8165_v25  ;;  %v8189_v17 = vld [vmem:[#allocation13 + $0xf00] sm:$0xff]  ;;  %v8190_v25 = vld [vmem:[#allocation13 + $0x1590] sm:$0xff] }
 0xeb0   : > { %5881 = vmatpush2.msra.mxu0 %v8166_v32  ;;  %5617 = vmatprep.subr.mxu1 %v8167_v61  ;;  %v8191_v32 = vld [vmem:[#allocation13 + $0xee8] sm:$0xff]  ;;  %v8192_v61 = vld [vmem:[#allocation13 + $0x1578] sm:$0xff] }
 0xeb1   : > { %5882 = vmatprep.subr.mxu0 %v8168_v40  ;;  %5618 = vmatpush2.msra.mxu1 %v8169_v51  ;;  %v8193_v40 = vld [vmem:[#allocation13 + $0xee0] sm:$0xff]  ;;  %v8194_v51 = vld [vmem:[#allocation13 + $0x1570] sm:$0xff] }
 0xeb2   : > { %5883 = vmatpush2.msra.mxu0 %v8170_v23  ;;  %5619 = vmatprep.subr.mxu1 %v8171_v43  ;;  %v8195_v23 = vld [vmem:[#allocation13 + $0xec8] sm:$0xff]  ;;  %v8196_v43 = vld [vmem:[#allocation13 + $0x1558] sm:$0xff] }
 0xeb3   : > { %5884 = vmatprep.subr.mxu0 %v8172_v14  ;;  %5620 = vmatpush2.msra.mxu1 %v8173_v33  ;;  %v8197_v14 = vld [vmem:[#allocation13 + $0xec0] sm:$0xff]  ;;  %v8198_v33 = vld [vmem:[#allocation13 + $0x1550] sm:$0xff] }
 0xeb4   : > { %5885 = vmatpush2.msra.mxu0 %v8174_v38  ;;  %5621 = vmatprep.subr.mxu1 %v8175_v62  ;;  %v8199_v38 = vld [vmem:[#allocation13 + $0xea8] sm:$0xff]  ;;  %v8200_v62 = vld [vmem:[#allocation13 + $0x1538] sm:$0xff] }
 0xeb5   : > { %5887 = vmatmul.mubr.f32.vlgmr.msra.gmra.mxu0 %v10468_v34  ;;  %6010 = vmatprep.subr.mxu0 %v8176_v45  ;;  %v8183_v34 = vld [vmem:[#allocation13 + $0xf28] sm:$0xff]  ;;  %v8201_v45 = vld [vmem:[#allocation13 + $0xea0] sm:$0xff] }
 0xeb6   : > { %5622 = vmatpush2.msra.mxu1 %v8177_v50  ;;  %5892 = vmatprep.mubr.f32.mxu0 %v10526_v52  ;;  %v8202_v50 = vld [vmem:[#allocation13 + $0x1530] sm:$0xff] }
 0xeb7   : > { %6011 = vmatpush1.msra.mxu0 %v8178_v49  ;;  %5623 = vmatprep.subr.mxu1 %v8179_v59  ;;  %v8204_v49 = vld [vmem:[#allocation13 + $0x1518] sm:$0xff]  ;;  %v8205_v59 = vld [vmem:[#allocation13 + $0xe80] sm:$0xff] }
 0xeb8   : > { %6012 = vmatprep.subr.mxu0 %v8180_v18  ;;  %5624 = vmatpush2.msra.mxu1 %v8181_v8  ;;  %v8206_v18 = vld [vmem:[#allocation13 + $0x1510] sm:$0xff]  ;;  %v8207_v8 = vld [vmem:[#allocation13 + $0xe68] sm:$0xff] }
 0xeb9   : > { %6013 = vmatpush1.msra.mxu0 %v8182_v0  ;;  %5625 = vmatprep.subr.mxu1 %v8183_v34  ;;  %v8208_v0 = vld [vmem:[#allocation13 + $0x14f8] sm:$0xff]  ;;  %v8209_v34 = vld [vmem:[#allocation13 + $0xe60] sm:$0xff] }
 0xeba   : > { %5893 = vmatmul.mubr.f32.gmra.mxu0 %v10531_v47  ;;  %6014 = vmatprep.subr.mxu0 %v8184_v30  ;;  %v8211_v30 = vld [vmem:[#allocation13 + $0xe48] sm:$0xff] }
 0xebb   : > { %5626 = vmatpush2.msra.mxu1 %v8185_v20  ;;  %6015 = vmatpush1.msra.mxu0 %v8186_v3  ;;  %v8212_v20 = vld [vmem:[#allocation13 + $0x14d8] sm:$0xff]  ;;  %v8213_v3 = vld [vmem:[#allocation13 + $0xe40] sm:$0xff] }
 0xebc   : > { %6074 = vmatprep.mubr.f32.mxu0 %v10537_v46  ;;  %5627 = vmatprep.subr.mxu1 %v8187_v44  ;;  %v8214_v44 = vld [vmem:[#allocation13 + $0x14d0] sm:$0xff] }
 0xebd   : > { %6016 = vmatprep.subr.mxu0 %v8188_v53  ;;  %5628 = vmatpush2.msra.mxu1 %v8189_v17  ;;  %v8215_v53 = vld [vmem:[#allocation13 + $0xe28] sm:$0xff]  ;;  %v8216_v17 = vld [vmem:[#allocation13 + $0x14b8] sm:$0xff] }
 0xebe   : > { %6017 = vmatpush1.msra.mxu0 %v8190_v25  ;;  %5629 = vmatprep.subr.mxu1 %v8191_v32  ;;  %v8217_v25 = vld [vmem:[#allocation13 + $0xe20] sm:$0xff]  ;;  %v8218_v32 = vld [vmem:[#allocation13 + $0x14b0] sm:$0xff] }
 0xebf   : > { %6018 = vmatprep.subr.mxu0 %v8192_v61  ;;  %5630 = vmatpush2.msra.mxu1 %v8193_v40  ;;  %v8219_v61 = vld [vmem:[#allocation13 + $0xe08] sm:$0xff]  ;;  %v8220_v40 = vld [vmem:[#allocation13 + $0x1498] sm:$0xff] }
 0xec0   : > { %6019 = vmatpush1.msra.mxu0 %v8194_v51  ;;  %5631 = vmatprep.subr.mxu1 %v8195_v23  ;;  %v8221_v51 = vld [vmem:[#allocation13 + $0xe00] sm:$0xff]  ;;  %v8222_v23 = vld [vmem:[#allocation13 + $0x1490] sm:$0xff] }
 0xec1   : > { %6020 = vmatprep.subr.mxu0 %v8196_v43  ;;  %5632 = vmatpush2.msra.mxu1 %v8197_v14  ;;  %v8223_v43 = vld [vmem:[#allocation13 + $0x11e8] sm:$0xff]  ;;  %v8224_v14 = vld [vmem:[#allocation13 + $0x1478] sm:$0xff] }
 0xec2   : > { %6021 = vmatpush1.msra.mxu0 %v8198_v33  ;;  %5633 = vmatprep.subr.mxu1 %v8199_v38  ;;  %v8225_v33 = vld [vmem:[#allocation13 + $0x11e0] sm:$0xff]  ;;  %v8226_v38 = vld [vmem:[#allocation13 + $0x1470] sm:$0xff] }
 0xec3   : > { %6022 = vmatprep.subr.mxu0 %v8200_v62  ;;  %5634 = vmatpush2.msra.mxu1 %v8201_v45  ;;  %v8227_v62 = vld [vmem:[#allocation13 + $0x11c8] sm:$0xff]  ;;  %v8228_v45 = vld [vmem:[#allocation13 + $0x1458] sm:$0xff] }
 0xec4   : > { %6023 = vmatpush1.msra.mxu0 %v8202_v50  ;;  %5635 = vmatprep.subr.mxu1 %v8203_v58  ;;  %v8229_v50 = vld [vmem:[#allocation13 + $0x11c0] sm:$0xff]  ;;  %v8230_v58 = vld [vmem:[#allocation13 + $0x1450] sm:$0xff] }
 0xec5   : > { %6024 = vmatprep.subr.mxu0 %v8204_v49  ;;  %5636 = vmatpush2.msra.mxu1 %v8205_v59  ;;  %v8232_v49 = vld [vmem:[#allocation13 + $0x1438] sm:$0xff]  ;;  %v8233_v59 = vld [vmem:[#allocation13 + $0x11a0] sm:$0xff] }
 0xec6   : > { %6025 = vmatpush1.msra.mxu0 %v8206_v18  ;;  %5637 = vmatprep.subr.mxu1 %v8207_v8  ;;  %v8235_v18 = vld [vmem:[#allocation13 + $0x1188] sm:$0xff]  ;;  %v8236_v8 = vld [vmem:[#allocation13 + $0x1418] sm:$0xff] }
 0xec7   : > { %6026 = vmatprep.subr.mxu0 %v8208_v0  ;;  %5638 = vmatpush2.msra.mxu1 %v8209_v34  ;;  %v8237_v0 = vld [vmem:[#allocation13 + $0x1180] sm:$0xff]  ;;  %v8238_v34 = vld [vmem:[#allocation13 + $0x1410] sm:$0xff] }
 0xec8   : > { %6027 = vmatpush1.msra.mxu0 %v8210_v60  ;;  %5639 = vmatprep.subr.mxu1 %v8211_v30  ;;  %v8239_v60 = vld [vmem:[#allocation13 + $0x1168] sm:$0xff]  ;;  %v8241_v30 = vld [vmem:[#allocation13 + $0x1160] sm:$0xff] }
 0xec9   : > { %6028 = vmatprep.subr.mxu0 %v8212_v20  ;;  %5640 = vmatpush2.msra.mxu1 %v8213_v3  ;;  %v8242_v20 = vld [vmem:[#allocation13 + $0x17f0] sm:$0xff]  ;;  %v8243_v3 = vld [vmem:[#allocation13 + $0x1148] sm:$0xff] }
 0xeca   : > { %6029 = vmatpush1.msra.mxu0 %v8214_v44  ;;  %5641 = vmatprep.subr.mxu1 %v8215_v53  ;;  %v8245_v44 = vld [vmem:[#allocation13 + $0x1140] sm:$0xff]  ;;  %v8246_v53 = vld [vmem:[#allocation13 + $0x17d0] sm:$0xff] }
 0xecb   : > { %6030 = vmatprep.subr.mxu0 %v8216_v17  ;;  %5642 = vmatpush2.msra.mxu1 %v8217_v25  ;;  %v8247_v17 = vld [vmem:[#allocation13 + $0x1128] sm:$0xff]  ;;  %v8248_v25 = vld [vmem:[#allocation13 + $0x17b8] sm:$0xff] }
 0xecc   : > { %6031 = vmatpush1.msra.mxu0 %v8218_v32  ;;  %5643 = vmatprep.subr.mxu1 %v8219_v61  ;;  %v8249_v32 = vld [vmem:[#allocation13 + $0x1120] sm:$0xff]  ;;  %v8250_v61 = vld [vmem:[#allocation13 + $0x17b0] sm:$0xff] }
 0xecd   : > { %6032 = vmatprep.subr.mxu0 %v8220_v40  ;;  %5644 = vmatpush2.msra.mxu1 %v8221_v51  ;;  %v8251_v40 = vld [vmem:[#allocation13 + $0x1108] sm:$0xff]  ;;  %v8252_v51 = vld [vmem:[#allocation13 + $0x1798] sm:$0xff] }
 0xece   : > { %6033 = vmatpush1.msra.mxu0 %v8222_v23  ;;  %5646 = vmatmul.mubr.f32.vlgmr.msra.gmra.mxu1 %v10508_v36  ;;  %v8231_v36 = vld [vmem:[#allocation13 + $0x11a8] sm:$0xff]  ;;  %v8253_v23 = vld [vmem:[#allocation13 + $0x1100] sm:$0xff] }
 0xecf   : > { %5745 = vmatprep.subr.mxu1 %v8223_v43  ;;  %6034 = vmatprep.subr.mxu0 %v8224_v14  ;;  %v8254_v43 = vld [vmem:[#allocation13 + $0x1790] sm:$0xff]  ;;  %v8255_v14 = vld [vmem:[#allocation13 + $0x10e8] sm:$0xff] }
 0xed0   : > { %5651 = vmatprep.mubr.f32.mxu1 %v10514_v55  ;;  %5746 = vmatpush1.msra.mxu1 %v8225_v33  ;;  %v8234_v55 = vld [vmem:[#allocation13 + $0x1430] sm:$0xff]  ;;  %v8256_v33 = vld [vmem:[#allocation13 + $0x1778] sm:$0xff] }
 0xed1   : > { %6035 = vmatpush1.msra.mxu0 %v8226_v38  ;;  %5747 = vmatprep.subr.mxu1 %v8227_v62  ;;  %v8257_v38 = vld [vmem:[#allocation13 + $0x10e0] sm:$0xff]  ;;  %v8258_v62 = vld [vmem:[#allocation13 + $0x1770] sm:$0xff] }
 0xed2   : > { %6036 = vmatprep.subr.mxu0 %v8228_v45  ;;  %5748 = vmatpush1.msra.mxu1 %v8229_v50  ;;  %v8259_v45 = vld [vmem:[#allocation13 + $0x10c8] sm:$0xff]  ;;  %v8260_v50 = vld [vmem:[#allocation13 + $0x1758] sm:$0xff] }
 0xed3   : > { %6037 = vmatpush1.msra.mxu0 %v8230_v58  ;;  %5652 = vmatmul.mubr.f32.gmra.mxu1 %v10518_v19  ;;  %v8240_v19 = vld [vmem:[#allocation13 + $0x17f8] sm:$0xff]  ;;  %v8261_v58 = vld [vmem:[#allocation13 + $0x10c0] sm:$0xff] }
 0xed4   : > { %5749 = vmatprep.subr.mxu1 %v8231_v36  ;;  %6038 = vmatprep.subr.mxu0 %v8232_v49  ;;  %v8262_v36 = vld [vmem:[#allocation13 + $0x1750] sm:$0xff]  ;;  %v8263_v49 = vld [vmem:[#allocation13 + $0x10a8] sm:$0xff] }
 0xed5   : > { %5750 = vmatpush1.msra.mxu1 %v8233_v59  ;;  %5809 = vmatprep.mubr.f32.mxu1 %v10481_v5  ;;  %v8244_v5 = vld [vmem:[#allocation13 + $0x17d8] sm:$0xff] }
 0xed6   : > { %6039 = vmatpush1.msra.mxu0 %v8234_v55  ;;  %5751 = vmatprep.subr.mxu1 %v8235_v18  ;;  %v8264_v59 = vld [vmem:[#allocation13 + $0x1738] sm:$0xff]  ;;  %v8265_v55 = vld [vmem:[#allocation13 + $0x10a0] sm:$0xff]  ;;  %v8266_v18 = vld [vmem:[#allocation13 + $0x1730] sm:$0xff] }
 0xed7   : > { %6040 = vmatprep.subr.mxu0 %v8236_v8  ;;  %5752 = vmatpush1.msra.mxu1 %v8237_v0  ;;  %v8267_v8 = vld [vmem:[#allocation13 + $0x1088] sm:$0xff]  ;;  %v8268_v0 = vld [vmem:[#allocation13 + $0x1718] sm:$0xff] }
 0xed8   : > { %6041 = vmatpush1.msra.mxu0 %v8238_v34  ;;  %5753 = vmatprep.subr.mxu1 %v8239_v60  ;;  %v8269_v34 = vld [vmem:[#allocation13 + $0x1080] sm:$0xff]  ;;  %v8270_v60 = vld [vmem:[#allocation13 + $0x1710] sm:$0xff] }
 0xed9   : > { %6042 = vmatprep.subr.mxu0 %v8240_v19  ;;  %5754 = vmatpush1.msra.mxu1 %v8241_v30  ;;  %v8271_v19 = vld [vmem:[#allocation13 + $0x1068] sm:$0xff]  ;;  %v8272_v30 = vld [vmem:[#allocation13 + $0x16f8] sm:$0xff] }
 0xeda   : > { %6043 = vmatpush2.msra.mxu0 %v8242_v20  ;;  %5755 = vmatprep.subr.mxu1 %v8243_v3  ;;  %v8273_v20 = vld [vmem:[#allocation13 + $0x1060] sm:$0xff]  ;;  %v8274_v3 = vld [vmem:[#allocation13 + $0x16f0] sm:$0xff] }
 0xedb   : > { %6044 = vmatprep.subr.mxu0 %v8244_v5  ;;  %5756 = vmatpush1.msra.mxu1 %v8245_v44  ;;  %v8275_v5 = vld [vmem:[#allocation13 + $0x1048] sm:$0xff]  ;;  %v8276_v44 = vld [vmem:[#allocation13 + $0x16d8] sm:$0xff] }
 0xedc   : > { %6045 = vmatpush2.msra.mxu0 %v8246_v53  ;;  %5757 = vmatprep.subr.mxu1 %v8247_v17  ;;  %v8277_v53 = vld [vmem:[#allocation13 + $0x1040] sm:$0xff]  ;;  %v8278_v17 = vld [vmem:[#allocation13 + $0x16d0] sm:$0xff] }
 0xedd   : > { %6046 = vmatprep.subr.mxu0 %v8248_v25  ;;  %5758 = vmatpush1.msra.mxu1 %v8249_v32  ;;  %v8279_v25 = vld [vmem:[#allocation13 + $0x1028] sm:$0xff]  ;;  %v8280_v32 = vld [vmem:[#allocation13 + $0x16b8] sm:$0xff] }
 0xede   : > { %6047 = vmatpush2.msra.mxu0 %v8250_v61  ;;  %5759 = vmatprep.subr.mxu1 %v8251_v40  ;;  %v8281_v61 = vld [vmem:[#allocation13 + $0x1020] sm:$0xff]  ;;  %v8282_v40 = vld [vmem:[#allocation13 + $0x16b0] sm:$0xff] }
 0xedf   : > { %6048 = vmatprep.subr.mxu0 %v8252_v51  ;;  %5760 = vmatpush1.msra.mxu1 %v8253_v23  ;;  %v8283_v51 = vld [vmem:[#allocation13 + $0x1008] sm:$0xff]  ;;  %v8284_v23 = vld [vmem:[#allocation13 + $0x1698] sm:$0xff] }
 0xee0   : > { %6049 = vmatpush2.msra.mxu0 %v8254_v43  ;;  %5761 = vmatprep.subr.mxu1 %v8255_v14  ;;  %v8285_v43 = vld [vmem:[#allocation13 + $0x1000] sm:$0xff]  ;;  %v8286_v14 = vld [vmem:[#allocation13 + $0x1690] sm:$0xff] }
 0xee1   : > { %6050 = vmatprep.subr.mxu0 %v8256_v33  ;;  %5762 = vmatpush1.msra.mxu1 %v8257_v38  ;;  %v8287_v33 = vld [vmem:[#allocation13 + $0x13e8] sm:$0xff]  ;;  %v8288_v38 = vld [vmem:[#allocation13 + $0x1678] sm:$0xff] }
 0xee2   : > { %6051 = vmatpush2.msra.mxu0 %v8258_v62  ;;  %5763 = vmatprep.subr.mxu1 %v8259_v45  ;;  %v8289_v62 = vld [vmem:[#allocation13 + $0x13e0] sm:$0xff]  ;;  %v8290_v45 = vld [vmem:[#allocation13 + $0x1670] sm:$0xff] }
 0xee3   : > { %6052 = vmatprep.subr.mxu0 %v8260_v50  ;;  %5764 = vmatpush1.msra.mxu1 %v8261_v58  ;;  %v8291_v50 = vld [vmem:[#allocation13 + $0x13c8] sm:$0xff]  ;;  %v5912_v58 = vld [vmem:[#allocation2 + $0x18] sm:$0x1] }
 0xee4   : > { %6053 = vmatpush2.msra.mxu0 %v8262_v36  ;;  %5765 = vmatprep.subr.mxu1 %v8263_v49  ;;  %v8292_v36 = vld [vmem:[#allocation13 + $0x1658] sm:$0xff]  ;;  %v8293_v49 = vld [vmem:[#allocation13 + $0x13c0] sm:$0xff] }
 0xee5   : > { %6054 = vmatprep.subr.mxu0 %v8264_v59  ;;  %5766 = vmatpush1.msra.mxu1 %v8265_v55  ;;  %v5907_v59 = vld [vmem:[#allocation2 + $0x50] sm:$0xfe] }
 0xee6   : > { %6055 = vmatpush2.msra.mxu0 %v8266_v18  ;;  %5767 = vmatprep.subr.mxu1 %v8267_v8  ;;  %v8294_v55 = vld [vmem:[#allocation13 + $0x1650] sm:$0xff]  ;;  %v8295_v18 = vld [vmem:[#allocation13 + $0x13a8] sm:$0xff]  ;;  %v5920_v8 = vrot.slane %v10531_v47, 1 }
 0xee7   : > { %6056 = vmatprep.subr.mxu0 %v8268_v0  ;;  %5768 = vmatpush1.msra.mxu1 %v8269_v34  ;;  %v8296_v0 = vld [vmem:[#allocation13 + $0x1638] sm:$0xff]  ;;  %v8297_v34 = vld [vmem:[#allocation13 + $0x13a0] sm:$0xff] }
 0xee8   : > { %6057 = vmatpush2.msra.mxu0 %v8270_v60  ;;  %5769 = vmatprep.subr.mxu1 %v8271_v19  ;;  %v5927_v60 = vrot.slane %v5912_v58, 1  ;;  %v8298_v19 = vld [vmem:[#allocation13 + $0x1630] sm:$0xff] }
 0xee9   : > { %6058 = vmatprep.subr.mxu0 %v8272_v30  ;;  %5770 = vmatpush1.msra.mxu1 %v8273_v20  ;;  %v8299_v30 = vld [vmem:[#allocation13 + $0x1388] sm:$0xff]  ;;  %v5919_v20 = vrot.slane %v5907_v59, 1  ;;  %v8314_v59 = vld [vmem:[#allocation13 + $0x19b0] sm:$0xff] }
 0xeea   : > { %6059 = vmatpush2.msra.mxu0 %v8274_v3  ;;  %5771 = vmatprep.subr.mxu1 %v8275_v5  ;;  %v5911_v3 = vld [vmem:[#allocation2 + $0x8] sm:$0x1]  ;;  %v8300_v5 = vld [vmem:[#allocation13 + $0x1618] sm:$0xff] }
 0xeeb   : > { %6060 = vmatprep.subr.mxu0 %v8276_v44  ;;  %5772 = vmatpush1.msra.mxu1 %v8277_v53  ;;  %v8301_v44 = vld [vmem:[#allocation13 + $0x1380] sm:$0xff]  ;;  %v8302_v53 = vld [vmem:[#allocation13 + $0x1610] sm:$0xff] }
 0xeec   : > { %6061 = vmatpush2.msra.mxu0 %v8278_v17  ;;  %5773 = vmatprep.subr.mxu1 %v8279_v25  ;;  %v8303_v17 = vld [vmem:[#allocation13 + $0x1368] sm:$0xff]  ;;  %v10546_v25 = vsel %vm3900_vm10, %v5919_v20, %v5920_v8  ;;  %v8322_v20 = vld [vmem:[#allocation13 + $0x1970] sm:$0xff] }
 0xeed   : > { %6062 = vmatprep.subr.mxu0 %v8280_v32  ;;  %5774 = vmatpush1.msra.mxu1 %v8281_v61  ;;  %v8304_v32 = vld [vmem:[#allocation13 + $0x19f8] sm:$0xff]  ;;  %v10552_v61 = vsel %vm3900_vm10, %v5923_v48, %v5927_v60  ;;  %v8311_v48 = vld [vmem:[#allocation13 + $0x1328] sm:$0xff] }
 0xeee   : > { %6063 = vmatpush2.msra.mxu0 %v8282_v40  ;;  %5775 = vmatprep.subr.mxu1 %v8283_v51  ;;  %v5925_v40 = vrot.slane %v5911_v3, 1  ;;  %v8305_v51 = vld [vmem:[#allocation13 + $0x1360] sm:$0xff]  ;;  %v8319_v60 = vld [vmem:[#allocation13 + $0x12e8] sm:$0xff] }
 0xeef   : > { %6064 = vmatprep.subr.mxu0 %v8284_v23  ;;  %5776 = vmatpush1.msra.mxu1 %v8285_v43  ;;  %v6096_v23 = vld [vmem:[#allocation2 + $0x60] sm:$0xfc]  ;;  %v8306_v43 = vld [vmem:[#allocation13 + $0x19f0] sm:$0xff]  ;;  %v8323_v3 = vld [vmem:[#allocation13 + $0x12c8] sm:$0xff] }
 0xef0   : > { %6065 = vmatpush2.msra.mxu0 %v8286_v14  ;;  %5777 = vmatprep.subr.mxu1 %v8287_v33  ;;  %v8307_v14 = vld [vmem:[#allocation13 + $0x1348] sm:$0xff]  ;;  %v6107_v33 = vrot.slane %v10526_v52, 2  ;;  %v6106_v58 = vrot.slane %v6096_v23, 2 }
 0xef1   : > { %6066 = vmatprep.subr.mxu0 %v8288_v38  ;;  %5778 = vmatpush2.msra.mxu1 %v8289_v62  ;;  %v8308_v38 = vld [vmem:[#allocation13 + $0x19d8] sm:$0xff]  ;;  %v8309_v62 = vld [vmem:[#allocation13 + $0x1340] sm:$0xff]  ;;  %v8331_v23 = vld [vmem:[#allocation13 + $0x1288] sm:$0xff] }
 0xef2   : > { %6067 = vmatpush2.msra.mxu0 %v8290_v45  ;;  %5779 = vmatprep.subr.mxu1 %v8291_v50  ;;  %v8310_v45 = vld [vmem:[#allocation13 + $0x19d0] sm:$0xff]  ;;  %v10557_v50 = vsel %vm3900_vm10, %v5920_v8, %v5925_v40  ;;  %v8316_v8 = vld [vmem:[#allocation13 + $0x1998] sm:$0xff]  ;;  %v8329_v40 = vld [vmem:[#allocation13 + $0x12a0] sm:$0xff] }
 0xef3   : > { %6068 = vmatprep.subr.mxu0 %v8292_v36  ;;  %5780 = vmatpush2.msra.mxu1 %v8293_v49  ;;  %v8312_v36 = vld [vmem:[#allocation13 + $0x19b8] sm:$0xff]  ;;  %v8313_v49 = vld [vmem:[#allocation13 + $0x1320] sm:$0xff] }
 0xef4   : > { %6069 = vmatpush2.msra.mxu0 %v8294_v55  ;;  %5781 = vmatprep.subr.mxu1 %v8295_v18  ;;  %v10563_v55 = vsel %vm4214_vm11, %v6106_v58, %v6107_v33  ;;  %v8315_v18 = vld [vmem:[#allocation13 + $0x1308] sm:$0xff]  ;;  %v8338_v58 = vld [vmem:[#allocation13 + $0x18f0] sm:$0xff] }
 0xef5   : > { %6070 = vmatprep.subr.mxu0 %v8296_v0  ;;  %5782 = vmatpush2.msra.mxu1 %v8297_v34  ;;  %v8317_v0 = vld [vmem:[#allocation13 + $0x1300] sm:$0xff]  ;;  %v8318_v34 = vld [vmem:[#allocation13 + $0x1990] sm:$0xff] }
 0xef6   : > { %6071 = vmatpush2.msra.mxu0 %v8298_v19  ;;  %5783 = vmatprep.subr.mxu1 %v8299_v30  ;;  %v8320_v19 = vld [vmem:[#allocation13 + $0x1978] sm:$0xff]  ;;  %v8321_v30 = vld [vmem:[#allocation13 + $0x12e0] sm:$0xff] }
 0xef7   : > { %6072 = vmatprep.subr.mxu0 %v8300_v5  ;;  %5784 = vmatpush2.msra.mxu1 %v8301_v44  ;;  %v8324_v5 = vld [vmem:[#allocation13 + $0x1958] sm:$0xff]  ;;  %v8325_v44 = vld [vmem:[#allocation13 + $0x12c0] sm:$0xff] }
 0xef8   : > { %6073 = vmatpush2.msra.mxu0 %v8302_v53  ;;  %5785 = vmatprep.subr.mxu1 %v8303_v17  ;;  %v8326_v53 = vld [vmem:[#allocation13 + $0x1950] sm:$0xff]  ;;  %v8327_v17 = vld [vmem:[#allocation13 + $0x12a8] sm:$0xff] }
 0xef9   : > { %6075 = vmatmul.mubr.f32.vlgmr.msra.gmra.mxu0 %v10546_v25  ;;  %6194 = vmatprep.subr.mxu0 %v8304_v32  ;;  %v8328_v32 = vld [vmem:[#allocation13 + $0x1938] sm:$0xff] }
 0xefa   : > { %5786 = vmatpush2.msra.mxu1 %v8305_v51  ;;  %6080 = vmatprep.mubr.f32.mxu0 %v10552_v61  ;;  %v8330_v51 = vld [vmem:[#allocation13 + $0x1930] sm:$0xff] }
 0xefb   : > { %6195 = vmatpush1.msra.mxu0 %v8306_v43  ;;  %5787 = vmatprep.subr.mxu1 %v8307_v14  ;;  %v8332_v43 = vld [vmem:[#allocation13 + $0x1918] sm:$0xff]  ;;  %v8333_v14 = vld [vmem:[#allocation13 + $0x1280] sm:$0xff] }
 0xefc   : > { %6196 = vmatprep.subr.mxu0 %v8308_v38  ;;  %5788 = vmatpush2.msra.mxu1 %v8309_v62  ;;  %v8334_v38 = vld [vmem:[#allocation13 + $0x1910] sm:$0xff]  ;;  %v8335_v62 = vld [vmem:[#allocation13 + $0x1268] sm:$0xff] }
 0xefd   : > { %6197 = vmatpush1.msra.mxu0 %v8310_v45  ;;  %5789 = vmatprep.subr.mxu1 %v8311_v48  ;;  %v8336_v45 = vld [vmem:[#allocation13 + $0x18f8] sm:$0xff]  ;;  %v8337_v48 = vld [vmem:[#allocation13 + $0x1260] sm:$0xff] }
 0xefe   : > { %6081 = vmatmul.mubr.f32.gmra.mxu0 %v10557_v50  ;;  %6198 = vmatprep.subr.mxu0 %v8312_v36  ;;  %v8339_v36 = vld [vmem:[#allocation13 + $0x1248] sm:$0xff] }
 0xeff   : > { %5790 = vmatpush2.msra.mxu1 %v8313_v49  ;;  %6199 = vmatpush1.msra.mxu0 %v8314_v59  ;;  %v8340_v49 = vld [vmem:[#allocation13 + $0x18d8] sm:$0xff]  ;;  %v8341_v59 = vld [vmem:[#allocation13 + $0x1240] sm:$0xff] }
 0xf00   : > { %6258 = vmatprep.mubr.f32.mxu0 %v10563_v55  ;;  %5791 = vmatprep.subr.mxu1 %v8315_v18  ;;  %v8342_v18 = vld [vmem:[#allocation13 + $0x18d0] sm:$0xff] }
 0xf01   : > { %6200 = vmatprep.subr.mxu0 %v8316_v8  ;;  %5792 = vmatpush2.msra.mxu1 %v8317_v0  ;;  %v8343_v8 = vld [vmem:[#allocation13 + $0x1228] sm:$0xff]  ;;  %v8344_v0 = vld [vmem:[#allocation13 + $0x18b8] sm:$0xff] }
 0xf02   : > { %6201 = vmatpush1.msra.mxu0 %v8318_v34  ;;  %5793 = vmatprep.subr.mxu1 %v8319_v60  ;;  %v8345_v34 = vld [vmem:[#allocation13 + $0x1220] sm:$0xff]  ;;  %v8346_v60 = vld [vmem:[#allocation13 + $0x18b0] sm:$0xff] }
 0xf03   : > { %6202 = vmatprep.subr.mxu0 %v8320_v19  ;;  %5794 = vmatpush2.msra.mxu1 %v8321_v30  ;;  %v8347_v19 = vld [vmem:[#allocation13 + $0x1208] sm:$0xff]  ;;  %v8348_v30 = vld [vmem:[#allocation13 + $0x1898] sm:$0xff] }
 0xf04   : > { %6203 = vmatpush1.msra.mxu0 %v8322_v20  ;;  %5795 = vmatprep.subr.mxu1 %v8323_v3  ;;  %v8349_v20 = vld [vmem:[#allocation13 + $0x1200] sm:$0xff]  ;;  %v8350_v3 = vld [vmem:[#allocation13 + $0x1890] sm:$0xff] }
 0xf05   : > { %6204 = vmatprep.subr.mxu0 %v8324_v5  ;;  %5796 = vmatpush2.msra.mxu1 %v8325_v44  ;;  %v8351_v5 = vld [vmem:[#allocation2 + $0x50] sm:$0xff] }
 0xf06   : > { %6205 = vmatpush1.msra.mxu0 %v8326_v53  ;;  %5797 = vmatprep.subr.mxu1 %v8327_v17  ;;  %v8352_v44 = vld [vmem:[#allocation13 + $0x15e8] sm:$0xff]  ;;  %v8353_v53 = vld [vmem:[#allocation13 + $0x1878] sm:$0xff]  ;;  %v8354_v17 = vld [vmem:[#allocation13 + $0x15e0] sm:$0xff] }
 0xf07   : > { %6206 = vmatprep.subr.mxu0 %v8328_v32  ;;  %5798 = vmatpush2.msra.mxu1 %v8329_v40  ;;  %v8355_v32 = vld [vmem:[#allocation13 + $0x1870] sm:$0xff]  ;;  %v8356_v40 = vld [vmem:[#allocation13 + $0x15c8] sm:$0xff] }
 0xf08   : > { %6207 = vmatpush1.msra.mxu0 %v8330_v51  ;;  %5799 = vmatprep.subr.mxu1 %v8331_v23  ;;  %v8357_v51 = vld [vmem:[#allocation13 + $0x1858] sm:$0xff]  ;;  %v8358_v23 = vld [vmem:[#allocation13 + $0x15c0] sm:$0xff] }
 0xf09   : > { %6208 = vmatprep.subr.mxu0 %v8332_v43  ;;  %5800 = vmatpush2.msra.mxu1 %v8333_v14  ;;  %v8359_v43 = vld [vmem:[#allocation13 + $0x1850] sm:$0xff]  ;;  %v8360_v14 = vld [vmem:[#allocation13 + $0x15a8] sm:$0xff] }
 0xf0a   : > { %6209 = vmatpush1.msra.mxu0 %v8334_v38  ;;  %5801 = vmatprep.subr.mxu1 %v8335_v62  ;;  %v8361_v38 = vld [vmem:[#allocation13 + $0x1838] sm:$0xff]  ;;  %v8362_v62 = vld [vmem:[#allocation13 + $0x15a0] sm:$0xff] }
 0xf0b   : > { %6210 = vmatprep.subr.mxu0 %v8336_v45  ;;  %5802 = vmatpush2.msra.mxu1 %v8337_v48  ;;  %v8363_v45 = vld [vmem:[#allocation13 + $0x1830] sm:$0xff]  ;;  %v8364_v48 = vld [vmem:[#allocation13 + $0x1588] sm:$0xff] }
 0xf0c   : > { %6211 = vmatpush1.msra.mxu0 %v8338_v58  ;;  %5803 = vmatprep.subr.mxu1 %v8339_v36  ;;  %v8365_v58 = vld [vmem:[#allocation13 + $0x1818] sm:$0xff]  ;;  %v8366_v36 = vld [vmem:[#allocation13 + $0x1580] sm:$0xff] }
 0xf0d   : > { %6212 = vmatprep.subr.mxu0 %v8340_v49  ;;  %5804 = vmatpush2.msra.mxu1 %v8341_v59  ;;  %v8367_v49 = vld [vmem:[#allocation13 + $0x1810] sm:$0xff]  ;;  %v8368_v59 = vld [vmem:[#allocation13 + $0x1568] sm:$0xff] }
 0xf0e   : > { %6213 = vmatpush1.msra.mxu0 %v8342_v18  ;;  %5805 = vmatprep.subr.mxu1 %v8343_v8  ;;  %v8369_v18 = vld [vmem:[#allocation13 + $0x1bf8] sm:$0xff]  ;;  %v8370_v8 = vld [vmem:[#allocation13 + $0x1560] sm:$0xff] }
 0xf0f   : > { %6214 = vmatprep.subr.mxu0 %v8344_v0  ;;  %5806 = vmatpush2.msra.mxu1 %v8345_v34  ;;  %v8371_v0 = vld [vmem:[#allocation13 + $0x1bf0] sm:$0xff]  ;;  %v8372_v34 = vld [vmem:[#allocation13 + $0x1548] sm:$0xff] }
 0xf10   : > { %6215 = vmatpush1.msra.mxu0 %v8346_v60  ;;  %5807 = vmatprep.subr.mxu1 %v8347_v19  ;;  %v8374_v60 = vld [vmem:[#allocation13 + $0x1540] sm:$0xff]  ;;  %v8375_v19 = vld [vmem:[#allocation13 + $0x1bd0] sm:$0xff] }
 0xf11   : > { %6216 = vmatprep.subr.mxu0 %v8348_v30  ;;  %5808 = vmatpush2.msra.mxu1 %v8349_v20  ;;  %v8376_v30 = vld [vmem:[#allocation13 + $0x1528] sm:$0xff]  ;;  %v8377_v20 = vld [vmem:[#allocation13 + $0x1bb8] sm:$0xff] }
 0xf12   : > { %6217 = vmatpush1.msra.mxu0 %v8350_v3  ;;  %5810 = vmatmul.mubr.f32.vlgmr.msra.gmra.mxu1 %v8351_v5  ;;  %v8378_v3 = vld [vmem:[#allocation13 + $0x1520] sm:$0xff]  ;;  %v8379_v5 = vld [vmem:[#allocation13 + $0x1bb0] sm:$0xff] }
 0xf13   : > { %5933 = vmatprep.subr.mxu1 %v8352_v44  ;;  %6218 = vmatprep.subr.mxu0 %v8353_v53  ;;  %v8380_v44 = vld [vmem:[#allocation13 + $0x1508] sm:$0xff]  ;;  %v8381_v53 = vld [vmem:[#allocation13 + $0x1b98] sm:$0xff] }
 0xf14   : > { %5815 = vmatprep.mubr.f32.mxu1 %v10526_v52  ;;  %5934 = vmatpush1.msra.mxu1 %v8354_v17  ;;  %v8382_v17 = vld [vmem:[#allocation13 + $0x1500] sm:$0xff] }
 0xf15   : > { %6219 = vmatpush1.msra.mxu0 %v8355_v32  ;;  %5935 = vmatprep.subr.mxu1 %v8356_v40  ;;  %v8383_v32 = vld [vmem:[#allocation13 + $0x1b90] sm:$0xff]  ;;  %v8384_v40 = vld [vmem:[#allocation13 + $0x14e8] sm:$0xff] }
 0xf16   : > { %6220 = vmatprep.subr.mxu0 %v8357_v51  ;;  %5936 = vmatpush1.msra.mxu1 %v8358_v23  ;;  %v8385_v51 = vld [vmem:[#allocation13 + $0x1b78] sm:$0xff]  ;;  %v8386_v23 = vld [vmem:[#allocation13 + $0x14e0] sm:$0xff] }
 0xf17   : > { %6221 = vmatpush1.msra.mxu0 %v8359_v43  ;;  %5816 = vmatmul.mubr.f32.gmra.mxu1 %v10531_v47  ;;  %v8387_v43 = vld [vmem:[#allocation13 + $0x1b70] sm:$0xff] }
 0xf18   : > { %5937 = vmatprep.subr.mxu1 %v8360_v14  ;;  %6222 = vmatprep.subr.mxu0 %v8361_v38  ;;  %v8388_v14 = vld [vmem:[#allocation13 + $0x14c8] sm:$0xff]  ;;  %v8389_v38 = vld [vmem:[#allocation13 + $0x1b58] sm:$0xff] }
 0xf19   : > { %5938 = vmatpush1.msra.mxu1 %v8362_v62  ;;  %5997 = vmatprep.mubr.f32.mxu1 %v10537_v46  ;;  %v8373_v46 = vld [vmem:[#allocation13 + $0x1bd8] sm:$0xff]  ;;  %v8390_v62 = vld [vmem:[#allocation13 + $0x14c0] sm:$0xff] }
 0xf1a   : > { %6223 = vmatpush1.msra.mxu0 %v8363_v45  ;;  %5939 = vmatprep.subr.mxu1 %v8364_v48  ;;  %v8391_v45 = vld [vmem:[#allocation13 + $0x1b50] sm:$0xff]  ;;  %v8392_v48 = vld [vmem:[#allocation13 + $0x14a8] sm:$0xff] }
 0xf1b   : > { %6224 = vmatprep.subr.mxu0 %v8365_v58  ;;  %5940 = vmatpush1.msra.mxu1 %v8366_v36  ;;  %v8393_v58 = vld [vmem:[#allocation13 + $0x1b38] sm:$0xff]  ;;  %v8394_v36 = vld [vmem:[#allocation13 + $0x14a0] sm:$0xff] }
 0xf1c   : > { %6225 = vmatpush1.msra.mxu0 %v8367_v49  ;;  %5941 = vmatprep.subr.mxu1 %v8368_v59  ;;  %v8395_v49 = vld [vmem:[#allocation13 + $0x1b30] sm:$0xff]  ;;  %v8396_v59 = vld [vmem:[#allocation13 + $0x1488] sm:$0xff] }
 0xf1d   : > { %6226 = vmatprep.subr.mxu0 %v8369_v18  ;;  %5942 = vmatpush1.msra.mxu1 %v8370_v8  ;;  %v8397_v18 = vld [vmem:[#allocation13 + $0x1b18] sm:$0xff]  ;;  %v8398_v8 = vld [vmem:[#allocation13 + $0x1480] sm:$0xff] }
 0xf1e   : > { %6227 = vmatpush2.msra.mxu0 %v8371_v0  ;;  %5943 = vmatprep.subr.mxu1 %v8372_v34  ;;  %v8399_v0 = vld [vmem:[#allocation13 + $0x1b10] sm:$0xff]  ;;  %v8400_v34 = vld [vmem:[#allocation13 + $0x1468] sm:$0xff] }
 0xf1f   : > { %6228 = vmatprep.subr.mxu0 %v8373_v46  ;;  %5944 = vmatpush1.msra.mxu1 %v8374_v60  ;;  %v8401_v46 = vld [vmem:[#allocation13 + $0x1af8] sm:$0xff]  ;;  %v8402_v60 = vld [vmem:[#allocation13 + $0x1460] sm:$0xff] }
 0xf20   : > { %6229 = vmatpush2.msra.mxu0 %v8375_v19  ;;  %5945 = vmatprep.subr.mxu1 %v8376_v30  ;;  %v8403_v19 = vld [vmem:[#allocation13 + $0x1af0] sm:$0xff]  ;;  %v8404_v30 = vld [vmem:[#allocation13 + $0x1448] sm:$0xff] }
 0xf21   : > { %6230 = vmatprep.subr.mxu0 %v8377_v20  ;;  %5946 = vmatpush1.msra.mxu1 %v8378_v3  ;;  %v8405_v20 = vld [vmem:[#allocation13 + $0x1ad8] sm:$0xff]  ;;  %v8406_v3 = vld [vmem:[#allocation13 + $0x1440] sm:$0xff] }
 0xf22   : > { %6231 = vmatpush2.msra.mxu0 %v8379_v5  ;;  %5947 = vmatprep.subr.mxu1 %v8380_v44  ;;  %v8407_v5 = vld [vmem:[#allocation13 + $0x1ad0] sm:$0xff]  ;;  %v8408_v44 = vld [vmem:[#allocation13 + $0x1428] sm:$0xff] }
 0xf23   : > { %6232 = vmatprep.subr.mxu0 %v8381_v53  ;;  %5948 = vmatpush1.msra.mxu1 %v8382_v17  ;;  %v8409_v53 = vld [vmem:[#allocation13 + $0x1ab8] sm:$0xff]  ;;  %v8410_v17 = vld [vmem:[#allocation13 + $0x1420] sm:$0xff] }
 0xf24   : > { %6233 = vmatpush2.msra.mxu0 %v8383_v32  ;;  %5949 = vmatprep.subr.mxu1 %v8384_v40  ;;  %v8411_v32 = vld [vmem:[#allocation13 + $0x1ab0] sm:$0xff]  ;;  %v8412_v40 = vld [vmem:[#allocation13 + $0x1408] sm:$0xff] }
 0xf25   : > { %6234 = vmatprep.subr.mxu0 %v8385_v51  ;;  %5950 = vmatpush1.msra.mxu1 %v8386_v23  ;;  %v8413_v51 = vld [vmem:[#allocation13 + $0x1a98] sm:$0xff]  ;;  %v8414_v23 = vld [vmem:[#allocation13 + $0x1400] sm:$0xff] }
 0xf26   : > { %6235 = vmatpush2.msra.mxu0 %v8387_v43  ;;  %5951 = vmatprep.subr.mxu1 %v8388_v14  ;;  %v8415_v43 = vld [vmem:[#allocation13 + $0x1a90] sm:$0xff]  ;;  %v8416_v14 = vld [vmem:[#allocation13 + $0x17e8] sm:$0xff] }
 0xf27   : > { %6236 = vmatprep.subr.mxu0 %v8389_v38  ;;  %5952 = vmatpush1.msra.mxu1 %v8390_v62  ;;  %v8417_v38 = vld [vmem:[#allocation13 + $0x1a78] sm:$0xff]  ;;  %v8418_v62 = vld [vmem:[#allocation13 + $0x17e0] sm:$0xff] }
 0xf28   : > { %6237 = vmatpush2.msra.mxu0 %v8391_v45  ;;  %5953 = vmatprep.subr.mxu1 %v8392_v48  ;;  %v8419_v45 = vld [vmem:[#allocation13 + $0x1a70] sm:$0xff]  ;;  %v8420_v48 = vld [vmem:[#allocation13 + $0x17c8] sm:$0xff] }
 0xf29   : > { %6238 = vmatprep.subr.mxu0 %v8393_v58  ;;  %5954 = vmatpush1.msra.mxu1 %v8394_v36  ;;  %v6098_v58 = vld [vmem:[#allocation2 + $0x18] sm:$0x3]  ;;  %v8421_v36 = vld [vmem:[#allocation13 + $0x1a58] sm:$0xff] }
 0xf2a   : > { %6239 = vmatpush2.msra.mxu0 %v8395_v49  ;;  %5955 = vmatprep.subr.mxu1 %v8396_v59  ;;  %v8422_v49 = vld [vmem:[#allocation13 + $0x17c0] sm:$0xff]  ;;  %v6095_v59 = vld [vmem:[#allocation2 + $0x50] sm:$0xfc] }
 0xf2b   : > { %6240 = vmatprep.subr.mxu0 %v8397_v18  ;;  %5956 = vmatpush1.msra.mxu1 %v8398_v8  ;;  %v8423_v18 = vld [vmem:[#allocation13 + $0x1a50] sm:$0xff]  ;;  %v8424_v8 = vld [vmem:[#allocation13 + $0x17a8] sm:$0xff] }
 0xf2c   : > { %6241 = vmatpush2.msra.mxu0 %v8399_v0  ;;  %5957 = vmatprep.subr.mxu1 %v8400_v34  ;;  %v6104_v0 = vrot.slane %v10531_v47, 2  ;;  %v8425_v34 = vld [vmem:[#allocation13 + $0x1a38] sm:$0xff] }
 0xf2d   : > { %6242 = vmatprep.subr.mxu0 %v8401_v46  ;;  %5958 = vmatpush1.msra.mxu1 %v8402_v60  ;;  %v8426_v46 = vld [vmem:[#allocation13 + $0x17a0] sm:$0xff]  ;;  %v6111_v60 = vrot.slane %v6098_v58, 2 }
 0xf2e   : > { %6243 = vmatpush2.msra.mxu0 %v8403_v19  ;;  %5959 = vmatprep.subr.mxu1 %v8404_v30  ;;  %v8427_v19 = vld [vmem:[#allocation13 + $0x1a30] sm:$0xff]  ;;  %v8428_v30 = vld [vmem:[#allocation13 + $0x1788] sm:$0xff]  ;;  %v8438_v58 = vld [vmem:[#allocation13 + $0x1740] sm:$0xff] }
 0xf2f   : > { %6244 = vmatprep.subr.mxu0 %v8405_v20  ;;  %5960 = vmatpush1.msra.mxu1 %v8406_v3  ;;  %v6103_v20 = vrot.slane %v6095_v59, 2  ;;  %v6097_v3 = vld [vmem:[#allocation2 + $0x8] sm:$0x3] }
 0xf30   : > { %6245 = vmatpush2.msra.mxu0 %v8407_v5  ;;  %5961 = vmatprep.subr.mxu1 %v8408_v44  ;;  %v8429_v5 = vld [vmem:[#allocation13 + $0x1a18] sm:$0xff]  ;;  %v8430_v44 = vld [vmem:[#allocation13 + $0x1780] sm:$0xff] }
 0xf31   : > { %6246 = vmatprep.subr.mxu0 %v8409_v53  ;;  %5962 = vmatpush1.msra.mxu1 %v8410_v17  ;;  %v8431_v53 = vld [vmem:[#allocation13 + $0x1a10] sm:$0xff]  ;;  %v8432_v17 = vld [vmem:[#allocation13 + $0x1768] sm:$0xff] }
 0xf32   : > { %6247 = vmatpush2.msra.mxu0 %v8411_v32  ;;  %5963 = vmatprep.subr.mxu1 %v8412_v40  ;;  %v10571_v32 = vsel %vm4214_vm11, %v6103_v20, %v6104_v0  ;;  %v8433_v40 = vld [vmem:[#allocation13 + $0x1df8] sm:$0xff]  ;;  %v8448_v20 = vld [vmem:[#allocation13 + $0x16e8] sm:$0xff] }
 0xf33   : > { %6248 = vmatprep.subr.mxu0 %v8413_v51  ;;  %5964 = vmatpush1.msra.mxu1 %v8414_v23  ;;  %v10577_v51 = vsel %vm4214_vm11, %v6107_v33, %v6111_v60  ;;  %v6109_v23 = vrot.slane %v6097_v3, 2  ;;  %v8440_v33 = vld [vmem:[#allocation13 + $0x1728] sm:$0xff]  ;;  %v8449_v3 = vld [vmem:[#allocation13 + $0x1d78] sm:$0xff] }
 0xf34   : > { %6249 = vmatpush2.msra.mxu0 %v8415_v43  ;;  %5965 = vmatprep.subr.mxu1 %v8416_v14  ;;  %v8434_v43 = vld [vmem:[#allocation13 + $0x1760] sm:$0xff]  ;;  %v8444_v60 = vld [vmem:[#allocation13 + $0x1708] sm:$0xff] }
 0xf35   : > { %6250 = vmatprep.subr.mxu0 %v8417_v38  ;;  %5966 = vmatpush2.msra.mxu1 %v8418_v62  ;;  %v6280_v14 = vld [vmem:[#allocation2 + $0x60] sm:$0xf8]  ;;  %v8435_v38 = vld [vmem:[#allocation13 + $0x1df0] sm:$0xff]  ;;  %v8436_v62 = vld [vmem:[#allocation13 + $0x1748] sm:$0xff] }
 0xf36   : > { %6251 = vmatpush2.msra.mxu0 %v8419_v45  ;;  %5967 = vmatprep.subr.mxu1 %v8420_v48  ;;  %v6291_v45 = vrot.slane %v10526_v52, 3  ;;  %v8437_v48 = vld [vmem:[#allocation13 + $0x1dd8] sm:$0xff]  ;;  %v6290_v59 = vrot.slane %v6280_v14, 3 }
 0xf37   : > { %6252 = vmatprep.subr.mxu0 %v8421_v36  ;;  %5968 = vmatpush2.msra.mxu1 %v8422_v49  ;;  %v8439_v36 = vld [vmem:[#allocation13 + $0x1dd0] sm:$0xff]  ;;  %v10582_v49 = vsel %vm4214_vm11, %v6104_v0, %v6109_v23  ;;  %v8445_v0 = vld [vmem:[#allocation13 + $0x1d98] sm:$0xff] }
 0xf38   : > { %6253 = vmatpush2.msra.mxu0 %v8423_v18  ;;  %5969 = vmatprep.subr.mxu1 %v8424_v8  ;;  %v8441_v18 = vld [vmem:[#allocation13 + $0x1db8] sm:$0xff]  ;;  %v8442_v8 = vld [vmem:[#allocation13 + $0x1720] sm:$0xff]  ;;  %v8455_v23 = vld [vmem:[#allocation13 + $0x1d50] sm:$0xff] }
 0xf39   : > { %6254 = vmatprep.subr.mxu0 %v8425_v34  ;;  %5970 = vmatpush2.msra.mxu1 %v8426_v46  ;;  %v8443_v34 = vld [vmem:[#allocation13 + $0x1db0] sm:$0xff]  ;;  %v10588_v46 = vsel %vm4528_vm12, %v6290_v59, %v6291_v45  ;;  %v8457_v14 = vld [vmem:[#allocation13 + $0x1d38] sm:$0xff]  ;;  %v8464_v59 = vld [vmem:[#allocation13 + $0x1668] sm:$0xff] }
 0xf3a   : > { %6255 = vmatpush2.msra.mxu0 %v8427_v19  ;;  %5971 = vmatprep.subr.mxu1 %v8428_v30  ;;  %v8446_v19 = vld [vmem:[#allocation13 + $0x1700] sm:$0xff]  ;;  %v8447_v30 = vld [vmem:[#allocation13 + $0x1d90] sm:$0xff] }
 0xf3b   : > { %6256 = vmatprep.subr.mxu0 %v8429_v5  ;;  %5972 = vmatpush2.msra.mxu1 %v8430_v44  ;;  %v8450_v5 = vld [vmem:[#allocation13 + $0x16e0] sm:$0xff]  ;;  %v8451_v44 = vld [vmem:[#allocation13 + $0x1d70] sm:$0xff] }
 0xf3c   : > { %6257 = vmatpush2.msra.mxu0 %v8431_v53  ;;  %5973 = vmatprep.subr.mxu1 %v8432_v17  ;;  %v8452_v53 = vld [vmem:[#allocation13 + $0x16c8] sm:$0xff]  ;;  %v8453_v17 = vld [vmem:[#allocation13 + $0x1d58] sm:$0xff] }
 0xf3d   : > { %6259 = vmatmul.mubr.f32.vlgmr.msra.gmra.mxu0 %v10571_v32  ;;  %6378 = vmatprep.subr.mxu0 %v8433_v40  ;;  %v8454_v40 = vld [vmem:[#allocation13 + $0x16c0] sm:$0xff] }
 0xf3e   : > { %5974 = vmatpush2.msra.mxu1 %v8434_v43  ;;  %6264 = vmatprep.mubr.f32.mxu0 %v10577_v51  ;;  %v8456_v43 = vld [vmem:[#allocation13 + $0x16a8] sm:$0xff] }
 0xf3f   : > { %6379 = vmatpush1.msra.mxu0 %v8435_v38  ;;  %5975 = vmatprep.subr.mxu1 %v8436_v62  ;;  %v8458_v38 = vld [vmem:[#allocation13 + $0x16a0] sm:$0xff]  ;;  %v8459_v62 = vld [vmem:[#allocation13 + $0x1d30] sm:$0xff] }
 0xf40   : > { %6380 = vmatprep.subr.mxu0 %v8437_v48  ;;  %5976 = vmatpush2.msra.mxu1 %v8438_v58  ;;  %v8460_v48 = vld [vmem:[#allocation13 + $0x1688] sm:$0xff]  ;;  %v8461_v58 = vld [vmem:[#allocation13 + $0x1d18] sm:$0xff] }
 0xf41   : > { %6381 = vmatpush1.msra.mxu0 %v8439_v36  ;;  %5977 = vmatprep.subr.mxu1 %v8440_v33  ;;  %v8462_v36 = vld [vmem:[#allocation13 + $0x1680] sm:$0xff]  ;;  %v8463_v33 = vld [vmem:[#allocation13 + $0x1d10] sm:$0xff] }
 0xf42   : > { %6265 = vmatmul.mubr.f32.gmra.mxu0 %v10582_v49  ;;  %6382 = vmatprep.subr.mxu0 %v8441_v18  ;;  %v8465_v18 = vld [vmem:[#allocation13 + $0x1cf8] sm:$0xff] }
 0xf43   : > { %5978 = vmatpush2.msra.mxu1 %v8442_v8  ;;  %6383 = vmatpush1.msra.mxu0 %v8443_v34  ;;  %v8466_v8 = vld [vmem:[#allocation13 + $0x1660] sm:$0xff]  ;;  %v8467_v34 = vld [vmem:[#allocation13 + $0x1cf0] sm:$0xff] }
 0xf44   : > { %6442 = vmatprep.mubr.f32.mxu0 %v10588_v46  ;;  %5979 = vmatprep.subr.mxu1 %v8444_v60  ;;  %v8468_v60 = vld [vmem:[#allocation13 + $0x1648] sm:$0xff] }
 0xf45   : > { %6384 = vmatprep.subr.mxu0 %v8445_v0  ;;  %5980 = vmatpush2.msra.mxu1 %v8446_v19  ;;  %v8469_v0 = vld [vmem:[#allocation13 + $0x1cd8] sm:$0xff]  ;;  %v8470_v19 = vld [vmem:[#allocation13 + $0x1640] sm:$0xff] }
 0xf46   : > { %6385 = vmatpush1.msra.mxu0 %v8447_v30  ;;  %5981 = vmatprep.subr.mxu1 %v8448_v20  ;;  %v8471_v30 = vld [vmem:[#allocation13 + $0x1cd0] sm:$0xff]  ;;  %v8472_v20 = vld [vmem:[#allocation13 + $0x1628] sm:$0xff] }
 0xf47   : > { %6386 = vmatprep.subr.mxu0 %v8449_v3  ;;  %5982 = vmatpush2.msra.mxu1 %v8450_v5  ;;  %v8473_v3 = vld [vmem:[#allocation13 + $0x1cb8] sm:$0xff]  ;;  %v8474_v5 = vld [vmem:[#allocation13 + $0x1620] sm:$0xff] }
 0xf48   : > { %6387 = vmatpush1.msra.mxu0 %v8451_v44  ;;  %5983 = vmatprep.subr.mxu1 %v8452_v53  ;;  %v8475_v44 = vld [vmem:[#allocation13 + $0x1cb0] sm:$0xff]  ;;  %v8476_v53 = vld [vmem:[#allocation13 + $0x1608] sm:$0xff] }
 0xf49   : > { %6388 = vmatprep.subr.mxu0 %v8453_v17  ;;  %5984 = vmatpush2.msra.mxu1 %v8454_v40  ;;  %v8477_v17 = vld [vmem:[#allocation13 + $0x1c98] sm:$0xff]  ;;  %v8478_v40 = vld [vmem:[#allocation13 + $0x1600] sm:$0xff] }
 0xf4a   : > { %6389 = vmatpush1.msra.mxu0 %v8455_v23  ;;  %5985 = vmatprep.subr.mxu1 %v8456_v43  ;;  %v8479_v23 = vld [vmem:[#allocation13 + $0x1c90] sm:$0xff]  ;;  %v8480_v43 = vld [vmem:[#allocation13 + $0x19e8] sm:$0xff] }
 0xf4b   : > { %6390 = vmatprep.subr.mxu0 %v8457_v14  ;;  %5986 = vmatpush2.msra.mxu1 %v8458_v38  ;;  %v8481_v14 = vld [vmem:[#allocation13 + $0x1c78] sm:$0xff]  ;;  %v8482_v38 = vld [vmem:[#allocation13 + $0x19e0] sm:$0xff] }
 0xf4c   : > { %6391 = vmatpush1.msra.mxu0 %v8459_v62  ;;  %5987 = vmatprep.subr.mxu1 %v8460_v48  ;;  %v8483_v62 = vld [vmem:[#allocation13 + $0x1c70] sm:$0xff]  ;;  %v8484_v48 = vld [vmem:[#allocation13 + $0x19c8] sm:$0xff] }
 0xf4d   : > { %6392 = vmatprep.subr.mxu0 %v8461_v58  ;;  %5988 = vmatpush2.msra.mxu1 %v8462_v36  ;;  %v8485_v58 = vld [vmem:[#allocation13 + $0x1c58] sm:$0xff]  ;;  %v8486_v36 = vld [vmem:[#allocation13 + $0x19c0] sm:$0xff] }
 0xf4e   : > { %6393 = vmatpush1.msra.mxu0 %v8463_v33  ;;  %5989 = vmatprep.subr.mxu1 %v8464_v59  ;;  %v8487_v33 = vld [vmem:[#allocation13 + $0x1c50] sm:$0xff]  ;;  %v8489_v59 = vld [vmem:[#allocation13 + $0x1c38] sm:$0xff] }
 0xf4f   : > { %6394 = vmatprep.subr.mxu0 %v8465_v18  ;;  %5990 = vmatpush2.msra.mxu1 %v8466_v8  ;;  %v8490_v18 = vld [vmem:[#allocation13 + $0x19a0] sm:$0xff]  ;;  %v8492_v8 = vld [vmem:[#allocation13 + $0x1988] sm:$0xff] }
 0xf50   : > { %6395 = vmatpush1.msra.mxu0 %v8467_v34  ;;  %5991 = vmatprep.subr.mxu1 %v8468_v60  ;;  %v8493_v34 = vld [vmem:[#allocation13 + $0x1c18] sm:$0xff]  ;;  %v8494_v60 = vld [vmem:[#allocation13 + $0x1980] sm:$0xff] }
 0xf51   : > { %6396 = vmatprep.subr.mxu0 %v8469_v0  ;;  %5992 = vmatpush2.msra.mxu1 %v8470_v19  ;;  %v8495_v0 = vld [vmem:[#allocation13 + $0x1c10] sm:$0xff]  ;;  %v8496_v19 = vld [vmem:[#allocation13 + $0x1968] sm:$0xff] }
 0xf52   : > { %6397 = vmatpush1.msra.mxu0 %v8471_v30  ;;  %5993 = vmatprep.subr.mxu1 %v8472_v20  ;;  %v8498_v30 = vld [vmem:[#allocation13 + $0x1960] sm:$0xff]  ;;  %v8499_v20 = vld [vmem:[#allocation13 + $0x1ff0] sm:$0xff] }
 0xf53   : > { %6398 = vmatprep.subr.mxu0 %v8473_v3  ;;  %5994 = vmatpush2.msra.mxu1 %v8474_v5  ;;  %v8500_v3 = vld [vmem:[#allocation13 + $0x1948] sm:$0xff]  ;;  %v8502_v5 = vld [vmem:[#allocation13 + $0x1940] sm:$0xff] }
 0xf54   : > { %6399 = vmatpush1.msra.mxu0 %v8475_v44  ;;  %5995 = vmatprep.subr.mxu1 %v8476_v53  ;;  %v8503_v44 = vld [vmem:[#allocation13 + $0x1fd0] sm:$0xff]  ;;  %v8504_v53 = vld [vmem:[#allocation13 + $0x1928] sm:$0xff] }
 0xf55   : > { %6400 = vmatprep.subr.mxu0 %v8477_v17  ;;  %5996 = vmatpush2.msra.mxu1 %v8478_v40  ;;  %v8505_v17 = vld [vmem:[#allocation13 + $0x1fb8] sm:$0xff]  ;;  %v8506_v40 = vld [vmem:[#allocation13 + $0x1920] sm:$0xff] }
 0xf56   : > { %6401 = vmatpush1.msra.mxu0 %v8479_v23  ;;  %5998 = vmatmul.mubr.f32.vlgmr.msra.gmra.mxu1 %v10546_v25  ;;  %v8488_v25 = vld [vmem:[#allocation13 + $0x19a8] sm:$0xff]  ;;  %v8507_v23 = vld [vmem:[#allocation13 + $0x1fb0] sm:$0xff] }
 0xf57   : > { %6117 = vmatprep.subr.mxu1 %v8480_v43  ;;  %6402 = vmatprep.subr.mxu0 %v8481_v14  ;;  %v8508_v43 = vld [vmem:[#allocation13 + $0x1908] sm:$0xff]  ;;  %v8509_v14 = vld [vmem:[#allocation13 + $0x1f98] sm:$0xff] }
 0xf58   : > { %6003 = vmatprep.mubr.f32.mxu1 %v10552_v61  ;;  %6118 = vmatpush1.msra.mxu1 %v8482_v38  ;;  %v8491_v61 = vld [vmem:[#allocation13 + $0x1c30] sm:$0xff]  ;;  %v8510_v38 = vld [vmem:[#allocation13 + $0x1900] sm:$0xff] }
 0xf59   : > { %6403 = vmatpush1.msra.mxu0 %v8483_v62  ;;  %6119 = vmatprep.subr.mxu1 %v8484_v48  ;;  %v8511_v62 = vld [vmem:[#allocation13 + $0x1f90] sm:$0xff]  ;;  %v8512_v48 = vld [vmem:[#allocation13 + $0x18e8] sm:$0xff] }
 0xf5a   : > { %6404 = vmatprep.subr.mxu0 %v8485_v58  ;;  %6120 = vmatpush1.msra.mxu1 %v8486_v36  ;;  %v8513_v58 = vld [vmem:[#allocation13 + $0x1f78] sm:$0xff]  ;;  %v8514_v36 = vld [vmem:[#allocation13 + $0x18e0] sm:$0xff] }
 0xf5b   : > { %6405 = vmatpush1.msra.mxu0 %v8487_v33  ;;  %6004 = vmatmul.mubr.f32.gmra.mxu1 %v10557_v50  ;;  %v8497_v50 = vld [vmem:[#allocation13 + $0x1ff8] sm:$0xff]  ;;  %v8515_v33 = vld [vmem:[#allocation13 + $0x1f70] sm:$0xff] }
 0xf5c   : > { %6121 = vmatprep.subr.mxu1 %v8488_v25  ;;  %6406 = vmatprep.subr.mxu0 %v8489_v59  ;;  %v8516_v25 = vld [vmem:[#allocation13 + $0x18c8] sm:$0xff]  ;;  %v8517_v59 = vld [vmem:[#allocation13 + $0x1f58] sm:$0xff] }
 0xf5d   : > { %6122 = vmatpush1.msra.mxu1 %v8490_v18  ;;  %6181 = vmatprep.mubr.f32.mxu1 %v10563_v55  ;;  %v8501_v55 = vld [vmem:[#allocation13 + $0x1fd8] sm:$0xff]  ;;  %v8518_v18 = vld [vmem:[#allocation13 + $0x18c0] sm:$0xff] }
 0xf5e   : > { %6407 = vmatpush1.msra.mxu0 %v8491_v61  ;;  %6123 = vmatprep.subr.mxu1 %v8492_v8  ;;  %v8519_v61 = vld [vmem:[#allocation13 + $0x1f50] sm:$0xff]  ;;  %v8520_v8 = vld [vmem:[#allocation13 + $0x18a8] sm:$0xff] }
 0xf5f   : > { %6408 = vmatprep.subr.mxu0 %v8493_v34  ;;  %6124 = vmatpush1.msra.mxu1 %v8494_v60  ;;  %v8521_v34 = vld [vmem:[#allocation13 + $0x1f38] sm:$0xff]  ;;  %v8522_v60 = vld [vmem:[#allocation13 + $0x18a0] sm:$0xff] }
 0xf60   : > { %6409 = vmatpush1.msra.mxu0 %v8495_v0  ;;  %6125 = vmatprep.subr.mxu1 %v8496_v19  ;;  %v8523_v0 = vld [vmem:[#allocation13 + $0x1f30] sm:$0xff]  ;;  %v8524_v19 = vld [vmem:[#allocation13 + $0x1888] sm:$0xff] }
 0xf61   : > { %6410 = vmatprep.subr.mxu0 %v8497_v50  ;;  %6126 = vmatpush1.msra.mxu1 %v8498_v30  ;;  %v8525_v50 = vld [vmem:[#allocation13 + $0x1f18] sm:$0xff]  ;;  %v8526_v30 = vld [vmem:[#allocation13 + $0x1880] sm:$0xff] }
 0xf62   : > { %6411 = vmatpush2.msra.mxu0 %v8499_v20  ;;  %6127 = vmatprep.subr.mxu1 %v8500_v3  ;;  %v8527_v20 = vld [vmem:[#allocation13 + $0x1f10] sm:$0xff]  ;;  %v8528_v3 = vld [vmem:[#allocation13 + $0x1868] sm:$0xff] }
 0xf63   : > { %6412 = vmatprep.subr.mxu0 %v8501_v55  ;;  %6128 = vmatpush1.msra.mxu1 %v8502_v5  ;;  %v8529_v55 = vld [vmem:[#allocation13 + $0x1ef8] sm:$0xff]  ;;  %v8530_v5 = vld [vmem:[#allocation13 + $0x1860] sm:$0xff] }
 0xf64   : > { %6413 = vmatpush2.msra.mxu0 %v8503_v44  ;;  %6129 = vmatprep.subr.mxu1 %v8504_v53  ;;  %v8531_v44 = vld [vmem:[#allocation13 + $0x1ef0] sm:$0xff]  ;;  %v8532_v53 = vld [vmem:[#allocation13 + $0x1848] sm:$0xff] }
 0xf65   : > { %6414 = vmatprep.subr.mxu0 %v8505_v17  ;;  %6130 = vmatpush1.msra.mxu1 %v8506_v40  ;;  %v8533_v17 = vld [vmem:[#allocation13 + $0x1ed8] sm:$0xff]  ;;  %v8534_v40 = vld [vmem:[#allocation13 + $0x1840] sm:$0xff] }
 0xf66   : > { %6415 = vmatpush2.msra.mxu0 %v8507_v23  ;;  %6131 = vmatprep.subr.mxu1 %v8508_v43  ;;  %v8535_v23 = vld [vmem:[#allocation13 + $0x1ed0] sm:$0xff]  ;;  %v8536_v43 = vld [vmem:[#allocation13 + $0x1828] sm:$0xff] }
 0xf67   : > { %6416 = vmatprep.subr.mxu0 %v8509_v14  ;;  %6132 = vmatpush1.msra.mxu1 %v8510_v38  ;;  %v8537_v14 = vld [vmem:[#allocation13 + $0x1eb8] sm:$0xff]  ;;  %v8538_v38 = vld [vmem:[#allocation13 + $0x1820] sm:$0xff] }
 0xf68   : > { %6417 = vmatpush2.msra.mxu0 %v8511_v62  ;;  %6133 = vmatprep.subr.mxu1 %v8512_v48  ;;  %v8539_v62 = vld [vmem:[#allocation13 + $0x1eb0] sm:$0xff]  ;;  %v8540_v48 = vld [vmem:[#allocation13 + $0x1808] sm:$0xff] }
 0xf69   : > { %6418 = vmatprep.subr.mxu0 %v8513_v58  ;;  %6134 = vmatpush1.msra.mxu1 %v8514_v36  ;;  %v8541_v58 = vld [vmem:[#allocation13 + $0x1e98] sm:$0xff]  ;;  %v8542_v36 = vld [vmem:[#allocation13 + $0x1800] sm:$0xff] }
 0xf6a   : > { %6419 = vmatpush2.msra.mxu0 %v8515_v33  ;;  %6135 = vmatprep.subr.mxu1 %v8516_v25  ;;  %v8543_v33 = vld [vmem:[#allocation13 + $0x1e90] sm:$0xff]  ;;  %v8544_v25 = vld [vmem:[#allocation13 + $0x1be8] sm:$0xff] }
 0xf6b   : > { %6420 = vmatprep.subr.mxu0 %v8517_v59  ;;  %6136 = vmatpush1.msra.mxu1 %v8518_v18  ;;  %v8545_v59 = vld [vmem:[#allocation13 + $0x1e78] sm:$0xff]  ;;  %v8546_v18 = vld [vmem:[#allocation13 + $0x1be0] sm:$0xff] }
 0xf6c   : > { %6421 = vmatpush2.msra.mxu0 %v8519_v61  ;;  %6137 = vmatprep.subr.mxu1 %v8520_v8  ;;  %v8547_v61 = vld [vmem:[#allocation13 + $0x1e70] sm:$0xff]  ;;  %v8548_v8 = vld [vmem:[#allocation13 + $0x1bc8] sm:$0xff] }
 0xf6d   : > { %6422 = vmatprep.subr.mxu0 %v8521_v34  ;;  %6138 = vmatpush1.msra.mxu1 %v8522_v60  ;;  %v6282_v34 = vld [vmem:[#allocation2 + $0x18] sm:$0x7]  ;;  %v8549_v60 = vld [vmem:[#allocation13 + $0x1e58] sm:$0xff] }
 0xf6e   : > { %6423 = vmatpush2.msra.mxu0 %v8523_v0  ;;  %6139 = vmatprep.subr.mxu1 %v8524_v19  ;;  %v8550_v0 = vld [vmem:[#allocation13 + $0x1bc0] sm:$0xff]  ;;  %v6279_v19 = vld [vmem:[#allocation2 + $0x50] sm:$0xf8] }
 0xf6f   : > { %6424 = vmatprep.subr.mxu0 %v8525_v50  ;;  %6140 = vmatpush1.msra.mxu1 %v8526_v30  ;;  %v8551_v50 = vld [vmem:[#allocation13 + $0x1e50] sm:$0xff]  ;;  %v8552_v30 = vld [vmem:[#allocation13 + $0x1ba8] sm:$0xff] }
 0xf70   : > { %6425 = vmatpush2.msra.mxu0 %v8527_v20  ;;  %6141 = vmatprep.subr.mxu1 %v8528_v3  ;;  %v6288_v20 = vrot.slane %v10531_v47, 3  ;;  %v8553_v3 = vld [vmem:[#allocation13 + $0x1e38] sm:$0xff] }
 0xf71   : > { %6426 = vmatprep.subr.mxu0 %v8529_v55  ;;  %6142 = vmatpush1.msra.mxu1 %v8530_v5  ;;  %v8554_v55 = vld [vmem:[#allocation13 + $0x1ba0] sm:$0xff]  ;;  %v6295_v5 = vrot.slane %v6282_v34, 3  ;;  %v8567_v34 = vld [vmem:[#allocation13 + $0x21d0] sm:$0xff] }
 0xf72   : > { %6427 = vmatpush2.msra.mxu0 %v8531_v44  ;;  %6143 = vmatprep.subr.mxu1 %v8532_v53  ;;  %v8555_v44 = vld [vmem:[#allocation13 + $0x1e30] sm:$0xff]  ;;  %v8556_v53 = vld [vmem:[#allocation13 + $0x1b88] sm:$0xff] }
 0xf73   : > { %6428 = vmatprep.subr.mxu0 %v8533_v17  ;;  %6144 = vmatpush1.msra.mxu1 %v8534_v40  ;;  %v6287_v17 = vrot.slane %v6279_v19, 3  ;;  %v6281_v40 = vld [vmem:[#allocation2 + $0x8] sm:$0x7]  ;;  %v8569_v19 = vld [vmem:[#allocation13 + $0x21b8] sm:$0xff] }
 0xf74   : > { %6429 = vmatpush2.msra.mxu0 %v8535_v23  ;;  %6145 = vmatprep.subr.mxu1 %v8536_v43  ;;  %v8557_v23 = vld [vmem:[#allocation13 + $0x1e18] sm:$0xff]  ;;  %v8558_v43 = vld [vmem:[#allocation13 + $0x1b80] sm:$0xff] }
 0xf75   : > { %6430 = vmatprep.subr.mxu0 %v8537_v14  ;;  %6146 = vmatpush1.msra.mxu1 %v8538_v38  ;;  %v8559_v14 = vld [vmem:[#allocation13 + $0x1e10] sm:$0xff]  ;;  %v8560_v38 = vld [vmem:[#allocation13 + $0x1b68] sm:$0xff]  ;;  %v10597_v47 = vsel %vm4528_vm12, %v6287_v17, %v6288_v20  ;;  %v8577_v17 = vld [vmem:[#allocation13 + $0x2178] sm:$0xff] }
 0xf76   : > { %6431 = vmatpush2.msra.mxu0 %v8539_v62  ;;  %6147 = vmatprep.subr.mxu1 %v8540_v48  ;;  %v8561_v62 = vld [vmem:[#allocation13 + $0x21f8] sm:$0xff]  ;;  %v10603_v48 = vsel %vm4528_vm12, %v6291_v45, %v6295_v5  ;;  %v8568_v45 = vld [vmem:[#allocation13 + $0x1b28] sm:$0xff]  ;;  %v8574_v5 = vld [vmem:[#allocation13 + $0x1b00] sm:$0xff] }
 0xf77   : > { %6432 = vmatprep.subr.mxu0 %v8541_v58  ;;  %6148 = vmatpush1.msra.mxu1 %v8542_v36  ;;  %v6293_v58 = vrot.slane %v6281_v40, 3  ;;  %v8562_v36 = vld [vmem:[#allocation13 + $0x1b60] sm:$0xff] }
 0xf78   : > { %6433 = vmatpush2.msra.mxu0 %v8543_v33  ;;  %6149 = vmatprep.subr.mxu1 %v8544_v25  ;;  %v6464_v33 = vld [vmem:[#allocation2 + $0x60] sm:$0xf0]  ;;  %v8563_v25 = vld [vmem:[#allocation13 + $0x21f0] sm:$0xff] }
 0xf79   : > { %6434 = vmatprep.subr.mxu0 %v8545_v59  ;;  %6150 = vmatpush2.msra.mxu1 %v8546_v18  ;;  %v8564_v59 = vld [vmem:[#allocation13 + $0x1b48] sm:$0xff]  ;;  %v6475_v18 = vrot.slane %v10526_v52, 4  ;;  %v8578_v40 = vld [vmem:[#allocation13 + $0x1ae0] sm:$0xff]  ;;  %v6791_v52 = vld [vmem:[#allocation16 + $0x2d0] sm:$0xff] }
 0xf7a   : > { %6435 = vmatpush2.msra.mxu0 %v8547_v61  ;;  %6151 = vmatprep.subr.mxu1 %v8548_v8  ;;  %v8565_v61 = vld [vmem:[#allocation13 + $0x21d8] sm:$0xff]  ;;  %v8566_v8 = vld [vmem:[#allocation13 + $0x1b40] sm:$0xff] }
 0xf7b   : > { %6436 = vmatprep.subr.mxu0 %v8549_v60  ;;  %6152 = vmatpush2.msra.mxu1 %v8550_v0  ;;  %v10608_v60 = vsel %vm4528_vm12, %v6288_v20, %v6293_v58  ;;  %v6474_v0 = vrot.slane %v6464_v33, 4  ;;  %v8573_v20 = vld [vmem:[#allocation13 + $0x2198] sm:$0xff]  ;;  %v8584_v58 = vld [vmem:[#allocation13 + $0x1aa8] sm:$0xff]  ;;  %v8586_v33 = vld [vmem:[#allocation13 + $0x1aa0] sm:$0xff] }
 0xf7c   : > { %6437 = vmatpush2.msra.mxu0 %v8551_v50  ;;  %6153 = vmatprep.subr.mxu1 %v8552_v30  ;;  %v8570_v50 = vld [vmem:[#allocation13 + $0x1b20] sm:$0xff]  ;;  %v8571_v30 = vld [vmem:[#allocation13 + $0x21b0] sm:$0xff] }
 0xf7d   : > { %6438 = vmatprep.subr.mxu0 %v8553_v3  ;;  %6154 = vmatpush2.msra.mxu1 %v8554_v55  ;;  %v10614_v3 = vsel %vm2669_vm6, %v6474_v0, %v6475_v18  ;;  %v8572_v55 = vld [vmem:[#allocation13 + $0x1b08] sm:$0xff]  ;;  %v8593_v0 = vld [vmem:[#allocation13 + $0x20f8] sm:$0xff] }
 0xf7e   : > { %6439 = vmatpush2.msra.mxu0 %v8555_v44  ;;  %6155 = vmatprep.subr.mxu1 %v8556_v53  ;;  %v8575_v44 = vld [vmem:[#allocation13 + $0x2190] sm:$0xff]  ;;  %v8576_v53 = vld [vmem:[#allocation13 + $0x1ae8] sm:$0xff] }
 0xf7f   : > { %6440 = vmatprep.subr.mxu0 %v8557_v23  ;;  %6156 = vmatpush2.msra.mxu1 %v8558_v43  ;;  %v8579_v23 = vld [vmem:[#allocation13 + $0x2170] sm:$0xff]  ;;  %v8580_v43 = vld [vmem:[#allocation13 + $0x1ac8] sm:$0xff] }
 0xf80   : > { %6441 = vmatpush2.msra.mxu0 %v8559_v14  ;;  %6157 = vmatprep.subr.mxu1 %v8560_v38  ;;  %v8581_v14 = vld [vmem:[#allocation13 + $0x2158] sm:$0xff]  ;;  %v8582_v38 = vld [vmem:[#allocation13 + $0x1ac0] sm:$0xff] }
 0xf81   : > { %6443 = vmatmul.mubr.f32.vlgmr.msra.gmra.mxu0 %v10597_v47  ;;  %6562 = vmatprep.subr.mxu0 %v8561_v62  ;;  %v8583_v62 = vld [vmem:[#allocation13 + $0x2150] sm:$0xff] }
 0xf82   : > { %6158 = vmatpush2.msra.mxu1 %v8562_v36  ;;  %6448 = vmatprep.mubr.f32.mxu0 %v10603_v48  ;;  %v8585_v36 = vld [vmem:[#allocation13 + $0x2138] sm:$0xff] }
 0xf83   : > { %6563 = vmatpush1.msra.mxu0 %v8563_v25  ;;  %6159 = vmatprep.subr.mxu1 %v8564_v59  ;;  %v8587_v25 = vld [vmem:[#allocation13 + $0x2130] sm:$0xff]  ;;  %v8588_v59 = vld [vmem:[#allocation13 + $0x1a88] sm:$0xff] }
 0xf84   : > { %6564 = vmatprep.subr.mxu0 %v8565_v61  ;;  %6160 = vmatpush2.msra.mxu1 %v8566_v8  ;;  %v8589_v61 = vld [vmem:[#allocation13 + $0x2118] sm:$0xff]  ;;  %v8590_v8 = vld [vmem:[#allocation13 + $0x1a80] sm:$0xff] }
 0xf85   : > { %6565 = vmatpush1.msra.mxu0 %v8567_v34  ;;  %6161 = vmatprep.subr.mxu1 %v8568_v45  ;;  %v8591_v34 = vld [vmem:[#allocation13 + $0x2110] sm:$0xff]  ;;  %v8592_v45 = vld [vmem:[#allocation13 + $0x1a68] sm:$0xff] }
 0xf86   : > { %6449 = vmatmul.mubr.f32.gmra.mxu0 %v10608_v60  ;;  %6566 = vmatprep.subr.mxu0 %v8569_v19  ;;  %v8594_v19 = vld [vmem:[#allocation13 + $0x1a60] sm:$0xff] }
 0xf87   : > { %6162 = vmatpush2.msra.mxu1 %v8570_v50  ;;  %6567 = vmatpush1.msra.mxu0 %v8571_v30  ;;  %v8595_v50 = vld [vmem:[#allocation13 + $0x20f0] sm:$0xff]  ;;  %v8596_v30 = vld [vmem:[#allocation13 + $0x1a48] sm:$0xff] }
 0xf88   : > { %6626 = vmatprep.mubr.f32.mxu0 %v10614_v3  ;;  %6163 = vmatprep.subr.mxu1 %v8572_v55  ;;  %v8597_v55 = vld [vmem:[#allocation13 + $0x20d8] sm:$0xff] }
 0xf89   : > { %6568 = vmatprep.subr.mxu0 %v8573_v20  ;;  %6164 = vmatpush2.msra.mxu1 %v8574_v5  ;;  %v8598_v20 = vld [vmem:[#allocation13 + $0x1a40] sm:$0xff]  ;;  %v8599_v5 = vld [vmem:[#allocation13 + $0x20d0] sm:$0xff] }
 0xf8a   : > { %6569 = vmatpush1.msra.mxu0 %v8575_v44  ;;  %6165 = vmatprep.subr.mxu1 %v8576_v53  ;;  %v8600_v44 = vld [vmem:[#allocation13 + $0x1a28] sm:$0xff]  ;;  %v8601_v53 = vld [vmem:[#allocation13 + $0x20b8] sm:$0xff] }
 0xf8b   : > { %6570 = vmatprep.subr.mxu0 %v8577_v17  ;;  %6166 = vmatpush2.msra.mxu1 %v8578_v40  ;;  %v8602_v17 = vld [vmem:[#allocation13 + $0x1a20] sm:$0xff]  ;;  %v8603_v40 = vld [vmem:[#allocation13 + $0x20b0] sm:$0xff] }
 0xf8c   : > { %6571 = vmatpush1.msra.mxu0 %v8579_v23  ;;  %6167 = vmatprep.subr.mxu1 %v8580_v43  ;;  %v8604_v23 = vld [vmem:[#allocation13 + $0x1a08] sm:$0xff]  ;;  %v8605_v43 = vld [vmem:[#allocation13 + $0x2098] sm:$0xff] }
 0xf8d   : > { %6572 = vmatprep.subr.mxu0 %v8581_v14  ;;  %6168 = vmatpush2.msra.mxu1 %v8582_v38  ;;  %v8606_v14 = vld [vmem:[#allocation13 + $0x1a00] sm:$0xff]  ;;  %v8607_v38 = vld [vmem:[#allocation13 + $0x2090] sm:$0xff] }
 0xf8e   : > { %6573 = vmatpush1.msra.mxu0 %v8583_v62  ;;  %6169 = vmatprep.subr.mxu1 %v8584_v58  ;;  %v8608_v62 = vld [vmem:[#allocation13 + $0x1de8] sm:$0xff]  ;;  %v8609_v58 = vld [vmem:[#allocation13 + $0x2078] sm:$0xff] }
 0xf8f   : > { %6574 = vmatprep.subr.mxu0 %v8585_v36  ;;  %6170 = vmatpush2.msra.mxu1 %v8586_v33  ;;  %v8610_v36 = vld [vmem:[#allocation13 + $0x1de0] sm:$0xff]  ;;  %v8611_v33 = vld [vmem:[#allocation13 + $0x2070] sm:$0xff] }
 0xf90   : > { %6575 = vmatpush1.msra.mxu0 %v8587_v25  ;;  %6171 = vmatprep.subr.mxu1 %v8588_v59  ;;  %v8612_v25 = vld [vmem:[#allocation13 + $0x1dc8] sm:$0xff]  ;;  %v8613_v59 = vld [vmem:[#allocation13 + $0x2058] sm:$0xff] }
 0xf91   : > { %6576 = vmatprep.subr.mxu0 %v8589_v61  ;;  %6172 = vmatpush2.msra.mxu1 %v8590_v8  ;;  %v8614_v61 = vld [vmem:[#allocation13 + $0x1dc0] sm:$0xff]  ;;  %v8615_v8 = vld [vmem:[#allocation13 + $0x2050] sm:$0xff] }
 0xf92   : > { %6577 = vmatpush1.msra.mxu0 %v8591_v34  ;;  %6173 = vmatprep.subr.mxu1 %v8592_v45  ;;  %v8617_v34 = vld [vmem:[#allocation13 + $0x2038] sm:$0xff]  ;;  %v8618_v45 = vld [vmem:[#allocation13 + $0x1da0] sm:$0xff] }
 0xf93   : > { %6578 = vmatprep.subr.mxu0 %v8593_v0  ;;  %6174 = vmatpush2.msra.mxu1 %v8594_v19  ;;  %v8620_v0 = vld [vmem:[#allocation13 + $0x1d88] sm:$0xff]  ;;  %v8621_v19 = vld [vmem:[#allocation13 + $0x2018] sm:$0xff] }
 0xf94   : > { %6579 = vmatpush1.msra.mxu0 %v8595_v50  ;;  %6175 = vmatprep.subr.mxu1 %v8596_v30  ;;  %v8622_v50 = vld [vmem:[#allocation13 + $0x1d80] sm:$0xff]  ;;  %v8623_v30 = vld [vmem:[#allocation13 + $0x2010] sm:$0xff] }
 0xf95   : > { %6580 = vmatprep.subr.mxu0 %v8597_v55  ;;  %6176 = vmatpush2.msra.mxu1 %v8598_v20  ;;  %v8624_v55 = vld [vmem:[#allocation13 + $0x1d68] sm:$0xff]  ;;  %v8626_v20 = vld [vmem:[#allocation13 + $0x1d60] sm:$0xff] }
 0xf96   : > { %6581 = vmatpush1.msra.mxu0 %v8599_v5  ;;  %6177 = vmatprep.subr.mxu1 %v8600_v44  ;;  %v8627_v5 = vld [vmem:[#allocation13 + $0x23f0] sm:$0xff]  ;;  %v8628_v44 = vld [vmem:[#allocation13 + $0x1d48] sm:$0xff] }
 0xf97   : > { %6582 = vmatprep.subr.mxu0 %v8601_v53  ;;  %6178 = vmatpush2.msra.mxu1 %v8602_v17  ;;  %v8630_v53 = vld [vmem:[#allocation13 + $0x1d40] sm:$0xff]  ;;  %v8631_v17 = vld [vmem:[#allocation13 + $0x23d0] sm:$0xff] }
 0xf98   : > { %6583 = vmatpush1.msra.mxu0 %v8603_v40  ;;  %6179 = vmatprep.subr.mxu1 %v8604_v23  ;;  %v8632_v40 = vld [vmem:[#allocation13 + $0x1d28] sm:$0xff]  ;;  %v8633_v23 = vld [vmem:[#allocation13 + $0x23b8] sm:$0xff] }
 0xf99   : > { %6584 = vmatprep.subr.mxu0 %v8605_v43  ;;  %6180 = vmatpush2.msra.mxu1 %v8606_v14  ;;  %v8634_v43 = vld [vmem:[#allocation13 + $0x1d20] sm:$0xff]  ;;  %v8635_v14 = vld [vmem:[#allocation13 + $0x23b0] sm:$0xff] }
 0xf9a   : > { %6585 = vmatpush1.msra.mxu0 %v8607_v38  ;;  %6182 = vmatmul.mubr.f32.vlgmr.msra.gmra.mxu1 %v10571_v32  ;;  %v8616_v32 = vld [vmem:[#allocation13 + $0x1da8] sm:$0xff] }
 0xf9b   : > { %6301 = vmatprep.subr.mxu1 %v8608_v62  ;;  %6586 = vmatprep.subr.mxu0 %v8609_v58  ;;  %v8636_v38 = vld [vmem:[#allocation13 + $0x1d08] sm:$0xff]  ;;  %v8637_v62 = vld [vmem:[#allocation13 + $0x2398] sm:$0xff]  ;;  %v8638_v58 = vld [vmem:[#allocation13 + $0x1d00] sm:$0xff] }
 0xf9c   : > { %6187 = vmatprep.mubr.f32.mxu1 %v10577_v51  ;;  %6302 = vmatpush1.msra.mxu1 %v8610_v36  ;;  %v8619_v51 = vld [vmem:[#allocation13 + $0x2030] sm:$0xff] }
 0xf9d   : > { %6587 = vmatpush1.msra.mxu0 %v8611_v33  ;;  %6303 = vmatprep.subr.mxu1 %v8612_v25  ;;  %v8639_v36 = vld [vmem:[#allocation13 + $0x2390] sm:$0xff]  ;;  %v8640_v33 = vld [vmem:[#allocation13 + $0x1ce8] sm:$0xff]  ;;  %v8641_v25 = vld [vmem:[#allocation13 + $0x2378] sm:$0xff] }
 0xf9e   : > { %6588 = vmatprep.subr.mxu0 %v8613_v59  ;;  %6304 = vmatpush1.msra.mxu1 %v8614_v61  ;;  %v8642_v59 = vld [vmem:[#allocation13 + $0x1ce0] sm:$0xff]  ;;  %v8643_v61 = vld [vmem:[#allocation13 + $0x2370] sm:$0xff] }
 0xf9f   : > { %6589 = vmatpush1.msra.mxu0 %v8615_v8  ;;  %6188 = vmatmul.mubr.f32.gmra.mxu1 %v10582_v49  ;;  %v8625_v49 = vld [vmem:[#allocation13 + $0x23f8] sm:$0xff]  ;;  %v8644_v8 = vld [vmem:[#allocation13 + $0x1cc8] sm:$0xff] }
 0xfa0   : > { %6305 = vmatprep.subr.mxu1 %v8616_v32  ;;  %6590 = vmatprep.subr.mxu0 %v8617_v34  ;;  %v8645_v32 = vld [vmem:[#allocation13 + $0x2358] sm:$0xff]  ;;  %v8646_v34 = vld [vmem:[#allocation13 + $0x1cc0] sm:$0xff] }
 0xfa1   : > { %6306 = vmatpush1.msra.mxu1 %v8618_v45  ;;  %6365 = vmatprep.mubr.f32.mxu1 %v10588_v46  ;;  %v8629_v46 = vld [vmem:[#allocation13 + $0x23d8] sm:$0xff]  ;;  %v8647_v45 = vld [vmem:[#allocation13 + $0x2350] sm:$0xff] }
 0xfa2   : > { %6591 = vmatpush1.msra.mxu0 %v8619_v51  ;;  %6307 = vmatprep.subr.mxu1 %v8620_v0  ;;  %v8648_v51 = vld [vmem:[#allocation13 + $0x1ca8] sm:$0xff]  ;;  %v8649_v0 = vld [vmem:[#allocation13 + $0x2338] sm:$0xff] }
 0xfa3   : > { %6592 = vmatprep.subr.mxu0 %v8621_v19  ;;  %6308 = vmatpush1.msra.mxu1 %v8622_v50  ;;  %v8650_v19 = vld [vmem:[#allocation13 + $0x1ca0] sm:$0xff]  ;;  %v8651_v50 = vld [vmem:[#allocation13 + $0x2330] sm:$0xff] }
 0xfa4   : > { %6593 = vmatpush1.msra.mxu0 %v8623_v30  ;;  %6309 = vmatprep.subr.mxu1 %v8624_v55  ;;  %v8652_v30 = vld [vmem:[#allocation13 + $0x1c88] sm:$0xff]  ;;  %v8653_v55 = vld [vmem:[#allocation13 + $0x2318] sm:$0xff] }
 0xfa5   : > { %6594 = vmatprep.subr.mxu0 %v8625_v49  ;;  %6310 = vmatpush1.msra.mxu1 %v8626_v20  ;;  %v8654_v49 = vld [vmem:[#allocation13 + $0x1c80] sm:$0xff]  ;;  %v2830_v20 = vadd.f32 %v10089_v21, %v10085_v29  ;;  %v8663_v21 = vld [vmem:[#allocation13 + $0x22d0] sm:$0xff] }
 0xfa6   : > { %6595 = vmatpush2.msra.mxu0 %v8627_v5  ;;  %6311 = vmatprep.subr.mxu1 %v8628_v44  ;;  %v8655_v5 = vld [vmem:[#allocation13 + $0x2310] sm:$0xff]  ;;  %v8656_v44 = vld [vmem:[#allocation13 + $0x1c68] sm:$0xff] }
 0xfa7   : > { %6596 = vmatprep.subr.mxu0 %v8629_v46  ;;  %6312 = vmatpush1.msra.mxu1 %v8630_v53  ;;  %v8657_v46 = vld [vmem:[#allocation13 + $0x22f8] sm:$0xff]  ;;  %v8658_v53 = vld [vmem:[#allocation13 + $0x1c60] sm:$0xff] }
 0xfa8   : > { %6597 = vmatpush2.msra.mxu0 %v8631_v17  ;;  %6313 = vmatprep.subr.mxu1 %v8632_v40  ;;  %v3147_v17 = vadd.f32 %v10123_v16, %v2830_v20  ;;  %v8659_v40 = vld [vmem:[#allocation13 + $0x22f0] sm:$0xff] }
 0xfa9   : > { %6598 = vmatprep.subr.mxu0 %v8633_v23  ;;  %6314 = vmatpush1.msra.mxu1 %v8634_v43  ;;  %v8660_v23 = vld [vmem:[#allocation13 + $0x1c48] sm:$0xff]  ;;  %v8661_v43 = vld [vmem:[#allocation13 + $0x22d8] sm:$0xff]  ;;  %v8679_v20 = vld [vmem:[#allocation13 + $0x2250] sm:$0xff] }
 0xfaa   : > { %6599 = vmatpush2.msra.mxu0 %v8635_v14  ;;  %6315 = vmatprep.subr.mxu1 %v8636_v38  ;;  %v8662_v14 = vld [vmem:[#allocation13 + $0x1c40] sm:$0xff]  ;;  %v3461_v29 = vadd.f32 %v10184_v1, %v3147_v17  ;;  %v8664_v38 = vld [vmem:[#allocation13 + $0x1c28] sm:$0xff] }
 0xfab   : > { %6600 = vmatprep.subr.mxu0 %v8637_v62  ;;  %6316 = vmatpush1.msra.mxu1 %v8638_v58  ;;  %v8665_v62 = vld [vmem:[#allocation13 + $0x22b8] sm:$0xff]  ;;  %v8666_v58 = vld [vmem:[#allocation13 + $0x1c20] sm:$0xff] }
 0xfac   : > { %6601 = vmatpush2.msra.mxu0 %v8639_v36  ;;  %6317 = vmatprep.subr.mxu1 %v8640_v33  ;;  %v3754_v16 = vadd.f32 %v10250_v63, %v3461_v29  ;;  %v8667_v36 = vld [vmem:[#allocation13 + $0x22b0] sm:$0xff]  ;;  %v8668_v33 = vld [vmem:[#allocation13 + $0x1c08] sm:$0xff]  ;;  %v8683_v17 = vld [vmem:[#allocation13 + $0x1fa0] sm:$0xff] }
 0xfad   : > { %6602 = vmatprep.subr.mxu0 %v8641_v25  ;;  %6318 = vmatpush1.msra.mxu1 %v8642_v59  ;;  %v10626_v25 = vpop.f32.mrf.mxu0  ;;  %v8669_v59 = vld [vmem:[#allocation13 + $0x2298] sm:$0xff]  ;;  %v8684_v29 = vld [vmem:[#allocation13 + $0x2230] sm:$0xff] }
 0xfae   : > { %6603 = vmatpush2.msra.mxu0 %v8643_v61  ;;  %6319 = vmatprep.subr.mxu1 %v8644_v8  ;;  %v8670_v61 = vld [vmem:[#allocation13 + $0x1c00] sm:$0xff]  ;;  %v4072_v1 = vadd.f32 %v10298_v13, %v3754_v16  ;;  %v8671_v8 = vld [vmem:[#allocation13 + $0x2290] sm:$0xff] }
 0xfaf   : > { %6604 = vmatprep.subr.mxu0 %v8645_v32  ;;  %6320 = vmatpush1.msra.mxu1 %v8646_v34  ;;  %v8672_v32 = vld [vmem:[#allocation13 + $0x1fe8] sm:$0xff]  ;;  %v8673_v34 = vld [vmem:[#allocation13 + $0x2278] sm:$0xff]  ;;  %v8687_v16 = vld [vmem:[#allocation13 + $0x1f80] sm:$0xff] }
 0xfb0   : > { %6605 = vmatpush2.msra.mxu0 %v8647_v45  ;;  %6321 = vmatprep.subr.mxu1 %v8648_v51  ;;  %v8674_v45 = vld [vmem:[#allocation13 + $0x1fe0] sm:$0xff]  ;;  %v4386_v63 = vadd.f32 %v10361_v11, %v4072_v1  ;;  %v8675_v51 = vld [vmem:[#allocation13 + $0x2270] sm:$0xff] }
 0xfb1   : > { %6606 = vmatprep.subr.mxu0 %v8649_v0  ;;  %6322 = vmatpush1.msra.mxu1 %v8650_v19  ;;  %v8676_v0 = vld [vmem:[#allocation13 + $0x1fc8] sm:$0xff]  ;;  %v6466_v19 = vld [vmem:[#allocation2 + $0x18] sm:$0xf]  ;;  %v10631_v11 = vld [vmem:[#allocation14] sm:$0xf] }
 0xfb2   : > { %6607 = vmatpush2.msra.mxu0 %v8651_v50  ;;  %6323 = vmatprep.subr.mxu1 %v8652_v30  ;;  %v5001_v50 = vpop.f32.mrf.mxu0  ;;  %v8677_v30 = vld [vmem:[#allocation13 + $0x2258] sm:$0xff]  ;;  %v6463_v13 = vld [vmem:[#allocation2 + $0x50] sm:$0xf0] }
 0xfb3   : > { %6608 = vmatprep.subr.mxu0 %v8653_v55  ;;  %6324 = vmatpush1.msra.mxu1 %v8654_v49  ;;  %v8678_v55 = vld [vmem:[#allocation13 + $0x1fc0] sm:$0xff]  ;;  %v4700_v49 = vadd.f32 %v10423_v56, %v4386_v63  ;;  %v8685_v56 = vld [vmem:[#allocation13 + $0x1f88] sm:$0xff] }
 0xfb4   : > { %6609 = vmatpush2.msra.mxu0 %v8655_v5  ;;  %6325 = vmatprep.subr.mxu1 %v8656_v44  ;;  %v8680_v5 = vld [vmem:[#allocation13 + $0x1fa8] sm:$0xff] }
 0xfb5   : > { %6610 = vmatprep.subr.mxu0 %v8657_v46  ;;  %6326 = vmatpush1.msra.mxu1 %v8658_v53  ;;  %v8681_v44 = vld [vmem:[#allocation2 + $0x68] sm:$0xff]  ;;  %v8682_v53 = vld [vmem:[#allocation13 + $0x2238] sm:$0xff] }
 0xfb6   : > { %6611 = vmatpush2.msra.mxu0 %v8659_v40  ;;  %6327 = vmatprep.subr.mxu1 %v8660_v23  ;;  %v6472_v46 = vrot.slane %v8681_v44, 4  ;;  %v6479_v40 = vrot.slane %v6466_v19, 4  ;;  %v5013_v23 = vadd.f32 %v5001_v50, %v4700_v49  ;;  %v6793_v63 = vld [vmem:[#allocation16 + $0x2e0] sm:$0xff] }
 0xfb7   : > { %6612 = vmatprep.subr.mxu0 %v8661_v43  ;;  %6328 = vmatpush1.msra.mxu1 %v8662_v14  ;;  %v10921_v43 = vld [vmem:[#allocation27_spill] sm:$0xff]  ;;  %v8692_v19 = vld [vmem:[#allocation13 + $0x1f40] sm:$0xff] }
 0xfb8   : > { %6613 = vmatpush2.msra.mxu0 %v8663_v21  ;;  %6329 = vmatprep.subr.mxu1 %v8664_v38  ;;  %v10635_v14 = vrot.slane %v10631_v11, %v10921_v43  ;;  %v6471_v21 = vrot.slane %v6463_v13, 4  ;;  %v6796_v38 = vld [vmem:[#allocation16 + $0x2f8] sm:$0xff]  ;;  %v10644_v1 = vsel %vm2669_vm6, %v6475_v18, %v6479_v40  ;;  %v8693_v18 = vld [vmem:[#allocation13 + $0x1f28] sm:$0xff] }
 0xfb9   : > { %6614 = vmatprep.subr.mxu0 %v8665_v62  ;;  %6330 = vmatpush1.msra.mxu1 %v8666_v58  ;;  %v6465_v62 = vld [vmem:[#allocation2 + $0x8] sm:$0xf]  ;;  %v8686_v58 = vld [vmem:[#allocation13 + $0x2218] sm:$0xff] }
 0xfba   : > { %6615 = vmatpush2.msra.mxu0 %v8667_v36  ;;  %6331 = vmatprep.subr.mxu1 %v8668_v33  ;;  %v8688_v36 = vld [vmem:[#allocation13 + $0x2210] sm:$0xff]  ;;  %v8689_v33 = vld [vmem:[#allocation13 + $0x1f68] sm:$0xff]  ;;  %v8694_v13 = vld [vmem:[#allocation13 + $0x1f20] sm:$0xff] }
 0xfbb   : > { %6616 = vmatprep.subr.mxu0 %v8669_v59  ;;  %6332 = vmatpush1.msra.mxu1 %v8670_v61  ;;  %v10638_v59 = vsel %vm2669_vm6, %v6471_v21, %v6472_v46  ;;  %v6795_v61 = vld [vmem:[#allocation16 + $0x2f0] sm:$0xff]  ;;  %v6789_v49 = vld [vmem:[#allocation16 + $0x2c0] sm:$0xff] }
 0xfbc   : > { %6617 = vmatpush2.msra.mxu0 %v8671_v8  ;;  %6333 = vmatprep.subr.mxu1 %v8672_v32  ;;  %v6794_v8 = vld [vmem:[#allocation16 + $0x2e8] sm:$0xff]  ;;  %v6477_v32 = vrot.slane %v6465_v62, 4  ;;  %v8696_v44 = vld [vmem:[#allocation13 + $0x1f00] sm:$0xff] }
 0xfbd   : > { %6618 = vmatprep.subr.mxu0 %v8673_v34  ;;  %6334 = vmatpush2.msra.mxu1 %v8674_v45  ;;  %v6672_v34 = vadd.f32 %v10635_v14, %v5013_v23  ;;  %v8690_v45 = vld [vmem:[#allocation13 + $0x1f60] sm:$0xff]  ;;  %v8701_v62 = vld [vmem:[#allocation13 + $0x1ea8] sm:$0xff] }
 0xfbe   : > { %6619 = vmatpush2.msra.mxu0 %v8675_v51  ;;  %6335 = vmatprep.subr.mxu1 %v8676_v0  ;;  %v8691_v51 = vld [vmem:[#allocation13 + $0x1f48] sm:$0xff]  ;;  %v6792_v0 = vld [vmem:[#allocation16 + $0x2d8] sm:$0xff]  ;;  %v10649_v50 = vsel %vm2669_vm6, %v6472_v46, %v6477_v32  ;;  %v6779_v32 = vld [vmem:[#allocation16 + $0x270] sm:$0xff] }
 0xfbf   : > { %6620 = vmatprep.subr.mxu0 %v8677_v30  ;;  %6336 = vmatpush2.msra.mxu1 %v8678_v55  ;;  %v6688_v30 = vmax.f32 %v6672_v34, 0.0  ;;  %v6790_v55 = vld [vmem:[#allocation16 + $0x2c8] sm:$0xff]  ;;  %v8698_v40 = vld [vmem:[#allocation13 + $0x1ee0] sm:$0xff] }
 0xfc0   : > { %6621 = vmatpush2.msra.mxu0 %v8679_v20  ;;  %6337 = vmatprep.subr.mxu1 %v8680_v5  ;;  %v8695_v20 = vld [vmem:[#allocation13 + $0x1f08] sm:$0xff]  ;;  %v6788_v5 = vld [vmem:[#allocation16 + $0x2b8] sm:$0xff] }
 0xfc1   : > { %6622 = vmatprep.subr.mxu0 %v8682_v53  ;;  %6338 = vmatpush2.msra.mxu1 %v8683_v17  ;;  %v6787_v53 = vld [vmem:[#allocation16 + $0x2b0] sm:$0xff]  ;;  %v8697_v46 = vld [vmem:[#allocation13 + $0x1ee8] sm:$0xff]  ;;  %v8700_v21 = vld [vmem:[#allocation13 + $0x1ec0] sm:$0xff] }
 0xfc2   : > { %6623 = vmatpush2.msra.mxu0 %v8684_v29  ;;  %6339 = vmatprep.subr.mxu1 %v8685_v56  ;;  %v6786_v17 = vld [vmem:[#allocation16 + $0x2a8] sm:$0xff]  ;;  %v6785_v23 = vld [vmem:[#allocation16 + $0x2a0] sm:$0xff]  ;;  %v6784_v56 = vld [vmem:[#allocation16 + $0x298] sm:$0xff] }
 0xfc3   : > { %6624 = vmatprep.subr.mxu0 %v8686_v58  ;;  %6340 = vmatpush2.msra.mxu1 %v8687_v16  ;;  %v8699_v29 = vld [vmem:[#allocation13 + $0x1ec8] sm:$0xff]  ;;  %v8702_v16 = vld [vmem:[#allocation13 + $0x1ea0] sm:$0xff] }
 0xfc4   : > { %6625 = vmatpush2.msra.mxu0 %v8688_v36  ;;  %6341 = vmatprep.subr.mxu1 %v8689_v33  ;;  %v6782_v58 = vld [vmem:[#allocation16 + $0x288] sm:$0xff]  ;;  %v6781_v36 = vld [vmem:[#allocation16 + $0x280] sm:$0xff] }
 0xfc5   : > { %6627 = vmatmul.mubr.f32.vlgmr.msra.gmra.mxu0 %v10638_v59  ;;  %6926 = vmatprep.subr.mxu0 %v6796_v38  ;;  %v6783_v38 = vld [vmem:[#allocation16 + $0x290] sm:$0xff]  ;;  %v8703_v33 = vld [vmem:[#allocation13 + $0x1e88] sm:$0xff] }
 0xfc6   : > { %6342 = vmatpush2.msra.mxu1 %v8690_v45  ;;  %6632 = vmatprep.mubr.f32.mxu0 %v10644_v1  ;;  %v8705_v34 = vld [vmem:[#allocation13 + $0x1e68] sm:$0xff] }
 0xfc7   : > { %6927 = vmatpush1.msra.mxu0 %v6795_v61  ;;  %6343 = vmatprep.subr.mxu1 %v8691_v51  ;;  %v6780_v61 = vld [vmem:[#allocation16 + $0x278] sm:$0xff]  ;;  %v6778_v45 = vld [vmem:[#allocation16 + $0x268] sm:$0xff]  ;;  %v6777_v51 = vld [vmem:[#allocation16 + $0x260] sm:$0xff] }
 0xfc8   : > { %6928 = vmatprep.subr.mxu0 %v6794_v8  ;;  %6344 = vmatpush2.msra.mxu1 %v8692_v19  ;;  %v8704_v8 = vld [vmem:[#allocation13 + $0x1e80] sm:$0xff] }
 0xfc9   : > { %6929 = vmatpush1.msra.mxu0 %v6793_v63  ;;  %6345 = vmatprep.subr.mxu1 %v8693_v18  ;;  %v8706_v63 = vld [vmem:[#allocation13 + $0x1e60] sm:$0xff]  ;;  %v6775_v18 = vld [vmem:[#allocation16 + $0x250] sm:$0xff] }
 0xfca   : > { %6633 = vmatmul.mubr.f32.gmra.mxu0 %v10649_v50  ;;  %6930 = vmatprep.subr.mxu0 %v6792_v0  ;;  %v8707_v0 = vld [vmem:[#allocation13 + $0x1e48] sm:$0xff]  ;;  %v6776_v19 = vld [vmem:[#allocation16 + $0x258] sm:$0xff] }
 0xfcb   : > { %6346 = vmatpush2.msra.mxu1 %v8694_v13  ;;  %6931 = vmatpush1.msra.mxu0 %v6791_v52  ;;  %v8708_v52 = vld [vmem:[#allocation13 + $0x1e40] sm:$0xff] }
 0xfcc   : > { %6990 = vmatprep.mubr.f32.mxu0 %v6688_v30  ;;  %6347 = vmatprep.subr.mxu1 %v8695_v20  ;;  %v8709_v30 = vld [vmem:[#allocation13 + $0x1e28] sm:$0xff]  ;;  %v8710_v13 = vld [vmem:[#allocation13 + $0x1e20] sm:$0xff] }
 0xfcd   : > { %6932 = vmatprep.subr.mxu0 %v6790_v55  ;;  %6348 = vmatpush2.msra.mxu1 %v8696_v44  ;;  %v6774_v55 = vld [vmem:[#allocation16 + $0x248] sm:$0xff]  ;;  %v8712_v44 = vld [vmem:[#allocation13 + $0x1e00] sm:$0xff] }
 0xfce   : > { %6933 = vmatpush1.msra.mxu0 %v6789_v49  ;;  %6349 = vmatprep.subr.mxu1 %v8697_v46  ;;  %v6773_v49 = vld [vmem:[#allocation16 + $0x240] sm:$0xff] }
 0xfcf   : > { %6934 = vmatprep.subr.mxu0 %v6788_v5  ;;  %6350 = vmatpush2.msra.mxu1 %v8698_v40  ;;  %v8711_v20 = vld [vmem:[#allocation13 + $0x1e08] sm:$0xff]  ;;  %v6772_v5 = vld [vmem:[#allocation16 + $0x238] sm:$0xff] }
 0xfd0   : > { %6935 = vmatpush1.msra.mxu0 %v6787_v53  ;;  %6351 = vmatprep.subr.mxu1 %v8699_v29  ;;  %v6771_v53 = vld [vmem:[#allocation16 + $0x230] sm:$0xff]  ;;  %v8713_v46 = vld [vmem:[#allocation13 + $0x21e8] sm:$0xff]  ;;  %v8714_v40 = vld [vmem:[#allocation13 + $0x21e0] sm:$0xff] }
 0xfd1   : > { %6936 = vmatprep.subr.mxu0 %v6786_v17  ;;  %6352 = vmatpush2.msra.mxu1 %v8700_v21  ;;  %v6770_v17 = vld [vmem:[#allocation16 + $0x228] sm:$0xff]  ;;  %v8716_v21 = vld [vmem:[#allocation13 + $0x21c0] sm:$0xff] }
 0xfd2   : > { %6937 = vmatpush1.msra.mxu0 %v6785_v23  ;;  %6353 = vmatprep.subr.mxu1 %v8701_v62  ;;  %v6769_v23 = vld [vmem:[#allocation16 + $0x220] sm:$0xff]  ;;  %v6766_v62 = vld [vmem:[#allocation16 + $0x208] sm:$0xff] }
 0xfd3   : > { %6938 = vmatprep.subr.mxu0 %v6784_v56  ;;  %6354 = vmatpush2.msra.mxu1 %v8702_v16  ;;  %v8715_v29 = vld [vmem:[#allocation13 + $0x21c8] sm:$0xff]  ;;  %v6768_v56 = vld [vmem:[#allocation16 + $0x218] sm:$0xff] }
 0xfd4   : > { %6939 = vmatpush1.msra.mxu0 %v6783_v38  ;;  %6355 = vmatprep.subr.mxu1 %v8703_v33  ;;  %v8717_v38 = vld [vmem:[#allocation13 + $0x21a8] sm:$0xff]  ;;  %v8720_v33 = vld [vmem:[#allocation13 + $0x2180] sm:$0xff] }
 0xfd5   : > { %6940 = vmatprep.subr.mxu0 %v6782_v58  ;;  %6356 = vmatpush2.msra.mxu1 %v8704_v8  ;;  %v8718_v58 = vld [vmem:[#allocation13 + $0x21a0] sm:$0xff]  ;;  %v8719_v16 = vld [vmem:[#allocation13 + $0x2188] sm:$0xff] }
 0xfd6   : > { %6941 = vmatpush1.msra.mxu0 %v6781_v36  ;;  %6357 = vmatprep.subr.mxu1 %v8705_v34  ;;  %v6828_v36 = vld [vmem:[#allocation16 + $0x3f8] sm:$0xff]  ;;  %v6826_v8 = vld [vmem:[#allocation16 + $0x3e8] sm:$0xff]  ;;  %v6825_v34 = vld [vmem:[#allocation16 + $0x3e0] sm:$0xff] }
 0xfd7   : > { %6942 = vmatprep.subr.mxu0 %v6780_v61  ;;  %6358 = vmatpush2.msra.mxu1 %v8706_v63  ;;  %v6827_v61 = vld [vmem:[#allocation16 + $0x3f0] sm:$0xff]  ;;  %v8724_v63 = vld [vmem:[#allocation13 + $0x2140] sm:$0xff] }
 0xfd8   : > { %6943 = vmatpush1.msra.mxu0 %v6779_v32  ;;  %6359 = vmatprep.subr.mxu1 %v8707_v0  ;;  %v8722_v32 = vld [vmem:[#allocation13 + $0x2160] sm:$0xff]  ;;  %v8725_v0 = vld [vmem:[#allocation13 + $0x2128] sm:$0xff] }
 0xfd9   : > { %6944 = vmatprep.subr.mxu0 %v6778_v45  ;;  %6360 = vmatpush2.msra.mxu1 %v8708_v52  ;;  %v8723_v45 = vld [vmem:[#allocation13 + $0x2148] sm:$0xff]  ;;  %v8726_v52 = vld [vmem:[#allocation13 + $0x2120] sm:$0xff] }
 0xfda   : > { %6945 = vmatpush1.msra.mxu0 %v6777_v51  ;;  %6361 = vmatprep.subr.mxu1 %v8709_v30  ;;  %v6823_v51 = vld [vmem:[#allocation16 + $0x3d0] sm:$0xff]  ;;  %v8727_v30 = vld [vmem:[#allocation13 + $0x2108] sm:$0xff] }
 0xfdb   : > { %6946 = vmatprep.subr.mxu0 %v6776_v19  ;;  %6362 = vmatpush2.msra.mxu1 %v8710_v13  ;;  %v6822_v19 = vld [vmem:[#allocation16 + $0x3c8] sm:$0xff]  ;;  %v8728_v13 = vld [vmem:[#allocation13 + $0x2100] sm:$0xff] }
 0xfdc   : > { %6947 = vmatpush1.msra.mxu0 %v6775_v18  ;;  %6363 = vmatprep.subr.mxu1 %v8711_v20  ;;  %v6821_v18 = vld [vmem:[#allocation16 + $0x3c0] sm:$0xff] }
 0xfdd   : > { %6948 = vmatprep.subr.mxu0 %v6774_v55  ;;  %6364 = vmatpush2.msra.mxu1 %v8712_v44  ;;  %v6820_v55 = vld [vmem:[#allocation16 + $0x3b8] sm:$0xff]  ;;  %v8729_v20 = vld [vmem:[#allocation13 + $0x20e8] sm:$0xff] }
 0xfde   : > { %6949 = vmatpush1.msra.mxu0 %v6773_v49  ;;  %6366 = vmatmul.mubr.f32.vlgmr.msra.gmra.mxu1 %v10597_v47  ;;  %v6767_v47 = vld [vmem:[#allocation16 + $0x210] sm:$0xff]  ;;  %v8730_v44 = vld [vmem:[#allocation13 + $0x20e0] sm:$0xff] }
 0xfdf   : > { %6485 = vmatprep.subr.mxu1 %v8713_v46  ;;  %6950 = vmatprep.subr.mxu0 %v6772_v5  ;;  %v6819_v49 = vld [vmem:[#allocation16 + $0x3b0] sm:$0xff]  ;;  %v6818_v5 = vld [vmem:[#allocation16 + $0x3a8] sm:$0xff] }
 0xfe0   : > { %6371 = vmatprep.mubr.f32.mxu1 %v10603_v48  ;;  %6486 = vmatpush1.msra.mxu1 %v8714_v40  ;;  %v6765_v48 = vld [vmem:[#allocation16 + $0x200] sm:$0xff] }
 0xfe1   : > { %6951 = vmatpush1.msra.mxu0 %v6771_v53  ;;  %6487 = vmatprep.subr.mxu1 %v8715_v29  ;;  %v6817_v53 = vld [vmem:[#allocation16 + $0x3a0] sm:$0xff] }
 0xfe2   : > { %6952 = vmatprep.subr.mxu0 %v6770_v17  ;;  %6488 = vmatpush1.msra.mxu1 %v8716_v21  ;;  %v8731_v46 = vld [vmem:[#allocation13 + $0x20c8] sm:$0xff]  ;;  %v6816_v17 = vld [vmem:[#allocation16 + $0x398] sm:$0xff] }
 0xfe3   : > { %6953 = vmatpush1.msra.mxu0 %v6769_v23  ;;  %6372 = vmatmul.mubr.f32.gmra.mxu1 %v10608_v60  ;;  %v8721_v60 = vld [vmem:[#allocation13 + $0x2168] sm:$0xff]  ;;  %v8732_v40 = vld [vmem:[#allocation13 + $0x20c0] sm:$0xff]  ;;  %v6815_v23 = vld [vmem:[#allocation16 + $0x390] sm:$0xff] }
 0xfe4   : > { %6489 = vmatprep.subr.mxu1 %v8717_v38  ;;  %6954 = vmatprep.subr.mxu0 %v6768_v56  ;;  %v8733_v29 = vld [vmem:[#allocation13 + $0x20a8] sm:$0xff]  ;;  %v8734_v21 = vld [vmem:[#allocation13 + $0x20a0] sm:$0xff] }
 0xfe5   : > { %6490 = vmatpush1.msra.mxu1 %v8718_v58  ;;  %6549 = vmatprep.mubr.f32.mxu1 %v10614_v3  ;;  %v6824_v3 = vld [vmem:[#allocation16 + $0x3d8] sm:$0xff]  ;;  %v6814_v56 = vld [vmem:[#allocation16 + $0x388] sm:$0xff] }
 0xfe6   : > { %6955 = vmatpush1.msra.mxu0 %v6767_v47  ;;  %6491 = vmatprep.subr.mxu1 %v8719_v16  ;;  %v6813_v47 = vld [vmem:[#allocation16 + $0x380] sm:$0xff] }
 0xfe7   : > { %6956 = vmatprep.subr.mxu0 %v6766_v62  ;;  %6492 = vmatpush1.msra.mxu1 %v8720_v33  ;;  %v8735_v38 = vld [vmem:[#allocation13 + $0x2088] sm:$0xff]  ;;  %v6812_v62 = vld [vmem:[#allocation16 + $0x378] sm:$0xff]  ;;  %v5005_v33 = vpop.f32.mrf.mxu0 }
 0xfe8   : > { %6957 = vmatpush1.msra.mxu0 %v6765_v48  ;;  %6493 = vmatprep.subr.mxu1 %v8721_v60  ;;  %v8736_v58 = vld [vmem:[#allocation13 + $0x2080] sm:$0xff]  ;;  %v6811_v48 = vld [vmem:[#allocation16 + $0x370] sm:$0xff]  ;;  %v8737_v16 = vld [vmem:[#allocation13 + $0x2068] sm:$0xff] }
 0xfe9   : > { %6958 = vmatprep.subr.mxu0 %v6828_v36  ;;  %6494 = vmatpush1.msra.mxu1 %v8722_v32  ;;  %v6810_v36 = vld [vmem:[#allocation16 + $0x368] sm:$0xff]  ;;  %v6809_v60 = vld [vmem:[#allocation16 + $0x360] sm:$0xff]  ;;  %v6808_v32 = vld [vmem:[#allocation16 + $0x358] sm:$0xff] }
 0xfea   : > { %6959 = vmatpush2.msra.mxu0 %v6827_v61  ;;  %6495 = vmatprep.subr.mxu1 %v8723_v45  ;;  %v8738_v61 = vld [vmem:[#allocation13 + $0x2060] sm:$0xff]  ;;  %v6807_v45 = vld [vmem:[#allocation16 + $0x350] sm:$0xff] }
 0xfeb   : > { %6960 = vmatprep.subr.mxu0 %v6826_v8  ;;  %6496 = vmatpush1.msra.mxu1 %v8724_v63  ;;  %v8739_v8 = vld [vmem:[#allocation13 + $0x2048] sm:$0xff] }
 0xfec   : > { %6961 = vmatpush2.msra.mxu0 %v6825_v34  ;;  %6497 = vmatprep.subr.mxu1 %v8725_v0  ;;  %v8740_v34 = vld [vmem:[#allocation13 + $0x2040] sm:$0xff]  ;;  %v6806_v63 = vld [vmem:[#allocation16 + $0x348] sm:$0xff] }
 0xfed   : > { %6962 = vmatprep.subr.mxu0 %v6824_v3  ;;  %6498 = vmatpush1.msra.mxu1 %v8726_v52  ;;  %v8741_v3 = vld [vmem:[#allocation13 + $0x2028] sm:$0xff]  ;;  %v8742_v0 = vld [vmem:[#allocation13 + $0x2020] sm:$0xff] }
 0xfee   : > { %6963 = vmatpush2.msra.mxu0 %v6823_v51  ;;  %6499 = vmatprep.subr.mxu1 %v8727_v30  ;;  %v5007_v51 = vpop.f32.mrf.mxu0  ;;  %v8743_v52 = vld [vmem:[#allocation13 + $0x2008] sm:$0xff]  ;;  %v5012_v30 = vadd.f32 %v10626_v25, %v10421_v2  ;;  %v6800_v25 = vld [vmem:[#allocation16 + $0x318] sm:$0xff] }
 0xfef   : > { %6964 = vmatprep.subr.mxu0 %v6822_v19  ;;  %6500 = vmatpush1.msra.mxu1 %v8728_v13  ;;  %v6805_v19 = vld [vmem:[#allocation16 + $0x340] sm:$0xff] }
 0xff0   : > { %6965 = vmatpush2.msra.mxu0 %v6821_v18  ;;  %6501 = vmatprep.subr.mxu1 %v8729_v20  ;;  %v6804_v18 = vld [vmem:[#allocation16 + $0x338] sm:$0xff]  ;;  %v5017_v20 = vadd.f32 %v5007_v51, %v10430_v12  ;;  %v8747_v2 = vld [vmem:[#allocation13 + $0x23c8] sm:$0xff]  ;;  %v6799_v12 = vld [vmem:[#allocation16 + $0x310] sm:$0xff] }
 0xff1   : > { %6966 = vmatprep.subr.mxu0 %v6820_v55  ;;  %6502 = vmatpush1.msra.mxu1 %v8730_v44  ;;  %v10660_v55 = vrot.slane %v10631_v11, %v9428_v10  ;;  %v8744_v13 = vld [vmem:[#allocation13 + $0x2000] sm:$0xff]  ;;  %v6802_v44 = vld [vmem:[#allocation16 + $0x328] sm:$0xff] }
 0xff2   : > { %6967 = vmatpush2.msra.mxu0 %v6819_v49  ;;  %6503 = vmatprep.subr.mxu1 %v8731_v46  ;;  %v6803_v49 = vld [vmem:[#allocation16 + $0x330] sm:$0xff]  ;;  %v6801_v46 = vld [vmem:[#allocation16 + $0x320] sm:$0xff] }
 0xff3   : > { %6968 = vmatprep.subr.mxu0 %v6818_v5  ;;  %6504 = vmatpush1.msra.mxu1 %v8732_v40  ;;  %v8745_v5 = vld [vmem:[#allocation13 + $0x23e8] sm:$0xff]  ;;  %v6671_v10 = vadd.f32 %v10660_v55, %v5012_v30  ;;  %v8748_v40 = vld [vmem:[#allocation13 + $0x23c0] sm:$0xff] }
 0xff4   : > { %6969 = vmatpush2.msra.mxu0 %v6817_v53  ;;  %6505 = vmatprep.subr.mxu1 %v8733_v29  ;;  %v8746_v53 = vld [vmem:[#allocation13 + $0x23e0] sm:$0xff]  ;;  %v8749_v29 = vld [vmem:[#allocation13 + $0x23a8] sm:$0xff] }
 0xff5   : > { %6970 = vmatprep.subr.mxu0 %v6816_v17  ;;  %6506 = vmatpush1.msra.mxu1 %v8734_v21  ;;  %v5016_v17 = vadd.f32 %v5005_v33, %v10426_v39  ;;  %v8750_v21 = vld [vmem:[#allocation13 + $0x23a0] sm:$0xff]  ;;  %v8755_v33 = vld [vmem:[#allocation13 + $0x2348] sm:$0xff] }
 0xff6   : > { %6971 = vmatpush2.msra.mxu0 %v6815_v23  ;;  %6507 = vmatprep.subr.mxu1 %v8735_v38  ;;  %v6676_v23 = vadd.f32 %v10635_v14, %v5017_v20  ;;  %v8751_v38 = vld [vmem:[#allocation13 + $0x2388] sm:$0xff] }
 0xff7   : > { %6972 = vmatprep.subr.mxu0 %v6814_v56  ;;  %6508 = vmatpush1.msra.mxu1 %v8736_v58  ;;  %v6798_v56 = vld [vmem:[#allocation16 + $0x308] sm:$0xff]  ;;  %v6675_v39 = vadd.f32 %v10660_v55, %v5016_v17  ;;  %v8752_v58 = vld [vmem:[#allocation13 + $0x2380] sm:$0xff]  ;;  %v10685_v17 = vrot.slane %v10631_v11, %v9442_v27 }
 0xff8   : > { %6973 = vmatpush2.msra.mxu0 %v6813_v47  ;;  %6509 = vmatprep.subr.mxu1 %v8737_v16  ;;  %v6797_v47 = vld [vmem:[#allocation16 + $0x300] sm:$0xff] }
 0xff9   : > { %6974 = vmatprep.subr.mxu0 %v6812_v62  ;;  %6510 = vmatpush1.msra.mxu1 %v8738_v61  ;;  %v6687_v62 = vmax.f32 %v6671_v10, 0.0  ;;  %v8753_v16 = vld [vmem:[#allocation13 + $0x2368] sm:$0xff]  ;;  %v6691_v61 = vmax.f32 %v6675_v39, 0.0  ;;  %v6728_v39 = vld [vmem:[#allocation16 + $0xd8] sm:$0xff] }
 0xffa   : > { %6975 = vmatpush2.msra.mxu0 %v6811_v48  ;;  %6511 = vmatprep.subr.mxu1 %v8739_v8  ;;  %v6692_v48 = vmax.f32 %v6676_v23, 0.0  ;;  %v8757_v8 = vld [vmem:[#allocation13 + $0x2328] sm:$0xff]  ;;  %v8774_v23 = vld [vmem:[#allocation13 + $0x2220] sm:$0xff] }
 0xffb   : > { %6976 = vmatprep.subr.mxu0 %v6810_v36  ;;  %6512 = vmatpush1.msra.mxu1 %v8740_v34  ;;  %v8754_v36 = vld [vmem:[#allocation13 + $0x2360] sm:$0xff]  ;;  %v8761_v51 = vld [vmem:[#allocation13 + $0x22e8] sm:$0xff] }
 0xffc   : > { %6977 = vmatpush2.msra.mxu0 %v6809_v60  ;;  %6513 = vmatprep.subr.mxu1 %v8741_v3  ;;  %v8756_v60 = vld [vmem:[#allocation13 + $0x2340] sm:$0xff]  ;;  %v8767_v20 = vld [vmem:[#allocation13 + $0x2288] sm:$0xff] }
 0xffd   : > { %6978 = vmatprep.subr.mxu0 %v6808_v32  ;;  %6514 = vmatpush1.msra.mxu1 %v8742_v0  ;;  %v2753_v32 = vadd.f32 %v10161_v22, %v10143_v41  ;;  %v8758_v34 = vld [vmem:[#allocation13 + $0x2320] sm:$0xff] }
 0xffe   : > { %6979 = vmatpush2.msra.mxu0 %v6807_v45  ;;  %6515 = vmatprep.subr.mxu1 %v8743_v52  ;;  %v8759_v45 = vld [vmem:[#allocation13 + $0x2308] sm:$0xff]  ;;  %v10671_v52 = vpop.f32.mrf.mxu1  ;;  %v8764_v22 = vld [vmem:[#allocation13 + $0x22c0] sm:$0xff] }
 0xfff   : > { %6980 = vmatprep.subr.mxu0 %v6806_v63  ;;  %6516 = vmatpush1.msra.mxu1 %v8744_v13  ;;  %v3145_v3 = vadd.f32 %v10224_v6, %v2753_v32  ;;  %v8760_v63 = vld [vmem:[#allocation13 + $0x2300] sm:$0xff]  ;;  %v8765_v13 = vld [vmem:[#allocation13 + $0x22a8] sm:$0xff] }
0x1000   : > { %6981 = vmatpush2.msra.mxu0 %v6805_v19  ;;  %6517 = vmatprep.subr.mxu1 %v8745_v5  ;;  %v8762_v19 = vld [vmem:[#allocation13 + $0x22e0] sm:$0xff]  ;;  %v10674_v30 = vpop.f32.mrf.mxu1  ;;  %v10678_v5 = vpop.f32.mrf.mxu0 }
0x1001   : > { %6982 = vmatprep.subr.mxu0 %v6804_v18  ;;  %6518 = vmatpush2.msra.mxu1 %v8746_v53  ;;  %v3459_v0 = vadd.f32 %v10283_v26, %v3145_v3  ;;  %v8763_v18 = vld [vmem:[#allocation13 + $0x22c8] sm:$0xff]  ;;  %v6720_v32 = vld [vmem:[#allocation16 + $0x98] sm:$0xff] }
0x1002   : > { %6983 = vmatpush2.msra.mxu0 %v6803_v49  ;;  %6519 = vmatprep.subr.mxu1 %v8747_v2  ;;  %v8766_v49 = vld [vmem:[#allocation13 + $0x22a0] sm:$0xff]  ;;  %v4924_v53 = vpop.f32.mrf.mxu1 }
0x1003   : > { %6984 = vmatprep.subr.mxu0 %v6802_v44  ;;  %6520 = vmatpush2.msra.mxu1 %v8748_v40  ;;  %v3752_v41 = vadd.f32 %v10331_v7, %v3459_v0  ;;  %v8768_v44 = vld [vmem:[#allocation13 + $0x2280] sm:$0xff]  ;;  %v8769_v7 = vld [vmem:[#allocation13 + $0x2268] sm:$0xff] }
0x1004   : > { %6985 = vmatpush2.msra.mxu0 %v6801_v46  ;;  %6521 = vmatprep.subr.mxu1 %v8749_v29  ;;  %v8770_v2 = vld [vmem:[#allocation13 + $0x2260] sm:$0xff]  ;;  %v8773_v40 = vld [vmem:[#allocation13 + $0x2228] sm:$0xff] }
0x1005   : > { %6986 = vmatprep.subr.mxu0 %v6800_v25  ;;  %6522 = vmatpush2.msra.mxu1 %v8750_v21  ;;  %v4070_v6 = vadd.f32 %v10389_v35, %v3752_v41  ;;  %v8771_v25 = vld [vmem:[#allocation13 + $0x2248] sm:$0xff]  ;;  %v10681_v35 = vpop.f32.mrf.mxu0 }
0x1006   : > { %6987 = vmatpush2.msra.mxu0 %v6799_v12  ;;  %6523 = vmatprep.subr.mxu1 %v8751_v38  ;;  %v8775_v29 = vld [vmem:[#allocation13 + $0x2208] sm:$0xff] }
0x1007   : > { %6988 = vmatprep.subr.mxu0 %v6798_v56  ;;  %6524 = vmatpush2.msra.mxu1 %v8752_v58  ;;  %v4384_v26 = vadd.f32 %v10456_v42, %v4070_v6  ;;  %v8772_v42 = vld [vmem:[#allocation13 + $0x2240] sm:$0xff]  ;;  %v10687_v12 = vpop.f32.mrf.mxu0  ;;  %v6731_v56 = vld [vmem:[#allocation16 + $0xf0] sm:$0xff]  ;;  %v6730_v38 = vld [vmem:[#allocation16 + $0xe8] sm:$0xff] }
0x1008   : > { %6989 = vmatpush2.msra.mxu0 %v6797_v47  ;;  %6525 = vmatprep.subr.mxu1 %v8753_v16  ;;  %v8776_v47 = vld [vmem:[#allocation13 + $0x2200] sm:$0xff]  ;;  %v6727_v58 = vld [vmem:[#allocation16 + $0xd0] sm:$0xff]  ;;  %v6710_v6 = vld [vmem:[#allocation16 + $0x48] sm:$0xff] }
0x1009   : > { %6991 = vmatmul.mubr.f32.vlgmr.msra.gmra.mxu0 %v6687_v62  ;;  %6526 = vmatpush2.msra.mxu1 %v8754_v36  ;;  %v4698_v46 = vadd.f32 %v10497_v9, %v4384_v26  ;;  %v6732_v9 = vld [vmem:[#allocation16 + $0xf8] sm:$0xff]  ;;  %v6729_v27 = vld [vmem:[#allocation16 + $0xe0] sm:$0xff]  ;;  %v10691_v62 = vpop.f32.mrf.mxu0  ;;  %v6726_v36 = vld [vmem:[#allocation16 + $0xc8] sm:$0xff] }
0x100a   : > { %6996 = vmatprep.mubr.f32.mxu0 %v6692_v48  ;;  %6527 = vmatprep.subr.mxu1 %v8755_v33  ;;  %v6725_v33 = vld [vmem:[#allocation16 + $0xc0] sm:$0xff]  ;;  %v6708_v26 = vld [vmem:[#allocation16 + $0x38] sm:$0xff] }
0x100b   : > { %6528 = vmatpush2.msra.mxu1 %v8756_v60  ;;  %v5011_v10 = vadd.f32 %v4924_v53, %v4698_v46  ;;  %v10694_v16 = vpop.f32.mrf.mxu0  ;;  %v6717_v3 = vld [vmem:[#allocation16 + $0x80] sm:$0xff]  ;;  %v6706_v53 = vld [vmem:[#allocation16 + $0x28] sm:$0xff] }
0x100c   : > { %6529 = vmatprep.subr.mxu1 %v8757_v8  ;;  %v6721_v8 = vld [vmem:[#allocation16 + $0xa0] sm:$0xff] }
0x100d   : > { %6997 = vmatmul.mubr.f32.gmra.mxu0 %v6691_v61  ;;  %6530 = vmatpush2.msra.mxu1 %v8758_v34  ;;  %v6670_v21 = vadd.f32 %v10685_v17, %v5011_v10  ;;  %v6723_v61 = vld [vmem:[#allocation16 + $0xb0] sm:$0xff]  ;;  %v10697_v60 = vpop.f32.mrf.mxu0  ;;  %v6702_v10 = vld [vmem:[#allocation16 + $0x8] sm:$0xff] }
0x100e   : > { %6531 = vmatprep.subr.mxu1 %v8759_v45  ;;  %v6719_v34 = vld [vmem:[#allocation16 + $0x90] sm:$0xff] }
0x100f   : > { %6532 = vmatpush2.msra.mxu1 %v8760_v63  ;;  %v6686_v48 = vmax.f32 %v6670_v21, 0.0  ;;  %v10699_v45 = vpop.f32.mrf.mxu0  ;;  %v6716_v63 = vld [vmem:[#allocation16 + $0x78] sm:$0xff]  ;;  %v6761_v21 = vld [vmem:[#allocation16 + $0x1e0] sm:$0xff] }
0x1010   : > { %6533 = vmatprep.subr.mxu1 %v8761_v51  ;;  %v6715_v51 = vld [vmem:[#allocation16 + $0x70] sm:$0xff] }
0x1011   : > { %6534 = vmatpush2.msra.mxu1 %v8762_v19  ;;  %v10701_v0 = vpop.f32.mrf.mxu0  ;;  %v6714_v19 = vld [vmem:[#allocation16 + $0x68] sm:$0xff] }
0x1012   : > { %6535 = vmatprep.subr.mxu1 %v8763_v18  ;;  %v6713_v18 = vld [vmem:[#allocation16 + $0x60] sm:$0xff] }
0x1013   : > { %6536 = vmatpush2.msra.mxu1 %v8764_v22  ;;  %v10703_v41 = vpop.f32.mrf.mxu0  ;;  %v6712_v22 = vld [vmem:[#allocation16 + $0x58] sm:$0xff] }
0x1014   : > { %6537 = vmatprep.subr.mxu1 %v8765_v13  ;;  %v6711_v13 = vld [vmem:[#allocation16 + $0x50] sm:$0xff] }
0x1015   : > { %6538 = vmatpush2.msra.mxu1 %v8766_v49  ;;  %v6709_v49 = vld [vmem:[#allocation16 + $0x40] sm:$0xff] }
0x1016   : > { %6539 = vmatprep.subr.mxu1 %v8767_v20  ;;  %v10705_v20 = vpop.f32.mrf.mxu0 }
0x1017   : > { %6540 = vmatpush2.msra.mxu1 %v8768_v44  ;;  %v6707_v44 = vld [vmem:[#allocation16 + $0x30] sm:$0xff] }
0x1018   : > { %6541 = vmatprep.subr.mxu1 %v8769_v7  ;;  %v6705_v7 = vld [vmem:[#allocation16 + $0x20] sm:$0xff]  ;;  %v10707_v46 = vpop.f32.mrf.mxu0 }
0x1019   : > { %6542 = vmatpush2.msra.mxu1 %v8770_v2  ;;  %v6704_v2 = vld [vmem:[#allocation16 + $0x18] sm:$0xff] }
0x101a   : > { %6543 = vmatprep.subr.mxu1 %v8771_v25  ;;  %v6703_v25 = vld [vmem:[#allocation16 + $0x10] sm:$0xff] }
0x101b   : > { %6544 = vmatpush2.msra.mxu1 %v8772_v42  ;;  %v6701_v42 = vld [vmem:[#allocation16] sm:$0xff] }
0x101c   : > { %6545 = vmatprep.subr.mxu1 %v8773_v40  ;;  %v10709_v40 = vpop.f32.mrf.mxu0 }
0x101d   : > { %6546 = vmatpush2.msra.mxu1 %v8774_v23  ;;  %v6764_v23 = vld [vmem:[#allocation16 + $0x1f8] sm:$0xff] }
0x101e   : > { %6547 = vmatprep.subr.mxu1 %v8775_v29  ;;  %v10711_v29 = vpop.f32.mrf.mxu0 }
0x101f   : > { %6548 = vmatpush2.msra.mxu1 %v8776_v47  ;;  %v6760_v47 = vld [vmem:[#allocation16 + $0x1d8] sm:$0xff] }
0x1020   : > { %6550 = vmatmul.mubr.f32.vlgmr.msra.gmra.mxu1 %v10638_v59  ;;  %6837 = vmatprep.subr.mxu1 %v6732_v9  ;;  %v6724_v59 = vld [vmem:[#allocation16 + $0xb8] sm:$0xff]  ;;  %v6763_v9 = vld [vmem:[#allocation16 + $0x1f0] sm:$0xff] }
0x1021   : > { %6555 = vmatprep.mubr.f32.mxu1 %v10644_v1  ;;  %6838 = vmatpush1.msra.mxu1 %v6731_v56  ;;  %v6722_v1 = vld [vmem:[#allocation16 + $0xa8] sm:$0xff] }
0x1022   : > { %6839 = vmatprep.subr.mxu1 %v6730_v38  ;;  %v6762_v56 = vld [vmem:[#allocation16 + $0x1e8] sm:$0xff]  ;;  %v6759_v38 = vld [vmem:[#allocation16 + $0x1d0] sm:$0xff] }
0x1023   : > { %6840 = vmatpush1.msra.mxu1 %v6729_v27  ;;  %v10713_v27 = vpop.f32.mrf.mxu0 }
0x1024   : > { %6556 = vmatmul.mubr.f32.gmra.mxu1 %v10649_v50  ;;  %6841 = vmatprep.subr.mxu1 %v6728_v39  ;;  %v6718_v50 = vld [vmem:[#allocation16 + $0x88] sm:$0xff] }
0x1025   : > { %6842 = vmatpush1.msra.mxu1 %v6727_v58  ;;  %6901 = vmatprep.mubr.f32.mxu1 %v6686_v48  ;;  %v6758_v39 = vld [vmem:[#allocation16 + $0x1c8] sm:$0xff]  ;;  %v6757_v58 = vld [vmem:[#allocation16 + $0x1c0] sm:$0xff]  ;;  %v6756_v48 = vld [vmem:[#allocation16 + $0x1b8] sm:$0xff] }
0x1026   : > { %6843 = vmatprep.subr.mxu1 %v6726_v36  ;;  %v6755_v36 = vld [vmem:[#allocation16 + $0x1b0] sm:$0xff] }
0x1027   : > { %6844 = vmatpush1.msra.mxu1 %v6725_v33  ;;  %v10715_v33 = vpop.f32.mrf.mxu0 }
0x1028   : > { %6845 = vmatprep.subr.mxu1 %v6724_v59  ;;  %v6754_v59 = vld [vmem:[#allocation16 + $0x1a8] sm:$0xff] }
0x1029   : > { %6846 = vmatpush1.msra.mxu1 %v6723_v61  ;;  %v6753_v61 = vld [vmem:[#allocation16 + $0x1a0] sm:$0xff] }
0x102a   : > { %6847 = vmatprep.subr.mxu1 %v6722_v1  ;;  %v6752_v1 = vld [vmem:[#allocation16 + $0x198] sm:$0xff] }
0x102b   : > { %6848 = vmatpush1.msra.mxu1 %v6721_v8  ;;  %v6751_v8 = vld [vmem:[#allocation16 + $0x190] sm:$0xff] }
0x102c   : > { %6849 = vmatprep.subr.mxu1 %v6720_v32  ;;  %v10717_v32 = vpop.f32.mrf.mxu0 }
0x102d   : > { %6850 = vmatpush1.msra.mxu1 %v6719_v34  ;;  %v6750_v34 = vld [vmem:[#allocation16 + $0x188] sm:$0xff] }
0x102e   : > { %6851 = vmatprep.subr.mxu1 %v6718_v50  ;;  %v6749_v50 = vld [vmem:[#allocation16 + $0x180] sm:$0xff] }
0x102f   : > { %6852 = vmatpush1.msra.mxu1 %v6717_v3  ;;  %v10719_v3 = vpop.f32.mrf.mxu0 }
0x1030   : > { %6853 = vmatprep.subr.mxu1 %v6716_v63  ;;  %v6748_v63 = vld [vmem:[#allocation16 + $0x178] sm:$0xff] }
0x1031   : > { %6854 = vmatpush1.msra.mxu1 %v6715_v51  ;;  %v6747_v51 = vld [vmem:[#allocation16 + $0x170] sm:$0xff] }
0x1032   : > { %6855 = vmatprep.subr.mxu1 %v6714_v19  ;;  %v6746_v19 = vld [vmem:[#allocation16 + $0x168] sm:$0xff] }
0x1033   : > { %6856 = vmatpush1.msra.mxu1 %v6713_v18  ;;  %v4928_v18 = vpop.f32.mrf.mxu1 }
0x1034   : > { %6857 = vmatprep.subr.mxu1 %v6712_v22  ;;  %v6745_v22 = vld [vmem:[#allocation16 + $0x160] sm:$0xff] }
0x1035   : > { %6858 = vmatpush1.msra.mxu1 %v6711_v13  ;;  %v10721_v13 = vpop.f32.mrf.mxu0 }
0x1036   : > { %6859 = vmatprep.subr.mxu1 %v6710_v6  ;;  %v6744_v6 = vld [vmem:[#allocation16 + $0x158] sm:$0xff] }
0x1037   : > { %6860 = vmatpush1.msra.mxu1 %v6709_v49  ;;  %v6743_v49 = vld [vmem:[#allocation16 + $0x150] sm:$0xff] }
0x1038   : > { %6861 = vmatprep.subr.mxu1 %v6708_v26  ;;  %v6742_v26 = vld [vmem:[#allocation16 + $0x148] sm:$0xff] }
0x1039   : > { %6862 = vmatpush1.msra.mxu1 %v6707_v44  ;;  %v4930_v44 = vpop.f32.mrf.mxu1 }
0x103a   : > { %6863 = vmatprep.subr.mxu1 %v6706_v53  ;;  %v6741_v53 = vld [vmem:[#allocation16 + $0x140] sm:$0xff] }
0x103b   : > { %6864 = vmatpush1.msra.mxu1 %v6705_v7  ;;  %v4702_v7 = vadd.f32 %v10671_v52, %v10462_v24  ;;  %v6736_v24 = vld [vmem:[#allocation16 + $0x118] sm:$0xff] }
0x103c   : > { %6865 = vmatprep.subr.mxu1 %v6704_v2  ;;  %v10725_v2 = vpop.f32.mrf.mxu0 }
0x103d   : > { %6866 = vmatpush1.msra.mxu1 %v6703_v25  ;;  %v6740_v25 = vld [vmem:[#allocation16 + $0x138] sm:$0xff] }
0x103e   : > { %6867 = vmatprep.subr.mxu1 %v6702_v10  ;;  %v5010_v10 = vadd.f32 %v10674_v30, %v10495_v28  ;;  %v6735_v28 = vld [vmem:[#allocation16 + $0x110] sm:$0xff] }
0x103f   : > { %6868 = vmatpush1.msra.mxu1 %v6701_v42  ;;  %v10731_v42 = vrot.slane %v10631_v11, %v9418_v15  ;;  %v6734_v11 = vld [vmem:[#allocation16 + $0x108] sm:$0xff] }
0x1040   : > { %6869 = vmatprep.subr.mxu1 %v6764_v23  ;;  %v6739_v23 = vld [vmem:[#allocation16 + $0x130] sm:$0xff] }
0x1041   : > { %6870 = vmatpush2.msra.mxu1 %v6763_v9  ;;  %v5015_v9 = vadd.f32 %v4930_v44, %v4702_v7  ;;  %v6669_v52 = vadd.f32 %v10731_v42, %v5010_v10  ;;  %v5371_v10 = vadd.f32 %v10699_v45, %v10687_v12 }
0x1042   : > { %6871 = vmatprep.subr.mxu1 %v6762_v56  ;;  %v6738_v56 = vld [vmem:[#allocation16 + $0x128] sm:$0xff] }
0x1043   : > { %6872 = vmatpush2.msra.mxu1 %v6761_v21  ;;  %v6737_v21 = vld [vmem:[#allocation16 + $0x120] sm:$0xff]  ;;  %v6674_v30 = vadd.f32 %v10685_v17, %v5015_v9 }
0x1044   : > { %6873 = vmatprep.subr.mxu1 %v6760_v47  ;;  %v5896_v47 = vpop.f32.mrf.mxu0 }
0x1045   : > { %6874 = vmatpush2.msra.mxu1 %v6759_v38  ;;  %v5014_v38 = vadd.f32 %v4928_v18, %v10500_v54 }
0x1046   : > { %6875 = vmatprep.subr.mxu1 %v6758_v39  ;;  %v6076_v15 = vpop.f32.mrf.mxu0  ;;  %v6733_v39 = vld [vmem:[#allocation16 + $0x100] sm:$0xff] }
0x1047   : > { %6876 = vmatpush2.msra.mxu1 %v6757_v58  ;;  %v6685_v58 = vmax.f32 %v6669_v52, 0.0 }
0x1048   : > { %6877 = vmatprep.subr.mxu1 %v6756_v48  ;;  %v6673_v48 = vadd.f32 %v10731_v42, %v5014_v38 }
0x1049   : > { %6878 = vmatpush2.msra.mxu1 %v6755_v36  ;;  %v6690_v36 = vmax.f32 %v6674_v30, 0.0 }
0x104a   : > { %6879 = vmatprep.subr.mxu1 %v6754_v59  ;;  %v6078_v59 = vpop.f32.mrf.mxu0  ;;  %v6689_v54 = vmax.f32 %v6673_v48, 0.0 }
0x104b   : > { %6880 = vmatpush2.msra.mxu1 %v6753_v61 }
0x104c   : > { %6881 = vmatprep.subr.mxu1 %v6752_v1  ;;  %v6082_v61 = vpop.f32.mrf.mxu0 }
0x104d   : > { %6882 = vmatpush2.msra.mxu1 %v6751_v8 }
0x104e   : > { %6883 = vmatprep.subr.mxu1 %v6750_v34  ;;  %v6084_v1 = vpop.f32.mrf.mxu0 }
0x104f   : > { %6884 = vmatpush2.msra.mxu1 %v6749_v50  ;;  %v10737_v50 = vpop.f32.mrf.mxu1 }
0x1050   : > { %6885 = vmatprep.subr.mxu1 %v6748_v63  ;;  %v6260_v8 = vpop.f32.mrf.mxu0 }
0x1051   : > { %6886 = vmatpush2.msra.mxu1 %v6747_v51  ;;  %v10739_v51 = vpop.f32.mrf.mxu1 }
0x1052   : > { %6887 = vmatprep.subr.mxu1 %v6746_v19  ;;  %v6262_v34 = vpop.f32.mrf.mxu0 }
0x1053   : > { %6888 = vmatpush2.msra.mxu1 %v6745_v22  ;;  %v5365_v22 = vadd.f32 %v10694_v16, %v10678_v5 }
0x1054   : > { %6889 = vmatprep.subr.mxu1 %v6744_v6  ;;  %v6266_v63 = vpop.f32.mrf.mxu0  ;;  %v10743_v6 = vpop.f32.mrf.mxu1 }
0x1055   : > { %6890 = vmatpush2.msra.mxu1 %v6743_v49  ;;  %v5367_v49 = vadd.f32 %v10697_v60, %v10681_v35  ;;  %v5373_v35 = vadd.f32 %v10701_v0, %v10691_v62  ;;  %v5557_v60 = vadd.f32 %v10707_v46, %v5371_v10 }
0x1056   : > { %6891 = vmatprep.subr.mxu1 %v6742_v26  ;;  %v6268_v19 = vpop.f32.mrf.mxu0  ;;  %v5553_v26 = vadd.f32 %v10703_v41, %v5365_v22 }
0x1057   : > { %6892 = vmatpush2.msra.mxu1 %v6741_v53  ;;  %v10748_v53 = vpop.f32.mrf.mxu1  ;;  %v5554_v7 = vadd.f32 %v10705_v20, %v5367_v49 }
0x1058   : > { %6893 = vmatprep.subr.mxu1 %v6740_v25  ;;  %v6444_v18 = vpop.f32.mrf.mxu0  ;;  %v5737_v25 = vadd.f32 %v10711_v29, %v5553_v26  ;;  %v5558_v29 = vadd.f32 %v10709_v40, %v5373_v35 }
0x1059   : > { %6894 = vmatpush2.msra.mxu1 %v6739_v23  ;;  %v10754_v23 = vpop.f32.mrf.mxu1  ;;  %v5738_v5 = vadd.f32 %v10713_v27, %v5554_v7 }
0x105a   : > { %6895 = vmatprep.subr.mxu1 %v6738_v56  ;;  %v6446_v44 = vpop.f32.mrf.mxu0  ;;  %v5901_v16 = vadd.f32 %v10719_v3, %v5737_v25  ;;  %v5741_v56 = vadd.f32 %v10715_v33, %v5557_v60  ;;  %v5742_v27 = vadd.f32 %v10717_v32, %v5558_v29 }
0x105b   : > { %6896 = vmatpush2.msra.mxu1 %v6737_v21  ;;  %v5902_v9 = vadd.f32 %v10721_v13, %v5738_v5  ;;  %v5289_v12 = vpop.f32.mrf.mxu1 }
0x105c   : > { %6897 = vmatprep.subr.mxu1 %v6736_v24  ;;  %v6450_v41 = vpop.f32.mrf.mxu0  ;;  %v6089_v20 = vadd.f32 %v6076_v15, %v5901_v16  ;;  %v5905_v3 = vadd.f32 %v10725_v2, %v5741_v56  ;;  %v5906_v0 = vadd.f32 %v5896_v47, %v5742_v27 }
0x105d   : > { %6898 = vmatpush2.msra.mxu1 %v6735_v28  ;;  %v6090_v45 = vadd.f32 %v6078_v59, %v5902_v9  ;;  %v5293_v28 = vpop.f32.mrf.mxu1 }
0x105e   : > { %6899 = vmatprep.subr.mxu1 %v6734_v11  ;;  %v6273_v21 = vadd.f32 %v6260_v8, %v6089_v20  ;;  %v6452_v24 = vpop.f32.mrf.mxu0  ;;  %v6093_v46 = vadd.f32 %v6082_v61, %v5905_v3  ;;  %v6094_v15 = vadd.f32 %v6084_v1, %v5906_v0  ;;  %v5288_v3 = vadd.f32 %v10754_v23, %v10737_v50 }
0x105f   : > { %6900 = vmatpush2.msra.mxu1 %v6733_v39  ;;  %v6274_v52 = vadd.f32 %v6262_v34, %v6090_v45  ;;  %v5295_v32 = vpop.f32.mrf.mxu1  ;;  %v5294_v0 = vadd.f32 %v5293_v28, %v10743_v6 }
0x1060   : > { %6902 = vmatmul.mubr.f32.vlgmr.msra.gmra.mxu1 %v6685_v58  ;;  %v6457_v62 = vadd.f32 %v6444_v18, %v6273_v21  ;;  %v6277_v40 = vadd.f32 %v6266_v63, %v6093_v46  ;;  %v6278_v39 = vadd.f32 %v6268_v19, %v6094_v15 }
0x1061   : > { %6907 = vmatprep.mubr.f32.mxu1 %v6690_v36  ;;  %v6458_v13 = vadd.f32 %v6446_v44, %v6274_v52  ;;  %v5463_v47 = vpop.f32.mrf.mxu1 }
0x1062   : > { %v6461_v58 = vadd.f32 %v6450_v41, %v6277_v40  ;;  %v6462_v59 = vadd.f32 %v6452_v24, %v6278_v39  ;;  %v5290_v24 = vadd.f32 %v5289_v12, %v10739_v51  ;;  %v5551_v52 = vadd.f32 %v5463_v47, %v5288_v3 }
0x1063   : > { %v5465_v19 = vpop.f32.mrf.mxu1 }
0x1064   : > { %6908 = vmatmul.mubr.f32.gmra.mxu1 %v6689_v54  ;;  %v5552_v46 = vadd.f32 %v5465_v19, %v5290_v24 }
0x1065   : > { %v5469_v26 = vpop.f32.mrf.mxu1 }
0x1067   : > { %v5471_v44 = vpop.f32.mrf.mxu1 }
0x1069   : > { %v5647_v7 = vpop.f32.mrf.mxu1 }
0x106b   : > { %v5649_v25 = vpop.f32.mrf.mxu1 }
0x106c   : > { %v5736_v15 = vadd.f32 %v5649_v25, %v5552_v46 }
0x106d   : > { %v5653_v10 = vpop.f32.mrf.mxu1 }
0x106f   : > { %v5655_v5 = vpop.f32.mrf.mxu1 }
0x1071   : > { %v5811_v16 = vpop.f32.mrf.mxu1 }
0x1073   : > { %v5813_v35 = vpop.f32.mrf.mxu1 }
0x1075   : > { %v5817_v60 = vpop.f32.mrf.mxu1 }
0x1077   : > { %v5819_v41 = vpop.f32.mrf.mxu1 }
0x1085   : > { %v6628_v38 = vpop.f32.mrf.mxu0 }
0x1086   : > { %v6641_v30 = vadd.f32 %v6628_v38, %v6457_v62  ;;  %v5735_v38 = vadd.f32 %v5647_v7, %v5551_v52 }
0x1087   : > { %v6630_v11 = vpop.f32.mrf.mxu0 }
0x1088   : > { %v6642_v33 = vadd.f32 %v6630_v11, %v6458_v13  ;;  %v6679_v48 = vadd.f32 %v10660_v55, %v6641_v30  ;;  %v5296_v13 = vadd.f32 %v5295_v32, %v10748_v53  ;;  %v5555_v30 = vadd.f32 %v5469_v26, %v5294_v0 }
0x1089   : > { %v5899_v40 = vadd.f32 %v5811_v16, %v5735_v38  ;;  %v8779_v38 = vld [vmem:[#allocation2 + $0x10] sm:$0xff] }
0x108a   : > { %v6680_v2 = vadd.f32 %v10635_v14, %v6642_v33  ;;  %v6634_v36 = vpop.f32.mrf.mxu0  ;;  %v6695_v34 = vmax.f32 %v6679_v48, 0.0  ;;  %v5556_v33 = vadd.f32 %v5471_v44, %v5296_v13  ;;  %v5739_v39 = vadd.f32 %v5653_v10, %v5555_v30  ;;  %v8780_v30 = vld [vmem:[#allocation2 + $0x30] sm:$0xff] }
0x108b   : > { %v6645_v54 = vadd.f32 %v6634_v36, %v6461_v58  ;;  %v5900_v58 = vadd.f32 %v5813_v35, %v5736_v15 }
0x108c   : > { %v6696_v61 = vmax.f32 %v6680_v2, 0.0  ;;  %v6636_v8 = vpop.f32.mrf.mxu0  ;;  %v5740_v2 = vadd.f32 %v5655_v5, %v5556_v33  ;;  %v5903_v50 = vadd.f32 %v5817_v60, %v5739_v39  ;;  %v8781_v33 = vld [vmem:[#allocation2 + $0x40] sm:$0xff] }
0x108d   : > { %v6646_v18 = vadd.f32 %v6636_v8, %v6462_v59  ;;  %v6683_v1 = vadd.f32 %v10660_v55, %v6645_v54  ;;  %v5999_v55 = vpop.f32.mrf.mxu1 }
0x108e   : > { %7002 = vmatprep.mubr.f32.mxu0 %v6696_v61  ;;  %v6087_v48 = vadd.f32 %v5999_v55, %v5899_v40  ;;  %v5904_v36 = vadd.f32 %v5819_v41, %v5740_v2  ;;  %v10779_v55 = vld [vmem:[#allocation17] sm:$0x3f] }
0x108f   : > { %v6684_v63 = vadd.f32 %v10635_v14, %v6646_v18  ;;  %7003 = vmatmul.mubr.f32.gmra.mxu0 %v6695_v34  ;;  %v6699_v49 = vmax.f32 %v6683_v1, 0.0  ;;  %v6001_v9 = vpop.f32.mrf.mxu1 }
0x1090   : > { %v6088_v23 = vadd.f32 %v6001_v9, %v5900_v58  ;;  %v6832_v9 = vrot.slane %v10779_v55, %v10921_v43  ;;  %v8782_v58 = vld [vmem:[#allocation2 + $0x78] sm:$0xff] }
0x1091   : > { %v6700_v22 = vmax.f32 %v6684_v63, 0.0  ;;  %v6005_v20 = vpop.f32.mrf.mxu1 }
0x1092   : > { %v6091_v59 = vadd.f32 %v6005_v20, %v5903_v50  ;;  %v10783_v20 = vld [vmem:[#allocation17 + $0x8] sm:$0x3f] }
0x1093   : > { %7008 = vmatprep.mubr.f32.mxu0 %v6700_v22  ;;  %v6007_v14 = vpop.f32.mrf.mxu1 }
0x1094   : > { %7009 = vmatmul.mubr.f32.gmra.mxu0 %v6699_v49  ;;  %v6092_v47 = vadd.f32 %v6007_v14, %v5904_v36  ;;  %v6836_v14 = vrot.slane %v10783_v20, %v10921_v43 }
0x1095   : > { %v6183_v29 = vpop.f32.mrf.mxu1 }
0x1096   : > { %v6271_v51 = vadd.f32 %v6183_v29, %v6087_v48 }
0x1097   : > { %v6185_v56 = vpop.f32.mrf.mxu1 }
0x1098   : > { %v6272_v6 = vadd.f32 %v6185_v56, %v6088_v23 }
0x1099   : > { %v6189_v45 = vpop.f32.mrf.mxu1 }
0x109a   : > { %v6275_v53 = vadd.f32 %v6189_v45, %v6091_v59 }
0x109b   : > { %v6191_v21 = vpop.f32.mrf.mxu1 }
0x109c   : > { %v6276_v34 = vadd.f32 %v6191_v21, %v6092_v47 }
0x109e   : > { %v6367_v27 = vpop.f32.mrf.mxu1 }
0x109f   : > { %v6455_v28 = vadd.f32 %v6367_v27, %v6271_v51 }
0x10a0   : > { %v6369_v62 = vpop.f32.mrf.mxu1 }
0x10a1   : > { %v6456_v32 = vadd.f32 %v6369_v62, %v6272_v6 }
0x10a3   : > { %v6373_v11 = vpop.f32.mrf.mxu1 }
0x10a4   : > { %v6459_v18 = vadd.f32 %v6373_v11, %v6275_v53 }
0x10a5   : > { %v6375_v12 = vpop.f32.mrf.mxu1 }
0x10a6   : > { %v6460_v22 = vadd.f32 %v6375_v12, %v6276_v34  ;;  %v8783_v34 = vld [vmem:[#allocation2 + $0x50] sm:$0xff] }
0x10c9   : > { %v6992_v41 = vpop.f32.mrf.mxu0 }
0x10e0   : > { %v6551_v54 = vpop.f32.mrf.mxu1 }
0x10e1   : > { %v6639_v61 = vadd.f32 %v6551_v54, %v6455_v28 }
0x10e2   : > { %v6553_v8 = vpop.f32.mrf.mxu1 }
0x10e3   : > { %v6640_v1 = vadd.f32 %v6553_v8, %v6456_v32  ;;  %v6677_v63 = vadd.f32 %v10731_v42, %v6639_v61 }
0x10e4   : > { %v6557_v19 = vpop.f32.mrf.mxu1 }
0x10e5   : > { %v6678_v49 = vadd.f32 %v10685_v17, %v6640_v1  ;;  %v6643_v26 = vadd.f32 %v6557_v19, %v6459_v18  ;;  %v6693_v10 = vmax.f32 %v6677_v63, 0.0  ;;  %v8784_v1 = vld [vmem:[#allocation2 + $0x60] sm:$0xff] }
0x10e6   : > { %v6559_v44 = vpop.f32.mrf.mxu1 }
0x10e7   : > { %v6694_v7 = vmax.f32 %v6678_v49, 0.0  ;;  %v6644_v25 = vadd.f32 %v6559_v44, %v6460_v22  ;;  %v6681_v5 = vadd.f32 %v10731_v42, %v6643_v26  ;;  %v6994_v42 = vpop.f32.mrf.mxu0 }
0x10e9   : > { %v6682_v16 = vadd.f32 %v10685_v17, %v6644_v25  ;;  %6913 = vmatprep.mubr.f32.mxu1 %v6694_v7  ;;  %v6697_v60 = vmax.f32 %v6681_v5, 0.0  ;;  %v6998_v27 = vpop.f32.mrf.mxu0  ;;  %v8785_v7 = vld [vmem:[#allocation2 + $0x68] sm:$0xff] }
0x10ea   : > { %6914 = vmatmul.mubr.f32.gmra.mxu1 %v6693_v10  ;;  %v8786_v10 = vld [vmem:[#allocation2 + $0x38] sm:$0xff] }
0x10eb   : > { %v6698_v35 = vmax.f32 %v6682_v16, 0.0  ;;  %v7000_v40 = vpop.f32.mrf.mxu0 }
0x10ed   : > { %6919 = vmatprep.mubr.f32.mxu1 %v6698_v35 }
0x10ee   : > { %6920 = vmatmul.mubr.f32.gmra.mxu1 %v6697_v60 }
0x1120   : > { %v6903_v29 = vpop.f32.mrf.mxu1 }
0x1121   : > { %v6904_v17 = vadd.f32 %v6903_v29, %v6832_v9 }
0x1122   : > { %v6905_v56 = vpop.f32.mrf.mxu1 }
0x1123   : > { %v6993_v45 = vadd.f32 %v6992_v41, %v6904_v17  ;;  %v6906_v21 = vadd.f32 %v6905_v56, %v6836_v14 }
0x1124   : > { %v6909_v3 = vpop.f32.mrf.mxu1 }
0x1125   : > { %v6995_v24 = vadd.f32 %v6994_v42, %v6906_v21  ;;  %v6910_v52 = vadd.f32 %v6909_v3, %v6832_v9  ;;  %v7015_v13 = vadd.f32 %v8779_v38, %v6993_v45 }
0x1126   : > { %v6911_v62 = vpop.f32.mrf.mxu1 }
0x1127   : > { %v6999_v0 = vadd.f32 %v6998_v27, %v6910_v52  ;;  %v6912_v46 = vadd.f32 %v6911_v62, %v6836_v14  ;;  %v7016_v15 = vadd.f32 %v8780_v30, %v6995_v24 }
0x1129   : > { %v7001_v11 = vadd.f32 %v7000_v40, %v6912_v46  ;;  %v7023_v43 = vadd.f32 %v7016_v15, %v7015_v13  ;;  %v7017_v39 = vadd.f32 %v8781_v33, %v6999_v0 }
0x112b   : > { %7024 = vadd.xlane.f32.xlu0 %v7023_v43  ;;  %v7018_v48 = vadd.f32 %v8782_v58, %v7001_v11 }
0x112d   : > { %v7026_v2 = vadd.f32 %v7018_v48, %v7017_v39 }
0x112f   : > { %7027 = vadd.xlane.f32.xlu1 %v7026_v2 }
0x114f   : > { %v7004_v50 = vpop.f32.mrf.mxu0 }
0x1151   : > { %v7006_v23 = vpop.f32.mrf.mxu0 }
0x1154   : > { %v7010_v28 = vpop.f32.mrf.mxu0 }
0x1156   : > { %v7012_v19 = vpop.f32.mrf.mxu0 }
0x11aa   : > { %v6915_v51 = vpop.f32.mrf.mxu1 }
0x11ab   : > { %v6916_v12 = vadd.f32 %v6915_v51, %v6832_v9  ;;  %v10922_v51 = vld [vmem:[#allocation28_spill] sm:$0xff] }
0x11ac   : > { %v6917_v36 = vpop.f32.mrf.mxu1 }
0x11ad   : > { %v7005_v59 = vadd.f32 %v7004_v50, %v6916_v12  ;;  %v6918_v6 = vadd.f32 %v6917_v36, %v6836_v14  ;;  %v7090_v12 = vrot.slane %v10779_v55, %v10922_v51  ;;  %v7094_v36 = vrot.slane %v10783_v20, %v10922_v51 }
0x11ae   : > { %v6921_v54 = vpop.f32.mrf.mxu1 }
0x11af   : > { %v7007_v47 = vadd.f32 %v7006_v23, %v6918_v6  ;;  %v6922_v53 = vadd.f32 %v6921_v54, %v6832_v9  ;;  %v7019_v18 = vadd.f32 %v8783_v34, %v7005_v59  ;;  %v10923_v6 = vld [vmem:[#allocation29_spill] sm:$0xff] }
0x11b0   : > { %v6923_v32 = vpop.f32.mrf.mxu1  ;;  %v7110_v54 = vrot.slane %v10783_v20, %v10923_v6 }
0x11b1   : > { %v7011_v61 = vadd.f32 %v7010_v28, %v6922_v53  ;;  %v6924_v8 = vadd.f32 %v6923_v32, %v6836_v14  ;;  %v7020_v63 = vadd.f32 %v8784_v1, %v7007_v47  ;;  %v7106_v28 = vrot.slane %v10779_v55, %v10923_v6 }
0x11b3   : > { %v7013_v22 = vadd.f32 %v7012_v19, %v6924_v8  ;;  %v7029_v49 = vadd.f32 %v7020_v63, %v7019_v18  ;;  %v7021_v25 = vadd.f32 %v8785_v7, %v7011_v61 }
0x11b4   : > { %v7025_v26 = vpop.xlane.xlu0 %7024 }
0x11b5   : > { %v7035_v44 = vmul.f32 0.00390625, %v7025_v26  ;;  %7030 = vadd.xlane.f32.xlu1 %v7029_v49  ;;  %v7022_v5 = vadd.f32 %v8786_v10, %v7013_v22 }
0x11b7   : > { %v7039_v16 = vsub.f32 %v7015_v13, %v7035_v44  ;;  %v7040_v35 = vsub.f32 %v7016_v15, %v7035_v44  ;;  %v7032_v60 = vadd.f32 %v7022_v5, %v7021_v25 }
0x11b8   : > { %v7028_v41 = vpop.xlane.xlu1 %7027 }
0x11b9   : > { %v7036_v9 = vmul.f32 0.00390625, %v7028_v41  ;;  %7033 = vadd.xlane.f32.xlu1 %v7032_v60  ;;  %v7047_v14 = vmul.f32 %v7039_v16, %v7039_v16  ;;  %v7048_v42 = vmul.f32 %v7040_v35, %v7040_v35 }
0x11bb   : > { %v7041_v29 = vsub.f32 %v7017_v39, %v7036_v9  ;;  %v7042_v17 = vsub.f32 %v7018_v48, %v7036_v9  ;;  %v7055_v56 = vadd.f32 %v7048_v42, %v7047_v14 }
0x11bd   : > { %7056 = vadd.xlane.f32.xlu1 %v7055_v56  ;;  %v7049_v45 = vmul.f32 %v7041_v29, %v7041_v29  ;;  %v7050_v21 = vmul.f32 %v7042_v17, %v7042_v17 }
0x11bf   : > { %v7058_v27 = vadd.f32 %v7050_v21, %v7049_v45 }
0x11c1   : > { %7059 = vadd.xlane.f32.xlu1 %v7058_v27 }
0x123e   : > { %v7031_v3 = vpop.xlane.xlu1 %7030 }
0x123f   : > { %v7037_v24 = vmul.f32 0.00390625, %v7031_v3 }
0x1241   : > { %v7043_v52 = vsub.f32 %v7019_v18, %v7037_v24  ;;  %v7044_v62 = vsub.f32 %v7020_v63, %v7037_v24 }
0x1242   : > { %v7034_v0 = vpop.xlane.xlu1 %7033 }
0x1243   : > { %v7038_v46 = vmul.f32 0.00390625, %v7034_v0  ;;  %v7051_v38 = vmul.f32 %v7043_v52, %v7043_v52  ;;  %v7052_v13 = vmul.f32 %v7044_v62, %v7044_v62 }
0x1245   : > { %v7045_v30 = vsub.f32 %v7021_v25, %v7038_v46  ;;  %v7046_v15 = vsub.f32 %v7022_v5, %v7038_v46  ;;  %v7061_v40 = vadd.f32 %v7052_v13, %v7051_v38 }
0x1246   : > { %v7057_v11 = vpop.xlane.xlu1 %7056 }
0x1247   : > { %v7067_v43 = vmul.f32 0.00390625, %v7057_v11  ;;  %7062 = vadd.xlane.f32.xlu1 %v7061_v40  ;;  %v7053_v33 = vmul.f32 %v7045_v30, %v7045_v30  ;;  %v7054_v39 = vmul.f32 %v7046_v15, %v7046_v15 }
0x1249   : > { %v7071_v58 = vadd.f32 1e-05, %v7067_v43  ;;  %v7064_v48 = vadd.f32 %v7054_v39, %v7053_v33 }
0x124a   : > { %v7060_v2 = vpop.xlane.xlu1 %7059 }
0x124b   : > { %7595 = vrsqrt.f32 %v7071_v58  ;;  %v7068_v50 = vmul.f32 0.00390625, %v7060_v2  ;;  %7065 = vadd.xlane.f32.xlu1 %v7064_v48 }
0x124d   : > { %v7072_v23 = vadd.f32 1e-05, %v7068_v50 }
0x124f   : > { %7597 = vrsqrt.f32 %v7072_v23 }
0x1258   : > { %v7596_v59 = vpop.eup %7595 }
0x1259   : > { %v7079_v47 = vmul.f32 %v7596_v59, %v7039_v16  ;;  %v7080_v53 = vmul.f32 %v7596_v59, %v7040_v35 }
0x125b   : > { %v7095_v32 = vmul.f32 %v7090_v12, %v7079_v47  ;;  %v7096_v61 = vmul.f32 %v7094_v36, %v7080_v53 }
0x125c   : > { %v7598_v8 = vpop.eup %7597 }
0x125d   : > { %v7111_v34 = vadd.f32 %v7106_v28, %v7095_v32  ;;  %v7112_v18 = vadd.f32 %v7110_v54, %v7096_v61  ;;  %v7081_v1 = vmul.f32 %v7598_v8, %v7041_v29  ;;  %v7082_v63 = vmul.f32 %v7598_v8, %v7042_v17 }
0x125f   : > { %v7119_v19 = vmul.f32 %v7111_v34, %v9938_v37  ;;  %v7120_v22 = vmul.f32 %v7112_v18, %v9938_v37  ;;  %v7097_v49 = vmul.f32 %v7090_v12, %v7081_v1  ;;  %v7098_v26 = vmul.f32 %v7094_v36, %v7082_v63 }
0x1261   : > { %7127 = vst [vmem:[%s10799_s25] sm:$0xff] %v7119_v19  ;;  %7128 = vst [vmem:[%s10799_s25 + $0x8] sm:$0xff] %v7120_v22  ;;  %v7113_v55 = vadd.f32 %v7106_v28, %v7097_v49  ;;  %v7114_v20 = vadd.f32 %v7110_v54, %v7098_v26 }
0x1263   : > { %v7121_v44 = vmul.f32 %v7113_v55, %v9952_v4  ;;  %v7122_v7 = vmul.f32 %v7114_v20, %v9952_v4 }
0x1265   : > { %7129 = vst [vmem:[%s10799_s25 + $0x10] sm:$0xff] %v7121_v44  ;;  %7130 = vst [vmem:[%s10799_s25 + $0x18] sm:$0xff] %v7122_v7 }
0x12d0   : > { %v7063_v37 = vpop.xlane.xlu1 %7062 }
0x12d1   : > { %v7069_v25 = vmul.f32 0.00390625, %v7063_v37 }
0x12d3   : > { %v7073_v10 = vadd.f32 1e-05, %v7069_v25 }
0x12d4   : > { %v7066_v5 = vpop.xlane.xlu1 %7065 }
0x12d5   : > { %7599 = vrsqrt.f32 %v7073_v10  ;;  %v7070_v16 = vmul.f32 0.00390625, %v7066_v5 }
0x12d7   : > { %v7074_v35 = vadd.f32 1e-05, %v7070_v16 }
0x12d9   : > { %7601 = vrsqrt.f32 %v7074_v35 }
0x12e2   : > { %v7600_v60 = vpop.eup %7599 }
0x12e3   : > { %v7083_v41 = vmul.f32 %v7600_v60, %v7043_v52  ;;  %v7084_v9 = vmul.f32 %v7600_v60, %v7044_v62 }
0x12e5   : > { %v7099_v14 = vmul.f32 %v7090_v12, %v7083_v41  ;;  %v7100_v42 = vmul.f32 %v7094_v36, %v7084_v9 }
0x12e6   : > { %v7602_v4 = vpop.eup %7601 }
0x12e7   : > { %v7115_v29 = vadd.f32 %v7106_v28, %v7099_v14  ;;  %v7116_v17 = vadd.f32 %v7110_v54, %v7100_v42  ;;  %v7085_v56 = vmul.f32 %v7602_v4, %v7045_v30  ;;  %v7086_v45 = vmul.f32 %v7602_v4, %v7046_v15 }
0x12e9   : > { %v7123_v21 = vmul.f32 %v7115_v29, %v10329_v31  ;;  %v7124_v27 = vmul.f32 %v7116_v17, %v10329_v31  ;;  %v7101_v3 = vmul.f32 %v7090_v12, %v7085_v56  ;;  %v7102_v24 = vmul.f32 %v7094_v36, %v7086_v45 }
0x12eb   : > { %7131 = vst [vmem:[%s10799_s25 + $0x20] sm:$0xff] %v7123_v21  ;;  %7132 = vst [vmem:[%s10799_s25 + $0x28] sm:$0xff] %v7124_v27  ;;  %v7117_v52 = vadd.f32 %v7106_v28, %v7101_v3  ;;  %v7118_v62 = vadd.f32 %v7110_v54, %v7102_v24 }
0x12ed   : > { %v7125_v31 = vmul.f32 %v7117_v52, %v10382_v57  ;;  %v7126_v0 = vmul.f32 %v7118_v62, %v10382_v57 }
0x12ef   : > { %7133 = vst [vmem:[%s10799_s25 + $0x30] sm:$0xff] %v7125_v31  ;;  %7134 = vst [vmem:[%s10799_s25 + $0x38] sm:$0xff] %v7126_v0 }
0x12f0   : > { %9018 = shalt.err (!%p9015_p12)
}
0x12f1   : > { %s9019_s18 = scalar_lea.hbm %s10816_s11, 1024  ;;  %s9023_s19 = scalar_lea.hbm %s10874_s9, 2048 }
0x12f2   : > { %p9020_p13 = scmp.ne.s32.totalorder %s10816_s11, %s9019_s18  ;;  %p9024_p2 = scmp.lt.s32.totalorder %s10816_s11, %s10874_s9 }
0x12f3   : > { %p9025_p5 = scmp.lt.s32.totalorder %s9023_s19, %s9019_s18 }
0x12f4   : > { %p9021_p3 = pnand %p9020_p13, %p10924_p11 }
0x12f5   : > { %p9026_p8 = por %p9025_p5, %p9024_p2 }
0x12f6   : > { %p9022_p4 = pneg %p9021_p3 }
0x12f8   : > { %p9027_p10 = pnand %p9026_p8, %p9022_p4 }
0x12fa   : > { %9030 = shalt.err (!%p9027_p10)
}
0x12fb   : > { %s9107_s29 = smov 256   ;;  %s9108_s0 = smov 16  }
0x12fc   : > { %7455 = dma.vmem_to_hbm [thread:$0]  (%p10924_p11), %s10818_s22, 1024, %s10816_s11, %s7136_s17, %s9107_s29, %s9107_s29, %s9108_s0  }
0x12fd PF: > { %s7165_s23 = sand.u32 1, %s9075_s12   ;;  %p10925_p0 = scmp.ne.s32.totalorder %s10901_s30, 0 }
0x12fe   : > { %p10926_p1 = scmp.ge.s32.totalorder %s9087_s15, 2  ;;  %s7166_s3 = scalar_lea.sflag [#allocation7], %s7165_s23 }
0x1300   : > { %p7484_p7 = pnand %p10926_p1, %p10925_p0 }
0x1302   : > { %p7485_p9 = pneg %p7484_p7 }
0x1304   : > { %9070 = dma.done.wait (%p7485_p9), %s7166_s3, 1024  }
0x1305   : > { %9072 = vsyncadd (%p7485_p9), %s7166_s3, 4294966272  ;;  %p30_p6 = scmp.ge.s32.totalorder %s9274_s21, 4   ;;  %s10927_s12 = smov %s9079_s13 }
0x1306   : > { %s10928_s13 = smov %s9083_s14  ;;  %s10929_s14 = smov %s9286_s26 }
0x1307   : > { %s10930_s15 = smov %s9274_s21  ;;  %32 = sbr.rel (!%p30_p6) target bundleno = 16 (0x10), region = 135 }
0x130c   :  { %7171 = vsyncpa [#allocation6], 1 }
0x130d   :  { %7173 = vsyncpa [#allocation6 + $0x1], 1 }
0x130e   :  { %7174 = vsyncpa [#allocation9], 1 }
0x130f   :  { %7175 = vsyncpa [#allocation12], 1 }
0x1310   :  { %7176 = vsyncpa [#allocation15], 1 }
0x1311   :  { %7177 = vsyncpa [#allocation18], 1 }
0x1312   :  { %7178 = vsyncpa [#allocation7], 1 }
0x1313   :  { %7180 = vsyncpa [#allocation7 + $0x1], 1 }

</bundles_post_ra>
